<compile_context>
chip_gen: v5e
topology: v5e:2x2
jax: 0.10.0
libtpu: 0.0.40
codegen_flags: <defaults>
</compile_context>

<pallas_src>
import jax
import jax.numpy as jnp
from jax.experimental import pallas as pl
from jax.experimental.pallas import tpu as pltpu


# ----------------------------------------------------------------------------
# Fused kernel: int8-dequant Linear(8192->512) (+BN1d folded into scale/bias)
#               + per-N-tile partial of fc Linear(512->C)
# ----------------------------------------------------------------------------
def ir152_head_kernel(x_ref, w1_ref, scale_ref, b1_ref, wfc_ref,
                      feat_ref, outp_ref):
    # Dequantize the int8 weight tile on the VPU; integer values <= 127 are
    # exact in bf16, so the MXU sees a clean bf16 x bf16 -> f32 matmul.
    w = w1_ref[...].astype(jnp.bfloat16)
    acc = jnp.dot(x_ref[...], w, preferred_element_type=jnp.float32)
    # Per-output-column dequant scale (also carries BN1d gamma) + folded bias.
    feat = acc * scale_ref[...] + b1_ref[...]
    feat_ref[...] = feat
    # Partial fc contribution of this N tile; tiles are summed in the wrapper.
    outp_ref[...] = jnp.dot(feat, wfc_ref[...],
                            preferred_element_type=jnp.float32)[None]


def ir152_head(x_bf16, w1_q, w1_scale, b1, wfc, *, tn=256):
    B, K = x_bf16.shape
    Kw, N = w1_q.shape
    C = wfc.shape[1]
    assert Kw == K and N % tn == 0
    ntiles = N // tn

    flops = 2 * B * K * N + 2 * B * N * C
    bytes_accessed = (w1_q.size + x_bf16.size * 2 + w1_scale.size * 4
                      + b1.size * 4 + wfc.size * 4
                      + B * N * 4 + ntiles * B * C * 4)

    return pl.pallas_call(
        ir152_head_kernel,
        out_shape=(jax.ShapeDtypeStruct((B, N), jnp.float32),            # feat
                   jax.ShapeDtypeStruct((ntiles, B, C), jnp.float32)),   # fc partials
        grid_spec=pltpu.PrefetchScalarGridSpec(
            num_scalar_prefetch=0,
            grid=(ntiles,),
            in_specs=[
                pl.BlockSpec((B, K), lambda n: (0, 0)),     # x   (bf16, resident)
                pl.BlockSpec((K, tn), lambda n: (0, n)),    # w1  (int8 column tile)
                pl.BlockSpec((1, tn), lambda n: (0, n)),    # dequant scale (f32)
                pl.BlockSpec((1, tn), lambda n: (0, n)),    # folded bias   (f32)
                pl.BlockSpec((tn, C), lambda n: (n, 0)),    # wfc row tile  (f32)
            ],
            out_specs=(pl.BlockSpec((B, tn), lambda n: (0, n)),
                       pl.BlockSpec((1, B, C), lambda n: (n, 0, 0))),
        ),
        compiler_params=pltpu.CompilerParams(
            dimension_semantics=("parallel",)),
        cost_estimate=pl.CostEstimate(flops=flops, transcendentals=0,
                                      bytes_accessed=bytes_accessed),
    )(x_bf16, w1_q, w1_scale, b1, wfc)


# ----------------------------------------------------------------------------
# One-time host-side parameter folding / quantization (outside jit)
# ----------------------------------------------------------------------------
def fold_params(params, *, hw, eps=1e-5):
    """Fold BN2d into an activation affine, BN1d into scale/bias, int8-quantize w1."""
    # BN2d eval affine, per flattened element (NCHW flatten order).
    s2 = params["bn2_gamma"] / jnp.sqrt(params["bn2_var"] + eps)
    t2 = params["bn2_beta"] - params["bn2_mean"] * s2
    x_scale = jnp.repeat(s2, hw)                       # (K,)
    x_shift = jnp.repeat(t2, hw)                       # (K,)
    # BN1d eval affine folded into the Linear's per-output-column scale/bias.
    s1 = params["bn1_gamma"] / jnp.sqrt(params["bn1_var"] + eps)
    t1 = params["bn1_beta"] - params["bn1_mean"] * s1
    b1 = params["b1"] * s1 + t1                        # (N,)
    # Symmetric per-output-column int8 quantization of w1; the BN1d scale s1 is
    # folded into the f32 dequant scale applied after the accumulate.
    w1 = params["w1"]                                  # (K, N)
    absmax = jnp.maximum(jnp.max(jnp.abs(w1), axis=0), 1e-12)
    qstep = absmax / 127.0
    w1_q = jnp.clip(jnp.round(w1 / qstep[None, :]), -127, 127).astype(jnp.int8)
    return {
        "x_scale": x_scale.astype(jnp.float32),
        "x_shift": x_shift.astype(jnp.float32),
        "w1_q": w1_q,                                              # int8 stream
        "w1_scale": (qstep * s1).reshape(1, -1).astype(jnp.float32),
        "b1": b1.reshape(1, -1).astype(jnp.float32),
        "wfc": params["wfc"].astype(jnp.float32),
        "bfc": params["bfc"].reshape(1, -1).astype(jnp.float32),
    }


# ----------------------------------------------------------------------------
# Full forward (glue in plain JAX)
# ----------------------------------------------------------------------------
@jax.jit
def ir152_forward(feat_map, folded):
    B = feat_map.shape[0]
    # Dropout (eval) = identity; Flatten = NCHW row-major reshape.
    x = feat_map.reshape(B, -1)
    # BN2d eval affine on the activations (f32), then bf16 for the MXU stream.
    x = (x * folded["x_scale"] + folded["x_shift"]).astype(jnp.bfloat16)
    feat, out_partial = ir152_head(x, folded["w1_q"], folded["w1_scale"],
                                   folded["b1"], folded["wfc"])
    out = out_partial.sum(axis=0) + folded["bfc"]
    return feat, out


# ----------------------------------------------------------------------------
# References
# ----------------------------------------------------------------------------
def reference_quantized(feat_map, folded):
    """Pure-JAX model using the SAME folded / int8 params (kernel-mechanics check)."""
    B = feat_map.shape[0]
    x = (feat_map.reshape(B, -1) * folded["x_scale"]
         + folded["x_shift"]).astype(jnp.bfloat16)
    q = folded["w1_q"].astype(jnp.bfloat16)
    feat = (jnp.dot(x, q, preferred_element_type=jnp.float32)
            * folded["w1_scale"] + folded["b1"])
    out = jnp.dot(feat, folded["wfc"], precision=jax.lax.Precision.HIGHEST,
                  preferred_element_type=jnp.float32) + folded["bfc"]
    return feat, out


def reference_forward(feat_map, params, eps=1e-5):
    """Original full-precision (f32) semantics."""
    B = feat_map.shape[0]
    hw = feat_map.shape[2] * feat_map.shape[3]
    s2 = params["bn2_gamma"] / jnp.sqrt(params["bn2_var"] + eps)
    t2 = params["bn2_beta"] - params["bn2_mean"] * s2
    x = feat_map.reshape(B, -1) * jnp.repeat(s2, hw) + jnp.repeat(t2, hw)
    y = jnp.dot(x, params["w1"],
                precision=jax.lax.Precision.HIGHEST) + params["b1"]
    s1 = params["bn1_gamma"] / jnp.sqrt(params["bn1_var"] + eps)
    feat = y * s1 + (params["bn1_beta"] - params["bn1_mean"] * s1)
    out = jnp.dot(feat, params["wfc"],
                  precision=jax.lax.Precision.HIGHEST) + params["bfc"]
    return feat, out


if __name__ == "__main__":
    B = 2                       # batch
    C_FEAT, H, W = 512, 4, 4    # backbone output (fixed by Linear(512*4*4, 512))
    FEAT_DIM = 512
    NUM_CLASSES = 128           # constructor arg (default 1000); small value chosen

    key = jax.random.PRNGKey(0)
    keys = jax.random.split(key, 11)

    feat_map = jax.random.normal(keys[0], (B, C_FEAT, H, W), jnp.float32)

    params = {
        # BatchNorm2d(512) (eval stats)
        "bn2_gamma": jax.random.uniform(keys[1], (C_FEAT,), jnp.float32, 0.5, 1.5),
        "bn2_beta": 0.1 * jax.random.normal(keys[2], (C_FEAT,), jnp.float32),
        "bn2_mean": 0.1 * jax.random.normal(keys[3], (C_FEAT,), jnp.float32),
        "bn2_var": jax.random.uniform(keys[4], (C_FEAT,), jnp.float32, 0.5, 1.5),
        # Linear(512*4*4, 512)   (stored as (in, out))
        "w1": 0.02 * jax.random.normal(keys[5], (C_FEAT * H * W, FEAT_DIM),
                                       jnp.float32),
        "b1": 0.01 * jax.random.normal(keys[6], (FEAT_DIM,), jnp.float32),
        # BatchNorm1d(512) (eval stats)
        "bn1_gamma": jax.random.uniform(keys[7], (FEAT_DIM,), jnp.float32, 0.5, 1.5),
        "bn1_beta": 0.1 * jax.random.normal(keys[8], (FEAT_DIM,), jnp.float32),
        "bn1_mean": jnp.zeros((FEAT_DIM,), jnp.float32),
        "bn1_var": jnp.ones((FEAT_DIM,), jnp.float32),
        # fc_layer: Linear(512, num_classes)   (stored as (in, out))
        "wfc": 0.05 * jax.random.normal(keys[9], (FEAT_DIM, NUM_CLASSES),
                                        jnp.float32),
        "bfc": 0.01 * jax.random.normal(keys[10], (NUM_CLASSES,), jnp.float32),
    }

    folded = fold_params(params, hw=H * W)
    feat, out = jax.block_until_ready(ir152_forward(feat_map, folded))
    assert feat.shape == (B, FEAT_DIM) and out.shape == (B, NUM_CLASSES)

    # Check 1: kernel mechanics vs pure-JAX model on the SAME int8/folded params.
    qf, qo = reference_quantized(feat_map, folded)
    assert jnp.allclose(feat, qf, rtol=2e-2, atol=2e-2), "feat mismatch vs quantized ref"
    assert jnp.allclose(out, qo, rtol=2e-2, atol=2e-2), "out mismatch vs quantized ref"

    # Check 2: end-to-end vs original f32 semantics.  Tolerance sized for the
    # per-column int8 weight quantization (the requested 2x-bandwidth change);
    # exact kernel correctness is already established by check 1.
    rf, ro = reference_forward(feat_map, params)
    assert jnp.allclose(feat, rf, rtol=3e-2, atol=1.5e-1), "feat mismatch vs f32 ref"
    assert jnp.allclose(out, ro, rtol=3e-2, atol=1.5e-1), "out mismatch vs f32 ref"

    print("KERNEL_OK")
</pallas_src>

<mosaic_0001>
module attributes {stable_mosaic.version = 11 : i64} {
  func.func @ir152_head_kernel(%arg0: i32, %arg1: memref<2x8192xbf16, #tpu.memory_space<vmem>>, %arg2: memref<8192x256xi8, #tpu.memory_space<vmem>>, %arg3: memref<1x256xf32, #tpu.memory_space<vmem>>, %arg4: memref<1x256xf32, #tpu.memory_space<vmem>>, %arg5: memref<256x128xf32, #tpu.memory_space<vmem>>, %arg6: memref<2x256xf32, #tpu.memory_space<vmem>>, %arg7: memref<1x2x128xf32, #tpu.memory_space<vmem>>) attributes {dimension_semantics = [#tpu.dimension_semantics<parallel>], iteration_bounds = array<i64: 2>, scalar_prefetch = 0 : i64, scratch_operands = 0 : i64, tpu.core_type = #tpu.core_type<tc>, window_params = [{pipeline_mode = #tpu.pipeline_mode<synchronous>, transform_indices = @transform_0, window_bounds = array<i64: 2, 8192>}, {transform_indices = @transform_1, window_bounds = array<i64: 8192, 256>}, {transform_indices = @transform_2, window_bounds = array<i64: 1, 256>}, {transform_indices = @transform_3, window_bounds = array<i64: 1, 256>}, {transform_indices = @transform_4, window_bounds = array<i64: 256, 128>}, {transform_indices = @transform_5, window_bounds = array<i64: 2, 256>}, {transform_indices = @transform_6, window_bounds = array<i64: 1, 2, 128>}]} {
    %c0 = arith.constant 0 : index
    %c0_0 = arith.constant 0 : index
    %0 = vector.load %arg2[%c0, %c0_0] : memref<8192x256xi8, #tpu.memory_space<vmem>>, vector<8192x256xi8>
    %1 = arith.sitofp %0 : vector<8192x256xi8> to vector<8192x256xbf16>
    %c0_1 = arith.constant 0 : index
    %c0_2 = arith.constant 0 : index
    %2 = vector.load %arg1[%c0_1, %c0_2] : memref<2x8192xbf16, #tpu.memory_space<vmem>>, vector<2x8192xbf16>
    %cst = arith.constant dense<0.000000e+00> : vector<2x256xf32>
    %3 = tpu.matmul %2, %1, %cst {dimension_numbers = #tpu.dot_dimension_numbers<[1], [0], [0], [1], [0, 0, 1, 1], [], []>} : vector<2x8192xbf16>, vector<8192x256xbf16>, vector<2x256xf32> -> vector<2x256xf32>
    %c0_3 = arith.constant 0 : index
    %c0_4 = arith.constant 0 : index
    %4 = vector.load %arg3[%c0_3, %c0_4] : memref<1x256xf32, #tpu.memory_space<vmem>>, vector<1x256xf32>
    %5 = vector.broadcast %4 : vector<1x256xf32> to vector<2x256xf32>
    %6 = arith.mulf %3, %5 : vector<2x256xf32>
    %c0_5 = arith.constant 0 : index
    %c0_6 = arith.constant 0 : index
    %7 = vector.load %arg4[%c0_5, %c0_6] : memref<1x256xf32, #tpu.memory_space<vmem>>, vector<1x256xf32>
    %8 = vector.broadcast %7 : vector<1x256xf32> to vector<2x256xf32>
    %9 = arith.addf %6, %8 : vector<2x256xf32>
    %c0_7 = arith.constant 0 : index
    %c0_8 = arith.constant 0 : index
    %10 = vector.load %arg6[%c0_7, %c0_8] : memref<2x256xf32, #tpu.memory_space<vmem>>, vector<2x256xf32>
    tpu.vector_store %arg6[%c0_7, %c0_8], %9 {strides = array<i32>} : memref<2x256xf32, #tpu.memory_space<vmem>>, vector<2x256xf32>,
    %c0_9 = arith.constant 0 : index
    %c0_10 = arith.constant 0 : index
    %11 = vector.load %arg5[%c0_9, %c0_10] : memref<256x128xf32, #tpu.memory_space<vmem>>, vector<256x128xf32>
    %cst_11 = arith.constant dense<0.000000e+00> : vector<2x128xf32>
    %12 = tpu.matmul %9, %11, %cst_11 {dimension_numbers = #tpu.dot_dimension_numbers<[1], [0], [0], [1], [0, 0, 1, 1], [], []>} : vector<2x256xf32>, vector<256x128xf32>, vector<2x128xf32> -> vector<2x128xf32>
    %13 = vector.shape_cast %12 : vector<2x128xf32> to vector<1x2x128xf32>
    %c0_12 = arith.constant 0 : index
    %c0_13 = arith.constant 0 : index
    %c0_14 = arith.constant 0 : index
    %14 = vector.load %arg7[%c0_12, %c0_13, %c0_14] : memref<1x2x128xf32, #tpu.memory_space<vmem>>, vector<1x2x128xf32>
    tpu.vector_store %arg7[%c0_12, %c0_13, %c0_14], %13 {strides = array<i32>} : memref<1x2x128xf32, #tpu.memory_space<vmem>>, vector<1x2x128xf32>,
    return
  }
  func.func @transform_0(%arg0: i32) -> (i32, i32) {
    %c0_i32 = arith.constant 0 : i32
    %c0_i32_0 = arith.constant 0 : i32
    %c0_i32_1 = arith.constant 0 : i32
    return %c0_i32, %c0_i32_0 : i32, i32
  }
  func.func @transform_1(%arg0: i32) -> (i32, i32) {
    %c0_i32 = arith.constant 0 : i32
    %c0_i32_0 = arith.constant 0 : i32
    return %c0_i32, %arg0 : i32, i32
  }
  func.func @transform_2(%arg0: i32) -> (i32, i32) {
    %c0_i32 = arith.constant 0 : i32
    %c0_i32_0 = arith.constant 0 : i32
    return %c0_i32, %arg0 : i32, i32
  }
  func.func @transform_3(%arg0: i32) -> (i32, i32) {
    %c0_i32 = arith.constant 0 : i32
    %c0_i32_0 = arith.constant 0 : i32
    return %c0_i32, %arg0 : i32, i32
  }
  func.func @transform_4(%arg0: i32) -> (i32, i32) {
    %c0_i32 = arith.constant 0 : i32
    %c0_i32_0 = arith.constant 0 : i32
    return %arg0, %c0_i32 : i32, i32
  }
  func.func @transform_5(%arg0: i32) -> (i32, i32) {
    %c0_i32 = arith.constant 0 : i32
    %c0_i32_0 = arith.constant 0 : i32
    return %c0_i32, %arg0 : i32, i32
  }
  func.func @transform_6(%arg0: i32) -> (i32, i32, i32) {
    %c0_i32 = arith.constant 0 : i32
    %c0_i32_0 = arith.constant 0 : i32
    %c0_i32_1 = arith.constant 0 : i32
    return %arg0, %c0_i32, %c0_i32_0 : i32, i32, i32
  }
}

</mosaic_0001>

<bundles_post_ra>
// kernel: ir152_forward.1
= control target key start
LH: loop header
LB: loop body
LE: loop exit
PB: predicated region body
PF: predicated region fallthrough
CT: control target
= control target key end

     0   :  { %s12016_s0 = inlined_call_operand.vmem [shape: bf16[2,8192], index: 0, kind: input, shape index: {}]   ;;  %s12017_s1 = inlined_call_operand.vmem [shape: s8[8192,512], index: 1, kind: input, shape index: {}]   ;;  %s12018_s2 = inlined_call_operand.vmem [shape: f32[1,512], index: 2, kind: input, shape index: {}]   ;;  %s12019_s3 = inlined_call_operand.hbm [shape: f32[1,512], index: 3, kind: input, shape index: {}]   ;;  %s12020_s4 = inlined_call_operand.vmem [shape: f32[512,128], index: 4, kind: input, shape index: {}]   ;;  %s12021_s5 = inlined_call_operand.hbm [shape: f32[2,512], index: 5, kind: output, shape index: {0}]   ;;  %s12022_s6 = inlined_call_operand.vmem [shape: f32[2,2,128], index: 6, kind: output, shape index: {1}]  }
   0x1   :  { %12053 = sst [smem:[#allocation39_spill]] %s12017_s1 }
   0x2   :  { %12 = vsyncpa [#allocation4], 0 }
   0x3   :  { %14 = vsyncpa [#allocation4 + $0x1], 0 }
   0x4   :  { %15 = vsyncpa [#allocation5], 0 }
   0x5   :  { %17 = vsyncpa [#allocation5 + $0x1], 0  ;;  %s9922_s21 = smov 0   ;;  %s9924_s22 = smov 0  }
   0x6   :  { %s9926_s23 = smov 0   ;;  %s9928_s24 = smov 0  }
   0x7 LB: > { %12054 = sst [smem:[#allocation9_spill]] %s9857_s21  ;;  %s9943_s25 = sadd.s32 4294967295, %s9869_s24   ;;  %s9869_s24 = sphi %s9928_s24, %s12123_s24   ;;  %s9865_s23 = sphi %s9926_s23, %s12127_s23   ;;  %s9861_s22 = sphi %s9924_s22, %s12126_s22   ;;  %s9857_s21 = sphi %s9922_s21, %s12125_s21  }
   0x8   : > { %s9653_s26 = sadd.s32 4294967294, %s9869_s24   ;;  %s9947_s27 = sadd.s32 1, %s9869_s24  }
   0x9   : > { %12055 = sst [smem:[#allocation10_spill]] %s9947_s27  ;;  %s51_s28 = sadd.s32 1, %s9865_s23 }
   0xa   : > { %s48_s29 = ssub.s32 %s9869_s24, %s9947_s27  ;;  %p58_p0 = scmp.ne.s32.totalorder %s9865_s23, %s9861_s22 }
   0xb   : > { %p49_p1 = scmp.eq.s32.totalorder %s48_s29, 0  ;;  %p59_p2 = scmp.eq.s32.totalorder %s9869_s24, 0 }
   0xc   : > { %p116_p3 = scmp.ne.s32.totalorder %s9861_s22, %s9857_s21  ;;  %p117_p4 = scmp.eq.s32.totalorder %s9943_s25, 0 }
   0xd   : > { %s9959_s30 = scalar_select %p49_p1, %s9865_s23, %s51_s28  }
   0xe   : > { %p9961_p5 = por %p59_p2, %p58_p0  ;;  %p9965_p6 = por %p117_p4, %p116_p3 }
   0xf   : > { %12056 = sst [smem:[#allocation11_spill]] %s9959_s30  ;;  %p166_p7 = scmp.eq.s32.totalorder %s9943_s25, 1 }
  0x10   : > { %p172_p8 = scmp.eq.s32.totalorder %s9653_s26, 1  ;;  %p9655_p11 = scmp.ge.s32.totalorder %s9869_s24, 2 }
  0x11   : > { %p9970_p9 = por %p166_p7, %p58_p0 }
  0x12   : > { %p9974_p10 = por %p172_p8, %p116_p3  ;;  %217 = sbr.rel (%p9655_p11) target bundleno = 306 (0x132), region = 20 }
  0x14   : > { %s12060_s10 = scalar_select %p9974_p10, 1, 0 }
  0x16   : > { %12061 = sst [smem:[#allocation12_spill]] %s12060_s10 }
  0x17   : > { %220 = sbr.rel (!%p9961_p5) target bundleno = 290 (0x122), region = 24  ;;  %s222_s11 = sand.u32 (%p9961_p5), 1, %s9865_s23  }
  0x18   : > { %s9676_s12 = sshll.u32 (%p9961_p5), %s9869_s24, 4  ;;  %s9985_s13 = sshll.u32 (%p9961_p5), %s222_s11, 12 }
  0x19   : > { %s12062_s1 = sld [smem:[#allocation39_spill]] (%p9961_p5)  ;;  %s224_s17 = scalar_lea.vmem (%p9961_p5), [#allocation2], %s9985_s13  }
  0x1a   : > { %s12063_s18 = smov (%p9961_p5), %s224_s17  ;;  %s10000_s20 = smov (%p9961_p5), 0  }
  0x1b   : > { %s10002_s26 = smov (%p9961_p5), 0  }
  0x1f   : > { %s9990_s16 = scalar_lea.vmem %s12062_s1, %s9676_s12  }
  0x20   : > { %s12064_s19 = smov %s9990_s16 }
  0x21 LB: >> { %v241_v0 = vld [vmem:[%s9877_s19] sm:$0xff]  ;;  %s753_s28 = sadd.s32 1, %s9881_s20  ;;  %s237_s26 = sadd.s32 1, %s9885_s26   ;;  %s9885_s26 = sphi %s10002_s26, %s237_s26   ;;  %s9881_s20 = sphi %s10000_s20, %s12067_s20   ;;  %s9877_s19 = sphi %s12064_s19, %s12066_s19   ;;  %s9873_s18 = sphi %s12063_s18, %s12065_s18  }
  0x22   : >> { %v243_v1 = vld [vmem:[%s9877_s19 + $0x20] sm:$0xff]  ;;  %242 = vst [vmem:[%s9873_s18] sm:$0xff] %v241_v0  ;;  %p754_p12 = scmp.ge.s32.totalorder %s753_s28, 2  ;;  %p234_p13 = scmp.ge.s32.totalorder %s237_s26, 2  }
  0x23   : >> { %v245_v2 = vld [vmem:[%s9877_s19 + $0x40] sm:$0xff]  ;;  %244 = vst [vmem:[%s9873_s18 + $0x10] sm:$0xff] %v243_v1 }
  0x24   : >> { %v247_v3 = vld [vmem:[%s9877_s19 + $0x60] sm:$0xff]  ;;  %246 = vst [vmem:[%s9873_s18 + $0x20] sm:$0xff] %v245_v2  ;;  %s12129_s28 = smov (%p754_p12, %s753_s28), 0 }
  0x25   : >> { %v249_v4 = vld [vmem:[%s9877_s19 + $0x80] sm:$0xff]  ;;  %248 = vst [vmem:[%s9873_s18 + $0x30] sm:$0xff] %v247_v3  ;;  %s9659_s29 = sshll.u32 %s12129_s28, 3  ;;  %s12067_s20 = smov %s12129_s28 }
  0x26   : >> { %v251_v5 = vld [vmem:[%s9877_s19 + $0xa0] sm:$0xff]  ;;  %250 = vst [vmem:[%s9873_s18 + $0x40] sm:$0xff] %v249_v4  ;;  %s10280_s11 = scalar_lea.vmem %s9990_s16, %s9659_s29   ;;  %s10284_s12 = scalar_lea.vmem %s224_s17, %s9659_s29 [#allocation2]  }
  0x27   : >> { %v253_v6 = vld [vmem:[%s9877_s19 + $0xc0] sm:$0xff]  ;;  %252 = vst [vmem:[%s9873_s18 + $0x50] sm:$0xff] %v251_v5 }
  0x28   : >> { %v255_v7 = vld [vmem:[%s9877_s19 + $0xe0] sm:$0xff]  ;;  %254 = vst [vmem:[%s9873_s18 + $0x60] sm:$0xff] %v253_v6 }
  0x29   : >> { %v257_v8 = vld [vmem:[%s9877_s19 + $0x100] sm:$0xff]  ;;  %256 = vst [vmem:[%s9873_s18 + $0x70] sm:$0xff] %v255_v7 }
  0x2a   : >> { %v259_v9 = vld [vmem:[%s9877_s19 + $0x120] sm:$0xff]  ;;  %258 = vst [vmem:[%s9873_s18 + $0x80] sm:$0xff] %v257_v8 }
  0x2b   : >> { %v261_v10 = vld [vmem:[%s9877_s19 + $0x140] sm:$0xff]  ;;  %260 = vst [vmem:[%s9873_s18 + $0x90] sm:$0xff] %v259_v9 }
  0x2c   : >> { %v263_v11 = vld [vmem:[%s9877_s19 + $0x160] sm:$0xff]  ;;  %262 = vst [vmem:[%s9873_s18 + $0xa0] sm:$0xff] %v261_v10 }
  0x2d   : >> { %v265_v12 = vld [vmem:[%s9877_s19 + $0x180] sm:$0xff]  ;;  %264 = vst [vmem:[%s9873_s18 + $0xb0] sm:$0xff] %v263_v11 }
  0x2e   : >> { %v267_v13 = vld [vmem:[%s9877_s19 + $0x1a0] sm:$0xff]  ;;  %266 = vst [vmem:[%s9873_s18 + $0xc0] sm:$0xff] %v265_v12 }
  0x2f   : >> { %v269_v14 = vld [vmem:[%s9877_s19 + $0x1c0] sm:$0xff]  ;;  %268 = vst [vmem:[%s9873_s18 + $0xd0] sm:$0xff] %v267_v13 }
  0x30   : >> { %v271_v15 = vld [vmem:[%s9877_s19 + $0x1e0] sm:$0xff]  ;;  %270 = vst [vmem:[%s9873_s18 + $0xe0] sm:$0xff] %v269_v14 }
  0x31   : >> { %v273_v16 = vld [vmem:[%s9877_s19 + $0x200] sm:$0xff]  ;;  %272 = vst [vmem:[%s9873_s18 + $0xf0] sm:$0xff] %v271_v15 }
  0x32   : >> { %v275_v17 = vld [vmem:[%s9877_s19 + $0x220] sm:$0xff]  ;;  %274 = vst [vmem:[%s9873_s18 + $0x100] sm:$0xff] %v273_v16 }
  0x33   : >> { %v277_v18 = vld [vmem:[%s9877_s19 + $0x240] sm:$0xff]  ;;  %276 = vst [vmem:[%s9873_s18 + $0x110] sm:$0xff] %v275_v17 }
  0x34   : >> { %v279_v19 = vld [vmem:[%s9877_s19 + $0x260] sm:$0xff]  ;;  %278 = vst [vmem:[%s9873_s18 + $0x120] sm:$0xff] %v277_v18 }
  0x35   : >> { %v281_v20 = vld [vmem:[%s9877_s19 + $0x280] sm:$0xff]  ;;  %280 = vst [vmem:[%s9873_s18 + $0x130] sm:$0xff] %v279_v19 }
  0x36   : >> { %v283_v21 = vld [vmem:[%s9877_s19 + $0x2a0] sm:$0xff]  ;;  %282 = vst [vmem:[%s9873_s18 + $0x140] sm:$0xff] %v281_v20 }
  0x37   : >> { %v285_v22 = vld [vmem:[%s9877_s19 + $0x2c0] sm:$0xff]  ;;  %284 = vst [vmem:[%s9873_s18 + $0x150] sm:$0xff] %v283_v21 }
  0x38   : >> { %v287_v23 = vld [vmem:[%s9877_s19 + $0x2e0] sm:$0xff]  ;;  %286 = vst [vmem:[%s9873_s18 + $0x160] sm:$0xff] %v285_v22 }
  0x39   : >> { %v289_v24 = vld [vmem:[%s9877_s19 + $0x300] sm:$0xff]  ;;  %288 = vst [vmem:[%s9873_s18 + $0x170] sm:$0xff] %v287_v23 }
  0x3a   : >> { %v291_v25 = vld [vmem:[%s9877_s19 + $0x320] sm:$0xff]  ;;  %290 = vst [vmem:[%s9873_s18 + $0x180] sm:$0xff] %v289_v24 }
  0x3b   : >> { %v293_v26 = vld [vmem:[%s9877_s19 + $0x340] sm:$0xff]  ;;  %292 = vst [vmem:[%s9873_s18 + $0x190] sm:$0xff] %v291_v25 }
  0x3c   : >> { %v295_v27 = vld [vmem:[%s9877_s19 + $0x360] sm:$0xff]  ;;  %294 = vst [vmem:[%s9873_s18 + $0x1a0] sm:$0xff] %v293_v26 }
  0x3d   : >> { %v297_v28 = vld [vmem:[%s9877_s19 + $0x380] sm:$0xff]  ;;  %296 = vst [vmem:[%s9873_s18 + $0x1b0] sm:$0xff] %v295_v27 }
  0x3e   : >> { %v299_v29 = vld [vmem:[%s9877_s19 + $0x3a0] sm:$0xff]  ;;  %298 = vst [vmem:[%s9873_s18 + $0x1c0] sm:$0xff] %v297_v28 }
  0x3f   : >> { %v301_v30 = vld [vmem:[%s9877_s19 + $0x3c0] sm:$0xff]  ;;  %300 = vst [vmem:[%s9873_s18 + $0x1d0] sm:$0xff] %v299_v29 }
  0x40   : >> { %v303_v31 = vld [vmem:[%s9877_s19 + $0x3e0] sm:$0xff]  ;;  %302 = vst [vmem:[%s9873_s18 + $0x1e0] sm:$0xff] %v301_v30 }
  0x41   : >> { %v305_v32 = vld [vmem:[%s9877_s19 + $0x400] sm:$0xff]  ;;  %304 = vst [vmem:[%s9873_s18 + $0x1f0] sm:$0xff] %v303_v31 }
  0x42   : >> { %v307_v33 = vld [vmem:[%s9877_s19 + $0x420] sm:$0xff]  ;;  %306 = vst [vmem:[%s9873_s18 + $0x200] sm:$0xff] %v305_v32 }
  0x43   : >> { %v309_v34 = vld [vmem:[%s9877_s19 + $0x440] sm:$0xff]  ;;  %308 = vst [vmem:[%s9873_s18 + $0x210] sm:$0xff] %v307_v33 }
  0x44   : >> { %v311_v35 = vld [vmem:[%s9877_s19 + $0x460] sm:$0xff]  ;;  %310 = vst [vmem:[%s9873_s18 + $0x220] sm:$0xff] %v309_v34 }
  0x45   : >> { %v313_v36 = vld [vmem:[%s9877_s19 + $0x480] sm:$0xff]  ;;  %312 = vst [vmem:[%s9873_s18 + $0x230] sm:$0xff] %v311_v35 }
  0x46   : >> { %v315_v37 = vld [vmem:[%s9877_s19 + $0x4a0] sm:$0xff]  ;;  %314 = vst [vmem:[%s9873_s18 + $0x240] sm:$0xff] %v313_v36 }
  0x47   : >> { %v317_v38 = vld [vmem:[%s9877_s19 + $0x4c0] sm:$0xff]  ;;  %316 = vst [vmem:[%s9873_s18 + $0x250] sm:$0xff] %v315_v37 }
  0x48   : >> { %v319_v39 = vld [vmem:[%s9877_s19 + $0x4e0] sm:$0xff]  ;;  %318 = vst [vmem:[%s9873_s18 + $0x260] sm:$0xff] %v317_v38 }
  0x49   : >> { %v321_v40 = vld [vmem:[%s9877_s19 + $0x500] sm:$0xff]  ;;  %320 = vst [vmem:[%s9873_s18 + $0x270] sm:$0xff] %v319_v39 }
  0x4a   : >> { %v323_v41 = vld [vmem:[%s9877_s19 + $0x520] sm:$0xff]  ;;  %322 = vst [vmem:[%s9873_s18 + $0x280] sm:$0xff] %v321_v40 }
  0x4b   : >> { %v325_v42 = vld [vmem:[%s9877_s19 + $0x540] sm:$0xff]  ;;  %324 = vst [vmem:[%s9873_s18 + $0x290] sm:$0xff] %v323_v41 }
  0x4c   : >> { %v327_v43 = vld [vmem:[%s9877_s19 + $0x560] sm:$0xff]  ;;  %326 = vst [vmem:[%s9873_s18 + $0x2a0] sm:$0xff] %v325_v42 }
  0x4d   : >> { %v329_v44 = vld [vmem:[%s9877_s19 + $0x580] sm:$0xff]  ;;  %328 = vst [vmem:[%s9873_s18 + $0x2b0] sm:$0xff] %v327_v43 }
  0x4e   : >> { %v331_v45 = vld [vmem:[%s9877_s19 + $0x5a0] sm:$0xff]  ;;  %330 = vst [vmem:[%s9873_s18 + $0x2c0] sm:$0xff] %v329_v44 }
  0x4f   : >> { %v333_v46 = vld [vmem:[%s9877_s19 + $0x5c0] sm:$0xff]  ;;  %332 = vst [vmem:[%s9873_s18 + $0x2d0] sm:$0xff] %v331_v45 }
  0x50   : >> { %v335_v47 = vld [vmem:[%s9877_s19 + $0x5e0] sm:$0xff]  ;;  %334 = vst [vmem:[%s9873_s18 + $0x2e0] sm:$0xff] %v333_v46 }
  0x51   : >> { %v337_v48 = vld [vmem:[%s9877_s19 + $0x600] sm:$0xff]  ;;  %336 = vst [vmem:[%s9873_s18 + $0x2f0] sm:$0xff] %v335_v47 }
  0x52   : >> { %v339_v49 = vld [vmem:[%s9877_s19 + $0x620] sm:$0xff]  ;;  %338 = vst [vmem:[%s9873_s18 + $0x300] sm:$0xff] %v337_v48 }
  0x53   : >> { %v341_v50 = vld [vmem:[%s9877_s19 + $0x640] sm:$0xff]  ;;  %340 = vst [vmem:[%s9873_s18 + $0x310] sm:$0xff] %v339_v49 }
  0x54   : >> { %v343_v51 = vld [vmem:[%s9877_s19 + $0x660] sm:$0xff]  ;;  %342 = vst [vmem:[%s9873_s18 + $0x320] sm:$0xff] %v341_v50 }
  0x55   : >> { %v345_v52 = vld [vmem:[%s9877_s19 + $0x680] sm:$0xff]  ;;  %344 = vst [vmem:[%s9873_s18 + $0x330] sm:$0xff] %v343_v51 }
  0x56   : >> { %v347_v53 = vld [vmem:[%s9877_s19 + $0x6a0] sm:$0xff]  ;;  %346 = vst [vmem:[%s9873_s18 + $0x340] sm:$0xff] %v345_v52 }
  0x57   : >> { %v349_v54 = vld [vmem:[%s9877_s19 + $0x6c0] sm:$0xff]  ;;  %348 = vst [vmem:[%s9873_s18 + $0x350] sm:$0xff] %v347_v53 }
  0x58   : >> { %v351_v55 = vld [vmem:[%s9877_s19 + $0x6e0] sm:$0xff]  ;;  %350 = vst [vmem:[%s9873_s18 + $0x360] sm:$0xff] %v349_v54 }
  0x59   : >> { %v353_v56 = vld [vmem:[%s9877_s19 + $0x700] sm:$0xff]  ;;  %352 = vst [vmem:[%s9873_s18 + $0x370] sm:$0xff] %v351_v55 }
  0x5a   : >> { %v355_v57 = vld [vmem:[%s9877_s19 + $0x720] sm:$0xff]  ;;  %354 = vst [vmem:[%s9873_s18 + $0x380] sm:$0xff] %v353_v56 }
  0x5b   : >> { %v357_v58 = vld [vmem:[%s9877_s19 + $0x740] sm:$0xff]  ;;  %356 = vst [vmem:[%s9873_s18 + $0x390] sm:$0xff] %v355_v57 }
  0x5c   : >> { %v359_v59 = vld [vmem:[%s9877_s19 + $0x760] sm:$0xff]  ;;  %358 = vst [vmem:[%s9873_s18 + $0x3a0] sm:$0xff] %v357_v58 }
  0x5d   : >> { %v361_v60 = vld [vmem:[%s9877_s19 + $0x780] sm:$0xff]  ;;  %360 = vst [vmem:[%s9873_s18 + $0x3b0] sm:$0xff] %v359_v59 }
  0x5e   : >> { %v363_v61 = vld [vmem:[%s9877_s19 + $0x7a0] sm:$0xff]  ;;  %362 = vst [vmem:[%s9873_s18 + $0x3c0] sm:$0xff] %v361_v60 }
  0x5f   : >> { %v365_v62 = vld [vmem:[%s9877_s19 + $0x7c0] sm:$0xff]  ;;  %364 = vst [vmem:[%s9873_s18 + $0x3d0] sm:$0xff] %v363_v61 }
  0x60   : >> { %v367_v63 = vld [vmem:[%s9877_s19 + $0x7e0] sm:$0xff]  ;;  %366 = vst [vmem:[%s9873_s18 + $0x3e0] sm:$0xff] %v365_v62 }
  0x61   : >> { %v369_v0 = vld [vmem:[%s9877_s19 + $0x800] sm:$0xff]  ;;  %368 = vst [vmem:[%s9873_s18 + $0x3f0] sm:$0xff] %v367_v63 }
  0x62   : >> { %v371_v1 = vld [vmem:[%s9877_s19 + $0x820] sm:$0xff]  ;;  %370 = vst [vmem:[%s9873_s18 + $0x400] sm:$0xff] %v369_v0 }
  0x63   : >> { %v373_v2 = vld [vmem:[%s9877_s19 + $0x840] sm:$0xff]  ;;  %372 = vst [vmem:[%s9873_s18 + $0x410] sm:$0xff] %v371_v1 }
  0x64   : >> { %v375_v3 = vld [vmem:[%s9877_s19 + $0x860] sm:$0xff]  ;;  %374 = vst [vmem:[%s9873_s18 + $0x420] sm:$0xff] %v373_v2 }
  0x65   : >> { %v377_v4 = vld [vmem:[%s9877_s19 + $0x880] sm:$0xff]  ;;  %376 = vst [vmem:[%s9873_s18 + $0x430] sm:$0xff] %v375_v3 }
  0x66   : >> { %v379_v5 = vld [vmem:[%s9877_s19 + $0x8a0] sm:$0xff]  ;;  %378 = vst [vmem:[%s9873_s18 + $0x440] sm:$0xff] %v377_v4 }
  0x67   : >> { %v381_v6 = vld [vmem:[%s9877_s19 + $0x8c0] sm:$0xff]  ;;  %380 = vst [vmem:[%s9873_s18 + $0x450] sm:$0xff] %v379_v5 }
  0x68   : >> { %v383_v7 = vld [vmem:[%s9877_s19 + $0x8e0] sm:$0xff]  ;;  %382 = vst [vmem:[%s9873_s18 + $0x460] sm:$0xff] %v381_v6 }
  0x69   : >> { %v385_v8 = vld [vmem:[%s9877_s19 + $0x900] sm:$0xff]  ;;  %384 = vst [vmem:[%s9873_s18 + $0x470] sm:$0xff] %v383_v7 }
  0x6a   : >> { %v387_v9 = vld [vmem:[%s9877_s19 + $0x920] sm:$0xff]  ;;  %386 = vst [vmem:[%s9873_s18 + $0x480] sm:$0xff] %v385_v8 }
  0x6b   : >> { %v389_v10 = vld [vmem:[%s9877_s19 + $0x940] sm:$0xff]  ;;  %388 = vst [vmem:[%s9873_s18 + $0x490] sm:$0xff] %v387_v9 }
  0x6c   : >> { %v391_v11 = vld [vmem:[%s9877_s19 + $0x960] sm:$0xff]  ;;  %390 = vst [vmem:[%s9873_s18 + $0x4a0] sm:$0xff] %v389_v10 }
  0x6d   : >> { %v393_v12 = vld [vmem:[%s9877_s19 + $0x980] sm:$0xff]  ;;  %392 = vst [vmem:[%s9873_s18 + $0x4b0] sm:$0xff] %v391_v11 }
  0x6e   : >> { %v395_v13 = vld [vmem:[%s9877_s19 + $0x9a0] sm:$0xff]  ;;  %394 = vst [vmem:[%s9873_s18 + $0x4c0] sm:$0xff] %v393_v12 }
  0x6f   : >> { %v397_v14 = vld [vmem:[%s9877_s19 + $0x9c0] sm:$0xff]  ;;  %396 = vst [vmem:[%s9873_s18 + $0x4d0] sm:$0xff] %v395_v13 }
  0x70   : >> { %v399_v15 = vld [vmem:[%s9877_s19 + $0x9e0] sm:$0xff]  ;;  %398 = vst [vmem:[%s9873_s18 + $0x4e0] sm:$0xff] %v397_v14 }
  0x71   : >> { %v401_v16 = vld [vmem:[%s9877_s19 + $0xa00] sm:$0xff]  ;;  %400 = vst [vmem:[%s9873_s18 + $0x4f0] sm:$0xff] %v399_v15 }
  0x72   : >> { %v403_v17 = vld [vmem:[%s9877_s19 + $0xa20] sm:$0xff]  ;;  %402 = vst [vmem:[%s9873_s18 + $0x500] sm:$0xff] %v401_v16 }
  0x73   : >> { %v405_v18 = vld [vmem:[%s9877_s19 + $0xa40] sm:$0xff]  ;;  %404 = vst [vmem:[%s9873_s18 + $0x510] sm:$0xff] %v403_v17 }
  0x74   : >> { %v407_v19 = vld [vmem:[%s9877_s19 + $0xa60] sm:$0xff]  ;;  %406 = vst [vmem:[%s9873_s18 + $0x520] sm:$0xff] %v405_v18 }
  0x75   : >> { %v409_v20 = vld [vmem:[%s9877_s19 + $0xa80] sm:$0xff]  ;;  %408 = vst [vmem:[%s9873_s18 + $0x530] sm:$0xff] %v407_v19 }
  0x76   : >> { %v411_v21 = vld [vmem:[%s9877_s19 + $0xaa0] sm:$0xff]  ;;  %410 = vst [vmem:[%s9873_s18 + $0x540] sm:$0xff] %v409_v20 }
  0x77   : >> { %v413_v22 = vld [vmem:[%s9877_s19 + $0xac0] sm:$0xff]  ;;  %412 = vst [vmem:[%s9873_s18 + $0x550] sm:$0xff] %v411_v21 }
  0x78   : >> { %v415_v23 = vld [vmem:[%s9877_s19 + $0xae0] sm:$0xff]  ;;  %414 = vst [vmem:[%s9873_s18 + $0x560] sm:$0xff] %v413_v22 }
  0x79   : >> { %v417_v24 = vld [vmem:[%s9877_s19 + $0xb00] sm:$0xff]  ;;  %416 = vst [vmem:[%s9873_s18 + $0x570] sm:$0xff] %v415_v23 }
  0x7a   : >> { %v419_v25 = vld [vmem:[%s9877_s19 + $0xb20] sm:$0xff]  ;;  %418 = vst [vmem:[%s9873_s18 + $0x580] sm:$0xff] %v417_v24 }
  0x7b   : >> { %v421_v26 = vld [vmem:[%s9877_s19 + $0xb40] sm:$0xff]  ;;  %420 = vst [vmem:[%s9873_s18 + $0x590] sm:$0xff] %v419_v25 }
  0x7c   : >> { %v423_v27 = vld [vmem:[%s9877_s19 + $0xb60] sm:$0xff]  ;;  %422 = vst [vmem:[%s9873_s18 + $0x5a0] sm:$0xff] %v421_v26 }
  0x7d   : >> { %v425_v28 = vld [vmem:[%s9877_s19 + $0xb80] sm:$0xff]  ;;  %424 = vst [vmem:[%s9873_s18 + $0x5b0] sm:$0xff] %v423_v27 }
  0x7e   : >> { %v427_v29 = vld [vmem:[%s9877_s19 + $0xba0] sm:$0xff]  ;;  %426 = vst [vmem:[%s9873_s18 + $0x5c0] sm:$0xff] %v425_v28 }
  0x7f   : >> { %v429_v30 = vld [vmem:[%s9877_s19 + $0xbc0] sm:$0xff]  ;;  %428 = vst [vmem:[%s9873_s18 + $0x5d0] sm:$0xff] %v427_v29 }
  0x80   : >> { %v431_v31 = vld [vmem:[%s9877_s19 + $0xbe0] sm:$0xff]  ;;  %430 = vst [vmem:[%s9873_s18 + $0x5e0] sm:$0xff] %v429_v30 }
  0x81   : >> { %v433_v32 = vld [vmem:[%s9877_s19 + $0xc00] sm:$0xff]  ;;  %432 = vst [vmem:[%s9873_s18 + $0x5f0] sm:$0xff] %v431_v31 }
  0x82   : >> { %v435_v33 = vld [vmem:[%s9877_s19 + $0xc20] sm:$0xff]  ;;  %434 = vst [vmem:[%s9873_s18 + $0x600] sm:$0xff] %v433_v32 }
  0x83   : >> { %v437_v34 = vld [vmem:[%s9877_s19 + $0xc40] sm:$0xff]  ;;  %436 = vst [vmem:[%s9873_s18 + $0x610] sm:$0xff] %v435_v33 }
  0x84   : >> { %v439_v35 = vld [vmem:[%s9877_s19 + $0xc60] sm:$0xff]  ;;  %438 = vst [vmem:[%s9873_s18 + $0x620] sm:$0xff] %v437_v34 }
  0x85   : >> { %v441_v36 = vld [vmem:[%s9877_s19 + $0xc80] sm:$0xff]  ;;  %440 = vst [vmem:[%s9873_s18 + $0x630] sm:$0xff] %v439_v35 }
  0x86   : >> { %v443_v37 = vld [vmem:[%s9877_s19 + $0xca0] sm:$0xff]  ;;  %442 = vst [vmem:[%s9873_s18 + $0x640] sm:$0xff] %v441_v36 }
  0x87   : >> { %v445_v38 = vld [vmem:[%s9877_s19 + $0xcc0] sm:$0xff]  ;;  %444 = vst [vmem:[%s9873_s18 + $0x650] sm:$0xff] %v443_v37 }
  0x88   : >> { %v447_v39 = vld [vmem:[%s9877_s19 + $0xce0] sm:$0xff]  ;;  %446 = vst [vmem:[%s9873_s18 + $0x660] sm:$0xff] %v445_v38 }
  0x89   : >> { %v449_v40 = vld [vmem:[%s9877_s19 + $0xd00] sm:$0xff]  ;;  %448 = vst [vmem:[%s9873_s18 + $0x670] sm:$0xff] %v447_v39 }
  0x8a   : >> { %v451_v41 = vld [vmem:[%s9877_s19 + $0xd20] sm:$0xff]  ;;  %450 = vst [vmem:[%s9873_s18 + $0x680] sm:$0xff] %v449_v40 }
  0x8b   : >> { %v453_v42 = vld [vmem:[%s9877_s19 + $0xd40] sm:$0xff]  ;;  %452 = vst [vmem:[%s9873_s18 + $0x690] sm:$0xff] %v451_v41 }
  0x8c   : >> { %v455_v43 = vld [vmem:[%s9877_s19 + $0xd60] sm:$0xff]  ;;  %454 = vst [vmem:[%s9873_s18 + $0x6a0] sm:$0xff] %v453_v42 }
  0x8d   : >> { %v457_v44 = vld [vmem:[%s9877_s19 + $0xd80] sm:$0xff]  ;;  %456 = vst [vmem:[%s9873_s18 + $0x6b0] sm:$0xff] %v455_v43 }
  0x8e   : >> { %v459_v45 = vld [vmem:[%s9877_s19 + $0xda0] sm:$0xff]  ;;  %458 = vst [vmem:[%s9873_s18 + $0x6c0] sm:$0xff] %v457_v44 }
  0x8f   : >> { %v461_v46 = vld [vmem:[%s9877_s19 + $0xdc0] sm:$0xff]  ;;  %460 = vst [vmem:[%s9873_s18 + $0x6d0] sm:$0xff] %v459_v45 }
  0x90   : >> { %v463_v47 = vld [vmem:[%s9877_s19 + $0xde0] sm:$0xff]  ;;  %462 = vst [vmem:[%s9873_s18 + $0x6e0] sm:$0xff] %v461_v46 }
  0x91   : >> { %v465_v48 = vld [vmem:[%s9877_s19 + $0xe00] sm:$0xff]  ;;  %464 = vst [vmem:[%s9873_s18 + $0x6f0] sm:$0xff] %v463_v47 }
  0x92   : >> { %v467_v49 = vld [vmem:[%s9877_s19 + $0xe20] sm:$0xff]  ;;  %466 = vst [vmem:[%s9873_s18 + $0x700] sm:$0xff] %v465_v48 }
  0x93   : >> { %v469_v50 = vld [vmem:[%s9877_s19 + $0xe40] sm:$0xff]  ;;  %468 = vst [vmem:[%s9873_s18 + $0x710] sm:$0xff] %v467_v49 }
  0x94   : >> { %v471_v51 = vld [vmem:[%s9877_s19 + $0xe60] sm:$0xff]  ;;  %470 = vst [vmem:[%s9873_s18 + $0x720] sm:$0xff] %v469_v50 }
  0x95   : >> { %v473_v52 = vld [vmem:[%s9877_s19 + $0xe80] sm:$0xff]  ;;  %472 = vst [vmem:[%s9873_s18 + $0x730] sm:$0xff] %v471_v51 }
  0x96   : >> { %v475_v53 = vld [vmem:[%s9877_s19 + $0xea0] sm:$0xff]  ;;  %474 = vst [vmem:[%s9873_s18 + $0x740] sm:$0xff] %v473_v52 }
  0x97   : >> { %v477_v54 = vld [vmem:[%s9877_s19 + $0xec0] sm:$0xff]  ;;  %476 = vst [vmem:[%s9873_s18 + $0x750] sm:$0xff] %v475_v53 }
  0x98   : >> { %v479_v55 = vld [vmem:[%s9877_s19 + $0xee0] sm:$0xff]  ;;  %478 = vst [vmem:[%s9873_s18 + $0x760] sm:$0xff] %v477_v54 }
  0x99   : >> { %v481_v56 = vld [vmem:[%s9877_s19 + $0xf00] sm:$0xff]  ;;  %480 = vst [vmem:[%s9873_s18 + $0x770] sm:$0xff] %v479_v55 }
  0x9a   : >> { %v483_v57 = vld [vmem:[%s9877_s19 + $0xf20] sm:$0xff]  ;;  %482 = vst [vmem:[%s9873_s18 + $0x780] sm:$0xff] %v481_v56 }
  0x9b   : >> { %v485_v58 = vld [vmem:[%s9877_s19 + $0xf40] sm:$0xff]  ;;  %484 = vst [vmem:[%s9873_s18 + $0x790] sm:$0xff] %v483_v57 }
  0x9c   : >> { %v487_v59 = vld [vmem:[%s9877_s19 + $0xf60] sm:$0xff]  ;;  %486 = vst [vmem:[%s9873_s18 + $0x7a0] sm:$0xff] %v485_v58 }
  0x9d   : >> { %v489_v60 = vld [vmem:[%s9877_s19 + $0xf80] sm:$0xff]  ;;  %488 = vst [vmem:[%s9873_s18 + $0x7b0] sm:$0xff] %v487_v59 }
  0x9e   : >> { %v491_v61 = vld [vmem:[%s9877_s19 + $0xfa0] sm:$0xff]  ;;  %490 = vst [vmem:[%s9873_s18 + $0x7c0] sm:$0xff] %v489_v60 }
  0x9f   : >> { %v493_v62 = vld [vmem:[%s9877_s19 + $0xfc0] sm:$0xff]  ;;  %492 = vst [vmem:[%s9873_s18 + $0x7d0] sm:$0xff] %v491_v61 }
  0xa0   : >> { %v495_v63 = vld [vmem:[%s9877_s19 + $0xfe0] sm:$0xff]  ;;  %494 = vst [vmem:[%s9873_s18 + $0x7e0] sm:$0xff] %v493_v62 }
  0xa1   : >> { %v497_v0 = vld [vmem:[%s9877_s19 + $0x1000] sm:$0xff]  ;;  %496 = vst [vmem:[%s9873_s18 + $0x7f0] sm:$0xff] %v495_v63 }
  0xa2   : >> { %v499_v1 = vld [vmem:[%s9877_s19 + $0x1020] sm:$0xff]  ;;  %498 = vst [vmem:[%s9873_s18 + $0x800] sm:$0xff] %v497_v0 }
  0xa3   : >> { %v501_v2 = vld [vmem:[%s9877_s19 + $0x1040] sm:$0xff]  ;;  %500 = vst [vmem:[%s9873_s18 + $0x810] sm:$0xff] %v499_v1 }
  0xa4   : >> { %v503_v3 = vld [vmem:[%s9877_s19 + $0x1060] sm:$0xff]  ;;  %502 = vst [vmem:[%s9873_s18 + $0x820] sm:$0xff] %v501_v2 }
  0xa5   : >> { %v505_v4 = vld [vmem:[%s9877_s19 + $0x1080] sm:$0xff]  ;;  %504 = vst [vmem:[%s9873_s18 + $0x830] sm:$0xff] %v503_v3 }
  0xa6   : >> { %v507_v5 = vld [vmem:[%s9877_s19 + $0x10a0] sm:$0xff]  ;;  %506 = vst [vmem:[%s9873_s18 + $0x840] sm:$0xff] %v505_v4 }
  0xa7   : >> { %v509_v6 = vld [vmem:[%s9877_s19 + $0x10c0] sm:$0xff]  ;;  %508 = vst [vmem:[%s9873_s18 + $0x850] sm:$0xff] %v507_v5 }
  0xa8   : >> { %v511_v7 = vld [vmem:[%s9877_s19 + $0x10e0] sm:$0xff]  ;;  %510 = vst [vmem:[%s9873_s18 + $0x860] sm:$0xff] %v509_v6 }
  0xa9   : >> { %v513_v8 = vld [vmem:[%s9877_s19 + $0x1100] sm:$0xff]  ;;  %512 = vst [vmem:[%s9873_s18 + $0x870] sm:$0xff] %v511_v7 }
  0xaa   : >> { %v515_v9 = vld [vmem:[%s9877_s19 + $0x1120] sm:$0xff]  ;;  %514 = vst [vmem:[%s9873_s18 + $0x880] sm:$0xff] %v513_v8 }
  0xab   : >> { %v517_v10 = vld [vmem:[%s9877_s19 + $0x1140] sm:$0xff]  ;;  %516 = vst [vmem:[%s9873_s18 + $0x890] sm:$0xff] %v515_v9 }
  0xac   : >> { %v519_v11 = vld [vmem:[%s9877_s19 + $0x1160] sm:$0xff]  ;;  %518 = vst [vmem:[%s9873_s18 + $0x8a0] sm:$0xff] %v517_v10 }
  0xad   : >> { %v521_v12 = vld [vmem:[%s9877_s19 + $0x1180] sm:$0xff]  ;;  %520 = vst [vmem:[%s9873_s18 + $0x8b0] sm:$0xff] %v519_v11 }
  0xae   : >> { %v523_v13 = vld [vmem:[%s9877_s19 + $0x11a0] sm:$0xff]  ;;  %522 = vst [vmem:[%s9873_s18 + $0x8c0] sm:$0xff] %v521_v12 }
  0xaf   : >> { %v525_v14 = vld [vmem:[%s9877_s19 + $0x11c0] sm:$0xff]  ;;  %524 = vst [vmem:[%s9873_s18 + $0x8d0] sm:$0xff] %v523_v13 }
  0xb0   : >> { %v527_v15 = vld [vmem:[%s9877_s19 + $0x11e0] sm:$0xff]  ;;  %526 = vst [vmem:[%s9873_s18 + $0x8e0] sm:$0xff] %v525_v14 }
  0xb1   : >> { %v529_v16 = vld [vmem:[%s9877_s19 + $0x1200] sm:$0xff]  ;;  %528 = vst [vmem:[%s9873_s18 + $0x8f0] sm:$0xff] %v527_v15 }
  0xb2   : >> { %v531_v17 = vld [vmem:[%s9877_s19 + $0x1220] sm:$0xff]  ;;  %530 = vst [vmem:[%s9873_s18 + $0x900] sm:$0xff] %v529_v16 }
  0xb3   : >> { %v533_v18 = vld [vmem:[%s9877_s19 + $0x1240] sm:$0xff]  ;;  %532 = vst [vmem:[%s9873_s18 + $0x910] sm:$0xff] %v531_v17 }
  0xb4   : >> { %v535_v19 = vld [vmem:[%s9877_s19 + $0x1260] sm:$0xff]  ;;  %534 = vst [vmem:[%s9873_s18 + $0x920] sm:$0xff] %v533_v18 }
  0xb5   : >> { %v537_v20 = vld [vmem:[%s9877_s19 + $0x1280] sm:$0xff]  ;;  %536 = vst [vmem:[%s9873_s18 + $0x930] sm:$0xff] %v535_v19 }
  0xb6   : >> { %v539_v21 = vld [vmem:[%s9877_s19 + $0x12a0] sm:$0xff]  ;;  %538 = vst [vmem:[%s9873_s18 + $0x940] sm:$0xff] %v537_v20 }
  0xb7   : >> { %v541_v22 = vld [vmem:[%s9877_s19 + $0x12c0] sm:$0xff]  ;;  %540 = vst [vmem:[%s9873_s18 + $0x950] sm:$0xff] %v539_v21 }
  0xb8   : >> { %v543_v23 = vld [vmem:[%s9877_s19 + $0x12e0] sm:$0xff]  ;;  %542 = vst [vmem:[%s9873_s18 + $0x960] sm:$0xff] %v541_v22 }
  0xb9   : >> { %v545_v24 = vld [vmem:[%s9877_s19 + $0x1300] sm:$0xff]  ;;  %544 = vst [vmem:[%s9873_s18 + $0x970] sm:$0xff] %v543_v23 }
  0xba   : >> { %v547_v25 = vld [vmem:[%s9877_s19 + $0x1320] sm:$0xff]  ;;  %546 = vst [vmem:[%s9873_s18 + $0x980] sm:$0xff] %v545_v24 }
  0xbb   : >> { %v549_v26 = vld [vmem:[%s9877_s19 + $0x1340] sm:$0xff]  ;;  %548 = vst [vmem:[%s9873_s18 + $0x990] sm:$0xff] %v547_v25 }
  0xbc   : >> { %v551_v27 = vld [vmem:[%s9877_s19 + $0x1360] sm:$0xff]  ;;  %550 = vst [vmem:[%s9873_s18 + $0x9a0] sm:$0xff] %v549_v26 }
  0xbd   : >> { %v553_v28 = vld [vmem:[%s9877_s19 + $0x1380] sm:$0xff]  ;;  %552 = vst [vmem:[%s9873_s18 + $0x9b0] sm:$0xff] %v551_v27 }
  0xbe   : >> { %v555_v29 = vld [vmem:[%s9877_s19 + $0x13a0] sm:$0xff]  ;;  %554 = vst [vmem:[%s9873_s18 + $0x9c0] sm:$0xff] %v553_v28 }
  0xbf   : >> { %v557_v30 = vld [vmem:[%s9877_s19 + $0x13c0] sm:$0xff]  ;;  %556 = vst [vmem:[%s9873_s18 + $0x9d0] sm:$0xff] %v555_v29 }
  0xc0   : >> { %v559_v31 = vld [vmem:[%s9877_s19 + $0x13e0] sm:$0xff]  ;;  %558 = vst [vmem:[%s9873_s18 + $0x9e0] sm:$0xff] %v557_v30 }
  0xc1   : >> { %v561_v32 = vld [vmem:[%s9877_s19 + $0x1400] sm:$0xff]  ;;  %560 = vst [vmem:[%s9873_s18 + $0x9f0] sm:$0xff] %v559_v31 }
  0xc2   : >> { %v563_v33 = vld [vmem:[%s9877_s19 + $0x1420] sm:$0xff]  ;;  %562 = vst [vmem:[%s9873_s18 + $0xa00] sm:$0xff] %v561_v32 }
  0xc3   : >> { %v565_v34 = vld [vmem:[%s9877_s19 + $0x1440] sm:$0xff]  ;;  %564 = vst [vmem:[%s9873_s18 + $0xa10] sm:$0xff] %v563_v33 }
  0xc4   : >> { %v567_v35 = vld [vmem:[%s9877_s19 + $0x1460] sm:$0xff]  ;;  %566 = vst [vmem:[%s9873_s18 + $0xa20] sm:$0xff] %v565_v34 }
  0xc5   : >> { %v569_v36 = vld [vmem:[%s9877_s19 + $0x1480] sm:$0xff]  ;;  %568 = vst [vmem:[%s9873_s18 + $0xa30] sm:$0xff] %v567_v35 }
  0xc6   : >> { %v571_v37 = vld [vmem:[%s9877_s19 + $0x14a0] sm:$0xff]  ;;  %570 = vst [vmem:[%s9873_s18 + $0xa40] sm:$0xff] %v569_v36 }
  0xc7   : >> { %v573_v38 = vld [vmem:[%s9877_s19 + $0x14c0] sm:$0xff]  ;;  %572 = vst [vmem:[%s9873_s18 + $0xa50] sm:$0xff] %v571_v37 }
  0xc8   : >> { %v575_v39 = vld [vmem:[%s9877_s19 + $0x14e0] sm:$0xff]  ;;  %574 = vst [vmem:[%s9873_s18 + $0xa60] sm:$0xff] %v573_v38 }
  0xc9   : >> { %v577_v40 = vld [vmem:[%s9877_s19 + $0x1500] sm:$0xff]  ;;  %576 = vst [vmem:[%s9873_s18 + $0xa70] sm:$0xff] %v575_v39 }
  0xca   : >> { %v579_v41 = vld [vmem:[%s9877_s19 + $0x1520] sm:$0xff]  ;;  %578 = vst [vmem:[%s9873_s18 + $0xa80] sm:$0xff] %v577_v40 }
  0xcb   : >> { %v581_v42 = vld [vmem:[%s9877_s19 + $0x1540] sm:$0xff]  ;;  %580 = vst [vmem:[%s9873_s18 + $0xa90] sm:$0xff] %v579_v41 }
  0xcc   : >> { %v583_v43 = vld [vmem:[%s9877_s19 + $0x1560] sm:$0xff]  ;;  %582 = vst [vmem:[%s9873_s18 + $0xaa0] sm:$0xff] %v581_v42 }
  0xcd   : >> { %v585_v44 = vld [vmem:[%s9877_s19 + $0x1580] sm:$0xff]  ;;  %584 = vst [vmem:[%s9873_s18 + $0xab0] sm:$0xff] %v583_v43 }
  0xce   : >> { %v587_v45 = vld [vmem:[%s9877_s19 + $0x15a0] sm:$0xff]  ;;  %586 = vst [vmem:[%s9873_s18 + $0xac0] sm:$0xff] %v585_v44 }
  0xcf   : >> { %v589_v46 = vld [vmem:[%s9877_s19 + $0x15c0] sm:$0xff]  ;;  %588 = vst [vmem:[%s9873_s18 + $0xad0] sm:$0xff] %v587_v45 }
  0xd0   : >> { %v591_v47 = vld [vmem:[%s9877_s19 + $0x15e0] sm:$0xff]  ;;  %590 = vst [vmem:[%s9873_s18 + $0xae0] sm:$0xff] %v589_v46 }
  0xd1   : >> { %v593_v48 = vld [vmem:[%s9877_s19 + $0x1600] sm:$0xff]  ;;  %592 = vst [vmem:[%s9873_s18 + $0xaf0] sm:$0xff] %v591_v47 }
  0xd2   : >> { %v595_v49 = vld [vmem:[%s9877_s19 + $0x1620] sm:$0xff]  ;;  %594 = vst [vmem:[%s9873_s18 + $0xb00] sm:$0xff] %v593_v48 }
  0xd3   : >> { %v597_v50 = vld [vmem:[%s9877_s19 + $0x1640] sm:$0xff]  ;;  %596 = vst [vmem:[%s9873_s18 + $0xb10] sm:$0xff] %v595_v49 }
  0xd4   : >> { %v599_v51 = vld [vmem:[%s9877_s19 + $0x1660] sm:$0xff]  ;;  %598 = vst [vmem:[%s9873_s18 + $0xb20] sm:$0xff] %v597_v50 }
  0xd5   : >> { %v601_v52 = vld [vmem:[%s9877_s19 + $0x1680] sm:$0xff]  ;;  %600 = vst [vmem:[%s9873_s18 + $0xb30] sm:$0xff] %v599_v51 }
  0xd6   : >> { %v603_v53 = vld [vmem:[%s9877_s19 + $0x16a0] sm:$0xff]  ;;  %602 = vst [vmem:[%s9873_s18 + $0xb40] sm:$0xff] %v601_v52 }
  0xd7   : >> { %v605_v54 = vld [vmem:[%s9877_s19 + $0x16c0] sm:$0xff]  ;;  %604 = vst [vmem:[%s9873_s18 + $0xb50] sm:$0xff] %v603_v53 }
  0xd8   : >> { %v607_v55 = vld [vmem:[%s9877_s19 + $0x16e0] sm:$0xff]  ;;  %606 = vst [vmem:[%s9873_s18 + $0xb60] sm:$0xff] %v605_v54 }
  0xd9   : >> { %v609_v56 = vld [vmem:[%s9877_s19 + $0x1700] sm:$0xff]  ;;  %608 = vst [vmem:[%s9873_s18 + $0xb70] sm:$0xff] %v607_v55 }
  0xda   : >> { %v611_v57 = vld [vmem:[%s9877_s19 + $0x1720] sm:$0xff]  ;;  %610 = vst [vmem:[%s9873_s18 + $0xb80] sm:$0xff] %v609_v56 }
  0xdb   : >> { %v613_v58 = vld [vmem:[%s9877_s19 + $0x1740] sm:$0xff]  ;;  %612 = vst [vmem:[%s9873_s18 + $0xb90] sm:$0xff] %v611_v57 }
  0xdc   : >> { %v615_v59 = vld [vmem:[%s9877_s19 + $0x1760] sm:$0xff]  ;;  %614 = vst [vmem:[%s9873_s18 + $0xba0] sm:$0xff] %v613_v58 }
  0xdd   : >> { %v617_v60 = vld [vmem:[%s9877_s19 + $0x1780] sm:$0xff]  ;;  %616 = vst [vmem:[%s9873_s18 + $0xbb0] sm:$0xff] %v615_v59 }
  0xde   : >> { %v619_v61 = vld [vmem:[%s9877_s19 + $0x17a0] sm:$0xff]  ;;  %618 = vst [vmem:[%s9873_s18 + $0xbc0] sm:$0xff] %v617_v60 }
  0xdf   : >> { %v621_v62 = vld [vmem:[%s9877_s19 + $0x17c0] sm:$0xff]  ;;  %620 = vst [vmem:[%s9873_s18 + $0xbd0] sm:$0xff] %v619_v61 }
  0xe0   : >> { %v623_v63 = vld [vmem:[%s9877_s19 + $0x17e0] sm:$0xff]  ;;  %622 = vst [vmem:[%s9873_s18 + $0xbe0] sm:$0xff] %v621_v62 }
  0xe1   : >> { %v625_v0 = vld [vmem:[%s9877_s19 + $0x1800] sm:$0xff]  ;;  %624 = vst [vmem:[%s9873_s18 + $0xbf0] sm:$0xff] %v623_v63 }
  0xe2   : >> { %v627_v1 = vld [vmem:[%s9877_s19 + $0x1820] sm:$0xff]  ;;  %626 = vst [vmem:[%s9873_s18 + $0xc00] sm:$0xff] %v625_v0 }
  0xe3   : >> { %v629_v2 = vld [vmem:[%s9877_s19 + $0x1840] sm:$0xff]  ;;  %628 = vst [vmem:[%s9873_s18 + $0xc10] sm:$0xff] %v627_v1 }
  0xe4   : >> { %v631_v3 = vld [vmem:[%s9877_s19 + $0x1860] sm:$0xff]  ;;  %630 = vst [vmem:[%s9873_s18 + $0xc20] sm:$0xff] %v629_v2 }
  0xe5   : >> { %v633_v4 = vld [vmem:[%s9877_s19 + $0x1880] sm:$0xff]  ;;  %632 = vst [vmem:[%s9873_s18 + $0xc30] sm:$0xff] %v631_v3 }
  0xe6   : >> { %v635_v5 = vld [vmem:[%s9877_s19 + $0x18a0] sm:$0xff]  ;;  %634 = vst [vmem:[%s9873_s18 + $0xc40] sm:$0xff] %v633_v4 }
  0xe7   : >> { %v637_v6 = vld [vmem:[%s9877_s19 + $0x18c0] sm:$0xff]  ;;  %636 = vst [vmem:[%s9873_s18 + $0xc50] sm:$0xff] %v635_v5 }
  0xe8   : >> { %v639_v7 = vld [vmem:[%s9877_s19 + $0x18e0] sm:$0xff]  ;;  %638 = vst [vmem:[%s9873_s18 + $0xc60] sm:$0xff] %v637_v6 }
  0xe9   : >> { %v641_v8 = vld [vmem:[%s9877_s19 + $0x1900] sm:$0xff]  ;;  %640 = vst [vmem:[%s9873_s18 + $0xc70] sm:$0xff] %v639_v7 }
  0xea   : >> { %v643_v9 = vld [vmem:[%s9877_s19 + $0x1920] sm:$0xff]  ;;  %642 = vst [vmem:[%s9873_s18 + $0xc80] sm:$0xff] %v641_v8 }
  0xeb   : >> { %v645_v10 = vld [vmem:[%s9877_s19 + $0x1940] sm:$0xff]  ;;  %644 = vst [vmem:[%s9873_s18 + $0xc90] sm:$0xff] %v643_v9 }
  0xec   : >> { %v647_v11 = vld [vmem:[%s9877_s19 + $0x1960] sm:$0xff]  ;;  %646 = vst [vmem:[%s9873_s18 + $0xca0] sm:$0xff] %v645_v10 }
  0xed   : >> { %v649_v12 = vld [vmem:[%s9877_s19 + $0x1980] sm:$0xff]  ;;  %648 = vst [vmem:[%s9873_s18 + $0xcb0] sm:$0xff] %v647_v11 }
  0xee   : >> { %v651_v13 = vld [vmem:[%s9877_s19 + $0x19a0] sm:$0xff]  ;;  %650 = vst [vmem:[%s9873_s18 + $0xcc0] sm:$0xff] %v649_v12 }
  0xef   : >> { %v653_v14 = vld [vmem:[%s9877_s19 + $0x19c0] sm:$0xff]  ;;  %652 = vst [vmem:[%s9873_s18 + $0xcd0] sm:$0xff] %v651_v13 }
  0xf0   : >> { %v655_v15 = vld [vmem:[%s9877_s19 + $0x19e0] sm:$0xff]  ;;  %654 = vst [vmem:[%s9873_s18 + $0xce0] sm:$0xff] %v653_v14 }
  0xf1   : >> { %v657_v16 = vld [vmem:[%s9877_s19 + $0x1a00] sm:$0xff]  ;;  %656 = vst [vmem:[%s9873_s18 + $0xcf0] sm:$0xff] %v655_v15 }
  0xf2   : >> { %v659_v17 = vld [vmem:[%s9877_s19 + $0x1a20] sm:$0xff]  ;;  %658 = vst [vmem:[%s9873_s18 + $0xd00] sm:$0xff] %v657_v16 }
  0xf3   : >> { %v661_v18 = vld [vmem:[%s9877_s19 + $0x1a40] sm:$0xff]  ;;  %660 = vst [vmem:[%s9873_s18 + $0xd10] sm:$0xff] %v659_v17 }
  0xf4   : >> { %v663_v19 = vld [vmem:[%s9877_s19 + $0x1a60] sm:$0xff]  ;;  %662 = vst [vmem:[%s9873_s18 + $0xd20] sm:$0xff] %v661_v18 }
  0xf5   : >> { %v665_v20 = vld [vmem:[%s9877_s19 + $0x1a80] sm:$0xff]  ;;  %664 = vst [vmem:[%s9873_s18 + $0xd30] sm:$0xff] %v663_v19 }
  0xf6   : >> { %v667_v21 = vld [vmem:[%s9877_s19 + $0x1aa0] sm:$0xff]  ;;  %666 = vst [vmem:[%s9873_s18 + $0xd40] sm:$0xff] %v665_v20 }
  0xf7   : >> { %v669_v22 = vld [vmem:[%s9877_s19 + $0x1ac0] sm:$0xff]  ;;  %668 = vst [vmem:[%s9873_s18 + $0xd50] sm:$0xff] %v667_v21 }
  0xf8   : >> { %v671_v23 = vld [vmem:[%s9877_s19 + $0x1ae0] sm:$0xff]  ;;  %670 = vst [vmem:[%s9873_s18 + $0xd60] sm:$0xff] %v669_v22 }
  0xf9   : >> { %v673_v24 = vld [vmem:[%s9877_s19 + $0x1b00] sm:$0xff]  ;;  %672 = vst [vmem:[%s9873_s18 + $0xd70] sm:$0xff] %v671_v23 }
  0xfa   : >> { %v675_v25 = vld [vmem:[%s9877_s19 + $0x1b20] sm:$0xff]  ;;  %674 = vst [vmem:[%s9873_s18 + $0xd80] sm:$0xff] %v673_v24 }
  0xfb   : >> { %v677_v26 = vld [vmem:[%s9877_s19 + $0x1b40] sm:$0xff]  ;;  %676 = vst [vmem:[%s9873_s18 + $0xd90] sm:$0xff] %v675_v25 }
  0xfc   : >> { %v679_v27 = vld [vmem:[%s9877_s19 + $0x1b60] sm:$0xff]  ;;  %678 = vst [vmem:[%s9873_s18 + $0xda0] sm:$0xff] %v677_v26 }
  0xfd   : >> { %v681_v28 = vld [vmem:[%s9877_s19 + $0x1b80] sm:$0xff]  ;;  %680 = vst [vmem:[%s9873_s18 + $0xdb0] sm:$0xff] %v679_v27 }
  0xfe   : >> { %v683_v29 = vld [vmem:[%s9877_s19 + $0x1ba0] sm:$0xff]  ;;  %682 = vst [vmem:[%s9873_s18 + $0xdc0] sm:$0xff] %v681_v28 }
  0xff   : >> { %v685_v30 = vld [vmem:[%s9877_s19 + $0x1bc0] sm:$0xff]  ;;  %684 = vst [vmem:[%s9873_s18 + $0xdd0] sm:$0xff] %v683_v29 }
 0x100   : >> { %v687_v31 = vld [vmem:[%s9877_s19 + $0x1be0] sm:$0xff]  ;;  %686 = vst [vmem:[%s9873_s18 + $0xde0] sm:$0xff] %v685_v30 }
 0x101   : >> { %v689_v32 = vld [vmem:[%s9877_s19 + $0x1c00] sm:$0xff]  ;;  %688 = vst [vmem:[%s9873_s18 + $0xdf0] sm:$0xff] %v687_v31 }
 0x102   : >> { %v691_v33 = vld [vmem:[%s9877_s19 + $0x1c20] sm:$0xff]  ;;  %690 = vst [vmem:[%s9873_s18 + $0xe00] sm:$0xff] %v689_v32 }
 0x103   : >> { %v693_v34 = vld [vmem:[%s9877_s19 + $0x1c40] sm:$0xff]  ;;  %692 = vst [vmem:[%s9873_s18 + $0xe10] sm:$0xff] %v691_v33 }
 0x104   : >> { %v695_v35 = vld [vmem:[%s9877_s19 + $0x1c60] sm:$0xff]  ;;  %694 = vst [vmem:[%s9873_s18 + $0xe20] sm:$0xff] %v693_v34 }
 0x105   : >> { %v697_v36 = vld [vmem:[%s9877_s19 + $0x1c80] sm:$0xff]  ;;  %696 = vst [vmem:[%s9873_s18 + $0xe30] sm:$0xff] %v695_v35 }
 0x106   : >> { %v699_v37 = vld [vmem:[%s9877_s19 + $0x1ca0] sm:$0xff]  ;;  %698 = vst [vmem:[%s9873_s18 + $0xe40] sm:$0xff] %v697_v36 }
 0x107   : >> { %v701_v38 = vld [vmem:[%s9877_s19 + $0x1cc0] sm:$0xff]  ;;  %700 = vst [vmem:[%s9873_s18 + $0xe50] sm:$0xff] %v699_v37 }
 0x108   : >> { %v703_v39 = vld [vmem:[%s9877_s19 + $0x1ce0] sm:$0xff]  ;;  %702 = vst [vmem:[%s9873_s18 + $0xe60] sm:$0xff] %v701_v38 }
 0x109   : >> { %v705_v40 = vld [vmem:[%s9877_s19 + $0x1d00] sm:$0xff]  ;;  %704 = vst [vmem:[%s9873_s18 + $0xe70] sm:$0xff] %v703_v39 }
 0x10a   : >> { %v707_v41 = vld [vmem:[%s9877_s19 + $0x1d20] sm:$0xff]  ;;  %706 = vst [vmem:[%s9873_s18 + $0xe80] sm:$0xff] %v705_v40 }
 0x10b   : >> { %v709_v42 = vld [vmem:[%s9877_s19 + $0x1d40] sm:$0xff]  ;;  %708 = vst [vmem:[%s9873_s18 + $0xe90] sm:$0xff] %v707_v41 }
 0x10c   : >> { %v711_v43 = vld [vmem:[%s9877_s19 + $0x1d60] sm:$0xff]  ;;  %710 = vst [vmem:[%s9873_s18 + $0xea0] sm:$0xff] %v709_v42 }
 0x10d   : >> { %v713_v44 = vld [vmem:[%s9877_s19 + $0x1d80] sm:$0xff]  ;;  %712 = vst [vmem:[%s9873_s18 + $0xeb0] sm:$0xff] %v711_v43 }
 0x10e   : >> { %v715_v45 = vld [vmem:[%s9877_s19 + $0x1da0] sm:$0xff]  ;;  %714 = vst [vmem:[%s9873_s18 + $0xec0] sm:$0xff] %v713_v44 }
 0x10f   : >> { %v717_v46 = vld [vmem:[%s9877_s19 + $0x1dc0] sm:$0xff]  ;;  %716 = vst [vmem:[%s9873_s18 + $0xed0] sm:$0xff] %v715_v45 }
 0x110   : >> { %v719_v47 = vld [vmem:[%s9877_s19 + $0x1de0] sm:$0xff]  ;;  %718 = vst [vmem:[%s9873_s18 + $0xee0] sm:$0xff] %v717_v46 }
 0x111   : >> { %v721_v48 = vld [vmem:[%s9877_s19 + $0x1e00] sm:$0xff]  ;;  %720 = vst [vmem:[%s9873_s18 + $0xef0] sm:$0xff] %v719_v47 }
 0x112   : >> { %v723_v49 = vld [vmem:[%s9877_s19 + $0x1e20] sm:$0xff]  ;;  %722 = vst [vmem:[%s9873_s18 + $0xf00] sm:$0xff] %v721_v48 }
 0x113   : >> { %v725_v50 = vld [vmem:[%s9877_s19 + $0x1e40] sm:$0xff]  ;;  %724 = vst [vmem:[%s9873_s18 + $0xf10] sm:$0xff] %v723_v49 }
 0x114   : >> { %v727_v51 = vld [vmem:[%s9877_s19 + $0x1e60] sm:$0xff]  ;;  %726 = vst [vmem:[%s9873_s18 + $0xf20] sm:$0xff] %v725_v50 }
 0x115   : >> { %v729_v52 = vld [vmem:[%s9877_s19 + $0x1e80] sm:$0xff]  ;;  %728 = vst [vmem:[%s9873_s18 + $0xf30] sm:$0xff] %v727_v51 }
 0x116   : >> { %v731_v53 = vld [vmem:[%s9877_s19 + $0x1ea0] sm:$0xff]  ;;  %730 = vst [vmem:[%s9873_s18 + $0xf40] sm:$0xff] %v729_v52 }
 0x117   : >> { %v733_v54 = vld [vmem:[%s9877_s19 + $0x1ec0] sm:$0xff]  ;;  %732 = vst [vmem:[%s9873_s18 + $0xf50] sm:$0xff] %v731_v53 }
 0x118   : >> { %v735_v55 = vld [vmem:[%s9877_s19 + $0x1ee0] sm:$0xff]  ;;  %734 = vst [vmem:[%s9873_s18 + $0xf60] sm:$0xff] %v733_v54 }
 0x119   : >> { %v737_v56 = vld [vmem:[%s9877_s19 + $0x1f00] sm:$0xff]  ;;  %736 = vst [vmem:[%s9873_s18 + $0xf70] sm:$0xff] %v735_v55 }
 0x11a   : >> { %v739_v57 = vld [vmem:[%s9877_s19 + $0x1f20] sm:$0xff]  ;;  %738 = vst [vmem:[%s9873_s18 + $0xf80] sm:$0xff] %v737_v56 }
 0x11b   : >> { %v741_v58 = vld [vmem:[%s9877_s19 + $0x1f40] sm:$0xff]  ;;  %740 = vst [vmem:[%s9873_s18 + $0xf90] sm:$0xff] %v739_v57 }
 0x11c   : >> { %v743_v59 = vld [vmem:[%s9877_s19 + $0x1f60] sm:$0xff]  ;;  %742 = vst [vmem:[%s9873_s18 + $0xfa0] sm:$0xff] %v741_v58 }
 0x11d   : >> { %v745_v60 = vld [vmem:[%s9877_s19 + $0x1f80] sm:$0xff]  ;;  %744 = vst [vmem:[%s9873_s18 + $0xfb0] sm:$0xff] %v743_v59  ;;  %236 = sbr.rel (!%p234_p13) target bundleno = 33 (0x21), region = 150 }
 0x11e   : >> { %v747_v61 = vld [vmem:[%s9877_s19 + $0x1fa0] sm:$0xff]  ;;  %746 = vst [vmem:[%s9873_s18 + $0xfc0] sm:$0xff] %v745_v60 }
 0x11f   : >> { %v749_v62 = vld [vmem:[%s9877_s19 + $0x1fc0] sm:$0xff]  ;;  %748 = vst [vmem:[%s9873_s18 + $0xfd0] sm:$0xff] %v747_v61 }
 0x120   : >> { %v751_v63 = vld [vmem:[%s9877_s19 + $0x1fe0] sm:$0xff]  ;;  %750 = vst [vmem:[%s9873_s18 + $0xfe0] sm:$0xff] %v749_v62  ;;  %s12066_s19 = smov %s10280_s11 }
 0x121   : >> { %752 = vst [vmem:[%s9873_s18 + $0xff0] sm:$0xff] %v751_v63  ;;  %s12065_s18 = smov %s10284_s12 }
 0x122 PF: > { %s1826_s14 = sand.u32 1, %s9865_s23   ;;  %s9662_s15 = sshll.u32 %s9869_s24, 1 }
 0x123   : > { %s9661_s29 = sshll.u32 %s1826_s14, 1  ;;  %s1834_s27 = scalar_lea.hbm %s12019_s3, %s9662_s15 }
 0x124   : > { %s1836_s10 = sshll.u32 %s1834_s27, 4  ;;  %s1830_s12 = scalar_lea.vmem [#allocation3], %s9661_s29  ;;  %s1837_s10 = int_to_ptr.hbm [resolvable:$true] %s1836_s10 }
 0x125   : > { %s1838_s21 = sshll.u32 %s1830_s12, 4  ;;  %s1827_s28 = scalar_lea.sflag [#allocation4], %s1826_s14  ;;  %s1839_s21 = int_to_ptr.vmem [resolvable:$true] %s1838_s21 }
 0x126   : > { %s9759_s11 = sshra.s32 %s1837_s10, 4  ;;  %s9765_s17 = scalar_lea.hbm %s12019_s3, 4  ;;  %s9760_s11 = int_to_ptr.hbm [resolvable:$true] %s9759_s11 }
 0x127   : > { %s9761_s26 = scalar_lea.hbm %s9760_s11, 2  ;;  %p9766_p3 = scmp.lt.s32.totalorder %s9760_s11, %s12019_s3 }
 0x128   : > { %p9762_p0 = scmp.ne.s32.totalorder %s9760_s11, %s9761_s26  ;;  %p9767_p4 = scmp.lt.s32.totalorder %s9765_s17, %s9761_s26 }
 0x12a   : > { %p9763_p1 = pnand %p9762_p0, %p9961_p5  ;;  %p9768_p7 = por %p9767_p4, %p9766_p3 }
 0x12c   : > { %p9764_p2 = pneg %p9763_p1 }
 0x12e   : > { %p9769_p8 = pnand %p9768_p7, %p9764_p2 }
 0x130   : > { %9772 = shalt.err (!%p9769_p8)
}
 0x131   : > { %9678 = dma.hbm_to_vmem [thread:$0]  (%p9961_p5), %s1837_s10, 32, %s1839_s21, %s1827_s28  }
 0x132 PF: > { %p9663_p12 = scmp.ge.s32.totalorder %s9869_s24, 1  ;;  %p1852_p13 = scmp.lt.s32.totalorder %s9869_s24, 3 }
 0x134   : > { %p1853_p0 = pnand %p9663_p12, %p1852_p13 }
 0x136   : > { %1856 = sbr.rel (%p1853_p0) target bundleno = 1902 (0x76e), region = 73 }
 0x13b   : > { %s10569_s27 = sand.u32 1, %s9861_s22  }
 0x13c   : > { %s9664_s30 = sshll.u32 %s10569_s27, 12  ;;  %s9665_s19 = sshll.u32 %s10569_s27, 1 }
 0x13d   : > { %s10573_s20 = scalar_lea.vmem [#allocation2], %s9664_s30  ;;  %s1866_s7 = scalar_lea.sflag [#allocation4], %s10569_s27 }
 0x13e   : > { %s10576_s21 = scalar_lea.vmem [#allocation3], %s9665_s19 }
 0x13f   : > { %9848 = dma.done.wait (%p9965_p6), %s1866_s7, 32  }
 0x140   : > { %9850 = vsyncadd (%p9965_p6), %s1866_s7, 4294967264  ;;  %v1940_v0 = vld [vmem:[%s10573_s20 + $0x30] sm:$0xff]  ;;  %v1938_v28 = vld [vmem:[%s10573_s20 + $0x20] sm:$0xff]  ;;  %s9668_s7 = sshll.u32 %s9943_s25, 5  ;;  %s9667_s29 = sshll.u32 %s9943_s25, 1  ;;  %vm9401_vm0 = vcmask 1041408  }
 0x141   : > { %v1948_v1 = vld [vmem:[%s10573_s20 + $0x70] sm:$0xff]  ;;  %v2474_v3 = vunpack.c.2.s8 %v1940_v0  ;;  %v2476_v4 = vunpack.c.3.s8 %v1940_v0  ;;  %v2470_v22 = vunpack.c.0.s8 %v1940_v0  ;;  %v2472_v23 = vunpack.c.1.s8 %v1940_v0  ;;  %v1946_v37 = vld [vmem:[%s10573_s20 + $0x60] sm:$0xff]  ;;  %p11895_p5 = scmp.lt.s32.totalorder %s9668_s7, 63  ;;  %p1918_p6 = scmp.lt.s32.totalorder %s9667_s29, 3 }
 0x142   : > { %v1956_v2 = vld [vmem:[%s10573_s20 + $0xb0] sm:$0xff]  ;;  %v2506_v5 = vunpack.c.2.s8 %v1948_v1  ;;  %v2508_v6 = vunpack.c.3.s8 %v1948_v1  ;;  %v2502_v26 = vunpack.c.0.s8 %v1948_v1  ;;  %v2504_v27 = vunpack.c.1.s8 %v1948_v1  ;;  %v1954_v42 = vld [vmem:[%s10573_s20 + $0xa0] sm:$0xff]  ;;  %s9677_s26 = sshll.u32 %s9943_s25, 2  ;;  %s9479_s19 = scalar_lea.sflag [#allocation5], %s10569_s27 }
 0x143   : > { %v1964_v7 = vld [vmem:[%s10573_s20 + $0xf0] sm:$0xff]  ;;  %v2538_v8 = vunpack.c.2.s8 %v1956_v2  ;;  %v2540_v9 = vunpack.c.3.s8 %v1956_v2  ;;  %v4522_v12 = vcvt.s32.f32 %v2474_v3  ;;  %v4524_v13 = vcvt.s32.f32 %v2476_v4  ;;  %v1962_v47 = vld [vmem:[%s10573_s20 + $0xe0] sm:$0xff]  ;;  %s12131_s7 = smov (!%p11895_p5, %s9668_s7), 63  ;;  %s12133_s29 = smov (!%p1918_p6, %s9667_s29), 3 }
 0x144   : > { %v2570_v10 = vunpack.c.2.s8 %v1964_v7  ;;  %v2572_v11 = vunpack.c.3.s8 %v1964_v7  ;;  %v4554_v14 = vcvt.s32.f32 %v2506_v5  ;;  %v4556_v15 = vcvt.s32.f32 %v2508_v6  ;;  %s1920_s11 = scalar_lea.vmem %s12018_s2, %s12133_s29  ;;  %s9494_s17 = scalar_lea.hbm %s12021_s5, %s9677_s26 }
 0x145   : > { %v4586_v16 = vcvt.s32.f32 %v2538_v8  ;;  %v4588_v17 = vcvt.s32.f32 %v2540_v9  ;;  %v6556_v20 = vpack.c.bf16 %v4524_v13, %v4522_v12  ;;  %v4518_v29 = vcvt.s32.f32 %v2470_v22  ;;  %v1936_v8 = vld [vmem:[%s10573_s20 + $0x10] sm:$0xff]  ;;  %s9498_s30 = sshll.u32 %s9494_s17, 4  ;;  %s9807_s14 = scalar_lea.hbm %s12021_s5, 8  ;;  %s9499_s30 = int_to_ptr.hbm [resolvable:$true] %s9498_s30 }
 0x146   : > { %v4618_v18 = vcvt.s32.f32 %v2570_v10  ;;  %v4620_v19 = vcvt.s32.f32 %v2572_v11  ;;  %v6572_v21 = vpack.c.bf16 %v4556_v15, %v4554_v14  ;;  %v4520_v30 = vcvt.s32.f32 %v2472_v23  ;;  %v1952_v22 = vld [vmem:[%s10573_s20 + $0x90] sm:$0xff] }
 0x147   : > { %v6588_v24 = vpack.c.bf16 %v4588_v17, %v4586_v16  ;;  %7718 = vmatpush.bf16.msra.mxu0 %v6556_v20  ;;  %v2534_v31 = vunpack.c.0.s8 %v1956_v2  ;;  %v2536_v32 = vunpack.c.1.s8 %v1956_v2  ;;  %v4550_v33 = vcvt.s32.f32 %v2502_v26  ;;  %v1944_v17 = vld [vmem:[%s10573_s20 + $0x50] sm:$0xff] }
 0x148   : > { %v6604_v25 = vpack.c.bf16 %v4620_v19, %v4618_v18  ;;  %7731 = vmatpush.bf16.msra.mxu1 %v6572_v21  ;;  %v4552_v34 = vcvt.s32.f32 %v2504_v27  ;;  %v2566_v35 = vunpack.c.0.s8 %v1964_v7  ;;  %v2568_v36 = vunpack.c.1.s8 %v1964_v7  ;;  %v1960_v27 = vld [vmem:[%s10573_s20 + $0xd0] sm:$0xff] }
 0x149   : > { %7744 = vmatpush.bf16.msra.mxu2 %v6588_v24  ;;  %v6554_v38 = vpack.c.bf16 %v4520_v30, %v4518_v29  ;;  %v4582_v39 = vcvt.s32.f32 %v2534_v31  ;;  %v4584_v40 = vcvt.s32.f32 %v2536_v32  ;;  %v2466_v41 = vunpack.c.2.s8 %v1938_v28 }
 0x14a   : > { %7757 = vmatpush.bf16.msra.mxu3 %v6604_v25  ;;  %v6570_v43 = vpack.c.bf16 %v4552_v34, %v4550_v33  ;;  %v4614_v44 = vcvt.s32.f32 %v2566_v35  ;;  %v4616_v45 = vcvt.s32.f32 %v2568_v36  ;;  %v2468_v46 = vunpack.c.3.s8 %v1938_v28 }
 0x14b   : > { %7719 = vmatpush.bf16.msra.mxu0 %v6554_v38  ;;  %v6586_v48 = vpack.c.bf16 %v4584_v40, %v4582_v39  ;;  %v4514_v49 = vcvt.s32.f32 %v2466_v41  ;;  %v2498_v50 = vunpack.c.2.s8 %v1946_v37  ;;  %v2500_v51 = vunpack.c.3.s8 %v1946_v37 }
 0x14c   : > { %7732 = vmatpush.bf16.msra.mxu1 %v6570_v43  ;;  %v6602_v52 = vpack.c.bf16 %v4616_v45, %v4614_v44  ;;  %v4516_v53 = vcvt.s32.f32 %v2468_v46  ;;  %v2530_v54 = vunpack.c.2.s8 %v1954_v42  ;;  %v2532_v55 = vunpack.c.3.s8 %v1954_v42 }
 0x14d   : > { %7745 = vmatpush.bf16.msra.mxu2 %v6586_v48  ;;  %v4546_v56 = vcvt.s32.f32 %v2498_v50  ;;  %v4548_v57 = vcvt.s32.f32 %v2500_v51  ;;  %v2562_v58 = vunpack.c.2.s8 %v1962_v47  ;;  %v2564_v59 = vunpack.c.3.s8 %v1962_v47 }
 0x14e   : > { %7758 = vmatpush.bf16.msra.mxu3 %v6602_v52  ;;  %v6552_v60 = vpack.c.bf16 %v4516_v53, %v4514_v49  ;;  %v4578_v61 = vcvt.s32.f32 %v2530_v54  ;;  %v4580_v62 = vcvt.s32.f32 %v2532_v55  ;;  %v2462_v63 = vunpack.c.0.s8 %v1938_v28  ;;  %v1934_v52 = vld [vmem:[%s10573_s20] sm:$0xff] }
 0x14f   : > { %v6568_v0 = vpack.c.bf16 %v4548_v57, %v4546_v56  ;;  %v4610_v1 = vcvt.s32.f32 %v2562_v58  ;;  %v4612_v2 = vcvt.s32.f32 %v2564_v59  ;;  %v2464_v3 = vunpack.c.1.s8 %v1938_v28 }
 0x150   : > { %7720 = vmatpush.bf16.msra.mxu0 %v6552_v60  ;;  %v6584_v4 = vpack.c.bf16 %v4580_v62, %v4578_v61  ;;  %v4510_v5 = vcvt.s32.f32 %v2462_v63  ;;  %v2494_v6 = vunpack.c.0.s8 %v1946_v37  ;;  %v2496_v7 = vunpack.c.1.s8 %v1946_v37  ;;  %v1942_v61 = vld [vmem:[%s10573_s20 + $0x40] sm:$0xff] }
 0x151   : > { %7733 = vmatpush.bf16.msra.mxu1 %v6568_v0  ;;  %v6600_v9 = vpack.c.bf16 %v4612_v2, %v4610_v1  ;;  %v4512_v10 = vcvt.s32.f32 %v2464_v3  ;;  %v2526_v11 = vunpack.c.0.s8 %v1954_v42  ;;  %v2528_v12 = vunpack.c.1.s8 %v1954_v42  ;;  %v1950_v2 = vld [vmem:[%s10573_s20 + $0x80] sm:$0xff] }
 0x152   : > { %7746 = vmatpush.bf16.msra.mxu2 %v6584_v4  ;;  %v4542_v13 = vcvt.s32.f32 %v2494_v6  ;;  %v4544_v14 = vcvt.s32.f32 %v2496_v7  ;;  %v2558_v15 = vunpack.c.0.s8 %v1962_v47  ;;  %v2560_v16 = vunpack.c.1.s8 %v1962_v47  ;;  %v1958_v7 = vld [vmem:[%s10573_s20 + $0xc0] sm:$0xff] }
 0x153   : > { %7759 = vmatpush.bf16.msra.mxu3 %v6600_v9  ;;  %v6550_v18 = vpack.c.bf16 %v4512_v10, %v4510_v5  ;;  %v4574_v19 = vcvt.s32.f32 %v2526_v11  ;;  %v4576_v20 = vcvt.s32.f32 %v2528_v12  ;;  %v2458_v21 = vunpack.c.2.s8 %v1936_v8  ;;  %v7566_v12 = vld [vmem:[%s12016_s0] sm:$0xff] }
 0x154   : > { %v6566_v23 = vpack.c.bf16 %v4544_v14, %v4542_v13  ;;  %v4606_v24 = vcvt.s32.f32 %v2558_v15  ;;  %v4608_v25 = vcvt.s32.f32 %v2560_v16  ;;  %v2460_v26 = vunpack.c.3.s8 %v1936_v8  ;;  %7575 = vst [vmem:[#allocation1] ss:$9 sm:$0xff] %v7566_v12 }
 0x155   : > { %7721 = vmatpush.bf16.msra.mxu0 %v6550_v18  ;;  %v6582_v28 = vpack.c.bf16 %v4576_v20, %v4574_v19  ;;  %v4506_v29 = vcvt.s32.f32 %v2458_v21  ;;  %v2490_v30 = vunpack.c.2.s8 %v1944_v17  ;;  %v2492_v31 = vunpack.c.3.s8 %v1944_v17 }
 0x156   : > { %7734 = vmatpush.bf16.msra.mxu1 %v6566_v23  ;;  %v6598_v32 = vpack.c.bf16 %v4608_v25, %v4606_v24  ;;  %v4508_v33 = vcvt.s32.f32 %v2460_v26  ;;  %v2522_v34 = vunpack.c.2.s8 %v1952_v22  ;;  %v2524_v35 = vunpack.c.3.s8 %v1952_v22 }
 0x157   : > { %7747 = vmatpush.bf16.msra.mxu2 %v6582_v28  ;;  %v4538_v36 = vcvt.s32.f32 %v2490_v30  ;;  %v4540_v37 = vcvt.s32.f32 %v2492_v31  ;;  %v2554_v38 = vunpack.c.2.s8 %v1960_v27  ;;  %v2556_v39 = vunpack.c.3.s8 %v1960_v27 }
 0x158   : > { %7760 = vmatpush.bf16.msra.mxu3 %v6598_v32  ;;  %v6548_v40 = vpack.c.bf16 %v4508_v33, %v4506_v29  ;;  %v4570_v41 = vcvt.s32.f32 %v2522_v34  ;;  %v4572_v42 = vcvt.s32.f32 %v2524_v35  ;;  %v2454_v43 = vunpack.c.0.s8 %v1936_v8  ;;  %v1972_v33 = vld [vmem:[%s10573_s20 + $0x130] sm:$0xff] }
 0x159   : > { %v6564_v44 = vpack.c.bf16 %v4540_v37, %v4538_v36  ;;  %v4602_v45 = vcvt.s32.f32 %v2554_v38  ;;  %v4604_v46 = vcvt.s32.f32 %v2556_v39  ;;  %v2456_v47 = vunpack.c.1.s8 %v1936_v8 }
 0x15a   : > { %7722 = vmatpush.bf16.msra.mxu0 %v6548_v40  ;;  %v6580_v48 = vpack.c.bf16 %v4572_v42, %v4570_v41  ;;  %v4502_v49 = vcvt.s32.f32 %v2454_v43  ;;  %v2486_v50 = vunpack.c.0.s8 %v1944_v17  ;;  %v2488_v51 = vunpack.c.1.s8 %v1944_v17  ;;  %v1980_v42 = vld [vmem:[%s10573_s20 + $0x170] sm:$0xff] }
 0x15b   : > { %7735 = vmatpush.bf16.msra.mxu1 %v6564_v44  ;;  %v6596_v53 = vpack.c.bf16 %v4604_v46, %v4602_v45  ;;  %v4504_v54 = vcvt.s32.f32 %v2456_v47  ;;  %v2518_v55 = vunpack.c.0.s8 %v1952_v22  ;;  %v2520_v56 = vunpack.c.1.s8 %v1952_v22  ;;  %v1988_v47 = vld [vmem:[%s10573_s20 + $0x1b0] sm:$0xff] }
 0x15c   : > { %7748 = vmatpush.bf16.msra.mxu2 %v6580_v48  ;;  %v4534_v57 = vcvt.s32.f32 %v2486_v50  ;;  %v4536_v58 = vcvt.s32.f32 %v2488_v51  ;;  %v2550_v59 = vunpack.c.0.s8 %v1960_v27  ;;  %v2552_v60 = vunpack.c.1.s8 %v1960_v27 }
 0x15d   : > { %7761 = vmatpush.bf16.msra.mxu3 %v6596_v53  ;;  %v6546_v62 = vpack.c.bf16 %v4504_v54, %v4502_v49  ;;  %v4566_v63 = vcvt.s32.f32 %v2518_v55  ;;  %v4568_v0 = vcvt.s32.f32 %v2520_v56  ;;  %v2450_v1 = vunpack.c.2.s8 %v1934_v52 }
 0x15e   : > { %v6562_v3 = vpack.c.bf16 %v4536_v58, %v4534_v57  ;;  %v4598_v4 = vcvt.s32.f32 %v2550_v59  ;;  %v4600_v5 = vcvt.s32.f32 %v2552_v60  ;;  %v2452_v6 = vunpack.c.3.s8 %v1934_v52 }
 0x15f   : > { %7723 = vmatpush.bf16.msra.mxu0 %v6546_v62  ;;  %v6578_v8 = vpack.c.bf16 %v4568_v0, %v4566_v63  ;;  %v4498_v9 = vcvt.s32.f32 %v2450_v1  ;;  %v2482_v10 = vunpack.c.2.s8 %v1942_v61  ;;  %v2484_v11 = vunpack.c.3.s8 %v1942_v61  ;;  %v10607_v62 = vld [vmem:[#allocation1 + $0x9] sm:$0xff] }
 0x160   : > { %7736 = vmatpush.bf16.msra.mxu1 %v6562_v3  ;;  %v6594_v13 = vpack.c.bf16 %v4600_v5, %v4598_v4  ;;  %v4500_v14 = vcvt.s32.f32 %v2452_v6  ;;  %v2514_v15 = vunpack.c.2.s8 %v1950_v2  ;;  %v2516_v16 = vunpack.c.3.s8 %v1950_v2  ;;  %v10609_v3 = vld [vmem:[#allocation1 + $0x12] sm:$0xff] }
 0x161   : > { %7749 = vmatpush.bf16.msra.mxu2 %v6578_v8  ;;  %v4530_v17 = vcvt.s32.f32 %v2482_v10  ;;  %v4532_v18 = vcvt.s32.f32 %v2484_v11  ;;  %v2546_v19 = vunpack.c.2.s8 %v1958_v7  ;;  %v2548_v20 = vunpack.c.3.s8 %v1958_v7  ;;  %v10612_v8 = vld [vmem:[#allocation1 + $0x1b] sm:$0xff] }
 0x162   : > { %7762 = vmatpush.bf16.msra.mxu3 %v6594_v13  ;;  %v6544_v21 = vpack.c.bf16 %v4500_v14, %v4498_v9  ;;  %v4562_v22 = vcvt.s32.f32 %v2514_v15  ;;  %v4564_v23 = vcvt.s32.f32 %v2516_v16  ;;  %v2446_v24 = vunpack.c.0.s8 %v1934_v52 }
 0x163   : > { %v6560_v25 = vpack.c.bf16 %v4532_v18, %v4530_v17  ;;  %v4594_v26 = vcvt.s32.f32 %v2546_v19  ;;  %v4596_v27 = vcvt.s32.f32 %v2548_v20  ;;  %v2448_v28 = vunpack.c.1.s8 %v1934_v52  ;;  %v1996_v52 = vld [vmem:[%s10573_s20 + $0x1f0] sm:$0xff]  ;;  %v1970_v17 = vld [vmem:[%s10573_s20 + $0x120] sm:$0xff] }
 0x164   : > { %7724 = vmatpush.bf16.msra.mxu0 %v6544_v21  ;;  %v6576_v29 = vpack.c.bf16 %v4564_v23, %v4562_v22  ;;  %v4494_v30 = vcvt.s32.f32 %v2446_v24  ;;  %v2478_v31 = vunpack.c.0.s8 %v1942_v61  ;;  %v2480_v32 = vunpack.c.1.s8 %v1942_v61  ;;  %v10605_v61 = vld [vmem:[#allocation1] sm:$0xff] }
 0x165   : > { %7737 = vmatpush.bf16.msra.mxu1 %v6560_v25  ;;  %v6592_v34 = vpack.c.bf16 %v4596_v27, %v4594_v26  ;;  %v4496_v35 = vcvt.s32.f32 %v2448_v28  ;;  %v2510_v36 = vunpack.c.0.s8 %v1950_v2  ;;  %v2512_v37 = vunpack.c.1.s8 %v1950_v2  ;;  %v1978_v26 = vld [vmem:[%s10573_s20 + $0x160] sm:$0xff] }
 0x166   : > { %7750 = vmatpush.bf16.msra.mxu2 %v6576_v29  ;;  %v4526_v38 = vcvt.s32.f32 %v2478_v31  ;;  %v4528_v39 = vcvt.s32.f32 %v2480_v32  ;;  %v2542_v40 = vunpack.c.0.s8 %v1958_v7  ;;  %v2544_v41 = vunpack.c.1.s8 %v1958_v7  ;;  %v1986_v31 = vld [vmem:[%s10573_s20 + $0x1a0] sm:$0xff] }
 0x167   : > { %7763 = vmatpush.bf16.msra.mxu3 %v6592_v34  ;;  %v6542_v43 = vpack.c.bf16 %v4496_v35, %v4494_v30  ;;  %v4558_v44 = vcvt.s32.f32 %v2510_v36  ;;  %v4560_v45 = vcvt.s32.f32 %v2512_v37  ;;  %v2602_v46 = vunpack.c.2.s8 %v1972_v33  ;;  %v1994_v36 = vld [vmem:[%s10573_s20 + $0x1e0] sm:$0xff] }
 0x168   : > { %v6558_v48 = vpack.c.bf16 %v4528_v39, %v4526_v38  ;;  %v4590_v49 = vcvt.s32.f32 %v2542_v40  ;;  %v4592_v50 = vcvt.s32.f32 %v2544_v41  ;;  %v2604_v51 = vunpack.c.3.s8 %v1972_v33 }
 0x169   : > { %7725 = vmatpush.bf16.msra.mxu0 %v6542_v43  ;;  %v6574_v53 = vpack.c.bf16 %v4560_v45, %v4558_v44  ;;  %v4650_v54 = vcvt.s32.f32 %v2602_v46  ;;  %v2634_v55 = vunpack.c.2.s8 %v1980_v42  ;;  %v2636_v56 = vunpack.c.3.s8 %v1980_v42 }
 0x16a   : > { %7738 = vmatpush.bf16.msra.mxu1 %v6558_v48  ;;  %v6590_v57 = vpack.c.bf16 %v4592_v50, %v4590_v49  ;;  %v4652_v58 = vcvt.s32.f32 %v2604_v51  ;;  %v2666_v59 = vunpack.c.2.s8 %v1988_v47  ;;  %v2668_v60 = vunpack.c.3.s8 %v1988_v47 }
 0x16b   : > { %7751 = vmatpush.bf16.msra.mxu2 %v6574_v53  ;;  %v4682_v63 = vcvt.s32.f32 %v2634_v55  ;;  %v4684_v0 = vcvt.s32.f32 %v2636_v56  ;;  %v2698_v1 = vunpack.c.2.s8 %v1996_v52  ;;  %v2700_v2 = vunpack.c.3.s8 %v1996_v52 }
 0x16c   : > { %7764 = vmatpush.bf16.msra.mxu3 %v6590_v57  ;;  %v6620_v4 = vpack.c.bf16 %v4652_v58, %v4650_v54  ;;  %v4714_v5 = vcvt.s32.f32 %v2666_v59  ;;  %v4716_v6 = vcvt.s32.f32 %v2668_v60  ;;  %v2598_v7 = vunpack.c.0.s8 %v1972_v33  ;;  %7726 = vmatmul.bf16.vlgmr.msra.gmra.mxu0 %v10605_v61 }
 0x16d   : > { %v6636_v9 = vpack.c.bf16 %v4684_v0, %v4682_v63  ;;  %v4746_v10 = vcvt.s32.f32 %v2698_v1  ;;  %v4748_v11 = vcvt.s32.f32 %v2700_v2  ;;  %v2600_v12 = vunpack.c.1.s8 %v1972_v33  ;;  %7739 = vmatmul.bf16.vlgmr.msra.gmra.mxu1 %v10607_v62  ;;  %v1968_v63 = vld [vmem:[%s10573_s20 + $0x110] sm:$0xff] }
 0x16e   : > { %7770 = vmatpush.bf16.msrb.mxu0 %v6620_v4  ;;  %v6652_v13 = vpack.c.bf16 %v4716_v6, %v4714_v5  ;;  %v4646_v14 = vcvt.s32.f32 %v2598_v7  ;;  %v2630_v15 = vunpack.c.0.s8 %v1980_v42  ;;  %v2632_v16 = vunpack.c.1.s8 %v1980_v42  ;;  %7752 = vmatmul.bf16.vlgmr.msra.gmra.mxu2 %v10609_v3 }
 0x16f   : > { %7783 = vmatpush.bf16.msrb.mxu1 %v6636_v9  ;;  %v6668_v18 = vpack.c.bf16 %v4748_v11, %v4746_v10  ;;  %v4648_v19 = vcvt.s32.f32 %v2600_v12  ;;  %v2662_v20 = vunpack.c.0.s8 %v1988_v47  ;;  %v2664_v21 = vunpack.c.1.s8 %v1988_v47  ;;  %7765 = vmatmul.bf16.vlgmr.msra.gmra.mxu3 %v10612_v8  ;;  %v1976_v10 = vld [vmem:[%s10573_s20 + $0x150] sm:$0xff] }
 0x170   : > { %7796 = vmatpush.bf16.msrb.mxu2 %v6652_v13  ;;  %v4678_v22 = vcvt.s32.f32 %v2630_v15  ;;  %v4680_v23 = vcvt.s32.f32 %v2632_v16  ;;  %v2694_v24 = vunpack.c.0.s8 %v1996_v52  ;;  %v2696_v25 = vunpack.c.1.s8 %v1996_v52  ;;  %v1984_v15 = vld [vmem:[%s10573_s20 + $0x190] sm:$0xff] }
 0x171   : > { %7809 = vmatpush.bf16.msrb.mxu3 %v6668_v18  ;;  %v6618_v27 = vpack.c.bf16 %v4648_v19, %v4646_v14  ;;  %v4710_v28 = vcvt.s32.f32 %v2662_v20  ;;  %v4712_v29 = vcvt.s32.f32 %v2664_v21  ;;  %v2594_v30 = vunpack.c.2.s8 %v1970_v17  ;;  %v1992_v20 = vld [vmem:[%s10573_s20 + $0x1d0] sm:$0xff] }
 0x172   : > { %v6634_v32 = vpack.c.bf16 %v4680_v23, %v4678_v22  ;;  %v4742_v33 = vcvt.s32.f32 %v2694_v24  ;;  %v4744_v34 = vcvt.s32.f32 %v2696_v25  ;;  %v2596_v35 = vunpack.c.3.s8 %v1970_v17 }
 0x173   : > { %7771 = vmatpush.bf16.msrb.mxu0 %v6618_v27  ;;  %v6650_v37 = vpack.c.bf16 %v4712_v29, %v4710_v28  ;;  %v4642_v38 = vcvt.s32.f32 %v2594_v30  ;;  %v2626_v39 = vunpack.c.2.s8 %v1978_v26  ;;  %v2628_v40 = vunpack.c.3.s8 %v1978_v26 }
 0x174   : > { %7784 = vmatpush.bf16.msrb.mxu1 %v6634_v32  ;;  %v6666_v41 = vpack.c.bf16 %v4744_v34, %v4742_v33  ;;  %v4644_v42 = vcvt.s32.f32 %v2596_v35  ;;  %v2658_v43 = vunpack.c.2.s8 %v1986_v31  ;;  %v2660_v44 = vunpack.c.3.s8 %v1986_v31 }
 0x175   : > { %7797 = vmatpush.bf16.msrb.mxu2 %v6650_v37  ;;  %v4674_v45 = vcvt.s32.f32 %v2626_v39  ;;  %v4676_v46 = vcvt.s32.f32 %v2628_v40  ;;  %v2690_v47 = vunpack.c.2.s8 %v1994_v36  ;;  %v2692_v48 = vunpack.c.3.s8 %v1994_v36 }
 0x176   : > { %7810 = vmatpush.bf16.msrb.mxu3 %v6666_v41  ;;  %v6616_v49 = vpack.c.bf16 %v4644_v42, %v4642_v38  ;;  %v4706_v50 = vcvt.s32.f32 %v2658_v43  ;;  %v4708_v51 = vcvt.s32.f32 %v2660_v44  ;;  %v2590_v52 = vunpack.c.0.s8 %v1970_v17 }
 0x177   : > { %v6632_v53 = vpack.c.bf16 %v4676_v46, %v4674_v45  ;;  %v4738_v54 = vcvt.s32.f32 %v2690_v47  ;;  %v4740_v55 = vcvt.s32.f32 %v2692_v48  ;;  %v2592_v56 = vunpack.c.1.s8 %v1970_v17  ;;  %v1966_v45 = vld [vmem:[%s10573_s20 + $0x100] sm:$0xff] }
 0x178   : > { %7772 = vmatpush.bf16.msrb.mxu0 %v6616_v49  ;;  %v6648_v57 = vpack.c.bf16 %v4708_v51, %v4706_v50  ;;  %v4638_v58 = vcvt.s32.f32 %v2590_v52  ;;  %v2622_v59 = vunpack.c.0.s8 %v1978_v26  ;;  %v2624_v60 = vunpack.c.1.s8 %v1978_v26 }
 0x179   : > { %7785 = vmatpush.bf16.msrb.mxu1 %v6632_v53  ;;  %v6664_v0 = vpack.c.bf16 %v4740_v55, %v4738_v54  ;;  %v4640_v1 = vcvt.s32.f32 %v2592_v56  ;;  %v2654_v2 = vunpack.c.0.s8 %v1986_v31  ;;  %v2656_v4 = vunpack.c.1.s8 %v1986_v31  ;;  %v1974_v54 = vld [vmem:[%s10573_s20 + $0x140] sm:$0xff] }
 0x17a   : > { %7798 = vmatpush.bf16.msrb.mxu2 %v6648_v57  ;;  %v4670_v5 = vcvt.s32.f32 %v2622_v59  ;;  %v4672_v6 = vcvt.s32.f32 %v2624_v60  ;;  %v2686_v7 = vunpack.c.0.s8 %v1994_v36  ;;  %v2688_v9 = vunpack.c.1.s8 %v1994_v36  ;;  %v1982_v59 = vld [vmem:[%s10573_s20 + $0x180] sm:$0xff] }
 0x17b   : > { %7811 = vmatpush.bf16.msrb.mxu3 %v6664_v0  ;;  %v6614_v11 = vpack.c.bf16 %v4640_v1, %v4638_v58  ;;  %v4702_v12 = vcvt.s32.f32 %v2654_v2  ;;  %v4704_v13 = vcvt.s32.f32 %v2656_v4  ;;  %v2586_v14 = vunpack.c.2.s8 %v1968_v63  ;;  %v1990_v2 = vld [vmem:[%s10573_s20 + $0x1c0] sm:$0xff] }
 0x17c   : > { %v6630_v16 = vpack.c.bf16 %v4672_v6, %v4670_v5  ;;  %v4734_v17 = vcvt.s32.f32 %v2686_v7  ;;  %v4736_v18 = vcvt.s32.f32 %v2688_v9  ;;  %v2588_v19 = vunpack.c.3.s8 %v1968_v63 }
 0x17d   : > { %7773 = vmatpush.bf16.msrb.mxu0 %v6614_v11  ;;  %v6646_v21 = vpack.c.bf16 %v4704_v13, %v4702_v12  ;;  %v4634_v22 = vcvt.s32.f32 %v2586_v14  ;;  %v2618_v23 = vunpack.c.2.s8 %v1976_v10  ;;  %v2620_v24 = vunpack.c.3.s8 %v1976_v10 }
 0x17e   : > { %7786 = vmatpush.bf16.msrb.mxu1 %v6630_v16  ;;  %v6662_v25 = vpack.c.bf16 %v4736_v18, %v4734_v17  ;;  %v4636_v26 = vcvt.s32.f32 %v2588_v19  ;;  %v2650_v27 = vunpack.c.2.s8 %v1984_v15  ;;  %v2652_v28 = vunpack.c.3.s8 %v1984_v15 }
 0x17f   : > { %7799 = vmatpush.bf16.msrb.mxu2 %v6646_v21  ;;  %v4666_v29 = vcvt.s32.f32 %v2618_v23  ;;  %v4668_v30 = vcvt.s32.f32 %v2620_v24  ;;  %v2682_v31 = vunpack.c.2.s8 %v1992_v20  ;;  %v2684_v32 = vunpack.c.3.s8 %v1992_v20 }
 0x180   : > { %7812 = vmatpush.bf16.msrb.mxu3 %v6662_v25  ;;  %v6612_v33 = vpack.c.bf16 %v4636_v26, %v4634_v22  ;;  %v4698_v34 = vcvt.s32.f32 %v2650_v27  ;;  %v4700_v35 = vcvt.s32.f32 %v2652_v28  ;;  %v2582_v36 = vunpack.c.0.s8 %v1968_v63 }
 0x181   : > { %v6628_v37 = vpack.c.bf16 %v4668_v30, %v4666_v29  ;;  %v4730_v38 = vcvt.s32.f32 %v2682_v31  ;;  %v4732_v39 = vcvt.s32.f32 %v2684_v32  ;;  %v2584_v40 = vunpack.c.1.s8 %v1968_v63  ;;  %v2004_v29 = vld [vmem:[%s10573_s20 + $0x230] sm:$0xff] }
 0x182   : > { %7774 = vmatpush.bf16.msrb.mxu0 %v6612_v33  ;;  %v6644_v41 = vpack.c.bf16 %v4700_v35, %v4698_v34  ;;  %v4630_v42 = vcvt.s32.f32 %v2582_v36  ;;  %v2614_v43 = vunpack.c.0.s8 %v1976_v10  ;;  %v2616_v44 = vunpack.c.1.s8 %v1976_v10 }
 0x183   : > { %7787 = vmatpush.bf16.msrb.mxu1 %v6628_v37  ;;  %v6660_v46 = vpack.c.bf16 %v4732_v39, %v4730_v38  ;;  %v4632_v47 = vcvt.s32.f32 %v2584_v40  ;;  %v2646_v48 = vunpack.c.0.s8 %v1984_v15  ;;  %v2648_v49 = vunpack.c.1.s8 %v1984_v15  ;;  %v2012_v38 = vld [vmem:[%s10573_s20 + $0x270] sm:$0xff] }
 0x184   : > { %7800 = vmatpush.bf16.msrb.mxu2 %v6644_v41  ;;  %v4662_v50 = vcvt.s32.f32 %v2614_v43  ;;  %v4664_v51 = vcvt.s32.f32 %v2616_v44  ;;  %v2678_v52 = vunpack.c.0.s8 %v1992_v20  ;;  %v2680_v53 = vunpack.c.1.s8 %v1992_v20  ;;  %v2020_v43 = vld [vmem:[%s10573_s20 + $0x2b0] sm:$0xff] }
 0x185   : > { %7813 = vmatpush.bf16.msrb.mxu3 %v6660_v46  ;;  %v6610_v55 = vpack.c.bf16 %v4632_v47, %v4630_v42  ;;  %v4694_v56 = vcvt.s32.f32 %v2646_v48  ;;  %v4696_v57 = vcvt.s32.f32 %v2648_v49  ;;  %v2578_v58 = vunpack.c.2.s8 %v1966_v45  ;;  %v2028_v48 = vld [vmem:[%s10573_s20 + $0x2f0] sm:$0xff] }
 0x186   : > { %v6626_v60 = vpack.c.bf16 %v4664_v51, %v4662_v50  ;;  %v4726_v63 = vcvt.s32.f32 %v2678_v52  ;;  %v4728_v0 = vcvt.s32.f32 %v2680_v53  ;;  %v2580_v1 = vunpack.c.3.s8 %v1966_v45  ;;  %v10633_v53 = vld [vmem:[#allocation1 + $0x24] sm:$0xff] }
 0x187   : > { %7775 = vmatpush.bf16.msrb.mxu0 %v6610_v55  ;;  %v6642_v4 = vpack.c.bf16 %v4696_v57, %v4694_v56  ;;  %v4626_v5 = vcvt.s32.f32 %v2578_v58  ;;  %v2610_v6 = vunpack.c.2.s8 %v1974_v54  ;;  %v2612_v7 = vunpack.c.3.s8 %v1974_v54  ;;  %v10635_v58 = vld [vmem:[#allocation1 + $0x2d] sm:$0xff] }
 0x188   : > { %7788 = vmatpush.bf16.msrb.mxu1 %v6626_v60  ;;  %v6658_v9 = vpack.c.bf16 %v4728_v0, %v4726_v63  ;;  %v4628_v10 = vcvt.s32.f32 %v2580_v1  ;;  %v2642_v11 = vunpack.c.2.s8 %v1982_v59  ;;  %v2644_v12 = vunpack.c.3.s8 %v1982_v59  ;;  %v10637_v1 = vld [vmem:[#allocation1 + $0x36] sm:$0xff] }
 0x189   : > { %7801 = vmatpush.bf16.msrb.mxu2 %v6642_v4  ;;  %v4658_v13 = vcvt.s32.f32 %v2610_v6  ;;  %v4660_v14 = vcvt.s32.f32 %v2612_v7  ;;  %v2674_v15 = vunpack.c.2.s8 %v1990_v2  ;;  %v2676_v16 = vunpack.c.3.s8 %v1990_v2  ;;  %v10640_v7 = vld [vmem:[#allocation1 + $0x3f] sm:$0xff] }
 0x18a   : > { %7814 = vmatpush.bf16.msrb.mxu3 %v6658_v9  ;;  %v6608_v17 = vpack.c.bf16 %v4628_v10, %v4626_v5  ;;  %v4690_v18 = vcvt.s32.f32 %v2642_v11  ;;  %v4692_v19 = vcvt.s32.f32 %v2644_v12  ;;  %v2574_v20 = vunpack.c.0.s8 %v1966_v45 }
 0x18b   : > { %v6624_v21 = vpack.c.bf16 %v4660_v14, %v4658_v13  ;;  %v4722_v22 = vcvt.s32.f32 %v2674_v15  ;;  %v4724_v23 = vcvt.s32.f32 %v2676_v16  ;;  %v2576_v24 = vunpack.c.1.s8 %v1966_v45 }
 0x18c   : > { %7776 = vmatpush.bf16.msrb.mxu0 %v6608_v17  ;;  %v6640_v25 = vpack.c.bf16 %v4692_v19, %v4690_v18  ;;  %v4622_v26 = vcvt.s32.f32 %v2574_v20  ;;  %v2606_v27 = vunpack.c.0.s8 %v1974_v54  ;;  %v2608_v28 = vunpack.c.1.s8 %v1974_v54  ;;  %v2002_v17 = vld [vmem:[%s10573_s20 + $0x220] sm:$0xff] }
 0x18d   : > { %7789 = vmatpush.bf16.msrb.mxu1 %v6624_v21  ;;  %v6656_v30 = vpack.c.bf16 %v4724_v23, %v4722_v22  ;;  %v4624_v31 = vcvt.s32.f32 %v2576_v24  ;;  %v2638_v32 = vunpack.c.0.s8 %v1982_v59  ;;  %v2640_v33 = vunpack.c.1.s8 %v1982_v59 }
 0x18e   : > { %7802 = vmatpush.bf16.msrb.mxu2 %v6640_v25  ;;  %v4654_v34 = vcvt.s32.f32 %v2606_v27  ;;  %v4656_v35 = vcvt.s32.f32 %v2608_v28  ;;  %v2670_v36 = vunpack.c.0.s8 %v1990_v2  ;;  %v2672_v37 = vunpack.c.1.s8 %v1990_v2 }
 0x18f   : > { %7815 = vmatpush.bf16.msrb.mxu3 %v6656_v30  ;;  %v6606_v39 = vpack.c.bf16 %v4624_v31, %v4622_v26  ;;  %v4686_v40 = vcvt.s32.f32 %v2638_v32  ;;  %v4688_v41 = vcvt.s32.f32 %v2640_v33  ;;  %v2730_v42 = vunpack.c.2.s8 %v2004_v29  ;;  %v2010_v26 = vld [vmem:[%s10573_s20 + $0x260] sm:$0xff] }
 0x190   : > { %v6622_v44 = vpack.c.bf16 %v4656_v35, %v4654_v34  ;;  %v4718_v45 = vcvt.s32.f32 %v2670_v36  ;;  %v4720_v46 = vcvt.s32.f32 %v2672_v37  ;;  %v2732_v47 = vunpack.c.3.s8 %v2004_v29  ;;  %v2018_v31 = vld [vmem:[%s10573_s20 + $0x2a0] sm:$0xff] }
 0x191   : > { %7777 = vmatpush.bf16.msrb.mxu0 %v6606_v39  ;;  %v6638_v49 = vpack.c.bf16 %v4688_v41, %v4686_v40  ;;  %v4778_v50 = vcvt.s32.f32 %v2730_v42  ;;  %v2762_v51 = vunpack.c.2.s8 %v2012_v38  ;;  %v2764_v52 = vunpack.c.3.s8 %v2012_v38  ;;  %v2026_v36 = vld [vmem:[%s10573_s20 + $0x2e0] sm:$0xff] }
 0x192   : > { %7790 = vmatpush.bf16.msrb.mxu1 %v6622_v44  ;;  %v6654_v54 = vpack.c.bf16 %v4720_v46, %v4718_v45  ;;  %v4780_v55 = vcvt.s32.f32 %v2732_v47  ;;  %v2794_v56 = vunpack.c.2.s8 %v2020_v43  ;;  %v2796_v57 = vunpack.c.3.s8 %v2020_v43  ;;  %v7567_v37 = vld [vmem:[%s12016_s0 + $0x8] sm:$0xff] }
 0x193   : > { %7803 = vmatpush.bf16.msrb.mxu2 %v6638_v49  ;;  %v4810_v59 = vcvt.s32.f32 %v2762_v51  ;;  %v4812_v60 = vcvt.s32.f32 %v2764_v52  ;;  %v2826_v63 = vunpack.c.2.s8 %v2028_v48  ;;  %v2828_v0 = vunpack.c.3.s8 %v2028_v48  ;;  %7585 = vst [vmem:[#allocation1] ss:$9 sm:$0xff] %v7567_v37 }
 0x194   : > { %7816 = vmatpush.bf16.msrb.mxu3 %v6654_v54  ;;  %v6684_v2 = vpack.c.bf16 %v4780_v55, %v4778_v50  ;;  %v4842_v4 = vcvt.s32.f32 %v2794_v56  ;;  %v4844_v5 = vcvt.s32.f32 %v2796_v57  ;;  %v2726_v6 = vunpack.c.0.s8 %v2004_v29  ;;  %7778 = vmatmul.bf16.vlgmr.msrb.gmra.mxu0 %v10633_v53 }
 0x195   : > { %v6700_v9 = vpack.c.bf16 %v4812_v60, %v4810_v59  ;;  %v4874_v10 = vcvt.s32.f32 %v2826_v63  ;;  %v4876_v11 = vcvt.s32.f32 %v2828_v0  ;;  %v2728_v12 = vunpack.c.1.s8 %v2004_v29  ;;  %7791 = vmatmul.bf16.vlgmr.msrb.gmra.mxu1 %v10635_v58 }
 0x196   : > { %7822 = vmatpush.bf16.msra.mxu0 %v6684_v2  ;;  %v6716_v13 = vpack.c.bf16 %v4844_v5, %v4842_v4  ;;  %v4774_v14 = vcvt.s32.f32 %v2726_v6  ;;  %v2758_v15 = vunpack.c.0.s8 %v2012_v38  ;;  %v2760_v16 = vunpack.c.1.s8 %v2012_v38  ;;  %7804 = vmatmul.bf16.vlgmr.msrb.gmra.mxu2 %v10637_v1  ;;  %v2000_v4 = vld [vmem:[%s10573_s20 + $0x210] sm:$0xff] }
 0x197   : > { %7835 = vmatpush.bf16.msra.mxu1 %v6700_v9  ;;  %v6732_v18 = vpack.c.bf16 %v4876_v11, %v4874_v10  ;;  %v4776_v19 = vcvt.s32.f32 %v2728_v12  ;;  %v2790_v20 = vunpack.c.0.s8 %v2020_v43  ;;  %v2792_v21 = vunpack.c.1.s8 %v2020_v43  ;;  %7817 = vmatmul.bf16.vlgmr.msrb.gmra.mxu3 %v10640_v7 }
 0x198   : > { %7848 = vmatpush.bf16.msra.mxu2 %v6716_v13  ;;  %v4806_v22 = vcvt.s32.f32 %v2758_v15  ;;  %v4808_v23 = vcvt.s32.f32 %v2760_v16  ;;  %v2822_v24 = vunpack.c.0.s8 %v2028_v48  ;;  %v2824_v25 = vunpack.c.1.s8 %v2028_v48  ;;  %v2008_v15 = vld [vmem:[%s10573_s20 + $0x250] sm:$0xff] }
 0x199   : > { %7861 = vmatpush.bf16.msra.mxu3 %v6732_v18  ;;  %v6682_v27 = vpack.c.bf16 %v4776_v19, %v4774_v14  ;;  %v4838_v28 = vcvt.s32.f32 %v2790_v20  ;;  %v4840_v29 = vcvt.s32.f32 %v2792_v21  ;;  %v2722_v30 = vunpack.c.2.s8 %v2002_v17  ;;  %v2016_v20 = vld [vmem:[%s10573_s20 + $0x290] sm:$0xff] }
 0x19a   : > { %v6698_v32 = vpack.c.bf16 %v4808_v23, %v4806_v22  ;;  %v4870_v33 = vcvt.s32.f32 %v2822_v24  ;;  %v4872_v34 = vcvt.s32.f32 %v2824_v25  ;;  %v2724_v35 = vunpack.c.3.s8 %v2002_v17  ;;  %v2024_v25 = vld [vmem:[%s10573_s20 + $0x2d0] sm:$0xff] }
 0x19b   : > { %7823 = vmatpush.bf16.msra.mxu0 %v6682_v27  ;;  %v6714_v38 = vpack.c.bf16 %v4840_v29, %v4838_v28  ;;  %v4770_v39 = vcvt.s32.f32 %v2722_v30  ;;  %v2754_v40 = vunpack.c.2.s8 %v2010_v26  ;;  %v2756_v41 = vunpack.c.3.s8 %v2010_v26 }
 0x19c   : > { %7836 = vmatpush.bf16.msra.mxu1 %v6698_v32  ;;  %v6730_v42 = vpack.c.bf16 %v4872_v34, %v4870_v33  ;;  %v4772_v43 = vcvt.s32.f32 %v2724_v35  ;;  %v2786_v44 = vunpack.c.2.s8 %v2018_v31  ;;  %v2788_v45 = vunpack.c.3.s8 %v2018_v31 }
 0x19d   : > { %7849 = vmatpush.bf16.msra.mxu2 %v6714_v38  ;;  %v4802_v46 = vcvt.s32.f32 %v2754_v40  ;;  %v4804_v47 = vcvt.s32.f32 %v2756_v41  ;;  %v2818_v48 = vunpack.c.2.s8 %v2026_v36  ;;  %v2820_v49 = vunpack.c.3.s8 %v2026_v36 }
 0x19e   : > { %7862 = vmatpush.bf16.msra.mxu3 %v6730_v42  ;;  %v6680_v50 = vpack.c.bf16 %v4772_v43, %v4770_v39  ;;  %v4834_v51 = vcvt.s32.f32 %v2786_v44  ;;  %v4836_v52 = vcvt.s32.f32 %v2788_v45  ;;  %v2718_v54 = vunpack.c.0.s8 %v2002_v17 }
 0x19f   : > { %v6696_v55 = vpack.c.bf16 %v4804_v47, %v4802_v46  ;;  %v4866_v56 = vcvt.s32.f32 %v2818_v48  ;;  %v4868_v57 = vcvt.s32.f32 %v2820_v49  ;;  %v2720_v59 = vunpack.c.1.s8 %v2002_v17 }
 0x1a0   : > { %7824 = vmatpush.bf16.msra.mxu0 %v6680_v50  ;;  %v6712_v60 = vpack.c.bf16 %v4836_v52, %v4834_v51  ;;  %v4766_v63 = vcvt.s32.f32 %v2718_v54  ;;  %v2750_v0 = vunpack.c.0.s8 %v2010_v26  ;;  %v2752_v2 = vunpack.c.1.s8 %v2010_v26  ;;  %v1998_v50 = vld [vmem:[%s10573_s20 + $0x200] sm:$0xff] }
 0x1a1   : > { %7837 = vmatpush.bf16.msra.mxu1 %v6696_v55  ;;  %v6728_v5 = vpack.c.bf16 %v4868_v57, %v4866_v56  ;;  %v4768_v6 = vcvt.s32.f32 %v2720_v59  ;;  %v2782_v9 = vunpack.c.0.s8 %v2018_v31  ;;  %v2784_v10 = vunpack.c.1.s8 %v2018_v31 }
 0x1a2   : > { %7850 = vmatpush.bf16.msra.mxu2 %v6712_v60  ;;  %v4798_v11 = vcvt.s32.f32 %v2750_v0  ;;  %v4800_v12 = vcvt.s32.f32 %v2752_v2  ;;  %v2814_v13 = vunpack.c.0.s8 %v2026_v36  ;;  %v2816_v14 = vunpack.c.1.s8 %v2026_v36 }
 0x1a3   : > { %7863 = vmatpush.bf16.msra.mxu3 %v6728_v5  ;;  %v6678_v16 = vpack.c.bf16 %v4768_v6, %v4766_v63  ;;  %v4830_v17 = vcvt.s32.f32 %v2782_v9  ;;  %v4832_v18 = vcvt.s32.f32 %v2784_v10  ;;  %v2714_v19 = vunpack.c.2.s8 %v2000_v4  ;;  %v2006_v63 = vld [vmem:[%s10573_s20 + $0x240] sm:$0xff] }
 0x1a4   : > { %v6694_v21 = vpack.c.bf16 %v4800_v12, %v4798_v11  ;;  %v4862_v22 = vcvt.s32.f32 %v2814_v13  ;;  %v4864_v23 = vcvt.s32.f32 %v2816_v14  ;;  %v2716_v24 = vunpack.c.3.s8 %v2000_v4  ;;  %v2014_v6 = vld [vmem:[%s10573_s20 + $0x280] sm:$0xff] }
 0x1a5   : > { %7825 = vmatpush.bf16.msra.mxu0 %v6678_v16  ;;  %v6710_v26 = vpack.c.bf16 %v4832_v18, %v4830_v17  ;;  %v4762_v27 = vcvt.s32.f32 %v2714_v19  ;;  %v2746_v28 = vunpack.c.2.s8 %v2008_v15  ;;  %v2748_v29 = vunpack.c.3.s8 %v2008_v15  ;;  %v2022_v13 = vld [vmem:[%s10573_s20 + $0x2c0] sm:$0xff] }
 0x1a6   : > { %7838 = vmatpush.bf16.msra.mxu1 %v6694_v21  ;;  %v6726_v30 = vpack.c.bf16 %v4864_v23, %v4862_v22  ;;  %v4764_v31 = vcvt.s32.f32 %v2716_v24  ;;  %v2778_v32 = vunpack.c.2.s8 %v2016_v20  ;;  %v2780_v33 = vunpack.c.3.s8 %v2016_v20 }
 0x1a7   : > { %7851 = vmatpush.bf16.msra.mxu2 %v6710_v26  ;;  %v4794_v34 = vcvt.s32.f32 %v2746_v28  ;;  %v4796_v35 = vcvt.s32.f32 %v2748_v29  ;;  %v2810_v36 = vunpack.c.2.s8 %v2024_v25  ;;  %v2812_v37 = vunpack.c.3.s8 %v2024_v25 }
 0x1a8   : > { %7864 = vmatpush.bf16.msra.mxu3 %v6726_v30  ;;  %v6676_v38 = vpack.c.bf16 %v4764_v31, %v4762_v27  ;;  %v4826_v39 = vcvt.s32.f32 %v2778_v32  ;;  %v4828_v40 = vcvt.s32.f32 %v2780_v33  ;;  %v2710_v41 = vunpack.c.0.s8 %v2000_v4 }
 0x1a9   : > { %v6692_v42 = vpack.c.bf16 %v4796_v35, %v4794_v34  ;;  %v4858_v43 = vcvt.s32.f32 %v2810_v36  ;;  %v4860_v44 = vcvt.s32.f32 %v2812_v37  ;;  %v2712_v45 = vunpack.c.1.s8 %v2000_v4 }
 0x1aa   : > { %7826 = vmatpush.bf16.msra.mxu0 %v6676_v38  ;;  %v6708_v46 = vpack.c.bf16 %v4828_v40, %v4826_v39  ;;  %v4758_v47 = vcvt.s32.f32 %v2710_v41  ;;  %v2742_v48 = vunpack.c.0.s8 %v2008_v15  ;;  %v2744_v49 = vunpack.c.1.s8 %v2008_v15  ;;  %v10661_v38 = vld [vmem:[%s10573_s20 + $0x330] sm:$0xff] }
 0x1ab   : > { %7839 = vmatpush.bf16.msra.mxu1 %v6692_v42  ;;  %v6724_v51 = vpack.c.bf16 %v4860_v44, %v4858_v43  ;;  %v4760_v52 = vcvt.s32.f32 %v2712_v45  ;;  %v2774_v54 = vunpack.c.0.s8 %v2016_v20  ;;  %v2776_v55 = vunpack.c.1.s8 %v2016_v20 }
 0x1ac   : > { %7852 = vmatpush.bf16.msra.mxu2 %v6708_v46  ;;  %v4790_v56 = vcvt.s32.f32 %v2742_v48  ;;  %v4792_v57 = vcvt.s32.f32 %v2744_v49  ;;  %v2806_v59 = vunpack.c.0.s8 %v2024_v25  ;;  %v2808_v60 = vunpack.c.1.s8 %v2024_v25 }
 0x1ad   : > { %7865 = vmatpush.bf16.msra.mxu3 %v6724_v51  ;;  %v6674_v0 = vpack.c.bf16 %v4760_v52, %v4758_v47  ;;  %v4822_v2 = vcvt.s32.f32 %v2774_v54  ;;  %v4824_v4 = vcvt.s32.f32 %v2776_v55  ;;  %v2706_v5 = vunpack.c.2.s8 %v1998_v50  ;;  %v2044_v47 = vld [vmem:[%s10573_s20 + $0x370] sm:$0xff] }
 0x1ae   : > { %v6690_v9 = vpack.c.bf16 %v4792_v57, %v4790_v56  ;;  %v4854_v10 = vcvt.s32.f32 %v2806_v59  ;;  %v4856_v11 = vcvt.s32.f32 %v2808_v60  ;;  %v2708_v12 = vunpack.c.3.s8 %v1998_v50  ;;  %v2052_v52 = vld [vmem:[%s10573_s20 + $0x3b0] sm:$0xff] }
 0x1af   : > { %7827 = vmatpush.bf16.msra.mxu0 %v6674_v0  ;;  %v6706_v14 = vpack.c.bf16 %v4824_v4, %v4822_v2  ;;  %v4754_v15 = vcvt.s32.f32 %v2706_v5  ;;  %v2738_v16 = vunpack.c.2.s8 %v2006_v63  ;;  %v2740_v17 = vunpack.c.3.s8 %v2006_v63  ;;  %v2060_v59 = vld [vmem:[%s10573_s20 + $0x3f0] sm:$0xff]  ;;  %v10668_v4 = vld [vmem:[#allocation1] sm:$0xff] }
 0x1b0   : > { %7840 = vmatpush.bf16.msra.mxu1 %v6690_v9  ;;  %v6722_v18 = vpack.c.bf16 %v4856_v11, %v4854_v10  ;;  %v4756_v19 = vcvt.s32.f32 %v2708_v12  ;;  %v2770_v20 = vunpack.c.2.s8 %v2014_v6  ;;  %v2772_v21 = vunpack.c.3.s8 %v2014_v6  ;;  %v10670_v11 = vld [vmem:[#allocation1 + $0x9] sm:$0xff] }
 0x1b1   : > { %7853 = vmatpush.bf16.msra.mxu2 %v6706_v14  ;;  %v4786_v22 = vcvt.s32.f32 %v2738_v16  ;;  %v4788_v23 = vcvt.s32.f32 %v2740_v17  ;;  %v2802_v24 = vunpack.c.2.s8 %v2022_v13  ;;  %v2804_v25 = vunpack.c.3.s8 %v2022_v13  ;;  %v10672_v16 = vld [vmem:[#allocation1 + $0x12] sm:$0xff] }
 0x1b2   : > { %7866 = vmatpush.bf16.msra.mxu3 %v6722_v18  ;;  %v6672_v26 = vpack.c.bf16 %v4756_v19, %v4754_v15  ;;  %v4818_v27 = vcvt.s32.f32 %v2770_v20  ;;  %v4820_v28 = vcvt.s32.f32 %v2772_v21  ;;  %v2702_v29 = vunpack.c.0.s8 %v1998_v50  ;;  %v10675_v20 = vld [vmem:[#allocation1 + $0x1b] sm:$0xff] }
 0x1b3   : > { %v6688_v30 = vpack.c.bf16 %v4788_v23, %v4786_v22  ;;  %v4850_v31 = vcvt.s32.f32 %v2802_v24  ;;  %v4852_v32 = vcvt.s32.f32 %v2804_v25  ;;  %v2704_v33 = vunpack.c.1.s8 %v1998_v50 }
 0x1b4   : > { %7828 = vmatpush.bf16.msra.mxu0 %v6672_v26  ;;  %v6704_v34 = vpack.c.bf16 %v4820_v28, %v4818_v27  ;;  %v4750_v35 = vcvt.s32.f32 %v2702_v29  ;;  %v2734_v36 = vunpack.c.0.s8 %v2006_v63  ;;  %v2736_v37 = vunpack.c.1.s8 %v2006_v63 }
 0x1b5   : > { %7841 = vmatpush.bf16.msra.mxu1 %v6688_v30  ;;  %v6720_v39 = vpack.c.bf16 %v4852_v32, %v4850_v31  ;;  %v4752_v40 = vcvt.s32.f32 %v2704_v33  ;;  %v2766_v41 = vunpack.c.0.s8 %v2014_v6  ;;  %v2768_v42 = vunpack.c.1.s8 %v2014_v6  ;;  %v2034_v30 = vld [vmem:[%s10573_s20 + $0x320] sm:$0xff] }
 0x1b6   : > { %7854 = vmatpush.bf16.msra.mxu2 %v6704_v34  ;;  %v4782_v43 = vcvt.s32.f32 %v2734_v36  ;;  %v4784_v44 = vcvt.s32.f32 %v2736_v37  ;;  %v2798_v45 = vunpack.c.0.s8 %v2022_v13  ;;  %v2800_v46 = vunpack.c.1.s8 %v2022_v13 }
 0x1b7   : > { %7867 = vmatpush.bf16.msra.mxu3 %v6720_v39  ;;  %v6670_v48 = vpack.c.bf16 %v4752_v40, %v4750_v35  ;;  %v4814_v49 = vcvt.s32.f32 %v2766_v41  ;;  %v4816_v50 = vcvt.s32.f32 %v2768_v42  ;;  %v2858_v51 = vunpack.c.2.s8 %v10661_v38  ;;  %v2042_v39 = vld [vmem:[%s10573_s20 + $0x360] sm:$0xff] }
 0x1b8   : > { %v6686_v54 = vpack.c.bf16 %v4784_v44, %v4782_v43  ;;  %v4846_v55 = vcvt.s32.f32 %v2798_v45  ;;  %v4848_v56 = vcvt.s32.f32 %v2800_v46  ;;  %v2860_v57 = vunpack.c.3.s8 %v10661_v38  ;;  %v2050_v44 = vld [vmem:[%s10573_s20 + $0x3a0] sm:$0xff] }
 0x1b9   : > { %7829 = vmatpush.bf16.msra.mxu0 %v6670_v48  ;;  %v6702_v60 = vpack.c.bf16 %v4816_v50, %v4814_v49  ;;  %v4906_v63 = vcvt.s32.f32 %v2858_v51  ;;  %v2890_v0 = vunpack.c.2.s8 %v2044_v47  ;;  %v2892_v2 = vunpack.c.3.s8 %v2044_v47  ;;  %v2058_v49 = vld [vmem:[%s10573_s20 + $0x3e0] sm:$0xff] }
 0x1ba   : > { %7842 = vmatpush.bf16.msra.mxu1 %v6686_v54  ;;  %v6718_v5 = vpack.c.bf16 %v4848_v56, %v4846_v55  ;;  %v4908_v6 = vcvt.s32.f32 %v2860_v57  ;;  %v2922_v9 = vunpack.c.2.s8 %v2052_v52  ;;  %v2924_v10 = vunpack.c.3.s8 %v2052_v52 }
 0x1bb   : > { %7855 = vmatpush.bf16.msra.mxu2 %v6702_v60  ;;  %v4938_v12 = vcvt.s32.f32 %v2890_v0  ;;  %v4940_v13 = vcvt.s32.f32 %v2892_v2  ;;  %v2954_v14 = vunpack.c.2.s8 %v2060_v59  ;;  %v2956_v15 = vunpack.c.3.s8 %v2060_v59 }
 0x1bc   : > { %7868 = vmatpush.bf16.msra.mxu3 %v6718_v5  ;;  %v6748_v17 = vpack.c.bf16 %v4908_v6, %v4906_v63  ;;  %v4970_v18 = vcvt.s32.f32 %v2922_v9  ;;  %v4972_v19 = vcvt.s32.f32 %v2924_v10  ;;  %7830 = vmatmul.bf16.vlgmr.msra.gmra.mxu0 %v10668_v4  ;;  %v2854_v21 = vunpack.c.0.s8 %v10661_v38 }
 0x1bd   : > { %v6764_v22 = vpack.c.bf16 %v4940_v13, %v4938_v12  ;;  %v5002_v23 = vcvt.s32.f32 %v2954_v14  ;;  %v5004_v24 = vcvt.s32.f32 %v2956_v15  ;;  %7843 = vmatmul.bf16.vlgmr.msra.gmra.mxu1 %v10670_v11  ;;  %v2856_v25 = vunpack.c.1.s8 %v10661_v38 }
 0x1be   : > { %7874 = vmatpush.bf16.msrb.mxu0 %v6748_v17  ;;  %v6780_v26 = vpack.c.bf16 %v4972_v19, %v4970_v18  ;;  %7856 = vmatmul.bf16.vlgmr.msra.gmra.mxu2 %v10672_v16  ;;  %v4902_v27 = vcvt.s32.f32 %v2854_v21  ;;  %v2886_v28 = vunpack.c.0.s8 %v2044_v47  ;;  %v2888_v29 = vunpack.c.1.s8 %v2044_v47 }
 0x1bf   : > { %7887 = vmatpush.bf16.msrb.mxu1 %v6764_v22  ;;  %v6796_v31 = vpack.c.bf16 %v5004_v24, %v5002_v23  ;;  %7869 = vmatmul.bf16.vlgmr.msra.gmra.mxu3 %v10675_v20  ;;  %v4904_v32 = vcvt.s32.f32 %v2856_v25  ;;  %v2918_v33 = vunpack.c.0.s8 %v2052_v52  ;;  %v2920_v34 = vunpack.c.1.s8 %v2052_v52  ;;  %v2032_v22 = vld [vmem:[%s10573_s20 + $0x310] sm:$0xff] }
 0x1c0   : > { %7900 = vmatpush.bf16.msrb.mxu2 %v6780_v26  ;;  %v4934_v35 = vcvt.s32.f32 %v2886_v28  ;;  %v4936_v36 = vcvt.s32.f32 %v2888_v29  ;;  %v2950_v37 = vunpack.c.0.s8 %v2060_v59  ;;  %v2952_v38 = vunpack.c.1.s8 %v2060_v59 }
 0x1c1   : > { %7913 = vmatpush.bf16.msrb.mxu3 %v6796_v31  ;;  %v6746_v40 = vpack.c.bf16 %v4904_v32, %v4902_v27  ;;  %v4966_v41 = vcvt.s32.f32 %v2918_v33  ;;  %v4968_v42 = vcvt.s32.f32 %v2920_v34  ;;  %v2850_v43 = vunpack.c.2.s8 %v2034_v30 }
 0x1c2   : > { %v6762_v45 = vpack.c.bf16 %v4936_v36, %v4934_v35  ;;  %v4998_v46 = vcvt.s32.f32 %v2950_v37  ;;  %v5000_v47 = vcvt.s32.f32 %v2952_v38  ;;  %v2852_v48 = vunpack.c.3.s8 %v2034_v30  ;;  %v2048_v36 = vld [vmem:[%s10573_s20 + $0x390] sm:$0xff] }
 0x1c3   : > { %7875 = vmatpush.bf16.msrb.mxu0 %v6746_v40  ;;  %v6778_v50 = vpack.c.bf16 %v4968_v42, %v4966_v41  ;;  %v4898_v51 = vcvt.s32.f32 %v2850_v43  ;;  %v2882_v52 = vunpack.c.2.s8 %v2042_v39  ;;  %v2884_v54 = vunpack.c.3.s8 %v2042_v39  ;;  %v2056_v41 = vld [vmem:[%s10573_s20 + $0x3d0] sm:$0xff] }
 0x1c4   : > { %7888 = vmatpush.bf16.msrb.mxu1 %v6762_v45  ;;  %v6794_v55 = vpack.c.bf16 %v5000_v47, %v4998_v46  ;;  %v4900_v56 = vcvt.s32.f32 %v2852_v48  ;;  %v2914_v57 = vunpack.c.2.s8 %v2050_v44  ;;  %v2916_v59 = vunpack.c.3.s8 %v2050_v44 }
 0x1c5   : > { %7901 = vmatpush.bf16.msrb.mxu2 %v6778_v50  ;;  %v4930_v60 = vcvt.s32.f32 %v2882_v52  ;;  %v4932_v63 = vcvt.s32.f32 %v2884_v54  ;;  %v2946_v0 = vunpack.c.2.s8 %v2058_v49  ;;  %v2948_v2 = vunpack.c.3.s8 %v2058_v49 }
 0x1c6   : > { %7914 = vmatpush.bf16.msrb.mxu3 %v6794_v55  ;;  %v6744_v5 = vpack.c.bf16 %v4900_v56, %v4898_v51  ;;  %v4962_v6 = vcvt.s32.f32 %v2914_v57  ;;  %v4964_v9 = vcvt.s32.f32 %v2916_v59  ;;  %v2846_v10 = vunpack.c.0.s8 %v2034_v30 }
 0x1c7   : > { %v6760_v12 = vpack.c.bf16 %v4932_v63, %v4930_v60  ;;  %v4994_v13 = vcvt.s32.f32 %v2946_v0  ;;  %v4996_v14 = vcvt.s32.f32 %v2948_v2  ;;  %v2848_v15 = vunpack.c.1.s8 %v2034_v30  ;;  %v2040_v30 = vld [vmem:[%s10573_s20 + $0x350] sm:$0xff] }
 0x1c8   : > { %7876 = vmatpush.bf16.msrb.mxu0 %v6744_v5  ;;  %v6776_v17 = vpack.c.bf16 %v4964_v9, %v4962_v6  ;;  %v4894_v18 = vcvt.s32.f32 %v2846_v10  ;;  %v2878_v19 = vunpack.c.0.s8 %v2042_v39  ;;  %v2880_v21 = vunpack.c.1.s8 %v2042_v39 }
 0x1c9   : > { %7889 = vmatpush.bf16.msrb.mxu1 %v6760_v12  ;;  %v6792_v23 = vpack.c.bf16 %v4996_v14, %v4994_v13  ;;  %v4896_v24 = vcvt.s32.f32 %v2848_v15  ;;  %v2910_v25 = vunpack.c.0.s8 %v2050_v44  ;;  %v2912_v26 = vunpack.c.1.s8 %v2050_v44  ;;  %v2030_v12 = vld [vmem:[%s10573_s20 + $0x300] sm:$0xff] }
 0x1ca   : > { %7902 = vmatpush.bf16.msrb.mxu2 %v6776_v17  ;;  %v4926_v27 = vcvt.s32.f32 %v2878_v19  ;;  %v4928_v28 = vcvt.s32.f32 %v2880_v21  ;;  %v2942_v29 = vunpack.c.0.s8 %v2058_v49  ;;  %v2944_v31 = vunpack.c.1.s8 %v2058_v49 }
 0x1cb   : > { %7915 = vmatpush.bf16.msrb.mxu3 %v6792_v23  ;;  %v6742_v32 = vpack.c.bf16 %v4896_v24, %v4894_v18  ;;  %v4958_v33 = vcvt.s32.f32 %v2910_v25  ;;  %v4960_v34 = vcvt.s32.f32 %v2912_v26  ;;  %v2842_v35 = vunpack.c.2.s8 %v2032_v22 }
 0x1cc   : > { %v6758_v37 = vpack.c.bf16 %v4928_v28, %v4926_v27  ;;  %v4990_v38 = vcvt.s32.f32 %v2942_v29  ;;  %v4992_v39 = vcvt.s32.f32 %v2944_v31  ;;  %v2844_v40 = vunpack.c.3.s8 %v2032_v22  ;;  %v2046_v28 = vld [vmem:[%s10573_s20 + $0x380] sm:$0xff] }
 0x1cd   : > { %7877 = vmatpush.bf16.msrb.mxu0 %v6742_v32  ;;  %v6774_v42 = vpack.c.bf16 %v4960_v34, %v4958_v33  ;;  %v4890_v43 = vcvt.s32.f32 %v2842_v35  ;;  %v2874_v44 = vunpack.c.2.s8 %v2040_v30  ;;  %v2876_v45 = vunpack.c.3.s8 %v2040_v30  ;;  %v2054_v33 = vld [vmem:[%s10573_s20 + $0x3c0] sm:$0xff] }
 0x1ce   : > { %7890 = vmatpush.bf16.msrb.mxu1 %v6758_v37  ;;  %v6790_v46 = vpack.c.bf16 %v4992_v39, %v4990_v38  ;;  %v4892_v47 = vcvt.s32.f32 %v2844_v40  ;;  %v2906_v48 = vunpack.c.2.s8 %v2048_v36  ;;  %v2908_v49 = vunpack.c.3.s8 %v2048_v36 }
 0x1cf   : > { %7903 = vmatpush.bf16.msrb.mxu2 %v6774_v42  ;;  %v4922_v50 = vcvt.s32.f32 %v2874_v44  ;;  %v4924_v51 = vcvt.s32.f32 %v2876_v45  ;;  %v2938_v52 = vunpack.c.2.s8 %v2056_v41  ;;  %v2940_v54 = vunpack.c.3.s8 %v2056_v41 }
 0x1d0   : > { %7916 = vmatpush.bf16.msrb.mxu3 %v6790_v46  ;;  %v6740_v55 = vpack.c.bf16 %v4892_v47, %v4890_v43  ;;  %v4954_v56 = vcvt.s32.f32 %v2906_v48  ;;  %v4956_v57 = vcvt.s32.f32 %v2908_v49  ;;  %v2838_v59 = vunpack.c.0.s8 %v2032_v22 }
 0x1d1   : > { %v6756_v60 = vpack.c.bf16 %v4924_v51, %v4922_v50  ;;  %v4986_v63 = vcvt.s32.f32 %v2938_v52  ;;  %v4988_v0 = vcvt.s32.f32 %v2940_v54  ;;  %v2840_v2 = vunpack.c.1.s8 %v2032_v22  ;;  %v2038_v22 = vld [vmem:[%s10573_s20 + $0x340] sm:$0xff] }
 0x1d2   : > { %7878 = vmatpush.bf16.msrb.mxu0 %v6740_v55  ;;  %v6772_v5 = vpack.c.bf16 %v4956_v57, %v4954_v56  ;;  %v4886_v6 = vcvt.s32.f32 %v2838_v59  ;;  %v2870_v9 = vunpack.c.0.s8 %v2040_v30  ;;  %v2872_v10 = vunpack.c.1.s8 %v2040_v30 }
 0x1d3   : > { %7891 = vmatpush.bf16.msrb.mxu1 %v6756_v60  ;;  %v6788_v13 = vpack.c.bf16 %v4988_v0, %v4986_v63  ;;  %v4888_v14 = vcvt.s32.f32 %v2840_v2  ;;  %v2902_v15 = vunpack.c.0.s8 %v2048_v36  ;;  %v2904_v17 = vunpack.c.1.s8 %v2048_v36  ;;  %v10695_v60 = vld [vmem:[%s10573_s20 + $0x430] sm:$0xff] }
 0x1d4   : > { %7904 = vmatpush.bf16.msrb.mxu2 %v6772_v5  ;;  %v4918_v18 = vcvt.s32.f32 %v2870_v9  ;;  %v4920_v19 = vcvt.s32.f32 %v2872_v10  ;;  %v2934_v21 = vunpack.c.0.s8 %v2056_v41  ;;  %v2936_v23 = vunpack.c.1.s8 %v2056_v41 }
 0x1d5   : > { %7917 = vmatpush.bf16.msrb.mxu3 %v6788_v13  ;;  %v6738_v24 = vpack.c.bf16 %v4888_v14, %v4886_v6  ;;  %v4950_v25 = vcvt.s32.f32 %v2902_v15  ;;  %v4952_v26 = vcvt.s32.f32 %v2904_v17  ;;  %v2834_v27 = vunpack.c.2.s8 %v2030_v12  ;;  %v2076_v13 = vld [vmem:[%s10573_s20 + $0x470] sm:$0xff] }
 0x1d6   : > { %v6754_v29 = vpack.c.bf16 %v4920_v19, %v4918_v18  ;;  %v4982_v31 = vcvt.s32.f32 %v2934_v21  ;;  %v4984_v30 = vcvt.s32.f32 %v2936_v23  ;;  %v2836_v32 = vunpack.c.3.s8 %v2030_v12  ;;  %v2084_v19 = vld [vmem:[%s10573_s20 + $0x4b0] sm:$0xff] }
 0x1d7   : > { %7879 = vmatpush.bf16.msrb.mxu0 %v6738_v24  ;;  %v6770_v34 = vpack.c.bf16 %v4952_v26, %v4950_v25  ;;  %v4882_v35 = vcvt.s32.f32 %v2834_v27  ;;  %v2866_v36 = vunpack.c.2.s8 %v2038_v22  ;;  %v2868_v37 = vunpack.c.3.s8 %v2038_v22  ;;  %v2092_v25 = vld [vmem:[%s10573_s20 + $0x4f0] sm:$0xff] }
 0x1d8   : > { %7892 = vmatpush.bf16.msrb.mxu1 %v6754_v29  ;;  %v6786_v38 = vpack.c.bf16 %v4984_v30, %v4982_v31  ;;  %v4884_v39 = vcvt.s32.f32 %v2836_v32  ;;  %v2898_v40 = vunpack.c.2.s8 %v2046_v28  ;;  %v2900_v41 = vunpack.c.3.s8 %v2046_v28  ;;  %v10702_v31 = vld [vmem:[#allocation1 + $0x24] sm:$0xff] }
 0x1d9   : > { %7905 = vmatpush.bf16.msrb.mxu2 %v6770_v34  ;;  %v4914_v42 = vcvt.s32.f32 %v2866_v36  ;;  %v4916_v43 = vcvt.s32.f32 %v2868_v37  ;;  %v2930_v44 = vunpack.c.2.s8 %v2054_v33  ;;  %v2932_v45 = vunpack.c.3.s8 %v2054_v33 }
 0x1da   : > { %7918 = vmatpush.bf16.msrb.mxu3 %v6786_v38  ;;  %v6736_v46 = vpack.c.bf16 %v4884_v39, %v4882_v35  ;;  %v4946_v47 = vcvt.s32.f32 %v2898_v40  ;;  %v4948_v48 = vcvt.s32.f32 %v2900_v41  ;;  %v2830_v49 = vunpack.c.0.s8 %v2030_v12  ;;  %v10704_v35 = vld [vmem:[#allocation1 + $0x2d] sm:$0xff]  ;;  %v10706_v40 = vld [vmem:[#allocation1 + $0x36] sm:$0xff] }
 0x1db   : > { %v6752_v50 = vpack.c.bf16 %v4916_v43, %v4914_v42  ;;  %v4978_v51 = vcvt.s32.f32 %v2930_v44  ;;  %v4980_v52 = vcvt.s32.f32 %v2932_v45  ;;  %v2832_v54 = vunpack.c.1.s8 %v2030_v12  ;;  %v10709_v44 = vld [vmem:[#allocation1 + $0x3f] sm:$0xff] }
 0x1dc   : > { %7880 = vmatpush.bf16.msrb.mxu0 %v6736_v46  ;;  %v6768_v55 = vpack.c.bf16 %v4948_v48, %v4946_v47  ;;  %v4878_v56 = vcvt.s32.f32 %v2830_v49  ;;  %v2862_v57 = vunpack.c.0.s8 %v2038_v22  ;;  %v2864_v59 = vunpack.c.1.s8 %v2038_v22 }
 0x1dd   : > { %7893 = vmatpush.bf16.msrb.mxu1 %v6752_v50  ;;  %v6784_v63 = vpack.c.bf16 %v4980_v52, %v4978_v51  ;;  %v4880_v0 = vcvt.s32.f32 %v2832_v54  ;;  %v2894_v2 = vunpack.c.0.s8 %v2046_v28  ;;  %v2896_v5 = vunpack.c.1.s8 %v2046_v28 }
 0x1de   : > { %7906 = vmatpush.bf16.msrb.mxu2 %v6768_v55  ;;  %v4910_v6 = vcvt.s32.f32 %v2862_v57  ;;  %v4912_v9 = vcvt.s32.f32 %v2864_v59  ;;  %v2926_v10 = vunpack.c.0.s8 %v2054_v33  ;;  %v2928_v12 = vunpack.c.1.s8 %v2054_v33  ;;  %v2066_v55 = vld [vmem:[%s10573_s20 + $0x420] sm:$0xff] }
 0x1df   : > { %7919 = vmatpush.bf16.msrb.mxu3 %v6784_v63  ;;  %v6734_v14 = vpack.c.bf16 %v4880_v0, %v4878_v56  ;;  %v4942_v15 = vcvt.s32.f32 %v2894_v2  ;;  %v4944_v17 = vcvt.s32.f32 %v2896_v5  ;;  %v2986_v18 = vunpack.c.2.s8 %v10695_v60 }
 0x1e0   : > { %v6750_v21 = vpack.c.bf16 %v4912_v9, %v4910_v6  ;;  %v4974_v23 = vcvt.s32.f32 %v2926_v10  ;;  %v4976_v22 = vcvt.s32.f32 %v2928_v12  ;;  %v2988_v24 = vunpack.c.3.s8 %v10695_v60  ;;  %v2074_v6 = vld [vmem:[%s10573_s20 + $0x460] sm:$0xff] }
 0x1e1   : > { %7881 = vmatpush.bf16.msrb.mxu0 %v6734_v14  ;;  %v6766_v26 = vpack.c.bf16 %v4944_v17, %v4942_v15  ;;  %v5034_v27 = vcvt.s32.f32 %v2986_v18  ;;  %v3018_v28 = vunpack.c.2.s8 %v2076_v13  ;;  %v3020_v29 = vunpack.c.3.s8 %v2076_v13  ;;  %v2082_v14 = vld [vmem:[%s10573_s20 + $0x4a0] sm:$0xff] }
 0x1e2   : > { %7894 = vmatpush.bf16.msrb.mxu1 %v6750_v21  ;;  %v6782_v30 = vpack.c.bf16 %v4976_v22, %v4974_v23  ;;  %v5036_v32 = vcvt.s32.f32 %v2988_v24  ;;  %v3050_v33 = vunpack.c.2.s8 %v2084_v19  ;;  %v3052_v34 = vunpack.c.3.s8 %v2084_v19  ;;  %v2090_v23 = vld [vmem:[%s10573_s20 + $0x4e0] sm:$0xff] }
 0x1e3   : > { %7907 = vmatpush.bf16.msrb.mxu2 %v6766_v26  ;;  %v5066_v36 = vcvt.s32.f32 %v3018_v28  ;;  %v5068_v37 = vcvt.s32.f32 %v3020_v29  ;;  %v3082_v38 = vunpack.c.2.s8 %v2092_v25  ;;  %v3084_v39 = vunpack.c.3.s8 %v2092_v25 }
 0x1e4   : > { %7920 = vmatpush.bf16.msrb.mxu3 %v6782_v30  ;;  %v6812_v41 = vpack.c.bf16 %v5036_v32, %v5034_v27  ;;  %v5098_v42 = vcvt.s32.f32 %v3050_v33  ;;  %v5100_v43 = vcvt.s32.f32 %v3052_v34  ;;  %7882 = vmatmul.bf16.vlgmr.msrb.gmra.mxu0 %v10702_v31  ;;  %v2982_v45 = vunpack.c.0.s8 %v10695_v60 }
 0x1e5   : > { %v6828_v46 = vpack.c.bf16 %v5068_v37, %v5066_v36  ;;  %v5130_v47 = vcvt.s32.f32 %v3082_v38  ;;  %v5132_v48 = vcvt.s32.f32 %v3084_v39  ;;  %7895 = vmatmul.bf16.vlgmr.msrb.gmra.mxu1 %v10704_v35  ;;  %v2984_v49 = vunpack.c.1.s8 %v10695_v60 }
 0x1e6   : > { %7926 = vmatpush.bf16.msra.mxu0 %v6812_v41  ;;  %v6844_v50 = vpack.c.bf16 %v5100_v43, %v5098_v42  ;;  %7908 = vmatmul.bf16.vlgmr.msrb.gmra.mxu2 %v10706_v40  ;;  %v5030_v51 = vcvt.s32.f32 %v2982_v45  ;;  %v3014_v52 = vunpack.c.0.s8 %v2076_v13  ;;  %v3016_v54 = vunpack.c.1.s8 %v2076_v13 }
 0x1e7   : > { %7939 = vmatpush.bf16.msra.mxu1 %v6828_v46  ;;  %v6860_v56 = vpack.c.bf16 %v5132_v48, %v5130_v47  ;;  %7921 = vmatmul.bf16.vlgmr.msrb.gmra.mxu3 %v10709_v44  ;;  %v5032_v57 = vcvt.s32.f32 %v2984_v49  ;;  %v3046_v59 = vunpack.c.0.s8 %v2084_v19  ;;  %v3048_v63 = vunpack.c.1.s8 %v2084_v19  ;;  %v7568_v19 = vld [vmem:[%s12016_s0 + $0x10] sm:$0xff] }
 0x1e8   : > { %7952 = vmatpush.bf16.msra.mxu2 %v6844_v50  ;;  %v5062_v60 = vcvt.s32.f32 %v3014_v52  ;;  %v5064_v0 = vcvt.s32.f32 %v3016_v54  ;;  %v3078_v2 = vunpack.c.0.s8 %v2092_v25  ;;  %v3080_v5 = vunpack.c.1.s8 %v2092_v25  ;;  %7595 = vst [vmem:[#allocation1] ss:$9 sm:$0xff] %v7568_v19 }
 0x1e9   : > { %7965 = vmatpush.bf16.msra.mxu3 %v6860_v56  ;;  %v6810_v9 = vpack.c.bf16 %v5032_v57, %v5030_v51  ;;  %v5094_v10 = vcvt.s32.f32 %v3046_v59  ;;  %v5096_v12 = vcvt.s32.f32 %v3048_v63  ;;  %v2978_v13 = vunpack.c.2.s8 %v2066_v55  ;;  %v2064_v51 = vld [vmem:[%s10573_s20 + $0x410] sm:$0xff] }
 0x1ea   : > { %v6826_v15 = vpack.c.bf16 %v5064_v0, %v5062_v60  ;;  %v5126_v17 = vcvt.s32.f32 %v3078_v2  ;;  %v5128_v18 = vcvt.s32.f32 %v3080_v5  ;;  %v2980_v21 = vunpack.c.3.s8 %v2066_v55 }
 0x1eb   : > { %7927 = vmatpush.bf16.msra.mxu0 %v6810_v9  ;;  %v6842_v22 = vpack.c.bf16 %v5096_v12, %v5094_v10  ;;  %v5026_v24 = vcvt.s32.f32 %v2978_v13  ;;  %v3010_v25 = vunpack.c.2.s8 %v2074_v6  ;;  %v3012_v26 = vunpack.c.3.s8 %v2074_v6 }
 0x1ec   : > { %7940 = vmatpush.bf16.msra.mxu1 %v6826_v15  ;;  %v6858_v27 = vpack.c.bf16 %v5128_v18, %v5126_v17  ;;  %v5028_v28 = vcvt.s32.f32 %v2980_v21  ;;  %v3042_v29 = vunpack.c.2.s8 %v2082_v14  ;;  %v3044_v30 = vunpack.c.3.s8 %v2082_v14  ;;  %v2088_v18 = vld [vmem:[%s10573_s20 + $0x4d0] sm:$0xff] }
 0x1ed   : > { %7953 = vmatpush.bf16.msra.mxu2 %v6842_v22  ;;  %v5058_v32 = vcvt.s32.f32 %v3010_v25  ;;  %v5060_v33 = vcvt.s32.f32 %v3012_v26  ;;  %v3074_v34 = vunpack.c.2.s8 %v2090_v23  ;;  %v3076_v36 = vunpack.c.3.s8 %v2090_v23 }
 0x1ee   : > { %7966 = vmatpush.bf16.msra.mxu3 %v6858_v27  ;;  %v6808_v37 = vpack.c.bf16 %v5028_v28, %v5026_v24  ;;  %v5090_v38 = vcvt.s32.f32 %v3042_v29  ;;  %v5092_v39 = vcvt.s32.f32 %v3044_v30  ;;  %v2974_v41 = vunpack.c.0.s8 %v2066_v55 }
 0x1ef   : > { %v6824_v42 = vpack.c.bf16 %v5060_v33, %v5058_v32  ;;  %v5122_v43 = vcvt.s32.f32 %v3074_v34  ;;  %v5124_v45 = vcvt.s32.f32 %v3076_v36  ;;  %v2976_v46 = vunpack.c.1.s8 %v2066_v55  ;;  %v2072_v55 = vld [vmem:[%s10573_s20 + $0x450] sm:$0xff] }
 0x1f0   : > { %7928 = vmatpush.bf16.msra.mxu0 %v6808_v37  ;;  %v6840_v47 = vpack.c.bf16 %v5092_v39, %v5090_v38  ;;  %v5022_v48 = vcvt.s32.f32 %v2974_v41  ;;  %v3006_v49 = vunpack.c.0.s8 %v2074_v6  ;;  %v3008_v50 = vunpack.c.1.s8 %v2074_v6  ;;  %v2080_v6 = vld [vmem:[%s10573_s20 + $0x490] sm:$0xff] }
 0x1f1   : > { %7941 = vmatpush.bf16.msra.mxu1 %v6824_v42  ;;  %v6856_v52 = vpack.c.bf16 %v5124_v45, %v5122_v43  ;;  %v5024_v54 = vcvt.s32.f32 %v2976_v46  ;;  %v3038_v56 = vunpack.c.0.s8 %v2082_v14  ;;  %v3040_v57 = vunpack.c.1.s8 %v2082_v14 }
 0x1f2   : > { %7954 = vmatpush.bf16.msra.mxu2 %v6840_v47  ;;  %v5054_v59 = vcvt.s32.f32 %v3006_v49  ;;  %v5056_v63 = vcvt.s32.f32 %v3008_v50  ;;  %v3070_v60 = vunpack.c.0.s8 %v2090_v23  ;;  %v3072_v0 = vunpack.c.1.s8 %v2090_v23  ;;  %v2062_v47 = vld [vmem:[%s10573_s20 + $0x400] sm:$0xff] }
 0x1f3   : > { %7967 = vmatpush.bf16.msra.mxu3 %v6856_v52  ;;  %v6806_v2 = vpack.c.bf16 %v5024_v54, %v5022_v48  ;;  %v5086_v5 = vcvt.s32.f32 %v3038_v56  ;;  %v5088_v9 = vcvt.s32.f32 %v3040_v57  ;;  %v2970_v10 = vunpack.c.2.s8 %v2064_v51 }
 0x1f4   : > { %v6822_v12 = vpack.c.bf16 %v5056_v63, %v5054_v59  ;;  %v5118_v13 = vcvt.s32.f32 %v3070_v60  ;;  %v5120_v15 = vcvt.s32.f32 %v3072_v0  ;;  %v2972_v17 = vunpack.c.3.s8 %v2064_v51 }
 0x1f5   : > { %7929 = vmatpush.bf16.msra.mxu0 %v6806_v2  ;;  %v6838_v14 = vpack.c.bf16 %v5088_v9, %v5086_v5  ;;  %v5018_v21 = vcvt.s32.f32 %v2970_v10  ;;  %v3002_v19 = vunpack.c.2.s8 %v2072_v55  ;;  %v3004_v22 = vunpack.c.3.s8 %v2072_v55 }
 0x1f6   : > { %7942 = vmatpush.bf16.msra.mxu1 %v6822_v12  ;;  %v6854_v24 = vpack.c.bf16 %v5120_v15, %v5118_v13  ;;  %v5020_v23 = vcvt.s32.f32 %v2972_v17  ;;  %v3034_v25 = vunpack.c.2.s8 %v2080_v6  ;;  %v3036_v26 = vunpack.c.3.s8 %v2080_v6  ;;  %v2086_v13 = vld [vmem:[%s10573_s20 + $0x4c0] sm:$0xff] }
 0x1f7   : > { %7955 = vmatpush.bf16.msra.mxu2 %v6838_v14  ;;  %v5050_v27 = vcvt.s32.f32 %v3002_v19  ;;  %v5052_v28 = vcvt.s32.f32 %v3004_v22  ;;  %v3066_v29 = vunpack.c.2.s8 %v2088_v18  ;;  %v3068_v30 = vunpack.c.3.s8 %v2088_v18 }
 0x1f8   : > { %7968 = vmatpush.bf16.msra.mxu3 %v6854_v24  ;;  %v6804_v32 = vpack.c.bf16 %v5020_v23, %v5018_v21  ;;  %v5082_v33 = vcvt.s32.f32 %v3034_v25  ;;  %v5084_v34 = vcvt.s32.f32 %v3036_v26  ;;  %v2966_v36 = vunpack.c.0.s8 %v2064_v51 }
 0x1f9   : > { %v6820_v37 = vpack.c.bf16 %v5052_v28, %v5050_v27  ;;  %v5114_v38 = vcvt.s32.f32 %v3066_v29  ;;  %v5116_v39 = vcvt.s32.f32 %v3068_v30  ;;  %v2968_v41 = vunpack.c.1.s8 %v2064_v51  ;;  %v2070_v51 = vld [vmem:[%s10573_s20 + $0x440] sm:$0xff] }
 0x1fa   : > { %7930 = vmatpush.bf16.msra.mxu0 %v6804_v32  ;;  %v6836_v42 = vpack.c.bf16 %v5084_v34, %v5082_v33  ;;  %v5014_v43 = vcvt.s32.f32 %v2966_v36  ;;  %v2998_v45 = vunpack.c.0.s8 %v2072_v55  ;;  %v3000_v46 = vunpack.c.1.s8 %v2072_v55  ;;  %v2078_v55 = vld [vmem:[%s10573_s20 + $0x480] sm:$0xff] }
 0x1fb   : > { %7943 = vmatpush.bf16.msra.mxu1 %v6820_v37  ;;  %v6852_v48 = vpack.c.bf16 %v5116_v39, %v5114_v38  ;;  %v5016_v49 = vcvt.s32.f32 %v2968_v41  ;;  %v3030_v50 = vunpack.c.0.s8 %v2080_v6  ;;  %v3032_v52 = vunpack.c.1.s8 %v2080_v6 }
 0x1fc   : > { %7956 = vmatpush.bf16.msra.mxu2 %v6836_v42  ;;  %v5046_v54 = vcvt.s32.f32 %v2998_v45  ;;  %v5048_v56 = vcvt.s32.f32 %v3000_v46  ;;  %v3062_v57 = vunpack.c.0.s8 %v2088_v18  ;;  %v3064_v59 = vunpack.c.1.s8 %v2088_v18  ;;  %v10732_v42 = vld [vmem:[%s10573_s20 + $0x530] sm:$0xff] }
 0x1fd   : > { %7969 = vmatpush.bf16.msra.mxu3 %v6852_v48  ;;  %v6802_v63 = vpack.c.bf16 %v5016_v49, %v5014_v43  ;;  %v5078_v60 = vcvt.s32.f32 %v3030_v50  ;;  %v5080_v0 = vcvt.s32.f32 %v3032_v52  ;;  %v2962_v2 = vunpack.c.2.s8 %v2062_v47 }
 0x1fe   : > { %v6818_v5 = vpack.c.bf16 %v5048_v56, %v5046_v54  ;;  %v5110_v9 = vcvt.s32.f32 %v3062_v57  ;;  %v5112_v10 = vcvt.s32.f32 %v3064_v59  ;;  %v2964_v12 = vunpack.c.3.s8 %v2062_v47  ;;  %v2108_v54 = vld [vmem:[%s10573_s20 + $0x570] sm:$0xff] }
 0x1ff   : > { %7931 = vmatpush.bf16.msra.mxu0 %v6802_v63  ;;  %v6834_v6 = vpack.c.bf16 %v5080_v0, %v5078_v60  ;;  %v5010_v15 = vcvt.s32.f32 %v2962_v2  ;;  %v2994_v17 = vunpack.c.2.s8 %v2070_v51  ;;  %v2996_v14 = vunpack.c.3.s8 %v2070_v51  ;;  %v2116_v63 = vld [vmem:[%s10573_s20 + $0x5b0] sm:$0xff] }
 0x200   : > { %7944 = vmatpush.bf16.msra.mxu1 %v6818_v5  ;;  %v6850_v21 = vpack.c.bf16 %v5112_v10, %v5110_v9  ;;  %v5012_v18 = vcvt.s32.f32 %v2964_v12  ;;  %v3026_v19 = vunpack.c.2.s8 %v2078_v55  ;;  %v3028_v22 = vunpack.c.3.s8 %v2078_v55 }
 0x201   : > { %7957 = vmatpush.bf16.msra.mxu2 %v6834_v6  ;;  %v5042_v24 = vcvt.s32.f32 %v2994_v17  ;;  %v5044_v23 = vcvt.s32.f32 %v2996_v14  ;;  %v3058_v25 = vunpack.c.2.s8 %v2086_v13  ;;  %v3060_v26 = vunpack.c.3.s8 %v2086_v13 }
 0x202   : > { %7970 = vmatpush.bf16.msra.mxu3 %v6850_v21  ;;  %v6800_v27 = vpack.c.bf16 %v5012_v18, %v5010_v15  ;;  %v5074_v28 = vcvt.s32.f32 %v3026_v19  ;;  %v5076_v29 = vcvt.s32.f32 %v3028_v22  ;;  %v2958_v30 = vunpack.c.0.s8 %v2062_v47  ;;  %v10741_v18 = vld [vmem:[#allocation1 + $0x9] sm:$0xff] }
 0x203   : > { %v6816_v32 = vpack.c.bf16 %v5044_v23, %v5042_v24  ;;  %v5106_v33 = vcvt.s32.f32 %v3058_v25  ;;  %v5108_v34 = vcvt.s32.f32 %v3060_v26  ;;  %v2960_v36 = vunpack.c.1.s8 %v2062_v47  ;;  %v10743_v25 = vld [vmem:[#allocation1 + $0x12] sm:$0xff] }
 0x204   : > { %7932 = vmatpush.bf16.msra.mxu0 %v6800_v27  ;;  %v6832_v37 = vpack.c.bf16 %v5076_v29, %v5074_v28  ;;  %v5006_v38 = vcvt.s32.f32 %v2958_v30  ;;  %v2990_v39 = vunpack.c.0.s8 %v2070_v51  ;;  %v2992_v41 = vunpack.c.1.s8 %v2070_v51  ;;  %v10746_v29 = vld [vmem:[#allocation1 + $0x1b] sm:$0xff] }
 0x205   : > { %7945 = vmatpush.bf16.msra.mxu1 %v6816_v32  ;;  %v6848_v43 = vpack.c.bf16 %v5108_v34, %v5106_v33  ;;  %v5008_v45 = vcvt.s32.f32 %v2960_v36  ;;  %v3022_v46 = vunpack.c.0.s8 %v2078_v55  ;;  %v3024_v48 = vunpack.c.1.s8 %v2078_v55  ;;  %v2124_v55 = vld [vmem:[%s10573_s20 + $0x5f0] sm:$0xff] }
 0x206   : > { %7958 = vmatpush.bf16.msra.mxu2 %v6832_v37  ;;  %v5038_v49 = vcvt.s32.f32 %v2990_v39  ;;  %v5040_v50 = vcvt.s32.f32 %v2992_v41  ;;  %v3054_v52 = vunpack.c.0.s8 %v2086_v13  ;;  %v3056_v47 = vunpack.c.1.s8 %v2086_v13  ;;  %v10739_v13 = vld [vmem:[#allocation1] sm:$0xff] }
 0x207   : > { %7971 = vmatpush.bf16.msra.mxu3 %v6848_v43  ;;  %v6798_v56 = vpack.c.bf16 %v5008_v45, %v5006_v38  ;;  %v5070_v57 = vcvt.s32.f32 %v3022_v46  ;;  %v5072_v59 = vcvt.s32.f32 %v3024_v48  ;;  %v3114_v51 = vunpack.c.2.s8 %v10732_v42  ;;  %v2098_v43 = vld [vmem:[%s10573_s20 + $0x520] sm:$0xff] }
 0x208   : > { %v6814_v60 = vpack.c.bf16 %v5040_v50, %v5038_v49  ;;  %v5102_v0 = vcvt.s32.f32 %v3054_v52  ;;  %v5104_v2 = vcvt.s32.f32 %v3056_v47  ;;  %v3116_v5 = vunpack.c.3.s8 %v10732_v42 }
 0x209   : > { %7933 = vmatpush.bf16.msra.mxu0 %v6798_v56  ;;  %v6830_v9 = vpack.c.bf16 %v5072_v59, %v5070_v57  ;;  %v5162_v10 = vcvt.s32.f32 %v3114_v51  ;;  %v3146_v12 = vunpack.c.2.s8 %v2108_v54  ;;  %v3148_v6 = vunpack.c.3.s8 %v2108_v54  ;;  %v2106_v56 = vld [vmem:[%s10573_s20 + $0x560] sm:$0xff] }
 0x20a   : > { %7946 = vmatpush.bf16.msra.mxu1 %v6814_v60  ;;  %v6846_v15 = vpack.c.bf16 %v5104_v2, %v5102_v0  ;;  %v5164_v17 = vcvt.s32.f32 %v3116_v5  ;;  %v3178_v14 = vunpack.c.2.s8 %v2116_v63  ;;  %v3180_v21 = vunpack.c.3.s8 %v2116_v63  ;;  %v2114_v60 = vld [vmem:[%s10573_s20 + $0x5a0] sm:$0xff] }
 0x20b   : > { %7959 = vmatpush.bf16.msra.mxu2 %v6830_v9  ;;  %v5194_v19 = vcvt.s32.f32 %v3146_v12  ;;  %v5196_v22 = vcvt.s32.f32 %v3148_v6  ;;  %v3210_v24 = vunpack.c.2.s8 %v2124_v55  ;;  %v3212_v23 = vunpack.c.3.s8 %v2124_v55 }
 0x20c   : > { %7972 = vmatpush.bf16.msra.mxu3 %v6846_v15  ;;  %v6876_v26 = vpack.c.bf16 %v5164_v17, %v5162_v10  ;;  %v5226_v27 = vcvt.s32.f32 %v3178_v14  ;;  %v5228_v28 = vcvt.s32.f32 %v3180_v21  ;;  %7934 = vmatmul.bf16.vlgmr.msra.gmra.mxu0 %v10739_v13  ;;  %v3110_v30 = vunpack.c.0.s8 %v10732_v42  ;;  %v2122_v10 = vld [vmem:[%s10573_s20 + $0x5e0] sm:$0xff] }
 0x20d   : > { %v6892_v32 = vpack.c.bf16 %v5196_v22, %v5194_v19  ;;  %v5258_v33 = vcvt.s32.f32 %v3210_v24  ;;  %v5260_v34 = vcvt.s32.f32 %v3212_v23  ;;  %7947 = vmatmul.bf16.vlgmr.msra.gmra.mxu1 %v10741_v18  ;;  %v3112_v36 = vunpack.c.1.s8 %v10732_v42 }
 0x20e   : > { %7978 = vmatpush.bf16.msrb.mxu0 %v6876_v26  ;;  %v6908_v37 = vpack.c.bf16 %v5228_v28, %v5226_v27  ;;  %7960 = vmatmul.bf16.vlgmr.msra.gmra.mxu2 %v10743_v25  ;;  %v5158_v38 = vcvt.s32.f32 %v3110_v30  ;;  %v3142_v39 = vunpack.c.0.s8 %v2108_v54  ;;  %v3144_v41 = vunpack.c.1.s8 %v2108_v54 }
 0x20f   : > { %7991 = vmatpush.bf16.msrb.mxu1 %v6892_v32  ;;  %v6924_v45 = vpack.c.bf16 %v5260_v34, %v5258_v33  ;;  %7973 = vmatmul.bf16.vlgmr.msra.gmra.mxu3 %v10746_v29  ;;  %v5160_v46 = vcvt.s32.f32 %v3112_v36  ;;  %v3174_v48 = vunpack.c.0.s8 %v2116_v63  ;;  %v3176_v49 = vunpack.c.1.s8 %v2116_v63 }
 0x210   : > { %8004 = vmatpush.bf16.msrb.mxu2 %v6908_v37  ;;  %v5190_v42 = vcvt.s32.f32 %v3142_v39  ;;  %v5192_v50 = vcvt.s32.f32 %v3144_v41  ;;  %v3206_v52 = vunpack.c.0.s8 %v2124_v55  ;;  %v3208_v47 = vunpack.c.1.s8 %v2124_v55 }
 0x211   : > { %8017 = vmatpush.bf16.msrb.mxu3 %v6924_v45  ;;  %v6874_v57 = vpack.c.bf16 %v5160_v46, %v5158_v38  ;;  %v5222_v59 = vcvt.s32.f32 %v3174_v48  ;;  %v5224_v54 = vcvt.s32.f32 %v3176_v49  ;;  %v3106_v51 = vunpack.c.2.s8 %v2098_v43  ;;  %v2096_v45 = vld [vmem:[%s10573_s20 + $0x510] sm:$0xff] }
 0x212   : > { %v6890_v0 = vpack.c.bf16 %v5192_v50, %v5190_v42  ;;  %v5254_v2 = vcvt.s32.f32 %v3206_v52  ;;  %v5256_v5 = vcvt.s32.f32 %v3208_v47  ;;  %v3108_v9 = vunpack.c.3.s8 %v2098_v43  ;;  %v10758_v50 = vpop.f32.mrf.mxu0  ;;  %v10760_v52 = vpop.f32.mrf.mxu1 }
 0x213   : > { %7979 = vmatpush.bf16.msrb.mxu0 %v6874_v57  ;;  %v6906_v63 = vpack.c.bf16 %v5224_v54, %v5222_v59  ;;  %v5154_v12 = vcvt.s32.f32 %v3106_v51  ;;  %v3138_v6 = vunpack.c.2.s8 %v2106_v56  ;;  %v3140_v15 = vunpack.c.3.s8 %v2106_v56  ;;  %v2104_v54 = vld [vmem:[%s10573_s20 + $0x550] sm:$0xff] }
 0x214   : > { %7992 = vmatpush.bf16.msrb.mxu1 %v6890_v0  ;;  %v6922_v17 = vpack.c.bf16 %v5256_v5, %v5254_v2  ;;  %v5156_v55 = vcvt.s32.f32 %v3108_v9  ;;  %v3170_v14 = vunpack.c.2.s8 %v2114_v60  ;;  %v3172_v21 = vunpack.c.3.s8 %v2114_v60  ;;  %v2112_v5 = vld [vmem:[%s10573_s20 + $0x590] sm:$0xff] }
 0x215   : > { %8005 = vmatpush.bf16.msrb.mxu2 %v6906_v63  ;;  %v5186_v19 = vcvt.s32.f32 %v3138_v6  ;;  %v5188_v22 = vcvt.s32.f32 %v3140_v15  ;;  %v3202_v24 = vunpack.c.2.s8 %v2122_v10  ;;  %v3204_v23 = vunpack.c.3.s8 %v2122_v10  ;;  %v2120_v6 = vld [vmem:[%s10573_s20 + $0x5d0] sm:$0xff] }
 0x216   : > { %8018 = vmatpush.bf16.msrb.mxu3 %v6922_v17  ;;  %v6872_v26 = vpack.c.bf16 %v5156_v55, %v5154_v12  ;;  %v5218_v27 = vcvt.s32.f32 %v3170_v14  ;;  %v5220_v28 = vcvt.s32.f32 %v3172_v21  ;;  %v3102_v30 = vunpack.c.0.s8 %v2098_v43 }
 0x217   : > { %v6888_v32 = vpack.c.bf16 %v5188_v22, %v5186_v19  ;;  %v5250_v33 = vcvt.s32.f32 %v3202_v24  ;;  %v5252_v34 = vcvt.s32.f32 %v3204_v23  ;;  %v3104_v36 = vunpack.c.1.s8 %v2098_v43 }
 0x218   : > { %7980 = vmatpush.bf16.msrb.mxu0 %v6872_v26  ;;  %v6904_v37 = vpack.c.bf16 %v5220_v28, %v5218_v27  ;;  %v5150_v38 = vcvt.s32.f32 %v3102_v30  ;;  %v3134_v39 = vunpack.c.0.s8 %v2106_v56  ;;  %v3136_v41 = vunpack.c.1.s8 %v2106_v56  ;;  %v10765_v28 = vpop.f32.mrf.mxu2  ;;  %v10767_v30 = vpop.f32.mrf.mxu3 }
 0x219   : > { %7993 = vmatpush.bf16.msrb.mxu1 %v6888_v32  ;;  %v6920_v46 = vpack.c.bf16 %v5252_v34, %v5250_v33  ;;  %v5152_v48 = vcvt.s32.f32 %v3104_v36  ;;  %v3166_v49 = vunpack.c.0.s8 %v2114_v60  ;;  %v3168_v42 = vunpack.c.1.s8 %v2114_v60 }
 0x21a   : > { %8006 = vmatpush.bf16.msrb.mxu2 %v6904_v37  ;;  %v5182_v43 = vcvt.s32.f32 %v3134_v39  ;;  %v5184_v47 = vcvt.s32.f32 %v3136_v41  ;;  %v3198_v57 = vunpack.c.0.s8 %v2122_v10  ;;  %v3200_v59 = vunpack.c.1.s8 %v2122_v10 }
 0x21b   : > { %8019 = vmatpush.bf16.msrb.mxu3 %v6920_v46  ;;  %v6870_v56 = vpack.c.bf16 %v5152_v48, %v5150_v38  ;;  %v5214_v51 = vcvt.s32.f32 %v3166_v49  ;;  %v5216_v0 = vcvt.s32.f32 %v3168_v42  ;;  %v3098_v2 = vunpack.c.2.s8 %v2096_v45  ;;  %v7729_v46 = vpop.f32.mrf.mxu0  ;;  %v7742_v48 = vpop.f32.mrf.mxu1 }
 0x21c   : > { %v6886_v9 = vpack.c.bf16 %v5184_v47, %v5182_v43  ;;  %v5246_v63 = vcvt.s32.f32 %v3198_v57  ;;  %v5248_v60 = vcvt.s32.f32 %v3200_v59  ;;  %v3100_v12 = vunpack.c.3.s8 %v2096_v45  ;;  %v2094_v57 = vld [vmem:[%s10573_s20 + $0x500] sm:$0xff] }
 0x21d   : > { %7981 = vmatpush.bf16.msrb.mxu0 %v6870_v56  ;;  %v6902_v15 = vpack.c.bf16 %v5216_v0, %v5214_v51  ;;  %v5146_v17 = vcvt.s32.f32 %v3098_v2  ;;  %v3130_v55 = vunpack.c.2.s8 %v2104_v54  ;;  %v3132_v14 = vunpack.c.3.s8 %v2104_v54 }
 0x21e   : > { %7994 = vmatpush.bf16.msrb.mxu1 %v6886_v9  ;;  %v6918_v21 = vpack.c.bf16 %v5248_v60, %v5246_v63  ;;  %v5148_v10 = vcvt.s32.f32 %v3100_v12  ;;  %v3162_v19 = vunpack.c.2.s8 %v2112_v5  ;;  %v3164_v22 = vunpack.c.3.s8 %v2112_v5  ;;  %v2102_v60 = vld [vmem:[%s10573_s20 + $0x540] sm:$0xff] }
 0x21f   : > { %8007 = vmatpush.bf16.msrb.mxu2 %v6902_v15  ;;  %v5178_v24 = vcvt.s32.f32 %v3130_v55  ;;  %v5180_v23 = vcvt.s32.f32 %v3132_v14  ;;  %v3194_v26 = vunpack.c.2.s8 %v2120_v6  ;;  %v3196_v27 = vunpack.c.3.s8 %v2120_v6 }
 0x220   : > { %8020 = vmatpush.bf16.msrb.mxu3 %v6918_v21  ;;  %v6868_v32 = vpack.c.bf16 %v5148_v10, %v5146_v17  ;;  %v5210_v33 = vcvt.s32.f32 %v3162_v19  ;;  %v5212_v34 = vcvt.s32.f32 %v3164_v22  ;;  %v3094_v36 = vunpack.c.0.s8 %v2096_v45  ;;  %v2118_v22 = vld [vmem:[%s10573_s20 + $0x5c0] sm:$0xff] }
 0x221   : > { %v6884_v37 = vpack.c.bf16 %v5180_v23, %v5178_v24  ;;  %v5242_v38 = vcvt.s32.f32 %v3194_v26  ;;  %v5244_v39 = vcvt.s32.f32 %v3196_v27  ;;  %v3096_v41 = vunpack.c.1.s8 %v2096_v45  ;;  %v7755_v27 = vpop.f32.mrf.mxu2 }
 0x222   : > { %7982 = vmatpush.bf16.msrb.mxu0 %v6868_v32  ;;  %v6900_v49 = vpack.c.bf16 %v5212_v34, %v5210_v33  ;;  %v5142_v42 = vcvt.s32.f32 %v3094_v36  ;;  %v3126_v43 = vunpack.c.0.s8 %v2104_v54  ;;  %v3128_v47 = vunpack.c.1.s8 %v2104_v54  ;;  %v2110_v54 = vld [vmem:[%s10573_s20 + $0x580] sm:$0xff]  ;;  %v7768_v32 = vpop.f32.mrf.mxu3  ;;  %v2148_v27 = vld [vmem:[%s10573_s20 + $0x6b0] sm:$0xff] }
 0x223   : > { %7995 = vmatpush.bf16.msrb.mxu1 %v6884_v37  ;;  %v6916_v59 = vpack.c.bf16 %v5244_v39, %v5242_v38  ;;  %v5144_v56 = vcvt.s32.f32 %v3096_v41  ;;  %v3158_v51 = vunpack.c.0.s8 %v2112_v5  ;;  %v3160_v0 = vunpack.c.1.s8 %v2112_v5 }
 0x224   : > { %8008 = vmatpush.bf16.msrb.mxu2 %v6900_v49  ;;  %v5174_v2 = vcvt.s32.f32 %v3126_v43  ;;  %v5176_v9 = vcvt.s32.f32 %v3128_v47  ;;  %v3190_v45 = vunpack.c.0.s8 %v2120_v6  ;;  %v3192_v63 = vunpack.c.1.s8 %v2120_v6 }
 0x225   : > { %8021 = vmatpush.bf16.msrb.mxu3 %v6916_v59  ;;  %v6866_v12 = vpack.c.bf16 %v5144_v56, %v5142_v42  ;;  %v5206_v15 = vcvt.s32.f32 %v3158_v51  ;;  %v5208_v17 = vcvt.s32.f32 %v3160_v0  ;;  %v3090_v55 = vunpack.c.2.s8 %v2094_v57 }
 0x226   : > { %v6882_v14 = vpack.c.bf16 %v5176_v9, %v5174_v2  ;;  %v5238_v21 = vcvt.s32.f32 %v3190_v45  ;;  %v5240_v10 = vcvt.s32.f32 %v3192_v63  ;;  %v3092_v19 = vunpack.c.3.s8 %v2094_v57  ;;  %v10774_v45 = vld [vmem:[%s10573_s20 + $0x630] sm:$0xff] }
 0x227   : > { %7983 = vmatpush.bf16.msrb.mxu0 %v6866_v12  ;;  %v6898_v5 = vpack.c.bf16 %v5208_v17, %v5206_v15  ;;  %v5138_v24 = vcvt.s32.f32 %v3090_v55  ;;  %v3122_v23 = vunpack.c.2.s8 %v2102_v60  ;;  %v3124_v26 = vunpack.c.3.s8 %v2102_v60 }
 0x228   : > { %7996 = vmatpush.bf16.msrb.mxu1 %v6882_v14  ;;  %v6914_v6 = vpack.c.bf16 %v5240_v10, %v5238_v21  ;;  %v5140_v33 = vcvt.s32.f32 %v3092_v19  ;;  %v3154_v34 = vunpack.c.2.s8 %v2110_v54  ;;  %v3156_v36 = vunpack.c.3.s8 %v2110_v54  ;;  %v10777_v10 = vld [vmem:[%s10573_s20 + $0x670] sm:$0xff]  ;;  %v10779_v19 = vpop.f32.mrf.mxu0 }
 0x229   : > { %8009 = vmatpush.bf16.msrb.mxu2 %v6898_v5  ;;  %v5170_v37 = vcvt.s32.f32 %v3122_v23  ;;  %v5172_v38 = vcvt.s32.f32 %v3124_v26  ;;  %v3186_v39 = vunpack.c.2.s8 %v2118_v22  ;;  %v3188_v41 = vunpack.c.3.s8 %v2118_v22  ;;  %v10781_v5 = vpop.f32.mrf.mxu1 }
 0x22a   : > { %8022 = vmatpush.bf16.msrb.mxu3 %v6914_v6  ;;  %v6864_v46 = vpack.c.bf16 %v5140_v33, %v5138_v24  ;;  %v5202_v48 = vcvt.s32.f32 %v3154_v34  ;;  %v5204_v49 = vcvt.s32.f32 %v3156_v36  ;;  %v3086_v42 = vunpack.c.0.s8 %v2094_v57  ;;  %v10787_v34 = vld [vmem:[%s10573_s20 + $0x6f0] sm:$0xff] }
 0x22b   : > { %v6880_v43 = vpack.c.bf16 %v5172_v38, %v5170_v37  ;;  %v5234_v47 = vcvt.s32.f32 %v3186_v39  ;;  %v5236_v59 = vcvt.s32.f32 %v3188_v41  ;;  %v3088_v56 = vunpack.c.1.s8 %v2094_v57  ;;  %v10791_v39 = vld [vmem:[#allocation1 + $0x24] sm:$0xff] }
 0x22c   : > { %7984 = vmatpush.bf16.msrb.mxu0 %v6864_v46  ;;  %v6896_v51 = vpack.c.bf16 %v5204_v49, %v5202_v48  ;;  %v5134_v0 = vcvt.s32.f32 %v3086_v42  ;;  %v3118_v2 = vunpack.c.0.s8 %v2102_v60  ;;  %v3120_v9 = vunpack.c.1.s8 %v2102_v60  ;;  %v10793_v42 = vld [vmem:[#allocation1 + $0x2d] sm:$0xff] }
 0x22d   : > { %7997 = vmatpush.bf16.msrb.mxu1 %v6880_v43  ;;  %v6912_v63 = vpack.c.bf16 %v5236_v59, %v5234_v47  ;;  %v5136_v12 = vcvt.s32.f32 %v3088_v56  ;;  %v3150_v15 = vunpack.c.0.s8 %v2110_v54  ;;  %v3152_v17 = vunpack.c.1.s8 %v2110_v54 }
 0x22e   : > { %8010 = vmatpush.bf16.msrb.mxu2 %v6896_v51  ;;  %v5166_v55 = vcvt.s32.f32 %v3118_v2  ;;  %v5168_v14 = vcvt.s32.f32 %v3120_v9  ;;  %v3182_v21 = vunpack.c.0.s8 %v2118_v22  ;;  %v3184_v57 = vunpack.c.1.s8 %v2118_v22  ;;  %v10797_v51 = vld [vmem:[#allocation1 + $0x36] sm:$0xff]  ;;  %v10801_v2 = vpop.f32.mrf.mxu3 }
 0x22f   : > { %8023 = vmatpush.bf16.msrb.mxu3 %v6912_v63  ;;  %v6862_v60 = vpack.c.bf16 %v5136_v12, %v5134_v0  ;;  %v5198_v24 = vcvt.s32.f32 %v3150_v15  ;;  %v5200_v23 = vcvt.s32.f32 %v3152_v17  ;;  %v3242_v26 = vunpack.c.2.s8 %v10774_v45  ;;  %v10799_v0 = vpop.f32.mrf.mxu2  ;;  %v10806_v17 = vld [vmem:[#allocation1 + $0x3f] sm:$0xff] }
 0x230   : > { %v6878_v54 = vpack.c.bf16 %v5168_v14, %v5166_v55  ;;  %v5230_v32 = vcvt.s32.f32 %v3182_v21  ;;  %v5232_v6 = vcvt.s32.f32 %v3184_v57  ;;  %v3244_v33 = vunpack.c.3.s8 %v10774_v45 }
 0x231   : > { %7985 = vmatpush.bf16.msrb.mxu0 %v6862_v60  ;;  %v6894_v22 = vpack.c.bf16 %v5200_v23, %v5198_v24  ;;  %v5290_v36 = vcvt.s32.f32 %v3242_v26  ;;  %v3274_v37 = vunpack.c.2.s8 %v10777_v10  ;;  %v3276_v38 = vunpack.c.3.s8 %v10777_v10  ;;  %v7794_v26 = vpop.f32.mrf.mxu1 }
 0x232   : > { %7998 = vmatpush.bf16.msrb.mxu1 %v6878_v54  ;;  %v6910_v41 = vpack.c.bf16 %v5232_v6, %v5230_v32  ;;  %v5292_v46 = vcvt.s32.f32 %v3244_v33  ;;  %v3306_v48 = vunpack.c.2.s8 %v2148_v27  ;;  %v3308_v49 = vunpack.c.3.s8 %v2148_v27 }
 0x233   : > { %8011 = vmatpush.bf16.msrb.mxu2 %v6894_v22  ;;  %v5322_v43 = vcvt.s32.f32 %v3274_v37  ;;  %v5324_v47 = vcvt.s32.f32 %v3276_v38  ;;  %v3338_v59 = vunpack.c.2.s8 %v10787_v34  ;;  %v3340_v56 = vunpack.c.3.s8 %v10787_v34  ;;  %v2130_v22 = vld [vmem:[%s10573_s20 + $0x620] sm:$0xff] }
 0x234   : > { %8024 = vmatpush.bf16.msrb.mxu3 %v6910_v41  ;;  %v6940_v9 = vpack.c.bf16 %v5292_v46, %v5290_v36  ;;  %v5354_v63 = vcvt.s32.f32 %v3306_v48  ;;  %v5356_v12 = vcvt.s32.f32 %v3308_v49  ;;  %7986 = vmatmul.bf16.vlgmr.msrb.gmra.mxu0 %v10791_v39  ;;  %v7741_v15 = vadd.f32 %v10760_v52, %v10758_v50  ;;  %v7781_v52 = vpop.f32.mrf.mxu0  ;;  %v2138_v49 = vld [vmem:[%s10573_s20 + $0x660] sm:$0xff] }
 0x235   : > { %v6956_v55 = vpack.c.bf16 %v5324_v47, %v5322_v43  ;;  %v5386_v14 = vcvt.s32.f32 %v3338_v59  ;;  %v5388_v21 = vcvt.s32.f32 %v3340_v56  ;;  %7999 = vmatmul.bf16.vlgmr.msrb.gmra.mxu1 %v10793_v42  ;;  %v3238_v57 = vunpack.c.0.s8 %v10774_v45  ;;  %v2146_v43 = vld [vmem:[%s10573_s20 + $0x6a0] sm:$0xff] }
 0x236   : > { %8030 = vmatpush.bf16.msra.mxu0 %v6940_v9  ;;  %v6972_v60 = vpack.c.bf16 %v5356_v12, %v5354_v63  ;;  %8012 = vmatmul.bf16.vlgmr.msrb.gmra.mxu2 %v10797_v51  ;;  %v3240_v24 = vunpack.c.1.s8 %v10774_v45  ;;  %v3270_v23 = vunpack.c.0.s8 %v10777_v10  ;;  %v3272_v50 = vunpack.c.1.s8 %v10777_v10  ;;  %v2154_v9 = vld [vmem:[%s10573_s20 + $0x6e0] sm:$0xff] }
 0x237   : > { %8043 = vmatpush.bf16.msra.mxu1 %v6956_v55  ;;  %v6988_v54 = vpack.c.bf16 %v5388_v21, %v5386_v14  ;;  %8025 = vmatmul.bf16.vlgmr.msrb.gmra.mxu3 %v10806_v17  ;;  %v5286_v32 = vcvt.s32.f32 %v3238_v57  ;;  %v3302_v6 = vunpack.c.0.s8 %v2148_v27  ;;  %v3304_v33 = vunpack.c.1.s8 %v2148_v27  ;;  %v7807_v21 = vpop.f32.mrf.mxu2  ;;  %v7820_v57 = vpop.f32.mrf.mxu3 }
 0x238   : > { %8056 = vmatpush.bf16.msra.mxu2 %v6972_v60  ;;  %v5288_v36 = vcvt.s32.f32 %v3240_v24  ;;  %v5318_v45 = vcvt.s32.f32 %v3270_v23  ;;  %v5320_v37 = vcvt.s32.f32 %v3272_v50  ;;  %v3334_v38 = vunpack.c.0.s8 %v10787_v34  ;;  %v7569_v24 = vld [vmem:[%s12016_s0 + $0x18] sm:$0xff] }
 0x239   : > { %8069 = vmatpush.bf16.msra.mxu3 %v6988_v54  ;;  %v5350_v10 = vcvt.s32.f32 %v3302_v6  ;;  %v5352_v41 = vcvt.s32.f32 %v3304_v33  ;;  %v3336_v46 = vunpack.c.1.s8 %v10787_v34  ;;  %v7754_v48 = vadd.f32 %v10765_v28, %v7741_v15  ;;  %7605 = vst [vmem:[#allocation1] ss:$9 sm:$0xff] %v7569_v24  ;;  %v2136_v57 = vld [vmem:[%s10573_s20 + $0x650] sm:$0xff] }
 0x23a   : > { %v6938_v47 = vpack.c.bf16 %v5288_v36, %v5286_v32  ;;  %v6954_v59 = vpack.c.bf16 %v5320_v37, %v5318_v45  ;;  %v5382_v27 = vcvt.s32.f32 %v3334_v38  ;;  %v3234_v56 = vunpack.c.2.s8 %v2130_v22 }
 0x23b   : > { %v6970_v63 = vpack.c.bf16 %v5352_v41, %v5350_v10  ;;  %v5384_v12 = vcvt.s32.f32 %v3336_v46  ;;  %v10823_v55 = vadd.f32 %v10767_v30, %v7754_v48  ;;  %v3236_v14 = vunpack.c.3.s8 %v2130_v22 }
 0x23c   : > { %8031 = vmatpush.bf16.msra.mxu0 %v6938_v47  ;;  %8044 = vmatpush.bf16.msra.mxu1 %v6954_v59  ;;  %v5282_v34 = vcvt.s32.f32 %v3234_v56  ;;  %v3266_v60 = vunpack.c.2.s8 %v2138_v49  ;;  %v3268_v28 = vunpack.c.3.s8 %v2138_v49  ;;  %v3298_v15 = vunpack.c.2.s8 %v2146_v43  ;;  %v2128_v56 = vld [vmem:[%s10573_s20 + $0x610] sm:$0xff] }
 0x23d   : > { %8057 = vmatpush.bf16.msra.mxu2 %v6970_v63  ;;  %v6986_v23 = vpack.c.bf16 %v5384_v12, %v5382_v27  ;;  %v5284_v50 = vcvt.s32.f32 %v3236_v14  ;;  %v3300_v52 = vunpack.c.3.s8 %v2146_v43  ;;  %v3330_v26 = vunpack.c.2.s8 %v2154_v9 }
 0x23e   : > { %v5314_v30 = vcvt.s32.f32 %v3266_v60  ;;  %v5316_v54 = vcvt.s32.f32 %v3268_v28  ;;  %v5346_v32 = vcvt.s32.f32 %v3298_v15  ;;  %v3332_v6 = vunpack.c.3.s8 %v2154_v9 }
 0x23f   : > { %8070 = vmatpush.bf16.msra.mxu3 %v6986_v23  ;;  %v6936_v33 = vpack.c.bf16 %v5284_v50, %v5282_v34  ;;  %v5348_v36 = vcvt.s32.f32 %v3300_v52  ;;  %v5378_v45 = vcvt.s32.f32 %v3330_v26  ;;  %v3230_v37 = vunpack.c.0.s8 %v2130_v22  ;;  %v2144_v50 = vld [vmem:[%s10573_s20 + $0x690] sm:$0xff] }
 0x240   : > { %v6952_v38 = vpack.c.bf16 %v5316_v54, %v5314_v30  ;;  %v5380_v10 = vcvt.s32.f32 %v3332_v6  ;;  %v3232_v41 = vunpack.c.1.s8 %v2130_v22  ;;  %v3262_v46 = vunpack.c.0.s8 %v2138_v49 }
 0x241   : > { %8032 = vmatpush.bf16.msra.mxu0 %v6936_v33  ;;  %v6968_v48 = vpack.c.bf16 %v5348_v36, %v5346_v32  ;;  %v5278_v47 = vcvt.s32.f32 %v3230_v37  ;;  %v3264_v59 = vunpack.c.1.s8 %v2138_v49  ;;  %v3294_v27 = vunpack.c.0.s8 %v2146_v43  ;;  %v2152_v32 = vld [vmem:[%s10573_s20 + $0x6d0] sm:$0xff] }
 0x242   : > { %8045 = vmatpush.bf16.msra.mxu1 %v6952_v38  ;;  %v6984_v63 = vpack.c.bf16 %v5380_v10, %v5378_v45  ;;  %v5280_v12 = vcvt.s32.f32 %v3232_v41  ;;  %v5310_v14 = vcvt.s32.f32 %v3262_v46  ;;  %v3296_v21 = vunpack.c.1.s8 %v2146_v43 }
 0x243   : > { %8058 = vmatpush.bf16.msra.mxu2 %v6968_v48  ;;  %v5312_v34 = vcvt.s32.f32 %v3264_v59  ;;  %v5342_v60 = vcvt.s32.f32 %v3294_v27  ;;  %v3326_v28 = vunpack.c.0.s8 %v2154_v9  ;;  %v3328_v22 = vunpack.c.1.s8 %v2154_v9 }
 0x244   : > { %8071 = vmatpush.bf16.msra.mxu3 %v6984_v63  ;;  %v6934_v15 = vpack.c.bf16 %v5280_v12, %v5278_v47  ;;  %v5344_v24 = vcvt.s32.f32 %v3296_v21  ;;  %v3226_v23 = vunpack.c.2.s8 %v2128_v56  ;;  %v3228_v49 = vunpack.c.3.s8 %v2128_v56 }
 0x245   : > { %v6950_v52 = vpack.c.bf16 %v5312_v34, %v5310_v14  ;;  %v5374_v26 = vcvt.s32.f32 %v3326_v28  ;;  %v5376_v30 = vcvt.s32.f32 %v3328_v22  ;;  %v3258_v54 = vunpack.c.2.s8 %v2136_v57 }
 0x246   : > { %8033 = vmatpush.bf16.msra.mxu0 %v6934_v15  ;;  %v6966_v43 = vpack.c.bf16 %v5344_v24, %v5342_v60  ;;  %v5274_v6 = vcvt.s32.f32 %v3226_v23  ;;  %v5276_v33 = vcvt.s32.f32 %v3228_v49  ;;  %v3260_v36 = vunpack.c.3.s8 %v2136_v57 }
 0x247   : > { %8046 = vmatpush.bf16.msra.mxu1 %v6950_v52  ;;  %v6982_v45 = vpack.c.bf16 %v5376_v30, %v5374_v26  ;;  %v5306_v37 = vcvt.s32.f32 %v3258_v54  ;;  %v3290_v9 = vunpack.c.2.s8 %v2144_v50  ;;  %v3292_v38 = vunpack.c.3.s8 %v2144_v50  ;;  %v2126_v26 = vld [vmem:[%s10573_s20 + $0x600] sm:$0xff] }
 0x248   : > { %8059 = vmatpush.bf16.msra.mxu2 %v6966_v43  ;;  %v6932_v10 = vpack.c.bf16 %v5276_v33, %v5274_v6  ;;  %v5308_v41 = vcvt.s32.f32 %v3260_v36  ;;  %v3322_v46 = vunpack.c.2.s8 %v2152_v32  ;;  %v3324_v48 = vunpack.c.3.s8 %v2152_v32  ;;  %v2134_v43 = vld [vmem:[%s10573_s20 + $0x640] sm:$0xff] }
 0x249   : > { %8072 = vmatpush.bf16.msra.mxu3 %v6982_v45  ;;  %v5338_v47 = vcvt.s32.f32 %v3290_v9  ;;  %v5340_v59 = vcvt.s32.f32 %v3292_v38  ;;  %v7780_v27 = vadd.f32 %v10779_v19, %v10823_v55  ;;  %v3222_v63 = vunpack.c.0.s8 %v2128_v56  ;;  %v2142_v38 = vld [vmem:[%s10573_s20 + $0x680] sm:$0xff] }
 0x24a   : > { %8034 = vmatpush.bf16.msra.mxu0 %v6932_v10  ;;  %v6948_v12 = vpack.c.bf16 %v5308_v41, %v5306_v37  ;;  %v5370_v14 = vcvt.s32.f32 %v3322_v46  ;;  %v5372_v21 = vcvt.s32.f32 %v3324_v48  ;;  %v3224_v34 = vunpack.c.1.s8 %v2128_v56  ;;  %v10837_v56 = vpop.f32.mrf.mxu0  ;;  %v2150_v46 = vld [vmem:[%s10573_s20 + $0x6c0] sm:$0xff] }
 0x24b   : > { %v6964_v60 = vpack.c.bf16 %v5340_v59, %v5338_v47  ;;  %v7793_v28 = vadd.f32 %v10781_v5, %v7780_v27  ;;  %v5270_v22 = vcvt.s32.f32 %v3222_v63  ;;  %v3254_v15 = vunpack.c.0.s8 %v2136_v57 }
 0x24c   : > { %8047 = vmatpush.bf16.msra.mxu1 %v6948_v12  ;;  %v6980_v24 = vpack.c.bf16 %v5372_v21, %v5370_v14  ;;  %v5272_v23 = vcvt.s32.f32 %v3224_v34  ;;  %v3256_v49 = vunpack.c.1.s8 %v2136_v57  ;;  %v3286_v52 = vunpack.c.0.s8 %v2144_v50  ;;  %v10845_v21 = vpop.f32.mrf.mxu1 }
 0x24d   : > { %8060 = vmatpush.bf16.msra.mxu2 %v6964_v60  ;;  %v5302_v19 = vcvt.s32.f32 %v3254_v15  ;;  %v3288_v55 = vunpack.c.1.s8 %v2144_v50  ;;  %v3318_v30 = vunpack.c.0.s8 %v2152_v32  ;;  %v3320_v54 = vunpack.c.1.s8 %v2152_v32 }
 0x24e   : > { %8073 = vmatpush.bf16.msra.mxu3 %v6980_v24  ;;  %v6930_v5 = vpack.c.bf16 %v5272_v23, %v5270_v22  ;;  %v5304_v6 = vcvt.s32.f32 %v3256_v49  ;;  %v5334_v33 = vcvt.s32.f32 %v3286_v52  ;;  %v7806_v36 = vadd.f32 %v10799_v0, %v7793_v28 }
 0x24f   : > { %v5336_v45 = vcvt.s32.f32 %v3288_v55  ;;  %v5366_v57 = vcvt.s32.f32 %v3318_v30  ;;  %v5368_v37 = vcvt.s32.f32 %v3320_v54  ;;  %v3218_v9 = vunpack.c.2.s8 %v2126_v26 }
 0x250   : > { %8035 = vmatpush.bf16.msra.mxu0 %v6930_v5  ;;  %v6946_v10 = vpack.c.bf16 %v5304_v6, %v5302_v19  ;;  %v10842_v50 = vadd.f32 %v10801_v2, %v7806_v36  ;;  %v3220_v32 = vunpack.c.3.s8 %v2126_v26  ;;  %v3250_v41 = vunpack.c.2.s8 %v2134_v43  ;;  %v2164_v36 = vld [vmem:[%s10573_s20 + $0x730] sm:$0xff] }
 0x251   : > { %v6962_v48 = vpack.c.bf16 %v5336_v45, %v5334_v33  ;;  %v6978_v47 = vpack.c.bf16 %v5368_v37, %v5366_v57  ;;  %v5266_v59 = vcvt.s32.f32 %v3218_v9  ;;  %v3252_v27 = vunpack.c.3.s8 %v2134_v43 }
 0x252   : > { %8048 = vmatpush.bf16.msra.mxu1 %v6946_v10  ;;  %v5268_v63 = vcvt.s32.f32 %v3220_v32  ;;  %v5298_v0 = vcvt.s32.f32 %v3250_v41  ;;  %v3282_v12 = vunpack.c.2.s8 %v2142_v38  ;;  %v3284_v14 = vunpack.c.3.s8 %v2142_v38  ;;  %v7833_v30 = vpop.f32.mrf.mxu0  ;;  %v10849_v10 = vld [vmem:[%s10573_s20 + $0x770] sm:$0xff] }
 0x253   : > { %8061 = vmatpush.bf16.msra.mxu2 %v6962_v48  ;;  %8074 = vmatpush.bf16.msra.mxu3 %v6978_v47  ;;  %v5300_v34 = vcvt.s32.f32 %v3252_v27  ;;  %v3314_v60 = vunpack.c.2.s8 %v2150_v46  ;;  %v3316_v2 = vunpack.c.3.s8 %v2150_v46  ;;  %v3214_v28 = vunpack.c.0.s8 %v2126_v26  ;;  %v10852_v47 = vld [vmem:[%s10573_s20 + $0x7b0] sm:$0xff]  ;;  %v10856_v27 = vpop.f32.mrf.mxu3  ;;  %v10865_v30 = vld [vmem:[#allocation1 + $0x9] sm:$0xff] }
 0x254   : > { %v6928_v22 = vpack.c.bf16 %v5268_v63, %v5266_v59  ;;  %v5330_v15 = vcvt.s32.f32 %v3282_v12  ;;  %v5332_v24 = vcvt.s32.f32 %v3284_v14  ;;  %v3216_v23 = vunpack.c.1.s8 %v2126_v26  ;;  %v10854_v59 = vpop.f32.mrf.mxu2 }
 0x255   : > { %v6944_v49 = vpack.c.bf16 %v5300_v34, %v5298_v0  ;;  %v5362_v52 = vcvt.s32.f32 %v3314_v60  ;;  %v5364_v19 = vcvt.s32.f32 %v3316_v2  ;;  %v5262_v55 = vcvt.s32.f32 %v3214_v28  ;;  %v2188_v2 = vld [vmem:[%s10573_s20 + $0x7f0] sm:$0xff]  ;;  %v10860_v28 = vld [vmem:[#allocation1] sm:$0xff] }
 0x256   : > { %8036 = vmatpush.bf16.msra.mxu0 %v6928_v22  ;;  %v6960_v54 = vpack.c.bf16 %v5332_v24, %v5330_v15  ;;  %v5264_v5 = vcvt.s32.f32 %v3216_v23  ;;  %v3246_v6 = vunpack.c.0.s8 %v2134_v43  ;;  %v3248_v33 = vunpack.c.1.s8 %v2134_v43 }
 0x257   : > { %8049 = vmatpush.bf16.msra.mxu1 %v6944_v49  ;;  %v6976_v45 = vpack.c.bf16 %v5364_v19, %v5362_v52  ;;  %v3278_v57 = vunpack.c.0.s8 %v2142_v38  ;;  %v3280_v37 = vunpack.c.1.s8 %v2142_v38  ;;  %v3310_v9 = vunpack.c.0.s8 %v2150_v46 }
 0x258   : > { %8062 = vmatpush.bf16.msra.mxu2 %v6960_v54  ;;  %v6926_v26 = vpack.c.bf16 %v5264_v5, %v5262_v55  ;;  %v5294_v32 = vcvt.s32.f32 %v3246_v6  ;;  %v5296_v41 = vcvt.s32.f32 %v3248_v33  ;;  %v3312_v48 = vunpack.c.1.s8 %v2150_v46  ;;  %v7846_v46 = vpop.f32.mrf.mxu1 }
 0x259   : > { %8075 = vmatpush.bf16.msra.mxu3 %v6976_v45  ;;  %v5326_v43 = vcvt.s32.f32 %v3278_v57  ;;  %v5328_v63 = vcvt.s32.f32 %v3280_v37  ;;  %v5358_v0 = vcvt.s32.f32 %v3310_v9  ;;  %v3370_v38 = vunpack.c.2.s8 %v2164_v36  ;;  %v10868_v45 = vld [vmem:[#allocation1 + $0x12] sm:$0xff]  ;;  %v10870_v9 = vld [vmem:[#allocation1 + $0x1b] sm:$0xff] }
 0x25a   : > { %8037 = vmatpush.bf16.msra.mxu0 %v6926_v26  ;;  %v6942_v12 = vpack.c.bf16 %v5296_v41, %v5294_v32  ;;  %v5360_v14 = vcvt.s32.f32 %v3312_v48  ;;  %v3372_v34 = vunpack.c.3.s8 %v2164_v36  ;;  %v3402_v60 = vunpack.c.2.s8 %v10849_v10 }
 0x25b   : > { %v6958_v22 = vpack.c.bf16 %v5328_v63, %v5326_v43  ;;  %v5418_v15 = vcvt.s32.f32 %v3370_v38  ;;  %v3404_v24 = vunpack.c.3.s8 %v10849_v10  ;;  %v3434_v23 = vunpack.c.2.s8 %v10852_v47  ;;  %v7872_v46 = vpop.f32.mrf.mxu3 }
 0x25c   : > { %8050 = vmatpush.bf16.msra.mxu1 %v6942_v12  ;;  %v6974_v49 = vpack.c.bf16 %v5360_v14, %v5358_v0  ;;  %v5420_v52 = vcvt.s32.f32 %v3372_v34  ;;  %v5450_v19 = vcvt.s32.f32 %v3402_v60  ;;  %v3436_v55 = vunpack.c.3.s8 %v10852_v47  ;;  %v2162_v34 = vld [vmem:[%s10573_s20 + $0x720] sm:$0xff]  ;;  %v7859_v60 = vpop.f32.mrf.mxu2 }
 0x25d   : > { %8063 = vmatpush.bf16.msra.mxu2 %v6958_v22  ;;  %v5452_v54 = vcvt.s32.f32 %v3404_v24  ;;  %v5482_v5 = vcvt.s32.f32 %v3434_v23  ;;  %v3466_v6 = vunpack.c.2.s8 %v2188_v2  ;;  %v3468_v33 = vunpack.c.3.s8 %v2188_v2  ;;  %8038 = vmatmul.bf16.vlgmr.msra.gmra.mxu0 %v10860_v28  ;;  %v2170_v23 = vld [vmem:[%s10573_s20 + $0x760] sm:$0xff] }
 0x25e   : > { %8076 = vmatpush.bf16.msra.mxu3 %v6974_v49  ;;  %v7004_v57 = vpack.c.bf16 %v5420_v52, %v5418_v15  ;;  %v5484_v37 = vcvt.s32.f32 %v3436_v55  ;;  %v3366_v26 = vunpack.c.0.s8 %v2164_v36  ;;  %v3368_v32 = vunpack.c.1.s8 %v2164_v36 }
 0x25f   : > { %v7020_v41 = vpack.c.bf16 %v5452_v54, %v5450_v19  ;;  %v5514_v48 = vcvt.s32.f32 %v3466_v6  ;;  %v5516_v43 = vcvt.s32.f32 %v3468_v33  ;;  %8051 = vmatmul.bf16.vlgmr.msra.gmra.mxu1 %v10865_v30  ;;  %v3398_v63 = vunpack.c.0.s8 %v10849_v10  ;;  %v2178_v33 = vld [vmem:[%s10573_s20 + $0x7a0] sm:$0xff] }
 0x260   : > { %8082 = vmatpush.bf16.msrb.mxu0 %v7004_v57  ;;  %v7036_v0 = vpack.c.bf16 %v5484_v37, %v5482_v5  ;;  %8064 = vmatmul.bf16.vlgmr.msra.gmra.mxu2 %v10868_v45  ;;  %v5414_v38 = vcvt.s32.f32 %v3366_v26  ;;  %v5416_v12 = vcvt.s32.f32 %v3368_v32  ;;  %v3400_v14 = vunpack.c.1.s8 %v10849_v10 }
 0x261   : > { %8095 = vmatpush.bf16.msrb.mxu1 %v7020_v41  ;;  %v7052_v36 = vpack.c.bf16 %v5516_v43, %v5514_v48  ;;  %8077 = vmatmul.bf16.vlgmr.msra.gmra.mxu3 %v10870_v9  ;;  %v5446_v22 = vcvt.s32.f32 %v3398_v63  ;;  %v3430_v15 = vunpack.c.0.s8 %v10852_v47  ;;  %v3432_v24 = vunpack.c.1.s8 %v10852_v47  ;;  %v2186_v41 = vld [vmem:[%s10573_s20 + $0x7e0] sm:$0xff] }
 0x262   : > { %8108 = vmatpush.bf16.msrb.mxu2 %v7036_v0  ;;  %v7002_v49 = vpack.c.bf16 %v5416_v12, %v5414_v38  ;;  %v5448_v52 = vcvt.s32.f32 %v3400_v14  ;;  %v3462_v19 = vunpack.c.0.s8 %v2188_v2  ;;  %v3464_v10 = vunpack.c.1.s8 %v2188_v2 }
 0x263   : > { %8121 = vmatpush.bf16.msrb.mxu3 %v7052_v36  ;;  %v5478_v55 = vcvt.s32.f32 %v3430_v15  ;;  %v5480_v54 = vcvt.s32.f32 %v3432_v24  ;;  %v3362_v5 = vunpack.c.2.s8 %v2162_v34  ;;  %v3364_v6 = vunpack.c.3.s8 %v2162_v34 }
 0x264   : > { %8083 = vmatpush.bf16.msrb.mxu0 %v7002_v49  ;;  %v7018_v57 = vpack.c.bf16 %v5448_v52, %v5446_v22  ;;  %v5510_v37 = vcvt.s32.f32 %v3462_v19  ;;  %v5512_v26 = vcvt.s32.f32 %v3464_v10  ;;  %v3394_v32 = vunpack.c.2.s8 %v2170_v23 }
 0x265   : > { %v7034_v47 = vpack.c.bf16 %v5480_v54, %v5478_v55  ;;  %v5410_v48 = vcvt.s32.f32 %v3362_v5  ;;  %v5412_v43 = vcvt.s32.f32 %v3364_v6  ;;  %v3396_v63 = vunpack.c.3.s8 %v2170_v23 }
 0x266   : > { %8096 = vmatpush.bf16.msrb.mxu1 %v7018_v57  ;;  %v7050_v0 = vpack.c.bf16 %v5512_v26, %v5510_v37  ;;  %v5442_v38 = vcvt.s32.f32 %v3394_v32  ;;  %v3426_v2 = vunpack.c.2.s8 %v2178_v33  ;;  %v3428_v12 = vunpack.c.3.s8 %v2178_v33 }
 0x267   : > { %8109 = vmatpush.bf16.msrb.mxu2 %v7034_v47  ;;  %v7000_v14 = vpack.c.bf16 %v5412_v43, %v5410_v48  ;;  %v5444_v60 = vcvt.s32.f32 %v3396_v63  ;;  %v3458_v46 = vunpack.c.2.s8 %v2186_v41  ;;  %v3460_v36 = vunpack.c.3.s8 %v2186_v41  ;;  %v2160_v48 = vld [vmem:[%s10573_s20 + $0x710] sm:$0xff] }
 0x268   : > { %8122 = vmatpush.bf16.msrb.mxu3 %v7050_v0  ;;  %v5474_v22 = vcvt.s32.f32 %v3426_v2  ;;  %v5476_v15 = vcvt.s32.f32 %v3428_v12  ;;  %v7832_v24 = vadd.f32 %v10837_v56, %v10842_v50  ;;  %v3358_v49 = vunpack.c.0.s8 %v2162_v34  ;;  %v2168_v0 = vld [vmem:[%s10573_s20 + $0x750] sm:$0xff] }
 0x269   : > { %8084 = vmatpush.bf16.msrb.mxu0 %v7000_v14  ;;  %v7016_v52 = vpack.c.bf16 %v5444_v60, %v5442_v38  ;;  %v5506_v19 = vcvt.s32.f32 %v3458_v46  ;;  %v5508_v10 = vcvt.s32.f32 %v3460_v36  ;;  %v3360_v55 = vunpack.c.1.s8 %v2162_v34  ;;  %v2176_v12 = vld [vmem:[%s10573_s20 + $0x790] sm:$0xff] }
 0x26a   : > { %v7032_v54 = vpack.c.bf16 %v5476_v15, %v5474_v22  ;;  %v5406_v5 = vcvt.s32.f32 %v3358_v49  ;;  %v3390_v6 = vunpack.c.0.s8 %v2170_v23  ;;  %v3392_v57 = vunpack.c.1.s8 %v2170_v23 }
 0x26b   : > { %8097 = vmatpush.bf16.msrb.mxu1 %v7016_v52  ;;  %v7048_v37 = vpack.c.bf16 %v5508_v10, %v5506_v19  ;;  %v5408_v26 = vcvt.s32.f32 %v3360_v55  ;;  %v3422_v32 = vunpack.c.0.s8 %v2178_v33  ;;  %v3424_v47 = vunpack.c.1.s8 %v2178_v33  ;;  %v2184_v33 = vld [vmem:[%s10573_s20 + $0x7d0] sm:$0xff] }
 0x26c   : > { %8110 = vmatpush.bf16.msrb.mxu2 %v7032_v54  ;;  %v5438_v56 = vcvt.s32.f32 %v3390_v6  ;;  %v5440_v50 = vcvt.s32.f32 %v3392_v57  ;;  %v3454_v43 = vunpack.c.0.s8 %v2186_v41  ;;  %v3456_v63 = vunpack.c.1.s8 %v2186_v41 }
 0x26d   : > { %8123 = vmatpush.bf16.msrb.mxu3 %v7048_v37  ;;  %v6998_v34 = vpack.c.bf16 %v5408_v26, %v5406_v5  ;;  %v5470_v38 = vcvt.s32.f32 %v3422_v32  ;;  %v5472_v2 = vcvt.s32.f32 %v3424_v47  ;;  %v7845_v23 = vadd.f32 %v10845_v21, %v7832_v24 }
 0x26e   : > { %v7014_v14 = vpack.c.bf16 %v5440_v50, %v5438_v56  ;;  %v5502_v60 = vcvt.s32.f32 %v3454_v43  ;;  %v5504_v46 = vcvt.s32.f32 %v3456_v63  ;;  %v3354_v36 = vunpack.c.2.s8 %v2160_v48 }
 0x26f   : > { %8085 = vmatpush.bf16.msrb.mxu0 %v6998_v34  ;;  %v7030_v22 = vpack.c.bf16 %v5472_v2, %v5470_v38  ;;  %v3356_v15 = vunpack.c.3.s8 %v2160_v48  ;;  %v3386_v49 = vunpack.c.2.s8 %v2168_v0  ;;  %v3388_v52 = vunpack.c.3.s8 %v2168_v0 }
 0x270   : > { %8098 = vmatpush.bf16.msrb.mxu1 %v7014_v14  ;;  %v7046_v41 = vpack.c.bf16 %v5504_v46, %v5502_v60  ;;  %v5402_v19 = vcvt.s32.f32 %v3354_v36  ;;  %v3418_v10 = vunpack.c.2.s8 %v2176_v12  ;;  %v3420_v55 = vunpack.c.3.s8 %v2176_v12  ;;  %v2158_v36 = vld [vmem:[%s10573_s20 + $0x700] sm:$0xff] }
 0x271   : > { %8111 = vmatpush.bf16.msrb.mxu2 %v7030_v22  ;;  %v5404_v54 = vcvt.s32.f32 %v3356_v15  ;;  %v5434_v5 = vcvt.s32.f32 %v3386_v49  ;;  %v5436_v21 = vcvt.s32.f32 %v3388_v52  ;;  %v3450_v24 = vunpack.c.2.s8 %v2184_v33  ;;  %v2166_v49 = vld [vmem:[%s10573_s20 + $0x740] sm:$0xff]  ;;  %v10896_v52 = vpop.f32.mrf.mxu0 }
 0x272   : > { %8124 = vmatpush.bf16.msrb.mxu3 %v7046_v41  ;;  %v5466_v6 = vcvt.s32.f32 %v3418_v10  ;;  %v5468_v57 = vcvt.s32.f32 %v3420_v55  ;;  %v3452_v37 = vunpack.c.3.s8 %v2184_v33  ;;  %v7858_v26 = vadd.f32 %v10854_v59, %v7845_v23  ;;  %v2174_v10 = vld [vmem:[%s10573_s20 + $0x780] sm:$0xff] }
 0x273   : > { %v6996_v32 = vpack.c.bf16 %v5404_v54, %v5402_v19  ;;  %v7012_v47 = vpack.c.bf16 %v5436_v21, %v5434_v5  ;;  %v5498_v56 = vcvt.s32.f32 %v3450_v24  ;;  %v3350_v50 = vunpack.c.0.s8 %v2160_v48 }
 0x274   : > { %v7028_v43 = vpack.c.bf16 %v5468_v57, %v5466_v6  ;;  %v5500_v63 = vcvt.s32.f32 %v3452_v37  ;;  %v10892_v34 = vadd.f32 %v10856_v27, %v7858_v26  ;;  %v3352_v38 = vunpack.c.1.s8 %v2160_v48 }
 0x275   : > { %8086 = vmatpush.bf16.msrb.mxu0 %v6996_v32  ;;  %8099 = vmatpush.bf16.msrb.mxu1 %v7012_v47  ;;  %v5398_v2 = vcvt.s32.f32 %v3350_v50  ;;  %v3382_v14 = vunpack.c.0.s8 %v2168_v0  ;;  %v3384_v60 = vunpack.c.1.s8 %v2168_v0  ;;  %v3414_v46 = vunpack.c.0.s8 %v2176_v12 }
 0x276   : > { %8112 = vmatpush.bf16.msrb.mxu2 %v7028_v43  ;;  %v7044_v59 = vpack.c.bf16 %v5500_v63, %v5498_v56  ;;  %v5400_v23 = vcvt.s32.f32 %v3352_v38  ;;  %v3416_v22 = vunpack.c.1.s8 %v2176_v12  ;;  %v3446_v15 = vunpack.c.0.s8 %v2184_v33  ;;  %v2182_v12 = vld [vmem:[%s10573_s20 + $0x7c0] sm:$0xff]  ;;  %v10900_v63 = vpop.f32.mrf.mxu1 }
 0x277   : > { %v5430_v27 = vcvt.s32.f32 %v3382_v14  ;;  %v5432_v41 = vcvt.s32.f32 %v3384_v60  ;;  %v5462_v48 = vcvt.s32.f32 %v3414_v46  ;;  %v3448_v19 = vunpack.c.1.s8 %v2184_v33 }
 0x278   : > { %8125 = vmatpush.bf16.msrb.mxu3 %v7044_v59  ;;  %v6994_v55 = vpack.c.bf16 %v5400_v23, %v5398_v2  ;;  %v5464_v54 = vcvt.s32.f32 %v3416_v22  ;;  %v5494_v0 = vcvt.s32.f32 %v3446_v15  ;;  %v3346_v5 = vunpack.c.2.s8 %v2158_v36 }
 0x279   : > { %v7010_v21 = vpack.c.bf16 %v5432_v41, %v5430_v27  ;;  %v5496_v24 = vcvt.s32.f32 %v3448_v19  ;;  %v3348_v6 = vunpack.c.3.s8 %v2158_v36  ;;  %v3378_v57 = vunpack.c.2.s8 %v2166_v49  ;;  %v7885_v19 = vpop.f32.mrf.mxu0 }
 0x27a   : > { %8087 = vmatpush.bf16.msrb.mxu0 %v6994_v55  ;;  %v7026_v37 = vpack.c.bf16 %v5464_v54, %v5462_v48  ;;  %v5394_v26 = vcvt.s32.f32 %v3346_v5  ;;  %v3380_v32 = vunpack.c.3.s8 %v2166_v49  ;;  %v3410_v47 = vunpack.c.2.s8 %v2174_v10 }
 0x27b   : > { %8100 = vmatpush.bf16.msrb.mxu1 %v7010_v21  ;;  %v7042_v56 = vpack.c.bf16 %v5496_v24, %v5494_v0  ;;  %v5396_v50 = vcvt.s32.f32 %v3348_v6  ;;  %v5426_v33 = vcvt.s32.f32 %v3378_v57  ;;  %v3412_v43 = vunpack.c.3.s8 %v2174_v10  ;;  %v2196_v21 = vld [vmem:[%s10573_s20 + $0x830] sm:$0xff] }
 0x27c   : > { %8113 = vmatpush.bf16.msrb.mxu2 %v7026_v37  ;;  %v5428_v38 = vcvt.s32.f32 %v3380_v32  ;;  %v5458_v2 = vcvt.s32.f32 %v3410_v47  ;;  %v3442_v14 = vunpack.c.2.s8 %v2182_v12  ;;  %v3444_v60 = vunpack.c.3.s8 %v2182_v12 }
 0x27d   : > { %8126 = vmatpush.bf16.msrb.mxu3 %v7042_v56  ;;  %v6992_v46 = vpack.c.bf16 %v5396_v50, %v5394_v26  ;;  %v5460_v59 = vcvt.s32.f32 %v3412_v43  ;;  %v3342_v23 = vunpack.c.0.s8 %v2158_v36  ;;  %v3344_v22 = vunpack.c.1.s8 %v2158_v36  ;;  %v10904_v26 = vld [vmem:[%s10573_s20 + $0x870] sm:$0xff]  ;;  %v10906_v50 = vpop.f32.mrf.mxu2 }
 0x27e   : > { %v7008_v15 = vpack.c.bf16 %v5428_v38, %v5426_v33  ;;  %v5490_v27 = vcvt.s32.f32 %v3442_v14  ;;  %v5492_v41 = vcvt.s32.f32 %v3444_v60  ;;  %v3374_v48 = vunpack.c.0.s8 %v2166_v49  ;;  %v10908_v33 = vpop.f32.mrf.mxu3  ;;  %v2212_v14 = vld [vmem:[%s10573_s20 + $0x8b0] sm:$0xff] }
 0x27f   : > { %8088 = vmatpush.bf16.msrb.mxu0 %v6992_v46  ;;  %v7024_v55 = vpack.c.bf16 %v5460_v59, %v5458_v2  ;;  %v5390_v54 = vcvt.s32.f32 %v3342_v23  ;;  %v5392_v0 = vcvt.s32.f32 %v3344_v22  ;;  %v3376_v5 = vunpack.c.1.s8 %v2166_v49  ;;  %v2220_v23 = vld [vmem:[%s10573_s20 + $0x8f0] sm:$0xff]  ;;  %v10913_v22 = vld [vmem:[#allocation1 + $0x24] sm:$0xff] }
 0x280   : > { %8101 = vmatpush.bf16.msrb.mxu1 %v7008_v15  ;;  %v7040_v24 = vpack.c.bf16 %v5492_v41, %v5490_v27  ;;  %v5422_v6 = vcvt.s32.f32 %v3374_v48  ;;  %v3406_v57 = vunpack.c.0.s8 %v2174_v10  ;;  %v3408_v37 = vunpack.c.1.s8 %v2174_v10 }
 0x281   : > { %8114 = vmatpush.bf16.msrb.mxu2 %v7024_v55  ;;  %v6990_v36 = vpack.c.bf16 %v5392_v0, %v5390_v54  ;;  %v5424_v32 = vcvt.s32.f32 %v3376_v5  ;;  %v3438_v47 = vunpack.c.0.s8 %v2182_v12  ;;  %v3440_v56 = vunpack.c.1.s8 %v2182_v12  ;;  %v7898_v12 = vpop.f32.mrf.mxu1  ;;  %v10916_v5 = vld [vmem:[#allocation1 + $0x2d] sm:$0xff] }
 0x282   : > { %8127 = vmatpush.bf16.msrb.mxu3 %v7040_v24  ;;  %v5454_v49 = vcvt.s32.f32 %v3406_v57  ;;  %v5456_v43 = vcvt.s32.f32 %v3408_v37  ;;  %v3498_v38 = vunpack.c.2.s8 %v2196_v21  ;;  %v3500_v2 = vunpack.c.3.s8 %v2196_v21 }
 0x283   : > { %8089 = vmatpush.bf16.msrb.mxu0 %v6990_v36  ;;  %v7006_v10 = vpack.c.bf16 %v5424_v32, %v5422_v6  ;;  %v5486_v60 = vcvt.s32.f32 %v3438_v47  ;;  %v5488_v46 = vcvt.s32.f32 %v3440_v56  ;;  %v3530_v59 = vunpack.c.2.s8 %v10904_v26  ;;  %v10919_v36 = vld [vmem:[#allocation1 + $0x36] sm:$0xff]  ;;  %v10921_v56 = vld [vmem:[#allocation1 + $0x3f] sm:$0xff] }
 0x284   : > { %v7022_v15 = vpack.c.bf16 %v5456_v43, %v5454_v49  ;;  %v5546_v27 = vcvt.s32.f32 %v3498_v38  ;;  %v5548_v41 = vcvt.s32.f32 %v3500_v2  ;;  %v3532_v48 = vunpack.c.3.s8 %v10904_v26  ;;  %12068 = vst [vmem:[#allocation13_spill] sm:$0xff] %v10919_v36 }
 0x285   : > { %8102 = vmatpush.bf16.msrb.mxu1 %v7006_v10  ;;  %v7038_v19 = vpack.c.bf16 %v5488_v46, %v5486_v60  ;;  %v5578_v55 = vcvt.s32.f32 %v3530_v59  ;;  %v3562_v54 = vunpack.c.2.s8 %v2212_v14  ;;  %v3564_v0 = vunpack.c.3.s8 %v2212_v14  ;;  %12069 = vst [vmem:[#allocation14_spill] sm:$0xff] %v10921_v56 }
 0x286   : > { %8115 = vmatpush.bf16.msrb.mxu2 %v7022_v15  ;;  %v7068_v24 = vpack.c.bf16 %v5548_v41, %v5546_v27  ;;  %v5580_v6 = vcvt.s32.f32 %v3532_v48  ;;  %v3594_v57 = vunpack.c.2.s8 %v2220_v23  ;;  %v3596_v37 = vunpack.c.3.s8 %v2220_v23  ;;  %8090 = vmatmul.bf16.vlgmr.msrb.gmra.mxu0 %v10913_v22  ;;  %v2194_v27 = vld [vmem:[%s10573_s20 + $0x820] sm:$0xff]  ;;  %v7911_v41 = vpop.f32.mrf.mxu2  ;;  %v7924_v48 = vpop.f32.mrf.mxu3 }
 0x287   : > { %8128 = vmatpush.bf16.msrb.mxu3 %v7038_v19  ;;  %v5610_v32 = vcvt.s32.f32 %v3562_v54  ;;  %v5612_v47 = vcvt.s32.f32 %v3564_v0  ;;  %v3494_v49 = vunpack.c.0.s8 %v2196_v21  ;;  %v3496_v43 = vunpack.c.1.s8 %v2196_v21  ;;  %v2202_v0 = vld [vmem:[%s10573_s20 + $0x860] sm:$0xff] }
 0x288   : > { %8134 = vmatpush.bf16.msra.mxu0 %v7068_v24  ;;  %v7084_v38 = vpack.c.bf16 %v5580_v6, %v5578_v55  ;;  %v5642_v2 = vcvt.s32.f32 %v3594_v57  ;;  %v5644_v10 = vcvt.s32.f32 %v3596_v37  ;;  %8103 = vmatmul.bf16.vlgmr.msrb.gmra.mxu1 %v10916_v5  ;;  %v3526_v60 = vunpack.c.0.s8 %v10904_v26  ;;  %v2218_v41 = vld [vmem:[%s10573_s20 + $0x8e0] sm:$0xff] }
 0x289   : > { %v7100_v46 = vpack.c.bf16 %v5612_v47, %v5610_v32  ;;  %8116 = vmatmul.bf16.vlgmr.msrb.gmra.mxu2 %v10919_v36  ;;  %v5542_v59 = vcvt.s32.f32 %v3494_v49  ;;  %v5544_v12 = vcvt.s32.f32 %v3496_v43  ;;  %v3528_v15 = vunpack.c.1.s8 %v10904_v26  ;;  %v2210_v43 = vld [vmem:[%s10573_s20 + $0x8a0] sm:$0xff] }
 0x28a   : > { %8147 = vmatpush.bf16.msra.mxu1 %v7084_v38  ;;  %v7116_v21 = vpack.c.bf16 %v5644_v10, %v5642_v2  ;;  %8129 = vmatmul.bf16.vlgmr.msrb.gmra.mxu3 %v10921_v56  ;;  %v5574_v19 = vcvt.s32.f32 %v3526_v60  ;;  %v3558_v55 = vunpack.c.0.s8 %v2212_v14  ;;  %v3560_v54 = vunpack.c.1.s8 %v2212_v14 }
 0x28b   : > { %8160 = vmatpush.bf16.msra.mxu2 %v7100_v46  ;;  %v7066_v24 = vpack.c.bf16 %v5544_v12, %v5542_v59  ;;  %v5576_v6 = vcvt.s32.f32 %v3528_v15  ;;  %v3590_v57 = vunpack.c.0.s8 %v2220_v23  ;;  %v3592_v37 = vunpack.c.1.s8 %v2220_v23  ;;  %v7570_v23 = vld [vmem:[%s12016_s0 + $0x20] sm:$0xff] }
 0x28c   : > { %8173 = vmatpush.bf16.msra.mxu3 %v7116_v21  ;;  %v5606_v26 = vcvt.s32.f32 %v3558_v55  ;;  %v5608_v32 = vcvt.s32.f32 %v3560_v54  ;;  %v3490_v47 = vunpack.c.2.s8 %v2194_v27  ;;  %v3492_v49 = vunpack.c.3.s8 %v2194_v27  ;;  %7615 = vst [vmem:[#allocation1] ss:$9 sm:$0xff] %v7570_v23 }
 0x28d   : > { %8135 = vmatpush.bf16.msra.mxu0 %v7066_v24  ;;  %v7082_v38 = vpack.c.bf16 %v5576_v6, %v5574_v19  ;;  %v5638_v2 = vcvt.s32.f32 %v3590_v57  ;;  %v5640_v10 = vcvt.s32.f32 %v3592_v37  ;;  %v3522_v60 = vunpack.c.2.s8 %v2202_v0 }
 0x28e   : > { %v7098_v14 = vpack.c.bf16 %v5608_v32, %v5606_v26  ;;  %v5538_v48 = vcvt.s32.f32 %v3490_v47  ;;  %v5540_v46 = vcvt.s32.f32 %v3492_v49  ;;  %v3524_v56 = vunpack.c.3.s8 %v2202_v0 }
 0x28f   : > { %8148 = vmatpush.bf16.msra.mxu1 %v7082_v38  ;;  %v7114_v59 = vpack.c.bf16 %v5640_v10, %v5638_v2  ;;  %v5570_v12 = vcvt.s32.f32 %v3522_v60  ;;  %v3554_v15 = vunpack.c.2.s8 %v2210_v43  ;;  %v3556_v21 = vunpack.c.3.s8 %v2210_v43 }
 0x290   : > { %8161 = vmatpush.bf16.msra.mxu2 %v7098_v14  ;;  %v7064_v19 = vpack.c.bf16 %v5540_v46, %v5538_v48  ;;  %v5572_v55 = vcvt.s32.f32 %v3524_v56  ;;  %v3586_v54 = vunpack.c.2.s8 %v2218_v41  ;;  %v3588_v24 = vunpack.c.3.s8 %v2218_v41 }
 0x291   : > { %8174 = vmatpush.bf16.msra.mxu3 %v7114_v59  ;;  %v5602_v6 = vcvt.s32.f32 %v3554_v15  ;;  %v5604_v57 = vcvt.s32.f32 %v3556_v21  ;;  %v7884_v37 = vadd.f32 %v10896_v52, %v10892_v34  ;;  %v3486_v26 = vunpack.c.0.s8 %v2194_v27  ;;  %v2192_v59 = vld [vmem:[%s10573_s20 + $0x810] sm:$0xff] }
 0x292   : > { %8136 = vmatpush.bf16.msra.mxu0 %v7064_v19  ;;  %v7080_v32 = vpack.c.bf16 %v5572_v55, %v5570_v12  ;;  %v5634_v47 = vcvt.s32.f32 %v3586_v54  ;;  %v5636_v49 = vcvt.s32.f32 %v3588_v24  ;;  %v3488_v38 = vunpack.c.1.s8 %v2194_v27  ;;  %v2200_v21 = vld [vmem:[%s10573_s20 + $0x850] sm:$0xff] }
 0x293   : > { %v7096_v2 = vpack.c.bf16 %v5604_v57, %v5602_v6  ;;  %v5534_v10 = vcvt.s32.f32 %v3486_v26  ;;  %v3518_v60 = vunpack.c.0.s8 %v2202_v0  ;;  %v3520_v56 = vunpack.c.1.s8 %v2202_v0  ;;  %v2208_v54 = vld [vmem:[%s10573_s20 + $0x890] sm:$0xff] }
 0x294   : > { %8149 = vmatpush.bf16.msra.mxu1 %v7080_v32  ;;  %v7112_v14 = vpack.c.bf16 %v5636_v49, %v5634_v47  ;;  %v5536_v48 = vcvt.s32.f32 %v3488_v38  ;;  %v3550_v46 = vunpack.c.0.s8 %v2210_v43  ;;  %v3552_v23 = vunpack.c.1.s8 %v2210_v43  ;;  %v2216_v43 = vld [vmem:[%s10573_s20 + $0x8d0] sm:$0xff] }
 0x295   : > { %8162 = vmatpush.bf16.msra.mxu2 %v7096_v2  ;;  %v5566_v34 = vcvt.s32.f32 %v3518_v60  ;;  %v5568_v52 = vcvt.s32.f32 %v3520_v56  ;;  %v3582_v12 = vunpack.c.0.s8 %v2218_v41  ;;  %v3584_v15 = vunpack.c.1.s8 %v2218_v41 }
 0x296   : > { %8175 = vmatpush.bf16.msra.mxu3 %v7112_v14  ;;  %v7062_v27 = vpack.c.bf16 %v5536_v48, %v5534_v10  ;;  %v5598_v19 = vcvt.s32.f32 %v3550_v46  ;;  %v5600_v55 = vcvt.s32.f32 %v3552_v23  ;;  %v7897_v0 = vadd.f32 %v10900_v63, %v7884_v37 }
 0x297   : > { %v7078_v24 = vpack.c.bf16 %v5568_v52, %v5566_v34  ;;  %v5630_v6 = vcvt.s32.f32 %v3582_v12  ;;  %v5632_v57 = vcvt.s32.f32 %v3584_v15  ;;  %v3482_v26 = vunpack.c.2.s8 %v2192_v59 }
 0x298   : > { %8137 = vmatpush.bf16.msra.mxu0 %v7062_v27  ;;  %v7094_v32 = vpack.c.bf16 %v5600_v55, %v5598_v19  ;;  %v3484_v47 = vunpack.c.3.s8 %v2192_v59  ;;  %v3514_v49 = vunpack.c.2.s8 %v2200_v21  ;;  %v3516_v38 = vunpack.c.3.s8 %v2200_v21 }
 0x299   : > { %8150 = vmatpush.bf16.msra.mxu1 %v7078_v24  ;;  %v7110_v41 = vpack.c.bf16 %v5632_v57, %v5630_v6  ;;  %v5530_v2 = vcvt.s32.f32 %v3482_v26  ;;  %v3546_v60 = vunpack.c.2.s8 %v2208_v54  ;;  %v3548_v10 = vunpack.c.3.s8 %v2208_v54 }
 0x29a   : > { %8163 = vmatpush.bf16.msra.mxu2 %v7094_v32  ;;  %v5532_v56 = vcvt.s32.f32 %v3484_v47  ;;  %v5562_v14 = vcvt.s32.f32 %v3514_v49  ;;  %v5564_v63 = vcvt.s32.f32 %v3516_v38  ;;  %v3578_v37 = vunpack.c.2.s8 %v2216_v43  ;;  %v2190_v49 = vld [vmem:[%s10573_s20 + $0x800] sm:$0xff] }
 0x29b   : > { %8176 = vmatpush.bf16.msra.mxu3 %v7110_v41  ;;  %v5594_v48 = vcvt.s32.f32 %v3546_v60  ;;  %v5596_v46 = vcvt.s32.f32 %v3548_v10  ;;  %v3580_v23 = vunpack.c.3.s8 %v2216_v43  ;;  %v7910_v34 = vadd.f32 %v10906_v50, %v7897_v0  ;;  %v10948_v60 = vpop.f32.mrf.mxu0 }
 0x29c   : > { %v7060_v52 = vpack.c.bf16 %v5532_v56, %v5530_v2  ;;  %v7076_v12 = vpack.c.bf16 %v5564_v63, %v5562_v14  ;;  %v5626_v15 = vcvt.s32.f32 %v3578_v37  ;;  %v3478_v27 = vunpack.c.0.s8 %v2192_v59  ;;  %v2198_v2 = vld [vmem:[%s10573_s20 + $0x840] sm:$0xff] }
 0x29d   : > { %v7092_v19 = vpack.c.bf16 %v5596_v46, %v5594_v48  ;;  %v5628_v55 = vcvt.s32.f32 %v3580_v23  ;;  %v10944_v24 = vadd.f32 %v10908_v33, %v7910_v34  ;;  %v3480_v6 = vunpack.c.1.s8 %v2192_v59  ;;  %v2206_v14 = vld [vmem:[%s10573_s20 + $0x880] sm:$0xff] }
 0x29e   : > { %8138 = vmatpush.bf16.msra.mxu0 %v7060_v52  ;;  %8151 = vmatpush.bf16.msra.mxu1 %v7076_v12  ;;  %v5526_v57 = vcvt.s32.f32 %v3478_v27  ;;  %v3510_v26 = vunpack.c.0.s8 %v2200_v21  ;;  %v3512_v32 = vunpack.c.1.s8 %v2200_v21  ;;  %v3542_v47 = vunpack.c.0.s8 %v2208_v54 }
 0x29f   : > { %8164 = vmatpush.bf16.msra.mxu2 %v7092_v19  ;;  %v7108_v50 = vpack.c.bf16 %v5628_v55, %v5626_v15  ;;  %v5528_v0 = vcvt.s32.f32 %v3480_v6  ;;  %v3544_v38 = vunpack.c.1.s8 %v2208_v54  ;;  %v3574_v41 = vunpack.c.0.s8 %v2216_v43  ;;  %v2214_v54 = vld [vmem:[%s10573_s20 + $0x8c0] sm:$0xff] }
 0x2a0   : > { %v5558_v33 = vcvt.s32.f32 %v3510_v26  ;;  %v5560_v10 = vcvt.s32.f32 %v3512_v32  ;;  %v5590_v59 = vcvt.s32.f32 %v3542_v47  ;;  %v3576_v56 = vunpack.c.1.s8 %v2216_v43  ;;  %v10952_v32 = vpop.f32.mrf.mxu1 }
 0x2a1   : > { %8177 = vmatpush.bf16.msra.mxu3 %v7108_v50  ;;  %v7058_v63 = vpack.c.bf16 %v5528_v0, %v5526_v57  ;;  %v5592_v37 = vcvt.s32.f32 %v3544_v38  ;;  %v5622_v21 = vcvt.s32.f32 %v3574_v41  ;;  %v3474_v48 = vunpack.c.2.s8 %v2190_v49 }
 0x2a2   : > { %v7074_v46 = vpack.c.bf16 %v5560_v10, %v5558_v33  ;;  %v5624_v23 = vcvt.s32.f32 %v3576_v56  ;;  %v3476_v34 = vunpack.c.3.s8 %v2190_v49  ;;  %v3506_v52 = vunpack.c.2.s8 %v2198_v2 }
 0x2a3   : > { %8139 = vmatpush.bf16.msra.mxu0 %v7058_v63  ;;  %v7090_v12 = vpack.c.bf16 %v5592_v37, %v5590_v59  ;;  %v5522_v15 = vcvt.s32.f32 %v3474_v48  ;;  %v3508_v27 = vunpack.c.3.s8 %v2198_v2  ;;  %v3538_v19 = vunpack.c.2.s8 %v2206_v14 }
 0x2a4   : > { %8152 = vmatpush.bf16.msra.mxu1 %v7074_v46  ;;  %v7106_v55 = vpack.c.bf16 %v5624_v23, %v5622_v21  ;;  %v5524_v6 = vcvt.s32.f32 %v3476_v34  ;;  %v5554_v43 = vcvt.s32.f32 %v3506_v52  ;;  %v3540_v26 = vunpack.c.3.s8 %v2206_v14  ;;  %v7937_v21 = vpop.f32.mrf.mxu0  ;;  %v2228_v52 = vld [vmem:[%s10573_s20 + $0x930] sm:$0xff] }
 0x2a5   : > { %8165 = vmatpush.bf16.msra.mxu2 %v7090_v12  ;;  %v5556_v57 = vcvt.s32.f32 %v3508_v27  ;;  %v5586_v47 = vcvt.s32.f32 %v3538_v19  ;;  %v3570_v50 = vunpack.c.2.s8 %v2214_v54  ;;  %v3572_v0 = vunpack.c.3.s8 %v2214_v54 }
 0x2a6   : > { %8178 = vmatpush.bf16.msra.mxu3 %v7106_v55  ;;  %v7056_v38 = vpack.c.bf16 %v5524_v6, %v5522_v15  ;;  %v5588_v41 = vcvt.s32.f32 %v3540_v26  ;;  %v3470_v33 = vunpack.c.0.s8 %v2190_v49  ;;  %v3472_v10 = vunpack.c.1.s8 %v2190_v49  ;;  %v10956_v55 = vld [vmem:[%s10573_s20 + $0x970] sm:$0xff] }
 0x2a7   : > { %v7072_v59 = vpack.c.bf16 %v5556_v57, %v5554_v43  ;;  %v5618_v56 = vcvt.s32.f32 %v3570_v50  ;;  %v5620_v63 = vcvt.s32.f32 %v3572_v0  ;;  %v3502_v37 = vunpack.c.0.s8 %v2198_v2  ;;  %v10958_v57 = vpop.f32.mrf.mxu2 }
 0x2a8   : > { %8140 = vmatpush.bf16.msra.mxu0 %v7056_v38  ;;  %v7088_v48 = vpack.c.bf16 %v5588_v41, %v5586_v47  ;;  %v5518_v46 = vcvt.s32.f32 %v3470_v33  ;;  %v5520_v23 = vcvt.s32.f32 %v3472_v10  ;;  %v3504_v34 = vunpack.c.1.s8 %v2198_v2  ;;  %v10960_v47 = vpop.f32.mrf.mxu3  ;;  %v2244_v41 = vld [vmem:[%s10573_s20 + $0x9b0] sm:$0xff] }
 0x2a9   : > { %8153 = vmatpush.bf16.msra.mxu1 %v7072_v59  ;;  %v7104_v12 = vpack.c.bf16 %v5620_v63, %v5618_v56  ;;  %v5550_v27 = vcvt.s32.f32 %v3502_v37  ;;  %v3534_v15 = vunpack.c.0.s8 %v2206_v14  ;;  %v3536_v19 = vunpack.c.1.s8 %v2206_v14  ;;  %v2252_v56 = vld [vmem:[%s10573_s20 + $0x9f0] sm:$0xff]  ;;  %v10965_v63 = vld [vmem:[#allocation1] sm:$0xff] }
 0x2aa   : > { %8166 = vmatpush.bf16.msra.mxu2 %v7088_v48  ;;  %v7054_v49 = vpack.c.bf16 %v5520_v23, %v5518_v46  ;;  %v5552_v6 = vcvt.s32.f32 %v3504_v34  ;;  %v3566_v43 = vunpack.c.0.s8 %v2214_v54  ;;  %v3568_v26 = vunpack.c.1.s8 %v2214_v54  ;;  %12070 = vst [vmem:[#allocation15_spill] sm:$0xff] %v10965_v63  ;;  %v7950_v54 = vpop.f32.mrf.mxu1 }
 0x2ab   : > { %8179 = vmatpush.bf16.msra.mxu3 %v7104_v12  ;;  %v5582_v2 = vcvt.s32.f32 %v3534_v15  ;;  %v5584_v50 = vcvt.s32.f32 %v3536_v19  ;;  %v3626_v0 = vunpack.c.2.s8 %v2228_v52  ;;  %v3628_v38 = vunpack.c.3.s8 %v2228_v52  ;;  %v10968_v19 = vld [vmem:[#allocation1 + $0x9] sm:$0xff] }
 0x2ac   : > { %8141 = vmatpush.bf16.msra.mxu0 %v7054_v49  ;;  %v7070_v14 = vpack.c.bf16 %v5552_v6, %v5550_v27  ;;  %v5614_v33 = vcvt.s32.f32 %v3566_v43  ;;  %v5616_v10 = vcvt.s32.f32 %v3568_v26  ;;  %v3658_v59 = vunpack.c.2.s8 %v10956_v55  ;;  %12071 = vst [vmem:[#allocation16_spill] sm:$0xff] %v10968_v19  ;;  %v10971_v26 = vld [vmem:[#allocation1 + $0x12] sm:$0xff] }
 0x2ad   : > { %v7086_v37 = vpack.c.bf16 %v5584_v50, %v5582_v2  ;;  %v5674_v21 = vcvt.s32.f32 %v3626_v0  ;;  %v5676_v48 = vcvt.s32.f32 %v3628_v38  ;;  %v3660_v46 = vunpack.c.3.s8 %v10956_v55  ;;  %12072 = vst [vmem:[#allocation17_spill] sm:$0xff] %v10971_v26  ;;  %v10973_v0 = vld [vmem:[#allocation1 + $0x1b] sm:$0xff] }
 0x2ae   : > { %8154 = vmatpush.bf16.msra.mxu1 %v7070_v14  ;;  %v7102_v23 = vpack.c.bf16 %v5616_v10, %v5614_v33  ;;  %v5706_v34 = vcvt.s32.f32 %v3658_v59  ;;  %v3690_v12 = vunpack.c.2.s8 %v2244_v41  ;;  %v3692_v15 = vunpack.c.3.s8 %v2244_v41  ;;  %12073 = vst [vmem:[#allocation18_spill] sm:$0xff] %v10973_v0 }
 0x2af   : > { %8167 = vmatpush.bf16.msra.mxu2 %v7086_v37  ;;  %v7132_v27 = vpack.c.bf16 %v5676_v48, %v5674_v21  ;;  %v5708_v49 = vcvt.s32.f32 %v3660_v46  ;;  %v3722_v6 = vunpack.c.2.s8 %v2252_v56  ;;  %v3724_v43 = vunpack.c.3.s8 %v2252_v56  ;;  %8142 = vmatmul.bf16.vlgmr.msra.gmra.mxu0 %v10965_v63 }
 0x2b0   : > { %8180 = vmatpush.bf16.msra.mxu3 %v7102_v23  ;;  %v5738_v2 = vcvt.s32.f32 %v3690_v12  ;;  %v5740_v50 = vcvt.s32.f32 %v3692_v15  ;;  %v3622_v38 = vunpack.c.0.s8 %v2228_v52  ;;  %v3624_v14 = vunpack.c.1.s8 %v2228_v52  ;;  %v2226_v23 = vld [vmem:[%s10573_s20 + $0x920] sm:$0xff]  ;;  %v7963_v12 = vpop.f32.mrf.mxu2  ;;  %v7976_v15 = vpop.f32.mrf.mxu3 }
 0x2b1   : > { %8186 = vmatpush.bf16.msrb.mxu0 %v7132_v27  ;;  %v7148_v33 = vpack.c.bf16 %v5708_v49, %v5706_v34  ;;  %v5770_v10 = vcvt.s32.f32 %v3722_v6  ;;  %v5772_v59 = vcvt.s32.f32 %v3724_v43  ;;  %8155 = vmatmul.bf16.vlgmr.msra.gmra.mxu1 %v10968_v19  ;;  %v3654_v54 = vunpack.c.0.s8 %v10956_v55  ;;  %v2234_v6 = vld [vmem:[%s10573_s20 + $0x960] sm:$0xff] }
 0x2b2   : > { %v7164_v37 = vpack.c.bf16 %v5740_v50, %v5738_v2  ;;  %8168 = vmatmul.bf16.vlgmr.msra.gmra.mxu2 %v10971_v26  ;;  %v5670_v21 = vcvt.s32.f32 %v3622_v38  ;;  %v5672_v48 = vcvt.s32.f32 %v3624_v14  ;;  %v3656_v46 = vunpack.c.1.s8 %v10956_v55  ;;  %v2250_v26 = vld [vmem:[%s10573_s20 + $0x9e0] sm:$0xff] }
 0x2b3   : > { %8199 = vmatpush.bf16.msrb.mxu1 %v7148_v33  ;;  %v7180_v52 = vpack.c.bf16 %v5772_v59, %v5770_v10  ;;  %8181 = vmatmul.bf16.vlgmr.msra.gmra.mxu3 %v10973_v0  ;;  %v5702_v34 = vcvt.s32.f32 %v3654_v54  ;;  %v3686_v27 = vunpack.c.0.s8 %v2244_v41  ;;  %v3688_v49 = vunpack.c.1.s8 %v2244_v41  ;;  %v2242_v33 = vld [vmem:[%s10573_s20 + $0x9a0] sm:$0xff] }
 0x2b4   : > { %8212 = vmatpush.bf16.msrb.mxu2 %v7164_v37  ;;  %v7130_v43 = vpack.c.bf16 %v5672_v48, %v5670_v21  ;;  %v5704_v2 = vcvt.s32.f32 %v3656_v46  ;;  %v3718_v50 = vunpack.c.0.s8 %v2252_v56  ;;  %v3720_v38 = vunpack.c.1.s8 %v2252_v56 }
 0x2b5   : > { %8225 = vmatpush.bf16.msrb.mxu3 %v7180_v52  ;;  %v5734_v55 = vcvt.s32.f32 %v3686_v27  ;;  %v5736_v14 = vcvt.s32.f32 %v3688_v49  ;;  %v3618_v12 = vunpack.c.2.s8 %v2226_v23  ;;  %v3620_v15 = vunpack.c.3.s8 %v2226_v23 }
 0x2b6   : > { %8187 = vmatpush.bf16.msrb.mxu0 %v7130_v43  ;;  %v7146_v10 = vpack.c.bf16 %v5704_v2, %v5702_v34  ;;  %v5766_v59 = vcvt.s32.f32 %v3718_v50  ;;  %v5768_v0 = vcvt.s32.f32 %v3720_v38  ;;  %v3650_v54 = vunpack.c.2.s8 %v2234_v6 }
 0x2b7   : > { %v7162_v41 = vpack.c.bf16 %v5736_v14, %v5734_v55  ;;  %v5666_v19 = vcvt.s32.f32 %v3618_v12  ;;  %v5668_v37 = vcvt.s32.f32 %v3620_v15  ;;  %v3652_v63 = vunpack.c.3.s8 %v2234_v6 }
 0x2b8   : > { %8200 = vmatpush.bf16.msrb.mxu1 %v7146_v10  ;;  %v7178_v21 = vpack.c.bf16 %v5768_v0, %v5766_v59  ;;  %v5698_v48 = vcvt.s32.f32 %v3650_v54  ;;  %v3682_v56 = vunpack.c.2.s8 %v2242_v33  ;;  %v3684_v46 = vunpack.c.3.s8 %v2242_v33 }
 0x2b9   : > { %8213 = vmatpush.bf16.msrb.mxu2 %v7162_v41  ;;  %v7128_v52 = vpack.c.bf16 %v5668_v37, %v5666_v19  ;;  %v5700_v27 = vcvt.s32.f32 %v3652_v63  ;;  %v3714_v49 = vunpack.c.2.s8 %v2250_v26  ;;  %v3716_v36 = vunpack.c.3.s8 %v2250_v26  ;;  %v2224_v37 = vld [vmem:[%s10573_s20 + $0x910] sm:$0xff] }
 0x2ba   : > { %8226 = vmatpush.bf16.msrb.mxu3 %v7178_v21  ;;  %v5730_v34 = vcvt.s32.f32 %v3682_v56  ;;  %v5732_v43 = vcvt.s32.f32 %v3684_v46  ;;  %v7936_v2 = vadd.f32 %v10948_v60, %v10944_v24  ;;  %v3614_v50 = vunpack.c.0.s8 %v2226_v23 }
 0x2bb   : > { %8188 = vmatpush.bf16.msrb.mxu0 %v7128_v52  ;;  %v7144_v38 = vpack.c.bf16 %v5700_v27, %v5698_v48  ;;  %v5762_v55 = vcvt.s32.f32 %v3714_v49  ;;  %v5764_v0 = vcvt.s32.f32 %v3716_v36  ;;  %v3616_v14 = vunpack.c.1.s8 %v2226_v23  ;;  %v2232_v36 = vld [vmem:[%s10573_s20 + $0x950] sm:$0xff] }
 0x2bc   : > { %v7160_v12 = vpack.c.bf16 %v5732_v43, %v5730_v34  ;;  %v5662_v15 = vcvt.s32.f32 %v3614_v50  ;;  %v3646_v19 = vunpack.c.0.s8 %v2234_v6  ;;  %v3648_v63 = vunpack.c.1.s8 %v2234_v6  ;;  %v2240_v52 = vld [vmem:[%s10573_s20 + $0x990] sm:$0xff] }
 0x2bd   : > { %8201 = vmatpush.bf16.msrb.mxu1 %v7144_v38  ;;  %v7176_v10 = vpack.c.bf16 %v5764_v0, %v5762_v55  ;;  %v5664_v59 = vcvt.s32.f32 %v3616_v14  ;;  %v3678_v54 = vunpack.c.0.s8 %v2242_v33  ;;  %v3680_v41 = vunpack.c.1.s8 %v2242_v33  ;;  %v2248_v33 = vld [vmem:[%s10573_s20 + $0x9d0] sm:$0xff] }
 0x2be   : > { %8214 = vmatpush.bf16.msrb.mxu2 %v7160_v12  ;;  %v5694_v24 = vcvt.s32.f32 %v3646_v19  ;;  %v5696_v60 = vcvt.s32.f32 %v3648_v63  ;;  %v3710_v21 = vunpack.c.0.s8 %v2250_v26  ;;  %v3712_v48 = vunpack.c.1.s8 %v2250_v26 }
 0x2bf   : > { %8227 = vmatpush.bf16.msrb.mxu3 %v7176_v10  ;;  %v7126_v23 = vpack.c.bf16 %v5664_v59, %v5662_v15  ;;  %v5726_v56 = vcvt.s32.f32 %v3678_v54  ;;  %v5728_v46 = vcvt.s32.f32 %v3680_v41  ;;  %v7949_v6 = vadd.f32 %v10952_v32, %v7936_v2 }
 0x2c0   : > { %v7142_v27 = vpack.c.bf16 %v5696_v60, %v5694_v24  ;;  %v5758_v49 = vcvt.s32.f32 %v3710_v21  ;;  %v5760_v34 = vcvt.s32.f32 %v3712_v48  ;;  %v3610_v43 = vunpack.c.2.s8 %v2224_v37 }
 0x2c1   : > { %8189 = vmatpush.bf16.msrb.mxu0 %v7126_v23  ;;  %v7158_v50 = vpack.c.bf16 %v5728_v46, %v5726_v56  ;;  %v3612_v38 = vunpack.c.3.s8 %v2224_v37  ;;  %v3642_v55 = vunpack.c.2.s8 %v2232_v36  ;;  %v3644_v0 = vunpack.c.3.s8 %v2232_v36 }
 0x2c2   : > { %8202 = vmatpush.bf16.msrb.mxu1 %v7142_v27  ;;  %v7174_v26 = vpack.c.bf16 %v5760_v34, %v5758_v49  ;;  %v5658_v14 = vcvt.s32.f32 %v3610_v43  ;;  %v3674_v12 = vunpack.c.2.s8 %v2240_v52  ;;  %v3676_v15 = vunpack.c.3.s8 %v2240_v52 }
 0x2c3   : > { %8215 = vmatpush.bf16.msrb.mxu2 %v7158_v50  ;;  %v5660_v19 = vcvt.s32.f32 %v3612_v38  ;;  %v5690_v63 = vcvt.s32.f32 %v3642_v55  ;;  %v5692_v32 = vcvt.s32.f32 %v3644_v0  ;;  %v3706_v2 = vunpack.c.2.s8 %v2248_v33  ;;  %v2222_v38 = vld [vmem:[%s10573_s20 + $0x900] sm:$0xff] }
 0x2c4   : > { %8228 = vmatpush.bf16.msrb.mxu3 %v7174_v26  ;;  %v5722_v10 = vcvt.s32.f32 %v3674_v12  ;;  %v5724_v59 = vcvt.s32.f32 %v3676_v15  ;;  %v3708_v54 = vunpack.c.3.s8 %v2248_v33  ;;  %v7962_v41 = vadd.f32 %v10958_v57, %v7949_v6  ;;  %v2230_v26 = vld [vmem:[%s10573_s20 + $0x940] sm:$0xff] }
 0x2c5   : > { %v7124_v24 = vpack.c.bf16 %v5660_v19, %v5658_v14  ;;  %v7140_v60 = vpack.c.bf16 %v5692_v32, %v5690_v63  ;;  %v5754_v21 = vcvt.s32.f32 %v3706_v2  ;;  %v3606_v48 = vunpack.c.0.s8 %v2224_v37  ;;  %v10997_v14 = vpop.f32.mrf.mxu0  ;;  %v2238_v19 = vld [vmem:[%s10573_s20 + $0x980] sm:$0xff] }
 0x2c6   : > { %v7156_v23 = vpack.c.bf16 %v5724_v59, %v5722_v10  ;;  %v5756_v56 = vcvt.s32.f32 %v3708_v54  ;;  %v10993_v46 = vadd.f32 %v10960_v47, %v7962_v41  ;;  %v3608_v27 = vunpack.c.1.s8 %v2224_v37 }
 0x2c7   : > { %8190 = vmatpush.bf16.msrb.mxu0 %v7124_v24  ;;  %8203 = vmatpush.bf16.msrb.mxu1 %v7140_v60  ;;  %v5654_v49 = vcvt.s32.f32 %v3606_v48  ;;  %v3638_v34 = vunpack.c.0.s8 %v2232_v36  ;;  %v3640_v43 = vunpack.c.1.s8 %v2232_v36  ;;  %v3670_v50 = vunpack.c.0.s8 %v2240_v52 }
 0x2c8   : > { %8216 = vmatpush.bf16.msrb.mxu2 %v7156_v23  ;;  %v7172_v57 = vpack.c.bf16 %v5756_v56, %v5754_v21  ;;  %v5656_v6 = vcvt.s32.f32 %v3608_v27  ;;  %v3672_v55 = vunpack.c.1.s8 %v2240_v52  ;;  %v3702_v0 = vunpack.c.0.s8 %v2248_v33  ;;  %v2246_v52 = vld [vmem:[%s10573_s20 + $0x9c0] sm:$0xff] }
 0x2c9   : > { %v5686_v47 = vcvt.s32.f32 %v3638_v34  ;;  %v5688_v12 = vcvt.s32.f32 %v3640_v43  ;;  %v5718_v37 = vcvt.s32.f32 %v3670_v50  ;;  %v3704_v15 = vunpack.c.1.s8 %v2248_v33  ;;  %v11001_v34 = vpop.f32.mrf.mxu1 }
 0x2ca   : > { %8229 = vmatpush.bf16.msrb.mxu3 %v7172_v57  ;;  %v7122_v63 = vpack.c.bf16 %v5656_v6, %v5654_v49  ;;  %v5720_v32 = vcvt.s32.f32 %v3672_v55  ;;  %v5750_v36 = vcvt.s32.f32 %v3702_v0  ;;  %v3602_v2 = vunpack.c.2.s8 %v2222_v38 }
 0x2cb   : > { %v7138_v10 = vpack.c.bf16 %v5688_v12, %v5686_v47  ;;  %v5752_v59 = vcvt.s32.f32 %v3704_v15  ;;  %v3604_v54 = vunpack.c.3.s8 %v2222_v38  ;;  %v3634_v41 = vunpack.c.2.s8 %v2230_v26 }
 0x2cc   : > { %8191 = vmatpush.bf16.msrb.mxu0 %v7122_v63  ;;  %v7154_v24 = vpack.c.bf16 %v5720_v32, %v5718_v37  ;;  %v5650_v60 = vcvt.s32.f32 %v3602_v2  ;;  %v3636_v21 = vunpack.c.3.s8 %v2230_v26  ;;  %v3666_v48 = vunpack.c.2.s8 %v2238_v19 }
 0x2cd   : > { %8204 = vmatpush.bf16.msrb.mxu1 %v7138_v10  ;;  %v7170_v23 = vpack.c.bf16 %v5752_v59, %v5750_v36  ;;  %v5652_v56 = vcvt.s32.f32 %v3604_v54  ;;  %v5682_v33 = vcvt.s32.f32 %v3634_v41  ;;  %v3668_v27 = vunpack.c.3.s8 %v2238_v19  ;;  %v7989_v32 = vpop.f32.mrf.mxu0  ;;  %v2260_v54 = vld [vmem:[%s10573_s20 + $0xa30] sm:$0xff] }
 0x2ce   : > { %8217 = vmatpush.bf16.msrb.mxu2 %v7154_v24  ;;  %v5684_v49 = vcvt.s32.f32 %v3636_v21  ;;  %v5714_v43 = vcvt.s32.f32 %v3666_v48  ;;  %v3698_v50 = vunpack.c.2.s8 %v2246_v52  ;;  %v3700_v57 = vunpack.c.3.s8 %v2246_v52  ;;  %v11005_v48 = vld [vmem:[%s10573_s20 + $0xa70] sm:$0xff] }
 0x2cf   : > { %8230 = vmatpush.bf16.msrb.mxu3 %v7170_v23  ;;  %v7120_v6 = vpack.c.bf16 %v5652_v56, %v5650_v60  ;;  %v5716_v55 = vcvt.s32.f32 %v3668_v27  ;;  %v3598_v0 = vunpack.c.0.s8 %v2222_v38  ;;  %v3600_v47 = vunpack.c.1.s8 %v2222_v38  ;;  %v11007_v27 = vpop.f32.mrf.mxu2 }
 0x2d0   : > { %v7136_v12 = vpack.c.bf16 %v5684_v49, %v5682_v33  ;;  %v5746_v37 = vcvt.s32.f32 %v3698_v50  ;;  %v5748_v15 = vcvt.s32.f32 %v3700_v57  ;;  %v3630_v63 = vunpack.c.0.s8 %v2230_v26  ;;  %v11009_v49 = vpop.f32.mrf.mxu3 }
 0x2d1   : > { %8192 = vmatpush.bf16.msrb.mxu0 %v7120_v6  ;;  %v7152_v36 = vpack.c.bf16 %v5716_v55, %v5714_v43  ;;  %v5646_v2 = vcvt.s32.f32 %v3598_v0  ;;  %v5648_v10 = vcvt.s32.f32 %v3600_v47  ;;  %v3632_v59 = vunpack.c.1.s8 %v2230_v26  ;;  %v2276_v6 = vld [vmem:[%s10573_s20 + $0xab0] sm:$0xff] }
 0x2d2   : > { %8205 = vmatpush.bf16.msrb.mxu1 %v7136_v12  ;;  %v7168_v41 = vpack.c.bf16 %v5748_v15, %v5746_v37  ;;  %v5678_v24 = vcvt.s32.f32 %v3630_v63  ;;  %v3662_v60 = vunpack.c.0.s8 %v2238_v19  ;;  %v3664_v21 = vunpack.c.1.s8 %v2238_v19  ;;  %v2284_v12 = vld [vmem:[%s10573_s20 + $0xaf0] sm:$0xff]  ;;  %v11014_v37 = vld [vmem:[#allocation1 + $0x24] sm:$0xff] }
 0x2d3   : > { %8218 = vmatpush.bf16.msrb.mxu2 %v7152_v36  ;;  %v7118_v38 = vpack.c.bf16 %v5648_v10, %v5646_v2  ;;  %v5680_v23 = vcvt.s32.f32 %v3632_v59  ;;  %v3694_v56 = vunpack.c.0.s8 %v2246_v52  ;;  %v3696_v33 = vunpack.c.1.s8 %v2246_v52  ;;  %12074 = vst [vmem:[#allocation19_spill] sm:$0xff] %v11014_v37  ;;  %v8002_v52 = vpop.f32.mrf.mxu1 }
 0x2d4   : > { %8231 = vmatpush.bf16.msrb.mxu3 %v7168_v41  ;;  %v5710_v26 = vcvt.s32.f32 %v3662_v60  ;;  %v5712_v43 = vcvt.s32.f32 %v3664_v21  ;;  %v3754_v50 = vunpack.c.2.s8 %v2260_v54  ;;  %v3756_v57 = vunpack.c.3.s8 %v2260_v54  ;;  %v11017_v60 = vld [vmem:[#allocation1 + $0x2d] sm:$0xff] }
 0x2d5   : > { %8193 = vmatpush.bf16.msrb.mxu0 %v7118_v38  ;;  %v7134_v19 = vpack.c.bf16 %v5680_v23, %v5678_v24  ;;  %v5742_v55 = vcvt.s32.f32 %v3694_v56  ;;  %v5744_v0 = vcvt.s32.f32 %v3696_v33  ;;  %v3786_v47 = vunpack.c.2.s8 %v11005_v48  ;;  %12075 = vst [vmem:[#allocation20_spill] sm:$0xff] %v11017_v60  ;;  %v11020_v56 = vld [vmem:[#allocation1 + $0x36] sm:$0xff] }
 0x2d6   : > { %v7150_v15 = vpack.c.bf16 %v5712_v43, %v5710_v26  ;;  %v5802_v63 = vcvt.s32.f32 %v3754_v50  ;;  %v5804_v32 = vcvt.s32.f32 %v3756_v57  ;;  %v3788_v36 = vunpack.c.3.s8 %v11005_v48  ;;  %12076 = vst [vmem:[#allocation21_spill] sm:$0xff] %v11020_v56  ;;  %v11022_v43 = vld [vmem:[#allocation1 + $0x3f] sm:$0xff] }
 0x2d7   : > { %8206 = vmatpush.bf16.msrb.mxu1 %v7134_v19  ;;  %v7166_v2 = vpack.c.bf16 %v5744_v0, %v5742_v55  ;;  %v5834_v10 = vcvt.s32.f32 %v3786_v47  ;;  %v3818_v59 = vunpack.c.2.s8 %v2276_v6  ;;  %v3820_v41 = vunpack.c.3.s8 %v2276_v6  ;;  %12077 = vst [vmem:[#allocation22_spill] sm:$0xff] %v11022_v43 }
 0x2d8   : > { %8219 = vmatpush.bf16.msrb.mxu2 %v7150_v15  ;;  %v7196_v24 = vpack.c.bf16 %v5804_v32, %v5802_v63  ;;  %v5836_v21 = vcvt.s32.f32 %v3788_v36  ;;  %v3850_v38 = vunpack.c.2.s8 %v2284_v12  ;;  %v3852_v23 = vunpack.c.3.s8 %v2284_v12  ;;  %8194 = vmatmul.bf16.vlgmr.msrb.gmra.mxu0 %v11014_v37  ;;  %v2258_v36 = vld [vmem:[%s10573_s20 + $0xa20] sm:$0xff] }
 0x2d9   : > { %8232 = vmatpush.bf16.msrb.mxu3 %v7166_v2  ;;  %v5866_v33 = vcvt.s32.f32 %v3818_v59  ;;  %v5868_v26 = vcvt.s32.f32 %v3820_v41  ;;  %v3750_v50 = vunpack.c.0.s8 %v2260_v54  ;;  %v3752_v57 = vunpack.c.1.s8 %v2260_v54  ;;  %v8015_v2 = vpop.f32.mrf.mxu2  ;;  %v8028_v59 = vpop.f32.mrf.mxu3 }
 0x2da   : > { %8238 = vmatpush.bf16.msra.mxu0 %v7196_v24  ;;  %v7212_v19 = vpack.c.bf16 %v5836_v21, %v5834_v10  ;;  %v5898_v55 = vcvt.s32.f32 %v3850_v38  ;;  %v5900_v0 = vcvt.s32.f32 %v3852_v23  ;;  %8207 = vmatmul.bf16.vlgmr.msrb.gmra.mxu1 %v11017_v60  ;;  %v3782_v47 = vunpack.c.0.s8 %v11005_v48  ;;  %v2266_v21 = vld [vmem:[%s10573_s20 + $0xa60] sm:$0xff] }
 0x2db   : > { %v7228_v52 = vpack.c.bf16 %v5868_v26, %v5866_v33  ;;  %8220 = vmatmul.bf16.vlgmr.msrb.gmra.mxu2 %v11020_v56  ;;  %v5798_v15 = vcvt.s32.f32 %v3750_v50  ;;  %v5800_v63 = vcvt.s32.f32 %v3752_v57  ;;  %v3784_v32 = vunpack.c.1.s8 %v11005_v48 }
 0x2dc   : > { %8251 = vmatpush.bf16.msra.mxu1 %v7212_v19  ;;  %v7244_v54 = vpack.c.bf16 %v5900_v0, %v5898_v55  ;;  %8233 = vmatmul.bf16.vlgmr.msrb.gmra.mxu3 %v11022_v43  ;;  %v5830_v10 = vcvt.s32.f32 %v3782_v47  ;;  %v3814_v41 = vunpack.c.0.s8 %v2276_v6  ;;  %v3816_v24 = vunpack.c.1.s8 %v2276_v6  ;;  %v2274_v19 = vld [vmem:[%s10573_s20 + $0xaa0] sm:$0xff] }
 0x2dd   : > { %8264 = vmatpush.bf16.msra.mxu2 %v7228_v52  ;;  %v7194_v38 = vpack.c.bf16 %v5800_v63, %v5798_v15  ;;  %v5832_v23 = vcvt.s32.f32 %v3784_v32  ;;  %v3846_v33 = vunpack.c.0.s8 %v2284_v12  ;;  %v3848_v26 = vunpack.c.1.s8 %v2284_v12  ;;  %v2282_v43 = vld [vmem:[%s10573_s20 + $0xae0] sm:$0xff] }
 0x2de   : > { %8277 = vmatpush.bf16.msra.mxu3 %v7244_v54  ;;  %v5862_v48 = vcvt.s32.f32 %v3814_v41  ;;  %v5864_v50 = vcvt.s32.f32 %v3816_v24  ;;  %v3746_v57 = vunpack.c.2.s8 %v2258_v36  ;;  %v3748_v2 = vunpack.c.3.s8 %v2258_v36  ;;  %v7571_v12 = vld [vmem:[%s12016_s0 + $0x28] sm:$0xff] }
 0x2df   : > { %8239 = vmatpush.bf16.msra.mxu0 %v7194_v38  ;;  %v7210_v55 = vpack.c.bf16 %v5832_v23, %v5830_v10  ;;  %v5894_v0 = vcvt.s32.f32 %v3846_v33  ;;  %v5896_v59 = vcvt.s32.f32 %v3848_v26  ;;  %v3778_v47 = vunpack.c.2.s8 %v2266_v21  ;;  %7625 = vst [vmem:[#allocation1] ss:$9 sm:$0xff] %v7571_v12 }
 0x2e0   : > { %v7226_v6 = vpack.c.bf16 %v5864_v50, %v5862_v48  ;;  %v5794_v56 = vcvt.s32.f32 %v3746_v57  ;;  %v5796_v52 = vcvt.s32.f32 %v3748_v2  ;;  %v3780_v60 = vunpack.c.3.s8 %v2266_v21 }
 0x2e1   : > { %8252 = vmatpush.bf16.msra.mxu1 %v7210_v55  ;;  %v7242_v15 = vpack.c.bf16 %v5896_v59, %v5894_v0  ;;  %v5826_v63 = vcvt.s32.f32 %v3778_v47  ;;  %v3810_v32 = vunpack.c.2.s8 %v2274_v19  ;;  %v3812_v54 = vunpack.c.3.s8 %v2274_v19 }
 0x2e2   : > { %8265 = vmatpush.bf16.msra.mxu2 %v7226_v6  ;;  %v7192_v10 = vpack.c.bf16 %v5796_v52, %v5794_v56  ;;  %v5828_v41 = vcvt.s32.f32 %v3780_v60  ;;  %v3842_v24 = vunpack.c.2.s8 %v2282_v43  ;;  %v3844_v38 = vunpack.c.3.s8 %v2282_v43 }
 0x2e3   : > { %8278 = vmatpush.bf16.msra.mxu3 %v7242_v15  ;;  %v5858_v23 = vcvt.s32.f32 %v3810_v32  ;;  %v5860_v33 = vcvt.s32.f32 %v3812_v54  ;;  %v7988_v26 = vadd.f32 %v10997_v14, %v10993_v46  ;;  %v3742_v48 = vunpack.c.0.s8 %v2258_v36  ;;  %v2256_v15 = vld [vmem:[%s10573_s20 + $0xa10] sm:$0xff] }
 0x2e4   : > { %8240 = vmatpush.bf16.msra.mxu0 %v7192_v10  ;;  %v7208_v50 = vpack.c.bf16 %v5828_v41, %v5826_v63  ;;  %v5890_v57 = vcvt.s32.f32 %v3842_v24  ;;  %v5892_v2 = vcvt.s32.f32 %v3844_v38  ;;  %v3744_v55 = vunpack.c.1.s8 %v2258_v36  ;;  %v2264_v54 = vld [vmem:[%s10573_s20 + $0xa50] sm:$0xff] }
 0x2e5   : > { %v7224_v0 = vpack.c.bf16 %v5860_v33, %v5858_v23  ;;  %v5790_v59 = vcvt.s32.f32 %v3742_v48  ;;  %v3774_v56 = vunpack.c.0.s8 %v2266_v21  ;;  %v3776_v60 = vunpack.c.1.s8 %v2266_v21  ;;  %v2272_v24 = vld [vmem:[%s10573_s20 + $0xa90] sm:$0xff] }
 0x2e6   : > { %8253 = vmatpush.bf16.msra.mxu1 %v7208_v50  ;;  %v7240_v47 = vpack.c.bf16 %v5892_v2, %v5890_v57  ;;  %v5792_v6 = vcvt.s32.f32 %v3744_v55  ;;  %v3806_v52 = vunpack.c.0.s8 %v2274_v19  ;;  %v3808_v12 = vunpack.c.1.s8 %v2274_v19  ;;  %v2280_v19 = vld [vmem:[%s10573_s20 + $0xad0] sm:$0xff] }
 0x2e7   : > { %8266 = vmatpush.bf16.msra.mxu2 %v7224_v0  ;;  %v5822_v46 = vcvt.s32.f32 %v3774_v56  ;;  %v5824_v14 = vcvt.s32.f32 %v3776_v60  ;;  %v3838_v63 = vunpack.c.0.s8 %v2282_v43  ;;  %v3840_v32 = vunpack.c.1.s8 %v2282_v43 }
 0x2e8   : > { %8279 = vmatpush.bf16.msra.mxu3 %v7240_v47  ;;  %v7190_v36 = vpack.c.bf16 %v5792_v6, %v5790_v59  ;;  %v5854_v10 = vcvt.s32.f32 %v3806_v52  ;;  %v5856_v41 = vcvt.s32.f32 %v3808_v12  ;;  %v8001_v21 = vadd.f32 %v11001_v34, %v7988_v26 }
 0x2e9   : > { %v7206_v38 = vpack.c.bf16 %v5824_v14, %v5822_v46  ;;  %v5886_v23 = vcvt.s32.f32 %v3838_v63  ;;  %v5888_v33 = vcvt.s32.f32 %v3840_v32  ;;  %v3738_v48 = vunpack.c.2.s8 %v2256_v15 }
 0x2ea   : > { %8241 = vmatpush.bf16.msra.mxu0 %v7190_v36  ;;  %v7222_v50 = vpack.c.bf16 %v5856_v41, %v5854_v10  ;;  %v3740_v57 = vunpack.c.3.s8 %v2256_v15  ;;  %v3770_v2 = vunpack.c.2.s8 %v2264_v54  ;;  %v3772_v55 = vunpack.c.3.s8 %v2264_v54 }
 0x2eb   : > { %8254 = vmatpush.bf16.msra.mxu1 %v7206_v38  ;;  %v7238_v43 = vpack.c.bf16 %v5888_v33, %v5886_v23  ;;  %v5786_v0 = vcvt.s32.f32 %v3738_v48  ;;  %v3802_v56 = vunpack.c.2.s8 %v2272_v24  ;;  %v3804_v59 = vunpack.c.3.s8 %v2272_v24 }
 0x2ec   : > { %8267 = vmatpush.bf16.msra.mxu2 %v7222_v50  ;;  %v5788_v60 = vcvt.s32.f32 %v3740_v57  ;;  %v5818_v47 = vcvt.s32.f32 %v3770_v2  ;;  %v5820_v34 = vcvt.s32.f32 %v3772_v55  ;;  %v3834_v26 = vunpack.c.2.s8 %v2280_v19  ;;  %v2254_v2 = vld [vmem:[%s10573_s20 + $0xa00] sm:$0xff] }
 0x2ed   : > { %8280 = vmatpush.bf16.msra.mxu3 %v7238_v43  ;;  %v5850_v6 = vcvt.s32.f32 %v3802_v56  ;;  %v5852_v52 = vcvt.s32.f32 %v3804_v59  ;;  %v3836_v12 = vunpack.c.3.s8 %v2280_v19  ;;  %v8014_v46 = vadd.f32 %v11007_v27, %v8001_v21  ;;  %v11049_v56 = vpop.f32.mrf.mxu0 }
 0x2ee   : > { %v7188_v14 = vpack.c.bf16 %v5788_v60, %v5786_v0  ;;  %v7204_v63 = vpack.c.bf16 %v5820_v34, %v5818_v47  ;;  %v5882_v32 = vcvt.s32.f32 %v3834_v26  ;;  %v3734_v36 = vunpack.c.0.s8 %v2256_v15  ;;  %v2262_v0 = vld [vmem:[%s10573_s20 + $0xa40] sm:$0xff] }
 0x2ef   : > { %v7220_v10 = vpack.c.bf16 %v5852_v52, %v5850_v6  ;;  %v5884_v41 = vcvt.s32.f32 %v3836_v12  ;;  %v11045_v38 = vadd.f32 %v11009_v49, %v8014_v46  ;;  %v3736_v23 = vunpack.c.1.s8 %v2256_v15  ;;  %v2270_v47 = vld [vmem:[%s10573_s20 + $0xa80] sm:$0xff] }
 0x2f0   : > { %8242 = vmatpush.bf16.msra.mxu0 %v7188_v14  ;;  %8255 = vmatpush.bf16.msra.mxu1 %v7204_v63  ;;  %v5782_v33 = vcvt.s32.f32 %v3734_v36  ;;  %v3766_v48 = vunpack.c.0.s8 %v2264_v54  ;;  %v3768_v50 = vunpack.c.1.s8 %v2264_v54  ;;  %v3798_v57 = vunpack.c.0.s8 %v2272_v24 }
 0x2f1   : > { %8268 = vmatpush.bf16.msra.mxu2 %v7220_v10  ;;  %v7236_v27 = vpack.c.bf16 %v5884_v41, %v5882_v32  ;;  %v5784_v21 = vcvt.s32.f32 %v3736_v23  ;;  %v3800_v55 = vunpack.c.1.s8 %v2272_v24  ;;  %v3830_v43 = vunpack.c.0.s8 %v2280_v19  ;;  %v2278_v24 = vld [vmem:[%s10573_s20 + $0xac0] sm:$0xff] }
 0x2f2   : > { %v5814_v49 = vcvt.s32.f32 %v3766_v48  ;;  %v5816_v59 = vcvt.s32.f32 %v3768_v50  ;;  %v5846_v15 = vcvt.s32.f32 %v3798_v57  ;;  %v3832_v60 = vunpack.c.1.s8 %v2280_v19  ;;  %v11053_v50 = vpop.f32.mrf.mxu1 }
 0x2f3   : > { %8281 = vmatpush.bf16.msra.mxu3 %v7236_v27  ;;  %v7186_v34 = vpack.c.bf16 %v5784_v21, %v5782_v33  ;;  %v5848_v26 = vcvt.s32.f32 %v3800_v55  ;;  %v5878_v54 = vcvt.s32.f32 %v3830_v43  ;;  %v3730_v6 = vunpack.c.2.s8 %v2254_v2 }
 0x2f4   : > { %v7202_v52 = vpack.c.bf16 %v5816_v59, %v5814_v49  ;;  %v5880_v12 = vcvt.s32.f32 %v3832_v60  ;;  %v3732_v46 = vunpack.c.3.s8 %v2254_v2  ;;  %v3762_v14 = vunpack.c.2.s8 %v2262_v0 }
 0x2f5   : > { %8243 = vmatpush.bf16.msra.mxu0 %v7186_v34  ;;  %v7218_v63 = vpack.c.bf16 %v5848_v26, %v5846_v15  ;;  %v5778_v32 = vcvt.s32.f32 %v3730_v6  ;;  %v3764_v36 = vunpack.c.3.s8 %v2262_v0  ;;  %v3794_v10 = vunpack.c.2.s8 %v2270_v47 }
 0x2f6   : > { %8256 = vmatpush.bf16.msra.mxu1 %v7202_v52  ;;  %v7234_v41 = vpack.c.bf16 %v5880_v12, %v5878_v54  ;;  %v5780_v23 = vcvt.s32.f32 %v3732_v46  ;;  %v5810_v19 = vcvt.s32.f32 %v3762_v14  ;;  %v3796_v48 = vunpack.c.3.s8 %v2270_v47  ;;  %v8041_v54 = vpop.f32.mrf.mxu0  ;;  %v2292_v14 = vld [vmem:[%s10573_s20 + $0xb30] sm:$0xff] }
 0x2f7   : > { %8269 = vmatpush.bf16.msra.mxu2 %v7218_v63  ;;  %v5812_v33 = vcvt.s32.f32 %v3764_v36  ;;  %v5842_v57 = vcvt.s32.f32 %v3794_v10  ;;  %v3826_v27 = vunpack.c.2.s8 %v2278_v24  ;;  %v3828_v21 = vunpack.c.3.s8 %v2278_v24 }
 0x2f8   : > { %8282 = vmatpush.bf16.msra.mxu3 %v7234_v41  ;;  %v7184_v55 = vpack.c.bf16 %v5780_v23, %v5778_v32  ;;  %v5844_v43 = vcvt.s32.f32 %v3796_v48  ;;  %v3726_v49 = vunpack.c.0.s8 %v2254_v2  ;;  %v3728_v59 = vunpack.c.1.s8 %v2254_v2  ;;  %v11057_v41 = vld [vmem:[%s10573_s20 + $0xb70] sm:$0xff] }
 0x2f9   : > { %v7200_v15 = vpack.c.bf16 %v5812_v33, %v5810_v19  ;;  %v5874_v60 = vcvt.s32.f32 %v3826_v27  ;;  %v5876_v34 = vcvt.s32.f32 %v3828_v21  ;;  %v3758_v26 = vunpack.c.0.s8 %v2262_v0  ;;  %v11059_v33 = vpop.f32.mrf.mxu2 }
 0x2fa   : > { %8244 = vmatpush.bf16.msra.mxu0 %v7184_v55  ;;  %v7216_v6 = vpack.c.bf16 %v5844_v43, %v5842_v57  ;;  %v5774_v52 = vcvt.s32.f32 %v3726_v49  ;;  %v5776_v12 = vcvt.s32.f32 %v3728_v59  ;;  %v3760_v46 = vunpack.c.1.s8 %v2262_v0  ;;  %v11061_v57 = vpop.f32.mrf.mxu3  ;;  %v2308_v43 = vld [vmem:[%s10573_s20 + $0xbb0] sm:$0xff] }
 0x2fb   : > { %8257 = vmatpush.bf16.msra.mxu1 %v7200_v15  ;;  %v7232_v63 = vpack.c.bf16 %v5876_v34, %v5874_v60  ;;  %v5806_v36 = vcvt.s32.f32 %v3758_v26  ;;  %v3790_v32 = vunpack.c.0.s8 %v2270_v47  ;;  %v3792_v10 = vunpack.c.1.s8 %v2270_v47  ;;  %v2316_v60 = vld [vmem:[%s10573_s20 + $0xbf0] sm:$0xff]  ;;  %v11066_v34 = vld [vmem:[#allocation1] sm:$0xff] }
 0x2fc   : > { %8270 = vmatpush.bf16.msra.mxu2 %v7216_v6  ;;  %v7182_v2 = vpack.c.bf16 %v5776_v12, %v5774_v52  ;;  %v5808_v23 = vcvt.s32.f32 %v3760_v46  ;;  %v3822_v19 = vunpack.c.0.s8 %v2278_v24  ;;  %v3824_v48 = vunpack.c.1.s8 %v2278_v24  ;;  %12078 = vst [vmem:[#allocation23_spill] sm:$0xff] %v11066_v34  ;;  %v8054_v24 = vpop.f32.mrf.mxu1 }
 0x2fd   : > { %8283 = vmatpush.bf16.msra.mxu3 %v7232_v63  ;;  %v5838_v0 = vcvt.s32.f32 %v3790_v32  ;;  %v5840_v27 = vcvt.s32.f32 %v3792_v10  ;;  %v3882_v21 = vunpack.c.2.s8 %v2292_v14  ;;  %v3884_v55 = vunpack.c.3.s8 %v2292_v14  ;;  %v11069_v10 = vld [vmem:[#allocation1 + $0x9] sm:$0xff] }
 0x2fe   : > { %8245 = vmatpush.bf16.msra.mxu0 %v7182_v2  ;;  %v7198_v47 = vpack.c.bf16 %v5808_v23, %v5806_v36  ;;  %v5870_v49 = vcvt.s32.f32 %v3822_v19  ;;  %v5872_v59 = vcvt.s32.f32 %v3824_v48  ;;  %v3914_v15 = vunpack.c.2.s8 %v11057_v41  ;;  %12079 = vst [vmem:[#allocation24_spill] sm:$0xff] %v11069_v10  ;;  %v11072_v48 = vld [vmem:[#allocation1 + $0x12] sm:$0xff] }
 0x2ff   : > { %v7214_v26 = vpack.c.bf16 %v5840_v27, %v5838_v0  ;;  %v5930_v54 = vcvt.s32.f32 %v3882_v21  ;;  %v5932_v6 = vcvt.s32.f32 %v3884_v55  ;;  %v3916_v52 = vunpack.c.3.s8 %v11057_v41  ;;  %12080 = vst [vmem:[#allocation25_spill] sm:$0xff] %v11072_v48  ;;  %v11074_v21 = vld [vmem:[#allocation1 + $0x1b] sm:$0xff] }
 0x300   : > { %8258 = vmatpush.bf16.msra.mxu1 %v7198_v47  ;;  %v7230_v12 = vpack.c.bf16 %v5872_v59, %v5870_v49  ;;  %v5962_v46 = vcvt.s32.f32 %v3914_v15  ;;  %v3946_v63 = vunpack.c.2.s8 %v2308_v43  ;;  %v3948_v32 = vunpack.c.3.s8 %v2308_v43  ;;  %12081 = vst [vmem:[#allocation26_spill] sm:$0xff] %v11074_v21 }
 0x301   : > { %8271 = vmatpush.bf16.msra.mxu2 %v7214_v26  ;;  %v7260_v36 = vpack.c.bf16 %v5932_v6, %v5930_v54  ;;  %v5964_v2 = vcvt.s32.f32 %v3916_v52  ;;  %v3978_v23 = vunpack.c.2.s8 %v2316_v60  ;;  %v3980_v19 = vunpack.c.3.s8 %v2316_v60  ;;  %8246 = vmatmul.bf16.vlgmr.msra.gmra.mxu0 %v11066_v34 }
 0x302   : > { %8284 = vmatpush.bf16.msra.mxu3 %v7230_v12  ;;  %v5994_v0 = vcvt.s32.f32 %v3946_v63  ;;  %v5996_v27 = vcvt.s32.f32 %v3948_v32  ;;  %v3878_v55 = vunpack.c.0.s8 %v2292_v14  ;;  %v3880_v47 = vunpack.c.1.s8 %v2292_v14  ;;  %v2290_v12 = vld [vmem:[%s10573_s20 + $0xb20] sm:$0xff]  ;;  %v8067_v63 = vpop.f32.mrf.mxu2  ;;  %v8080_v32 = vpop.f32.mrf.mxu3 }
 0x303   : > { %8290 = vmatpush.bf16.msrb.mxu0 %v7260_v36  ;;  %v7276_v49 = vpack.c.bf16 %v5964_v2, %v5962_v46  ;;  %v6026_v59 = vcvt.s32.f32 %v3978_v23  ;;  %v6028_v15 = vcvt.s32.f32 %v3980_v19  ;;  %8259 = vmatmul.bf16.vlgmr.msra.gmra.mxu1 %v11069_v10  ;;  %v3910_v24 = vunpack.c.0.s8 %v11057_v41  ;;  %v2298_v23 = vld [vmem:[%s10573_s20 + $0xb60] sm:$0xff] }
 0x304   : > { %v7292_v26 = vpack.c.bf16 %v5996_v27, %v5994_v0  ;;  %8272 = vmatmul.bf16.vlgmr.msra.gmra.mxu2 %v11072_v48  ;;  %v5926_v54 = vcvt.s32.f32 %v3878_v55  ;;  %v5928_v6 = vcvt.s32.f32 %v3880_v47  ;;  %v3912_v52 = vunpack.c.1.s8 %v11057_v41  ;;  %v2314_v48 = vld [vmem:[%s10573_s20 + $0xbe0] sm:$0xff] }
 0x305   : > { %8303 = vmatpush.bf16.msrb.mxu1 %v7276_v49  ;;  %v7308_v14 = vpack.c.bf16 %v6028_v15, %v6026_v59  ;;  %8285 = vmatmul.bf16.vlgmr.msra.gmra.mxu3 %v11074_v21  ;;  %v5958_v46 = vcvt.s32.f32 %v3910_v24  ;;  %v3942_v36 = vunpack.c.0.s8 %v2308_v43  ;;  %v3944_v2 = vunpack.c.1.s8 %v2308_v43  ;;  %v2306_v49 = vld [vmem:[%s10573_s20 + $0xba0] sm:$0xff] }
 0x306   : > { %8316 = vmatpush.bf16.msrb.mxu2 %v7292_v26  ;;  %v7258_v19 = vpack.c.bf16 %v5928_v6, %v5926_v54  ;;  %v5960_v0 = vcvt.s32.f32 %v3912_v52  ;;  %v3974_v27 = vunpack.c.0.s8 %v2316_v60  ;;  %v3976_v55 = vunpack.c.1.s8 %v2316_v60 }
 0x307   : > { %8329 = vmatpush.bf16.msrb.mxu3 %v7308_v14  ;;  %v5990_v41 = vcvt.s32.f32 %v3942_v36  ;;  %v5992_v47 = vcvt.s32.f32 %v3944_v2  ;;  %v3874_v63 = vunpack.c.2.s8 %v2290_v12  ;;  %v3876_v32 = vunpack.c.3.s8 %v2290_v12 }
 0x308   : > { %8291 = vmatpush.bf16.msrb.mxu0 %v7258_v19  ;;  %v7274_v59 = vpack.c.bf16 %v5960_v0, %v5958_v46  ;;  %v6022_v15 = vcvt.s32.f32 %v3974_v27  ;;  %v6024_v21 = vcvt.s32.f32 %v3976_v55  ;;  %v3906_v24 = vunpack.c.2.s8 %v2298_v23 }
 0x309   : > { %v7290_v43 = vpack.c.bf16 %v5992_v47, %v5990_v41  ;;  %v5922_v10 = vcvt.s32.f32 %v3874_v63  ;;  %v5924_v26 = vcvt.s32.f32 %v3876_v32  ;;  %v3908_v34 = vunpack.c.3.s8 %v2298_v23 }
 0x30a   : > { %8304 = vmatpush.bf16.msrb.mxu1 %v7274_v59  ;;  %v7306_v54 = vpack.c.bf16 %v6024_v21, %v6022_v15  ;;  %v5954_v6 = vcvt.s32.f32 %v3906_v24  ;;  %v3938_v60 = vunpack.c.2.s8 %v2306_v49  ;;  %v3940_v52 = vunpack.c.3.s8 %v2306_v49 }
 0x30b   : > { %8317 = vmatpush.bf16.msrb.mxu2 %v7290_v43  ;;  %v7256_v14 = vpack.c.bf16 %v5924_v26, %v5922_v10  ;;  %v5956_v36 = vcvt.s32.f32 %v3908_v34  ;;  %v3970_v2 = vunpack.c.2.s8 %v2314_v48  ;;  %v3972_v37 = vunpack.c.3.s8 %v2314_v48  ;;  %v2288_v26 = vld [vmem:[%s10573_s20 + $0xb10] sm:$0xff] }
 0x30c   : > { %8330 = vmatpush.bf16.msrb.mxu3 %v7306_v54  ;;  %v5986_v46 = vcvt.s32.f32 %v3938_v60  ;;  %v5988_v19 = vcvt.s32.f32 %v3940_v52  ;;  %v8040_v0 = vadd.f32 %v11049_v56, %v11045_v38  ;;  %v3870_v27 = vunpack.c.0.s8 %v2290_v12 }
 0x30d   : > { %8292 = vmatpush.bf16.msrb.mxu0 %v7256_v14  ;;  %v7272_v55 = vpack.c.bf16 %v5956_v36, %v5954_v6  ;;  %v6018_v41 = vcvt.s32.f32 %v3970_v2  ;;  %v6020_v21 = vcvt.s32.f32 %v3972_v37  ;;  %v3872_v47 = vunpack.c.1.s8 %v2290_v12  ;;  %v2296_v37 = vld [vmem:[%s10573_s20 + $0xb50] sm:$0xff] }
 0x30e   : > { %v7288_v63 = vpack.c.bf16 %v5988_v19, %v5986_v46  ;;  %v5918_v32 = vcvt.s32.f32 %v3870_v27  ;;  %v3902_v10 = vunpack.c.0.s8 %v2298_v23  ;;  %v3904_v34 = vunpack.c.1.s8 %v2298_v23  ;;  %v2304_v14 = vld [vmem:[%s10573_s20 + $0xb90] sm:$0xff] }
 0x30f   : > { %8305 = vmatpush.bf16.msrb.mxu1 %v7272_v55  ;;  %v7304_v59 = vpack.c.bf16 %v6020_v21, %v6018_v41  ;;  %v5920_v15 = vcvt.s32.f32 %v3872_v47  ;;  %v3934_v24 = vunpack.c.0.s8 %v2306_v49  ;;  %v3936_v43 = vunpack.c.1.s8 %v2306_v49  ;;  %v2312_v49 = vld [vmem:[%s10573_s20 + $0xbd0] sm:$0xff] }
 0x310   : > { %8318 = vmatpush.bf16.msrb.mxu2 %v7288_v63  ;;  %v5950_v38 = vcvt.s32.f32 %v3902_v10  ;;  %v5952_v56 = vcvt.s32.f32 %v3904_v34  ;;  %v3966_v54 = vunpack.c.0.s8 %v2314_v48  ;;  %v3968_v6 = vunpack.c.1.s8 %v2314_v48 }
 0x311   : > { %8331 = vmatpush.bf16.msrb.mxu3 %v7304_v59  ;;  %v7254_v12 = vpack.c.bf16 %v5920_v15, %v5918_v32  ;;  %v5982_v60 = vcvt.s32.f32 %v3934_v24  ;;  %v5984_v52 = vcvt.s32.f32 %v3936_v43  ;;  %v8053_v23 = vadd.f32 %v11053_v50, %v8040_v0 }
 0x312   : > { %v7270_v36 = vpack.c.bf16 %v5952_v56, %v5950_v38  ;;  %v6014_v2 = vcvt.s32.f32 %v3966_v54  ;;  %v6016_v46 = vcvt.s32.f32 %v3968_v6  ;;  %v3866_v19 = vunpack.c.2.s8 %v2288_v26 }
 0x313   : > { %8293 = vmatpush.bf16.msrb.mxu0 %v7254_v12  ;;  %v7286_v27 = vpack.c.bf16 %v5984_v52, %v5982_v60  ;;  %v3868_v55 = vunpack.c.3.s8 %v2288_v26  ;;  %v3898_v41 = vunpack.c.2.s8 %v2296_v37  ;;  %v3900_v21 = vunpack.c.3.s8 %v2296_v37 }
 0x314   : > { %8306 = vmatpush.bf16.msrb.mxu1 %v7270_v36  ;;  %v7302_v48 = vpack.c.bf16 %v6016_v46, %v6014_v2  ;;  %v5914_v47 = vcvt.s32.f32 %v3866_v19  ;;  %v3930_v63 = vunpack.c.2.s8 %v2304_v14  ;;  %v3932_v32 = vunpack.c.3.s8 %v2304_v14 }
 0x315   : > { %8319 = vmatpush.bf16.msrb.mxu2 %v7286_v27  ;;  %v5916_v10 = vcvt.s32.f32 %v3868_v55  ;;  %v5946_v34 = vcvt.s32.f32 %v3898_v41  ;;  %v5948_v50 = vcvt.s32.f32 %v3900_v21  ;;  %v3962_v0 = vunpack.c.2.s8 %v2312_v49  ;;  %v2286_v55 = vld [vmem:[%s10573_s20 + $0xb00] sm:$0xff] }
 0x316   : > { %8332 = vmatpush.bf16.msrb.mxu3 %v7302_v48  ;;  %v5978_v59 = vcvt.s32.f32 %v3930_v63  ;;  %v5980_v15 = vcvt.s32.f32 %v3932_v32  ;;  %v3964_v24 = vunpack.c.3.s8 %v2312_v49  ;;  %v8066_v43 = vadd.f32 %v11059_v33, %v8053_v23  ;;  %v2294_v48 = vld [vmem:[%s10573_s20 + $0xb40] sm:$0xff] }
 0x317   : > { %v7252_v38 = vpack.c.bf16 %v5916_v10, %v5914_v47  ;;  %v7268_v56 = vpack.c.bf16 %v5948_v50, %v5946_v34  ;;  %v6010_v54 = vcvt.s32.f32 %v3962_v0  ;;  %v3862_v6 = vunpack.c.0.s8 %v2288_v26  ;;  %v11098_v47 = vpop.f32.mrf.mxu0  ;;  %v2302_v10 = vld [vmem:[%s10573_s20 + $0xb80] sm:$0xff] }
 0x318   : > { %v7284_v12 = vpack.c.bf16 %v5980_v15, %v5978_v59  ;;  %v6012_v60 = vcvt.s32.f32 %v3964_v24  ;;  %v11094_v52 = vadd.f32 %v11061_v57, %v8066_v43  ;;  %v3864_v36 = vunpack.c.1.s8 %v2288_v26 }
 0x319   : > { %8294 = vmatpush.bf16.msrb.mxu0 %v7252_v38  ;;  %8307 = vmatpush.bf16.msrb.mxu1 %v7268_v56  ;;  %v5910_v2 = vcvt.s32.f32 %v3862_v6  ;;  %v3894_v46 = vunpack.c.0.s8 %v2296_v37  ;;  %v3896_v19 = vunpack.c.1.s8 %v2296_v37  ;;  %v3926_v27 = vunpack.c.0.s8 %v2304_v14 }
 0x31a   : > { %8320 = vmatpush.bf16.msrb.mxu2 %v7284_v12  ;;  %v7300_v33 = vpack.c.bf16 %v6012_v60, %v6010_v54  ;;  %v5912_v23 = vcvt.s32.f32 %v3864_v36  ;;  %v3928_v41 = vunpack.c.1.s8 %v2304_v14  ;;  %v3958_v21 = vunpack.c.0.s8 %v2312_v49  ;;  %v2310_v14 = vld [vmem:[%s10573_s20 + $0xbc0] sm:$0xff] }
 0x31b   : > { %v5942_v57 = vcvt.s32.f32 %v3894_v46  ;;  %v5944_v63 = vcvt.s32.f32 %v3896_v19  ;;  %v5974_v26 = vcvt.s32.f32 %v3926_v27  ;;  %v3960_v32 = vunpack.c.1.s8 %v2312_v49  ;;  %v11102_v46 = vpop.f32.mrf.mxu1 }
 0x31c   : > { %8333 = vmatpush.bf16.msrb.mxu3 %v7300_v33  ;;  %v7250_v34 = vpack.c.bf16 %v5912_v23, %v5910_v2  ;;  %v5976_v50 = vcvt.s32.f32 %v3928_v41  ;;  %v6006_v37 = vcvt.s32.f32 %v3958_v21  ;;  %v3858_v0 = vunpack.c.2.s8 %v2286_v55 }
 0x31d   : > { %v7266_v59 = vpack.c.bf16 %v5944_v63, %v5942_v57  ;;  %v6008_v15 = vcvt.s32.f32 %v3960_v32  ;;  %v3860_v24 = vunpack.c.3.s8 %v2286_v55  ;;  %v3890_v43 = vunpack.c.2.s8 %v2294_v48 }
 0x31e   : > { %8295 = vmatpush.bf16.msrb.mxu0 %v7250_v34  ;;  %v7282_v38 = vpack.c.bf16 %v5976_v50, %v5974_v26  ;;  %v5906_v56 = vcvt.s32.f32 %v3858_v0  ;;  %v3892_v54 = vunpack.c.3.s8 %v2294_v48  ;;  %v3922_v6 = vunpack.c.2.s8 %v2302_v10 }
 0x31f   : > { %8308 = vmatpush.bf16.msrb.mxu1 %v7266_v59  ;;  %v7298_v12 = vpack.c.bf16 %v6008_v15, %v6006_v37  ;;  %v5908_v60 = vcvt.s32.f32 %v3860_v24  ;;  %v5938_v49 = vcvt.s32.f32 %v3890_v43  ;;  %v3924_v36 = vunpack.c.3.s8 %v2302_v10  ;;  %v8093_v50 = vpop.f32.mrf.mxu0  ;;  %v2324_v24 = vld [vmem:[%s10573_s20 + $0xc30] sm:$0xff] }
 0x320   : > { %8321 = vmatpush.bf16.msrb.mxu2 %v7282_v38  ;;  %v5940_v2 = vcvt.s32.f32 %v3892_v54  ;;  %v5970_v19 = vcvt.s32.f32 %v3922_v6  ;;  %v3954_v27 = vunpack.c.2.s8 %v2310_v14  ;;  %v3956_v33 = vunpack.c.3.s8 %v2310_v14  ;;  %v11106_v6 = vld [vmem:[%s10573_s20 + $0xc70] sm:$0xff] }
 0x321   : > { %8334 = vmatpush.bf16.msrb.mxu3 %v7298_v12  ;;  %v7248_v23 = vpack.c.bf16 %v5908_v60, %v5906_v56  ;;  %v5972_v41 = vcvt.s32.f32 %v3924_v36  ;;  %v3854_v21 = vunpack.c.0.s8 %v2286_v55  ;;  %v3856_v57 = vunpack.c.1.s8 %v2286_v55  ;;  %v11108_v36 = vpop.f32.mrf.mxu2 }
 0x322   : > { %v7264_v63 = vpack.c.bf16 %v5940_v2, %v5938_v49  ;;  %v6002_v26 = vcvt.s32.f32 %v3954_v27  ;;  %v6004_v32 = vcvt.s32.f32 %v3956_v33  ;;  %v3886_v34 = vunpack.c.0.s8 %v2294_v48  ;;  %v11110_v2 = vpop.f32.mrf.mxu3 }
 0x323   : > { %8296 = vmatpush.bf16.msrb.mxu0 %v7248_v23  ;;  %v7280_v37 = vpack.c.bf16 %v5972_v41, %v5970_v19  ;;  %v5902_v0 = vcvt.s32.f32 %v3854_v21  ;;  %v5904_v59 = vcvt.s32.f32 %v3856_v57  ;;  %v3888_v15 = vunpack.c.1.s8 %v2294_v48  ;;  %v2340_v23 = vld [vmem:[%s10573_s20 + $0xcb0] sm:$0xff] }
 0x324   : > { %8309 = vmatpush.bf16.msrb.mxu1 %v7264_v63  ;;  %v7296_v43 = vpack.c.bf16 %v6004_v32, %v6002_v26  ;;  %v5934_v38 = vcvt.s32.f32 %v3886_v34  ;;  %v3918_v56 = vunpack.c.0.s8 %v2302_v10  ;;  %v3920_v54 = vunpack.c.1.s8 %v2302_v10  ;;  %v2348_v63 = vld [vmem:[%s10573_s20 + $0xcf0] sm:$0xff]  ;;  %v11115_v26 = vld [vmem:[#allocation1 + $0x24] sm:$0xff] }
 0x325   : > { %8322 = vmatpush.bf16.msrb.mxu2 %v7280_v37  ;;  %v7246_v55 = vpack.c.bf16 %v5904_v59, %v5902_v0  ;;  %v5936_v12 = vcvt.s32.f32 %v3888_v15  ;;  %v3950_v60 = vunpack.c.0.s8 %v2310_v14  ;;  %v3952_v49 = vunpack.c.1.s8 %v2310_v14  ;;  %12082 = vst [vmem:[#allocation27_spill] sm:$0xff] %v11115_v26  ;;  %v8106_v14 = vpop.f32.mrf.mxu1 }
 0x326   : > { %8335 = vmatpush.bf16.msrb.mxu3 %v7296_v43  ;;  %v5966_v48 = vcvt.s32.f32 %v3918_v56  ;;  %v5968_v19 = vcvt.s32.f32 %v3920_v54  ;;  %v4010_v27 = vunpack.c.2.s8 %v2324_v24  ;;  %v4012_v33 = vunpack.c.3.s8 %v2324_v24  ;;  %v11118_v56 = vld [vmem:[#allocation1 + $0x2d] sm:$0xff] }
 0x327   : > { %8297 = vmatpush.bf16.msrb.mxu0 %v7246_v55  ;;  %v7262_v10 = vpack.c.bf16 %v5936_v12, %v5934_v38  ;;  %v5998_v41 = vcvt.s32.f32 %v3950_v60  ;;  %v6000_v21 = vcvt.s32.f32 %v3952_v49  ;;  %v4042_v57 = vunpack.c.2.s8 %v11106_v6  ;;  %12083 = vst [vmem:[#allocation28_spill] sm:$0xff] %v11118_v56  ;;  %v11121_v60 = vld [vmem:[#allocation1 + $0x36] sm:$0xff] }
 0x328   : > { %v7278_v32 = vpack.c.bf16 %v5968_v19, %v5966_v48  ;;  %v6058_v34 = vcvt.s32.f32 %v4010_v27  ;;  %v6060_v50 = vcvt.s32.f32 %v4012_v33  ;;  %v4044_v37 = vunpack.c.3.s8 %v11106_v6  ;;  %12084 = vst [vmem:[#allocation29_spill] sm:$0xff] %v11121_v60  ;;  %v11123_v19 = vld [vmem:[#allocation1 + $0x3f] sm:$0xff] }
 0x329   : > { %8310 = vmatpush.bf16.msrb.mxu1 %v7262_v10  ;;  %v7294_v0 = vpack.c.bf16 %v6000_v21, %v5998_v41  ;;  %v6090_v59 = vcvt.s32.f32 %v4042_v57  ;;  %v4074_v15 = vunpack.c.2.s8 %v2340_v23  ;;  %v4076_v43 = vunpack.c.3.s8 %v2340_v23  ;;  %12085 = vst [vmem:[#allocation30_spill] sm:$0xff] %v11123_v19 }
 0x32a   : > { %8323 = vmatpush.bf16.msrb.mxu2 %v7278_v32  ;;  %v7324_v38 = vpack.c.bf16 %v6060_v50, %v6058_v34  ;;  %v6092_v54 = vcvt.s32.f32 %v4044_v37  ;;  %v4106_v55 = vunpack.c.2.s8 %v2348_v63  ;;  %v4108_v12 = vunpack.c.3.s8 %v2348_v63  ;;  %8298 = vmatmul.bf16.vlgmr.msrb.gmra.mxu0 %v11115_v26  ;;  %v2322_v37 = vld [vmem:[%s10573_s20 + $0xc20] sm:$0xff] }
 0x32b   : > { %8336 = vmatpush.bf16.msrb.mxu3 %v7294_v0  ;;  %v6122_v49 = vcvt.s32.f32 %v4074_v15  ;;  %v6124_v48 = vcvt.s32.f32 %v4076_v43  ;;  %v4006_v27 = vunpack.c.0.s8 %v2324_v24  ;;  %v4008_v33 = vunpack.c.1.s8 %v2324_v24  ;;  %v8119_v0 = vpop.f32.mrf.mxu2  ;;  %v8132_v15 = vpop.f32.mrf.mxu3 }
 0x32c   : > { %8342 = vmatpush.bf16.msra.mxu0 %v7324_v38  ;;  %v7340_v10 = vpack.c.bf16 %v6092_v54, %v6090_v59  ;;  %v6154_v41 = vcvt.s32.f32 %v4106_v55  ;;  %v6156_v21 = vcvt.s32.f32 %v4108_v12  ;;  %8311 = vmatmul.bf16.vlgmr.msrb.gmra.mxu1 %v11118_v56  ;;  %v4038_v57 = vunpack.c.0.s8 %v11106_v6  ;;  %v2330_v54 = vld [vmem:[%s10573_s20 + $0xc60] sm:$0xff] }
 0x32d   : > { %v7356_v14 = vpack.c.bf16 %v6124_v48, %v6122_v49  ;;  %8324 = vmatmul.bf16.vlgmr.msrb.gmra.mxu2 %v11121_v60  ;;  %v6054_v32 = vcvt.s32.f32 %v4006_v27  ;;  %v6056_v34 = vcvt.s32.f32 %v4008_v33  ;;  %v4040_v50 = vunpack.c.1.s8 %v11106_v6 }
 0x32e   : > { %8355 = vmatpush.bf16.msra.mxu1 %v7340_v10  ;;  %v7372_v24 = vpack.c.bf16 %v6156_v21, %v6154_v41  ;;  %8337 = vmatmul.bf16.vlgmr.msrb.gmra.mxu3 %v11123_v19  ;;  %v6086_v59 = vcvt.s32.f32 %v4038_v57  ;;  %v4070_v43 = vunpack.c.0.s8 %v2340_v23  ;;  %v4072_v38 = vunpack.c.1.s8 %v2340_v23  ;;  %v2338_v10 = vld [vmem:[%s10573_s20 + $0xca0] sm:$0xff] }
 0x32f   : > { %8368 = vmatpush.bf16.msra.mxu2 %v7356_v14  ;;  %v7322_v55 = vpack.c.bf16 %v6056_v34, %v6054_v32  ;;  %v6088_v12 = vcvt.s32.f32 %v4040_v50  ;;  %v4102_v49 = vunpack.c.0.s8 %v2348_v63  ;;  %v4104_v48 = vunpack.c.1.s8 %v2348_v63  ;;  %v2346_v19 = vld [vmem:[%s10573_s20 + $0xce0] sm:$0xff]  ;;  %v7572_v63 = vld [vmem:[%s12016_s0 + $0x30] sm:$0xff] }
 0x330   : > { %8381 = vmatpush.bf16.msra.mxu3 %v7372_v24  ;;  %v6118_v6 = vcvt.s32.f32 %v4070_v43  ;;  %v6120_v27 = vcvt.s32.f32 %v4072_v38  ;;  %v4002_v33 = vunpack.c.2.s8 %v2322_v37  ;;  %v4004_v0 = vunpack.c.3.s8 %v2322_v37  ;;  %7635 = vst [vmem:[#allocation1] ss:$9 sm:$0xff] %v7572_v63 }
 0x331   : > { %8343 = vmatpush.bf16.msra.mxu0 %v7322_v55  ;;  %v7338_v41 = vpack.c.bf16 %v6088_v12, %v6086_v59  ;;  %v6150_v21 = vcvt.s32.f32 %v4102_v49  ;;  %v6152_v15 = vcvt.s32.f32 %v4104_v48  ;;  %v4034_v57 = vunpack.c.2.s8 %v2330_v54 }
 0x332   : > { %v7354_v23 = vpack.c.bf16 %v6120_v27, %v6118_v6  ;;  %v6050_v60 = vcvt.s32.f32 %v4002_v33  ;;  %v6052_v14 = vcvt.s32.f32 %v4004_v0  ;;  %v4036_v56 = vunpack.c.3.s8 %v2330_v54 }
 0x333   : > { %8356 = vmatpush.bf16.msra.mxu1 %v7338_v41  ;;  %v7370_v32 = vpack.c.bf16 %v6152_v15, %v6150_v21  ;;  %v6082_v34 = vcvt.s32.f32 %v4034_v57  ;;  %v4066_v50 = vunpack.c.2.s8 %v2338_v10  ;;  %v4068_v24 = vunpack.c.3.s8 %v2338_v10 }
 0x334   : > { %8369 = vmatpush.bf16.msra.mxu2 %v7354_v23  ;;  %v7320_v59 = vpack.c.bf16 %v6052_v14, %v6050_v60  ;;  %v6084_v43 = vcvt.s32.f32 %v4036_v56  ;;  %v4098_v38 = vunpack.c.2.s8 %v2346_v19  ;;  %v4100_v55 = vunpack.c.3.s8 %v2346_v19 }
 0x335   : > { %8382 = vmatpush.bf16.msra.mxu3 %v7370_v32  ;;  %v6114_v12 = vcvt.s32.f32 %v4066_v50  ;;  %v6116_v49 = vcvt.s32.f32 %v4068_v24  ;;  %v8092_v48 = vadd.f32 %v11098_v47, %v11094_v52  ;;  %v3998_v6 = vunpack.c.0.s8 %v2322_v37  ;;  %v2320_v32 = vld [vmem:[%s10573_s20 + $0xc10] sm:$0xff] }
 0x336   : > { %8344 = vmatpush.bf16.msra.mxu0 %v7320_v59  ;;  %v7336_v27 = vpack.c.bf16 %v6084_v43, %v6082_v34  ;;  %v6146_v33 = vcvt.s32.f32 %v4098_v38  ;;  %v6148_v0 = vcvt.s32.f32 %v4100_v55  ;;  %v4000_v41 = vunpack.c.1.s8 %v2322_v37  ;;  %v2328_v24 = vld [vmem:[%s10573_s20 + $0xc50] sm:$0xff] }
 0x337   : > { %v7352_v21 = vpack.c.bf16 %v6116_v49, %v6114_v12  ;;  %v6046_v15 = vcvt.s32.f32 %v3998_v6  ;;  %v4030_v60 = vunpack.c.0.s8 %v2330_v54  ;;  %v4032_v56 = vunpack.c.1.s8 %v2330_v54  ;;  %v2336_v38 = vld [vmem:[%s10573_s20 + $0xc90] sm:$0xff] }
 0x338   : > { %8357 = vmatpush.bf16.msra.mxu1 %v7336_v27  ;;  %v7368_v57 = vpack.c.bf16 %v6148_v0, %v6146_v33  ;;  %v6048_v23 = vcvt.s32.f32 %v4000_v41  ;;  %v4062_v14 = vunpack.c.0.s8 %v2338_v10  ;;  %v4064_v63 = vunpack.c.1.s8 %v2338_v10  ;;  %v2344_v10 = vld [vmem:[%s10573_s20 + $0xcd0] sm:$0xff] }
 0x339   : > { %8370 = vmatpush.bf16.msra.mxu2 %v7352_v21  ;;  %v6078_v52 = vcvt.s32.f32 %v4030_v60  ;;  %v6080_v47 = vcvt.s32.f32 %v4032_v56  ;;  %v4094_v34 = vunpack.c.0.s8 %v2346_v19  ;;  %v4096_v50 = vunpack.c.1.s8 %v2346_v19 }
 0x33a   : > { %8383 = vmatpush.bf16.msra.mxu3 %v7368_v57  ;;  %v7318_v37 = vpack.c.bf16 %v6048_v23, %v6046_v15  ;;  %v6110_v59 = vcvt.s32.f32 %v4062_v14  ;;  %v6112_v43 = vcvt.s32.f32 %v4064_v63  ;;  %v8105_v54 = vadd.f32 %v11102_v46, %v8092_v48 }
 0x33b   : > { %v7334_v55 = vpack.c.bf16 %v6080_v47, %v6078_v52  ;;  %v6142_v12 = vcvt.s32.f32 %v4094_v34  ;;  %v6144_v49 = vcvt.s32.f32 %v4096_v50  ;;  %v3994_v6 = vunpack.c.2.s8 %v2320_v32 }
 0x33c   : > { %8345 = vmatpush.bf16.msra.mxu0 %v7318_v37  ;;  %v7350_v27 = vpack.c.bf16 %v6112_v43, %v6110_v59  ;;  %v3996_v33 = vunpack.c.3.s8 %v2320_v32  ;;  %v4026_v0 = vunpack.c.2.s8 %v2328_v24  ;;  %v4028_v41 = vunpack.c.3.s8 %v2328_v24 }
 0x33d   : > { %8358 = vmatpush.bf16.msra.mxu1 %v7334_v55  ;;  %v7366_v19 = vpack.c.bf16 %v6144_v49, %v6142_v12  ;;  %v6042_v21 = vcvt.s32.f32 %v3994_v6  ;;  %v4058_v60 = vunpack.c.2.s8 %v2336_v38  ;;  %v4060_v15 = vunpack.c.3.s8 %v2336_v38 }
 0x33e   : > { %8371 = vmatpush.bf16.msra.mxu2 %v7350_v27  ;;  %v6044_v56 = vcvt.s32.f32 %v3996_v33  ;;  %v6074_v57 = vcvt.s32.f32 %v4026_v0  ;;  %v6076_v46 = vcvt.s32.f32 %v4028_v41  ;;  %v4090_v48 = vunpack.c.2.s8 %v2344_v10  ;;  %v2318_v0 = vld [vmem:[%s10573_s20 + $0xc00] sm:$0xff] }
 0x33f   : > { %8384 = vmatpush.bf16.msra.mxu3 %v7366_v19  ;;  %v6106_v23 = vcvt.s32.f32 %v4058_v60  ;;  %v6108_v14 = vcvt.s32.f32 %v4060_v15  ;;  %v4092_v63 = vunpack.c.3.s8 %v2344_v10  ;;  %v8118_v52 = vadd.f32 %v11108_v36, %v8105_v54  ;;  %v11150_v60 = vpop.f32.mrf.mxu0 }
 0x340   : > { %v7316_v47 = vpack.c.bf16 %v6044_v56, %v6042_v21  ;;  %v7332_v34 = vpack.c.bf16 %v6076_v46, %v6074_v57  ;;  %v6138_v50 = vcvt.s32.f32 %v4090_v48  ;;  %v3990_v37 = vunpack.c.0.s8 %v2320_v32  ;;  %v2326_v21 = vld [vmem:[%s10573_s20 + $0xc40] sm:$0xff] }
 0x341   : > { %v7348_v59 = vpack.c.bf16 %v6108_v14, %v6106_v23  ;;  %v6140_v43 = vcvt.s32.f32 %v4092_v63  ;;  %v11146_v55 = vadd.f32 %v11110_v2, %v8118_v52  ;;  %v3992_v12 = vunpack.c.1.s8 %v2320_v32  ;;  %v2334_v57 = vld [vmem:[%s10573_s20 + $0xc80] sm:$0xff] }
 0x342   : > { %8346 = vmatpush.bf16.msra.mxu0 %v7316_v47  ;;  %8359 = vmatpush.bf16.msra.mxu1 %v7332_v34  ;;  %v6038_v49 = vcvt.s32.f32 %v3990_v37  ;;  %v4022_v6 = vunpack.c.0.s8 %v2328_v24  ;;  %v4024_v27 = vunpack.c.1.s8 %v2328_v24  ;;  %v4054_v33 = vunpack.c.0.s8 %v2336_v38 }
 0x343   : > { %8372 = vmatpush.bf16.msra.mxu2 %v7348_v59  ;;  %v7364_v36 = vpack.c.bf16 %v6140_v43, %v6138_v50  ;;  %v6040_v54 = vcvt.s32.f32 %v3992_v12  ;;  %v4056_v41 = vunpack.c.1.s8 %v2336_v38  ;;  %v4086_v19 = vunpack.c.0.s8 %v2344_v10  ;;  %v2342_v38 = vld [vmem:[%s10573_s20 + $0xcc0] sm:$0xff] }
 0x344   : > { %v6070_v2 = vcvt.s32.f32 %v4022_v6  ;;  %v6072_v15 = vcvt.s32.f32 %v4024_v27  ;;  %v6102_v32 = vcvt.s32.f32 %v4054_v33  ;;  %v4088_v56 = vunpack.c.1.s8 %v2344_v10  ;;  %v11154_v27 = vpop.f32.mrf.mxu1 }
 0x345   : > { %8385 = vmatpush.bf16.msra.mxu3 %v7364_v36  ;;  %v7314_v46 = vpack.c.bf16 %v6040_v54, %v6038_v49  ;;  %v6104_v48 = vcvt.s32.f32 %v4056_v41  ;;  %v6134_v24 = vcvt.s32.f32 %v4086_v19  ;;  %v3986_v23 = vunpack.c.2.s8 %v2318_v0 }
 0x346   : > { %v7330_v14 = vpack.c.bf16 %v6072_v15, %v6070_v2  ;;  %v6136_v63 = vcvt.s32.f32 %v4088_v56  ;;  %v3988_v52 = vunpack.c.3.s8 %v2318_v0  ;;  %v4018_v47 = vunpack.c.2.s8 %v2326_v21 }
 0x347   : > { %8347 = vmatpush.bf16.msra.mxu0 %v7314_v46  ;;  %v7346_v34 = vpack.c.bf16 %v6104_v48, %v6102_v32  ;;  %v6034_v50 = vcvt.s32.f32 %v3986_v23  ;;  %v4020_v37 = vunpack.c.3.s8 %v2326_v21  ;;  %v4050_v59 = vunpack.c.2.s8 %v2334_v57 }
 0x348   : > { %8360 = vmatpush.bf16.msra.mxu1 %v7330_v14  ;;  %v7362_v43 = vpack.c.bf16 %v6136_v63, %v6134_v24  ;;  %v6036_v12 = vcvt.s32.f32 %v3988_v52  ;;  %v6066_v10 = vcvt.s32.f32 %v4018_v47  ;;  %v4052_v6 = vunpack.c.3.s8 %v2334_v57  ;;  %v8145_v24 = vpop.f32.mrf.mxu0  ;;  %v2356_v47 = vld [vmem:[%s10573_s20 + $0xd30] sm:$0xff] }
 0x349   : > { %8373 = vmatpush.bf16.msra.mxu2 %v7346_v34  ;;  %v6068_v49 = vcvt.s32.f32 %v4020_v37  ;;  %v6098_v33 = vcvt.s32.f32 %v4050_v59  ;;  %v4082_v36 = vunpack.c.2.s8 %v2342_v38  ;;  %v4084_v54 = vunpack.c.3.s8 %v2342_v38 }
 0x34a   : > { %8386 = vmatpush.bf16.msra.mxu3 %v7362_v43  ;;  %v7312_v41 = vpack.c.bf16 %v6036_v12, %v6034_v50  ;;  %v6100_v19 = vcvt.s32.f32 %v4052_v6  ;;  %v3982_v2 = vunpack.c.0.s8 %v2318_v0  ;;  %v3984_v15 = vunpack.c.1.s8 %v2318_v0  ;;  %v11158_v43 = vld [vmem:[%s10573_s20 + $0xd70] sm:$0xff] }
 0x34b   : > { %v7328_v32 = vpack.c.bf16 %v6068_v49, %v6066_v10  ;;  %v6130_v56 = vcvt.s32.f32 %v4082_v36  ;;  %v6132_v46 = vcvt.s32.f32 %v4084_v54  ;;  %v4014_v48 = vunpack.c.0.s8 %v2326_v21  ;;  %v11160_v49 = vpop.f32.mrf.mxu2 }
 0x34c   : > { %8348 = vmatpush.bf16.msra.mxu0 %v7312_v41  ;;  %v7344_v23 = vpack.c.bf16 %v6100_v19, %v6098_v33  ;;  %v6030_v14 = vcvt.s32.f32 %v3982_v2  ;;  %v6032_v63 = vcvt.s32.f32 %v3984_v15  ;;  %v4016_v52 = vunpack.c.1.s8 %v2326_v21  ;;  %v11162_v33 = vpop.f32.mrf.mxu3  ;;  %v2372_v19 = vld [vmem:[%s10573_s20 + $0xdb0] sm:$0xff] }
 0x34d   : > { %8361 = vmatpush.bf16.msra.mxu1 %v7328_v32  ;;  %v7360_v34 = vpack.c.bf16 %v6132_v46, %v6130_v56  ;;  %v6062_v37 = vcvt.s32.f32 %v4014_v48  ;;  %v4046_v50 = vunpack.c.0.s8 %v2334_v57  ;;  %v4048_v59 = vunpack.c.1.s8 %v2334_v57  ;;  %v2380_v56 = vld [vmem:[%s10573_s20 + $0xdf0] sm:$0xff]  ;;  %v11167_v46 = vld [vmem:[#allocation1] sm:$0xff] }
 0x34e   : > { %8374 = vmatpush.bf16.msra.mxu2 %v7344_v23  ;;  %v7310_v0 = vpack.c.bf16 %v6032_v63, %v6030_v14  ;;  %v6064_v12 = vcvt.s32.f32 %v4016_v52  ;;  %v4078_v10 = vunpack.c.0.s8 %v2342_v38  ;;  %v4080_v6 = vunpack.c.1.s8 %v2342_v38  ;;  %12086 = vst [vmem:[#allocation31_spill] sm:$0xff] %v11167_v46  ;;  %v8158_v38 = vpop.f32.mrf.mxu1 }
 0x34f   : > { %8387 = vmatpush.bf16.msra.mxu3 %v7360_v34  ;;  %v6094_v21 = vcvt.s32.f32 %v4046_v50  ;;  %v6096_v36 = vcvt.s32.f32 %v4048_v59  ;;  %v4138_v54 = vunpack.c.2.s8 %v2356_v47  ;;  %v4140_v41 = vunpack.c.3.s8 %v2356_v47  ;;  %v11170_v59 = vld [vmem:[#allocation1 + $0x9] sm:$0xff] }
 0x350   : > { %8349 = vmatpush.bf16.msra.mxu0 %v7310_v0  ;;  %v7326_v57 = vpack.c.bf16 %v6064_v12, %v6062_v37  ;;  %v6126_v2 = vcvt.s32.f32 %v4078_v10  ;;  %v6128_v15 = vcvt.s32.f32 %v4080_v6  ;;  %v4170_v32 = vunpack.c.2.s8 %v11158_v43  ;;  %12087 = vst [vmem:[#allocation32_spill] sm:$0xff] %v11170_v59  ;;  %v11173_v6 = vld [vmem:[#allocation1 + $0x12] sm:$0xff] }
 0x351   : > { %v7342_v48 = vpack.c.bf16 %v6096_v36, %v6094_v21  ;;  %v6186_v24 = vcvt.s32.f32 %v4138_v54  ;;  %v6188_v23 = vcvt.s32.f32 %v4140_v41  ;;  %v4172_v14 = vunpack.c.3.s8 %v11158_v43  ;;  %12088 = vst [vmem:[#allocation33_spill] sm:$0xff] %v11173_v6  ;;  %v11175_v54 = vld [vmem:[#allocation1 + $0x1b] sm:$0xff] }
 0x352   : > { %8362 = vmatpush.bf16.msra.mxu1 %v7326_v57  ;;  %v7358_v63 = vpack.c.bf16 %v6128_v15, %v6126_v2  ;;  %v6218_v52 = vcvt.s32.f32 %v4170_v32  ;;  %v4202_v34 = vunpack.c.2.s8 %v2372_v19  ;;  %v4204_v50 = vunpack.c.3.s8 %v2372_v19  ;;  %12089 = vst [vmem:[#allocation34_spill] sm:$0xff] %v11175_v54 }
 0x353   : > { %8375 = vmatpush.bf16.msra.mxu2 %v7342_v48  ;;  %v7388_v37 = vpack.c.bf16 %v6188_v23, %v6186_v24  ;;  %v6220_v0 = vcvt.s32.f32 %v4172_v14  ;;  %v4234_v12 = vunpack.c.2.s8 %v2380_v56  ;;  %v4236_v10 = vunpack.c.3.s8 %v2380_v56  ;;  %8350 = vmatmul.bf16.vlgmr.msra.gmra.mxu0 %v11167_v46 }
 0x354   : > { %8388 = vmatpush.bf16.msra.mxu3 %v7358_v63  ;;  %v6250_v21 = vcvt.s32.f32 %v4202_v34  ;;  %v6252_v36 = vcvt.s32.f32 %v4204_v50  ;;  %v4134_v41 = vunpack.c.0.s8 %v2356_v47  ;;  %v4136_v57 = vunpack.c.1.s8 %v2356_v47  ;;  %v2354_v63 = vld [vmem:[%s10573_s20 + $0xd20] sm:$0xff]  ;;  %v8171_v34 = vpop.f32.mrf.mxu2  ;;  %v8184_v50 = vpop.f32.mrf.mxu3 }
 0x355   : > { %8394 = vmatpush.bf16.msrb.mxu0 %v7388_v37  ;;  %v7404_v2 = vpack.c.bf16 %v6220_v0, %v6218_v52  ;;  %v6282_v15 = vcvt.s32.f32 %v4234_v12  ;;  %v6284_v32 = vcvt.s32.f32 %v4236_v10  ;;  %8363 = vmatmul.bf16.vlgmr.msra.gmra.mxu1 %v11170_v59  ;;  %v4166_v38 = vunpack.c.0.s8 %v11158_v43  ;;  %v2362_v12 = vld [vmem:[%s10573_s20 + $0xd60] sm:$0xff] }
 0x356   : > { %v7420_v48 = vpack.c.bf16 %v6252_v36, %v6250_v21  ;;  %8376 = vmatmul.bf16.vlgmr.msra.gmra.mxu2 %v11173_v6  ;;  %v6182_v24 = vcvt.s32.f32 %v4134_v41  ;;  %v6184_v23 = vcvt.s32.f32 %v4136_v57  ;;  %v4168_v14 = vunpack.c.1.s8 %v11158_v43  ;;  %v2378_v6 = vld [vmem:[%s10573_s20 + $0xde0] sm:$0xff] }
 0x357   : > { %8407 = vmatpush.bf16.msrb.mxu1 %v7404_v2  ;;  %v7436_v47 = vpack.c.bf16 %v6284_v32, %v6282_v15  ;;  %8389 = vmatmul.bf16.vlgmr.msra.gmra.mxu3 %v11175_v54  ;;  %v6214_v52 = vcvt.s32.f32 %v4166_v38  ;;  %v4198_v37 = vunpack.c.0.s8 %v2372_v19  ;;  %v4200_v0 = vunpack.c.1.s8 %v2372_v19  ;;  %v2370_v2 = vld [vmem:[%s10573_s20 + $0xda0] sm:$0xff] }
 0x358   : > { %8420 = vmatpush.bf16.msrb.mxu2 %v7420_v48  ;;  %v7386_v10 = vpack.c.bf16 %v6184_v23, %v6182_v24  ;;  %v6216_v21 = vcvt.s32.f32 %v4168_v14  ;;  %v4230_v36 = vunpack.c.0.s8 %v2380_v56  ;;  %v4232_v41 = vunpack.c.1.s8 %v2380_v56 }
 0x359   : > { %8433 = vmatpush.bf16.msrb.mxu3 %v7436_v47  ;;  %v6246_v43 = vcvt.s32.f32 %v4198_v37  ;;  %v6248_v57 = vcvt.s32.f32 %v4200_v0  ;;  %v4130_v34 = vunpack.c.2.s8 %v2354_v63  ;;  %v4132_v50 = vunpack.c.3.s8 %v2354_v63 }
 0x35a   : > { %8395 = vmatpush.bf16.msrb.mxu0 %v7386_v10  ;;  %v7402_v15 = vpack.c.bf16 %v6216_v21, %v6214_v52  ;;  %v6278_v32 = vcvt.s32.f32 %v4230_v36  ;;  %v6280_v54 = vcvt.s32.f32 %v4232_v41  ;;  %v4162_v38 = vunpack.c.2.s8 %v2362_v12 }
 0x35b   : > { %v7418_v19 = vpack.c.bf16 %v6248_v57, %v6246_v43  ;;  %v6178_v59 = vcvt.s32.f32 %v4130_v34  ;;  %v6180_v48 = vcvt.s32.f32 %v4132_v50  ;;  %v4164_v46 = vunpack.c.3.s8 %v2362_v12 }
 0x35c   : > { %8408 = vmatpush.bf16.msrb.mxu1 %v7402_v15  ;;  %v7434_v24 = vpack.c.bf16 %v6280_v54, %v6278_v32  ;;  %v6210_v23 = vcvt.s32.f32 %v4162_v38  ;;  %v4194_v56 = vunpack.c.2.s8 %v2370_v2  ;;  %v4196_v14 = vunpack.c.3.s8 %v2370_v2 }
 0x35d   : > { %8421 = vmatpush.bf16.msrb.mxu2 %v7418_v19  ;;  %v7384_v47 = vpack.c.bf16 %v6180_v48, %v6178_v59  ;;  %v6212_v37 = vcvt.s32.f32 %v4164_v46  ;;  %v4226_v0 = vunpack.c.2.s8 %v2378_v6  ;;  %v4228_v26 = vunpack.c.3.s8 %v2378_v6  ;;  %v2352_v48 = vld [vmem:[%s10573_s20 + $0xd10] sm:$0xff] }
 0x35e   : > { %8434 = vmatpush.bf16.msrb.mxu3 %v7434_v24  ;;  %v6242_v52 = vcvt.s32.f32 %v4194_v56  ;;  %v6244_v10 = vcvt.s32.f32 %v4196_v14  ;;  %v8144_v21 = vadd.f32 %v11150_v60, %v11146_v55  ;;  %v4126_v36 = vunpack.c.0.s8 %v2354_v63 }
 0x35f   : > { %8396 = vmatpush.bf16.msrb.mxu0 %v7384_v47  ;;  %v7400_v41 = vpack.c.bf16 %v6212_v37, %v6210_v23  ;;  %v6274_v43 = vcvt.s32.f32 %v4226_v0  ;;  %v6276_v54 = vcvt.s32.f32 %v4228_v26  ;;  %v4128_v57 = vunpack.c.1.s8 %v2354_v63  ;;  %v2360_v26 = vld [vmem:[%s10573_s20 + $0xd50] sm:$0xff] }
 0x360   : > { %v7416_v34 = vpack.c.bf16 %v6244_v10, %v6242_v52  ;;  %v6174_v50 = vcvt.s32.f32 %v4126_v36  ;;  %v4158_v59 = vunpack.c.0.s8 %v2362_v12  ;;  %v4160_v46 = vunpack.c.1.s8 %v2362_v12  ;;  %v2368_v47 = vld [vmem:[%s10573_s20 + $0xd90] sm:$0xff] }
 0x361   : > { %8409 = vmatpush.bf16.msrb.mxu1 %v7400_v41  ;;  %v7432_v15 = vpack.c.bf16 %v6276_v54, %v6274_v43  ;;  %v6176_v32 = vcvt.s32.f32 %v4128_v57  ;;  %v4190_v38 = vunpack.c.0.s8 %v2370_v2  ;;  %v4192_v19 = vunpack.c.1.s8 %v2370_v2  ;;  %v2376_v2 = vld [vmem:[%s10573_s20 + $0xdd0] sm:$0xff] }
 0x362   : > { %8422 = vmatpush.bf16.msrb.mxu2 %v7416_v34  ;;  %v6206_v55 = vcvt.s32.f32 %v4158_v59  ;;  %v6208_v60 = vcvt.s32.f32 %v4160_v46  ;;  %v4222_v24 = vunpack.c.0.s8 %v2378_v6  ;;  %v4224_v23 = vunpack.c.1.s8 %v2378_v6 }
 0x363   : > { %8435 = vmatpush.bf16.msrb.mxu3 %v7432_v15  ;;  %v7382_v63 = vpack.c.bf16 %v6176_v32, %v6174_v50  ;;  %v6238_v56 = vcvt.s32.f32 %v4190_v38  ;;  %v6240_v14 = vcvt.s32.f32 %v4192_v19  ;;  %v8157_v12 = vadd.f32 %v11154_v27, %v8144_v21 }
 0x364   : > { %v7398_v37 = vpack.c.bf16 %v6208_v60, %v6206_v55  ;;  %v6270_v0 = vcvt.s32.f32 %v4222_v24  ;;  %v6272_v52 = vcvt.s32.f32 %v4224_v23  ;;  %v4122_v10 = vunpack.c.2.s8 %v2352_v48 }
 0x365   : > { %8397 = vmatpush.bf16.msrb.mxu0 %v7382_v63  ;;  %v7414_v36 = vpack.c.bf16 %v6240_v14, %v6238_v56  ;;  %v4124_v41 = vunpack.c.3.s8 %v2352_v48  ;;  %v4154_v43 = vunpack.c.2.s8 %v2360_v26  ;;  %v4156_v54 = vunpack.c.3.s8 %v2360_v26 }
 0x366   : > { %8410 = vmatpush.bf16.msrb.mxu1 %v7398_v37  ;;  %v7430_v6 = vpack.c.bf16 %v6272_v52, %v6270_v0  ;;  %v6170_v57 = vcvt.s32.f32 %v4122_v10  ;;  %v4186_v34 = vunpack.c.2.s8 %v2368_v47  ;;  %v4188_v50 = vunpack.c.3.s8 %v2368_v47 }
 0x367   : > { %8423 = vmatpush.bf16.msrb.mxu2 %v7414_v36  ;;  %v6172_v59 = vcvt.s32.f32 %v4124_v41  ;;  %v6202_v46 = vcvt.s32.f32 %v4154_v43  ;;  %v6204_v27 = vcvt.s32.f32 %v4156_v54  ;;  %v4218_v21 = vunpack.c.2.s8 %v2376_v2  ;;  %v2350_v41 = vld [vmem:[%s10573_s20 + $0xd00] sm:$0xff] }
 0x368   : > { %8436 = vmatpush.bf16.msrb.mxu3 %v7430_v6  ;;  %v6234_v15 = vcvt.s32.f32 %v4186_v34  ;;  %v6236_v32 = vcvt.s32.f32 %v4188_v50  ;;  %v4220_v38 = vunpack.c.3.s8 %v2376_v2  ;;  %v8170_v19 = vadd.f32 %v11160_v49, %v8157_v12  ;;  %v2358_v6 = vld [vmem:[%s10573_s20 + $0xd40] sm:$0xff] }
 0x369   : > { %v7380_v55 = vpack.c.bf16 %v6172_v59, %v6170_v57  ;;  %v7396_v60 = vpack.c.bf16 %v6204_v27, %v6202_v46  ;;  %v6266_v24 = vcvt.s32.f32 %v4218_v21  ;;  %v4118_v23 = vunpack.c.0.s8 %v2352_v48  ;;  %v11199_v57 = vpop.f32.mrf.mxu0  ;;  %v2366_v59 = vld [vmem:[%s10573_s20 + $0xd80] sm:$0xff] }
 0x36a   : > { %v7412_v63 = vpack.c.bf16 %v6236_v32, %v6234_v15  ;;  %v6268_v56 = vcvt.s32.f32 %v4220_v38  ;;  %v11195_v14 = vadd.f32 %v11162_v33, %v8170_v19  ;;  %v4120_v37 = vunpack.c.1.s8 %v2352_v48 }
 0x36b   : > { %8398 = vmatpush.bf16.msrb.mxu0 %v7380_v55  ;;  %8411 = vmatpush.bf16.msrb.mxu1 %v7396_v60  ;;  %v6166_v0 = vcvt.s32.f32 %v4118_v23  ;;  %v4150_v52 = vunpack.c.0.s8 %v2360_v26  ;;  %v4152_v10 = vunpack.c.1.s8 %v2360_v26  ;;  %v4182_v36 = vunpack.c.0.s8 %v2368_v47 }
 0x36c   : > { %8424 = vmatpush.bf16.msrb.mxu2 %v7412_v63  ;;  %v7428_v49 = vpack.c.bf16 %v6268_v56, %v6266_v24  ;;  %v6168_v12 = vcvt.s32.f32 %v4120_v37  ;;  %v4184_v43 = vunpack.c.1.s8 %v2368_v47  ;;  %v4214_v54 = vunpack.c.0.s8 %v2376_v2  ;;  %v2374_v47 = vld [vmem:[%s10573_s20 + $0xdc0] sm:$0xff] }
 0x36d   : > { %v6198_v33 = vcvt.s32.f32 %v4150_v52  ;;  %v6200_v34 = vcvt.s32.f32 %v4152_v10  ;;  %v6230_v48 = vcvt.s32.f32 %v4182_v36  ;;  %v4216_v50 = vunpack.c.1.s8 %v2376_v2  ;;  %v11203_v52 = vpop.f32.mrf.mxu1 }
 0x36e   : > { %8437 = vmatpush.bf16.msrb.mxu3 %v7428_v49  ;;  %v7378_v46 = vpack.c.bf16 %v6168_v12, %v6166_v0  ;;  %v6232_v27 = vcvt.s32.f32 %v4184_v43  ;;  %v6262_v26 = vcvt.s32.f32 %v4214_v54  ;;  %v4114_v21 = vunpack.c.2.s8 %v2350_v41 }
 0x36f   : > { %v7394_v15 = vpack.c.bf16 %v6200_v34, %v6198_v33  ;;  %v6264_v32 = vcvt.s32.f32 %v4216_v50  ;;  %v4116_v38 = vunpack.c.3.s8 %v2350_v41  ;;  %v4146_v19 = vunpack.c.2.s8 %v2358_v6 }
 0x370   : > { %8399 = vmatpush.bf16.msrb.mxu0 %v7378_v46  ;;  %v7410_v55 = vpack.c.bf16 %v6232_v27, %v6230_v48  ;;  %v6162_v60 = vcvt.s32.f32 %v4114_v21  ;;  %v4148_v24 = vunpack.c.3.s8 %v2358_v6  ;;  %v4178_v23 = vunpack.c.2.s8 %v2366_v59 }
 0x371   : > { %8412 = vmatpush.bf16.msrb.mxu1 %v7394_v15  ;;  %v7426_v63 = vpack.c.bf16 %v6264_v32, %v6262_v26  ;;  %v6164_v56 = vcvt.s32.f32 %v4116_v38  ;;  %v6194_v2 = vcvt.s32.f32 %v4146_v19  ;;  %v4180_v37 = vunpack.c.3.s8 %v2366_v59  ;;  %v8197_v27 = vpop.f32.mrf.mxu0  ;;  %v2388_v38 = vld [vmem:[%s10573_s20 + $0xe30] sm:$0xff] }
 0x372   : > { %8425 = vmatpush.bf16.msrb.mxu2 %v7410_v55  ;;  %v6196_v0 = vcvt.s32.f32 %v4148_v24  ;;  %v6226_v10 = vcvt.s32.f32 %v4178_v23  ;;  %v4210_v36 = vunpack.c.2.s8 %v2374_v47  ;;  %v4212_v49 = vunpack.c.3.s8 %v2374_v47  ;;  %v11207_v23 = vld [vmem:[%s10573_s20 + $0xe70] sm:$0xff] }
 0x373   : > { %8438 = vmatpush.bf16.msrb.mxu3 %v7426_v63  ;;  %v7376_v12 = vpack.c.bf16 %v6164_v56, %v6162_v60  ;;  %v6228_v43 = vcvt.s32.f32 %v4180_v37  ;;  %v4110_v54 = vunpack.c.0.s8 %v2350_v41  ;;  %v4112_v33 = vunpack.c.1.s8 %v2350_v41  ;;  %v11209_v37 = vpop.f32.mrf.mxu2 }
 0x374   : > { %v7392_v34 = vpack.c.bf16 %v6196_v0, %v6194_v2  ;;  %v6258_v48 = vcvt.s32.f32 %v4210_v36  ;;  %v6260_v50 = vcvt.s32.f32 %v4212_v49  ;;  %v4142_v46 = vunpack.c.0.s8 %v2358_v6  ;;  %v11211_v0 = vpop.f32.mrf.mxu3 }
 0x375   : > { %8400 = vmatpush.bf16.msrb.mxu0 %v7376_v12  ;;  %v7408_v26 = vpack.c.bf16 %v6228_v43, %v6226_v10  ;;  %v6158_v21 = vcvt.s32.f32 %v4110_v54  ;;  %v6160_v15 = vcvt.s32.f32 %v4112_v33  ;;  %v4144_v32 = vunpack.c.1.s8 %v2358_v6  ;;  %v2404_v12 = vld [vmem:[%s10573_s20 + $0xeb0] sm:$0xff] }
 0x376   : > { %8413 = vmatpush.bf16.msrb.mxu1 %v7392_v34  ;;  %v7424_v19 = vpack.c.bf16 %v6260_v50, %v6258_v48  ;;  %v6190_v55 = vcvt.s32.f32 %v4142_v46  ;;  %v4174_v60 = vunpack.c.0.s8 %v2366_v59  ;;  %v4176_v24 = vunpack.c.1.s8 %v2366_v59  ;;  %v2412_v34 = vld [vmem:[%s10573_s20 + $0xef0] sm:$0xff]  ;;  %v11216_v48 = vld [vmem:[#allocation1 + $0x24] sm:$0xff] }
 0x377   : > { %8426 = vmatpush.bf16.msrb.mxu2 %v7408_v26  ;;  %v7374_v41 = vpack.c.bf16 %v6160_v15, %v6158_v21  ;;  %v6192_v63 = vcvt.s32.f32 %v4144_v32  ;;  %v4206_v56 = vunpack.c.0.s8 %v2374_v47  ;;  %v4208_v2 = vunpack.c.1.s8 %v2374_v47  ;;  %12090 = vst [vmem:[#allocation35_spill] sm:$0xff] %v11216_v48  ;;  %v8210_v47 = vpop.f32.mrf.mxu1 }
 0x378   : > { %8439 = vmatpush.bf16.msrb.mxu3 %v7424_v19  ;;  %v6222_v6 = vcvt.s32.f32 %v4174_v60  ;;  %v6224_v10 = vcvt.s32.f32 %v4176_v24  ;;  %v4266_v36 = vunpack.c.2.s8 %v2388_v38  ;;  %v4268_v49 = vunpack.c.3.s8 %v2388_v38  ;;  %v11219_v60 = vld [vmem:[#allocation1 + $0x2d] sm:$0xff] }
 0x379   : > { %8401 = vmatpush.bf16.msrb.mxu0 %v7374_v41  ;;  %v7390_v59 = vpack.c.bf16 %v6192_v63, %v6190_v55  ;;  %v6254_v43 = vcvt.s32.f32 %v4206_v56  ;;  %v6256_v54 = vcvt.s32.f32 %v4208_v2  ;;  %v4298_v33 = vunpack.c.2.s8 %v11207_v23  ;;  %12091 = vst [vmem:[#allocation36_spill] sm:$0xff] %v11219_v60  ;;  %v11222_v56 = vld [vmem:[#allocation1 + $0x36] sm:$0xff] }
 0x37a   : > { %v7406_v50 = vpack.c.bf16 %v6224_v10, %v6222_v6  ;;  %v6314_v46 = vcvt.s32.f32 %v4266_v36  ;;  %v6316_v27 = vcvt.s32.f32 %v4268_v49  ;;  %v4300_v26 = vunpack.c.3.s8 %v11207_v23  ;;  %12092 = vst [vmem:[#allocation37_spill] sm:$0xff] %v11222_v56  ;;  %v11224_v10 = vld [vmem:[#allocation1 + $0x3f] sm:$0xff] }
 0x37b   : > { %8414 = vmatpush.bf16.msrb.mxu1 %v7390_v59  ;;  %v7422_v21 = vpack.c.bf16 %v6256_v54, %v6254_v43  ;;  %v6346_v15 = vcvt.s32.f32 %v4298_v33  ;;  %v4330_v32 = vunpack.c.2.s8 %v2404_v12  ;;  %v4332_v19 = vunpack.c.3.s8 %v2404_v12  ;;  %12093 = vst [vmem:[#allocation38_spill] sm:$0xff] %v11224_v10 }
 0x37c   : > { %8427 = vmatpush.bf16.msrb.mxu2 %v7406_v50  ;;  %v7452_v55 = vpack.c.bf16 %v6316_v27, %v6314_v46  ;;  %v6348_v24 = vcvt.s32.f32 %v4300_v26  ;;  %v4362_v41 = vunpack.c.2.s8 %v2412_v34  ;;  %v4364_v63 = vunpack.c.3.s8 %v2412_v34  ;;  %8402 = vmatmul.bf16.vlgmr.msrb.gmra.mxu0 %v11216_v48  ;;  %v2386_v26 = vld [vmem:[%s10573_s20 + $0xe20] sm:$0xff] }
 0x37d   : > { %8440 = vmatpush.bf16.msrb.mxu3 %v7422_v21  ;;  %v6378_v2 = vcvt.s32.f32 %v4330_v32  ;;  %v6380_v6 = vcvt.s32.f32 %v4332_v19  ;;  %v4262_v36 = vunpack.c.0.s8 %v2388_v38  ;;  %v4264_v49 = vunpack.c.1.s8 %v2388_v38  ;;  %v8223_v21 = vpop.f32.mrf.mxu2  ;;  %v8236_v32 = vpop.f32.mrf.mxu3 }
 0x37e   : > { %8446 = vmatpush.bf16.msra.mxu0 %v7452_v55  ;;  %v7468_v59 = vpack.c.bf16 %v6348_v24, %v6346_v15  ;;  %v6410_v43 = vcvt.s32.f32 %v4362_v41  ;;  %v6412_v54 = vcvt.s32.f32 %v4364_v63  ;;  %8415 = vmatmul.bf16.vlgmr.msrb.gmra.mxu1 %v11219_v60  ;;  %v4294_v33 = vunpack.c.0.s8 %v11207_v23  ;;  %v2394_v24 = vld [vmem:[%s10573_s20 + $0xe60] sm:$0xff] }
 0x37f   : > { %v7484_v47 = vpack.c.bf16 %v6380_v6, %v6378_v2  ;;  %8428 = vmatmul.bf16.vlgmr.msrb.gmra.mxu2 %v11222_v56  ;;  %v6310_v50 = vcvt.s32.f32 %v4262_v36  ;;  %v6312_v46 = vcvt.s32.f32 %v4264_v49  ;;  %v4296_v27 = vunpack.c.1.s8 %v11207_v23 }
 0x380   : > { %8459 = vmatpush.bf16.msra.mxu1 %v7468_v59  ;;  %v7500_v38 = vpack.c.bf16 %v6412_v54, %v6410_v43  ;;  %8441 = vmatmul.bf16.vlgmr.msrb.gmra.mxu3 %v11224_v10  ;;  %v6342_v15 = vcvt.s32.f32 %v4294_v33  ;;  %v4326_v19 = vunpack.c.0.s8 %v2404_v12  ;;  %v4328_v55 = vunpack.c.1.s8 %v2404_v12  ;;  %v2402_v59 = vld [vmem:[%s10573_s20 + $0xea0] sm:$0xff] }
 0x381   : > { %8472 = vmatpush.bf16.msra.mxu2 %v7484_v47  ;;  %v7450_v41 = vpack.c.bf16 %v6312_v46, %v6310_v50  ;;  %v6344_v63 = vcvt.s32.f32 %v4296_v27  ;;  %v4358_v2 = vunpack.c.0.s8 %v2412_v34  ;;  %v4360_v6 = vunpack.c.1.s8 %v2412_v34  ;;  %v2410_v10 = vld [vmem:[%s10573_s20 + $0xee0] sm:$0xff]  ;;  %v7573_v34 = vld [vmem:[%s12016_s0 + $0x38] sm:$0xff] }
 0x382   : > { %8485 = vmatpush.bf16.msra.mxu3 %v7500_v38  ;;  %v6374_v23 = vcvt.s32.f32 %v4326_v19  ;;  %v6376_v36 = vcvt.s32.f32 %v4328_v55  ;;  %v4258_v49 = vunpack.c.2.s8 %v2386_v26  ;;  %v4260_v21 = vunpack.c.3.s8 %v2386_v26  ;;  %7645 = vst [vmem:[#allocation1] ss:$9 sm:$0xff] %v7573_v34 }
 0x383   : > { %8447 = vmatpush.bf16.msra.mxu0 %v7450_v41  ;;  %v7466_v43 = vpack.c.bf16 %v6344_v63, %v6342_v15  ;;  %v6406_v54 = vcvt.s32.f32 %v4358_v2  ;;  %v6408_v32 = vcvt.s32.f32 %v4360_v6  ;;  %v4290_v33 = vunpack.c.2.s8 %v2394_v24 }
 0x384   : > { %v7482_v12 = vpack.c.bf16 %v6376_v36, %v6374_v23  ;;  %v6306_v56 = vcvt.s32.f32 %v4258_v49  ;;  %v6308_v47 = vcvt.s32.f32 %v4260_v21  ;;  %v4292_v60 = vunpack.c.3.s8 %v2394_v24 }
 0x385   : > { %8460 = vmatpush.bf16.msra.mxu1 %v7466_v43  ;;  %v7498_v50 = vpack.c.bf16 %v6408_v32, %v6406_v54  ;;  %v6338_v46 = vcvt.s32.f32 %v4290_v33  ;;  %v4322_v27 = vunpack.c.2.s8 %v2402_v59  ;;  %v4324_v38 = vunpack.c.3.s8 %v2402_v59 }
 0x386   : > { %8473 = vmatpush.bf16.msra.mxu2 %v7482_v12  ;;  %v7448_v15 = vpack.c.bf16 %v6308_v47, %v6306_v56  ;;  %v6340_v19 = vcvt.s32.f32 %v4292_v60  ;;  %v4354_v55 = vunpack.c.2.s8 %v2410_v10  ;;  %v4356_v41 = vunpack.c.3.s8 %v2410_v10 }
 0x387   : > { %8486 = vmatpush.bf16.msra.mxu3 %v7498_v50  ;;  %v6370_v63 = vcvt.s32.f32 %v4322_v27  ;;  %v6372_v2 = vcvt.s32.f32 %v4324_v38  ;;  %v8196_v6 = vadd.f32 %v11199_v57, %v11195_v14  ;;  %v4254_v23 = vunpack.c.0.s8 %v2386_v26  ;;  %v2384_v50 = vld [vmem:[%s10573_s20 + $0xe10] sm:$0xff] }
 0x388   : > { %8448 = vmatpush.bf16.msra.mxu0 %v7448_v15  ;;  %v7464_v36 = vpack.c.bf16 %v6340_v19, %v6338_v46  ;;  %v6402_v49 = vcvt.s32.f32 %v4354_v55  ;;  %v6404_v21 = vcvt.s32.f32 %v4356_v41  ;;  %v4256_v43 = vunpack.c.1.s8 %v2386_v26  ;;  %v2392_v38 = vld [vmem:[%s10573_s20 + $0xe50] sm:$0xff] }
 0x389   : > { %v7480_v54 = vpack.c.bf16 %v6372_v2, %v6370_v63  ;;  %v6302_v32 = vcvt.s32.f32 %v4254_v23  ;;  %v4286_v56 = vunpack.c.0.s8 %v2394_v24  ;;  %v4288_v60 = vunpack.c.1.s8 %v2394_v24  ;;  %v2400_v55 = vld [vmem:[%s10573_s20 + $0xe90] sm:$0xff] }
 0x38a   : > { %8461 = vmatpush.bf16.msra.mxu1 %v7464_v36  ;;  %v7496_v33 = vpack.c.bf16 %v6404_v21, %v6402_v49  ;;  %v6304_v12 = vcvt.s32.f32 %v4256_v43  ;;  %v4318_v47 = vunpack.c.0.s8 %v2402_v59  ;;  %v4320_v34 = vunpack.c.1.s8 %v2402_v59  ;;  %v2408_v59 = vld [vmem:[%s10573_s20 + $0xed0] sm:$0xff] }
 0x38b   : > { %8474 = vmatpush.bf16.msra.mxu2 %v7480_v54  ;;  %v6334_v14 = vcvt.s32.f32 %v4286_v56  ;;  %v6336_v57 = vcvt.s32.f32 %v4288_v60  ;;  %v4350_v46 = vunpack.c.0.s8 %v2410_v10  ;;  %v4352_v27 = vunpack.c.1.s8 %v2410_v10 }
 0x38c   : > { %8487 = vmatpush.bf16.msra.mxu3 %v7496_v33  ;;  %v7446_v26 = vpack.c.bf16 %v6304_v12, %v6302_v32  ;;  %v6366_v15 = vcvt.s32.f32 %v4318_v47  ;;  %v6368_v19 = vcvt.s32.f32 %v4320_v34  ;;  %v8209_v24 = vadd.f32 %v11203_v52, %v8196_v6 }
 0x38d   : > { %v7462_v41 = vpack.c.bf16 %v6336_v57, %v6334_v14  ;;  %v6398_v63 = vcvt.s32.f32 %v4350_v46  ;;  %v6400_v2 = vcvt.s32.f32 %v4352_v27  ;;  %v4250_v23 = vunpack.c.2.s8 %v2384_v50 }
 0x38e   : > { %8449 = vmatpush.bf16.msra.mxu0 %v7446_v26  ;;  %v7478_v36 = vpack.c.bf16 %v6368_v19, %v6366_v15  ;;  %v4252_v49 = vunpack.c.3.s8 %v2384_v50  ;;  %v4282_v21 = vunpack.c.2.s8 %v2392_v38  ;;  %v4284_v43 = vunpack.c.3.s8 %v2392_v38 }
 0x38f   : > { %8462 = vmatpush.bf16.msra.mxu1 %v7462_v41  ;;  %v7494_v10 = vpack.c.bf16 %v6400_v2, %v6398_v63  ;;  %v6298_v54 = vcvt.s32.f32 %v4250_v23  ;;  %v4314_v56 = vunpack.c.2.s8 %v2400_v55  ;;  %v4316_v32 = vunpack.c.3.s8 %v2400_v55 }
 0x390   : > { %8475 = vmatpush.bf16.msra.mxu2 %v7478_v36  ;;  %v6300_v60 = vcvt.s32.f32 %v4252_v49  ;;  %v6330_v33 = vcvt.s32.f32 %v4282_v21  ;;  %v6332_v52 = vcvt.s32.f32 %v4284_v43  ;;  %v4346_v6 = vunpack.c.2.s8 %v2408_v59  ;;  %v2382_v21 = vld [vmem:[%s10573_s20 + $0xe00] sm:$0xff] }
 0x391   : > { %8488 = vmatpush.bf16.msra.mxu3 %v7494_v10  ;;  %v6362_v12 = vcvt.s32.f32 %v4314_v56  ;;  %v6364_v47 = vcvt.s32.f32 %v4316_v32  ;;  %v4348_v34 = vunpack.c.3.s8 %v2408_v59  ;;  %v8222_v14 = vadd.f32 %v11209_v37, %v8209_v24  ;;  %v11251_v56 = vpop.f32.mrf.mxu0 }
 0x392   : > { %v7444_v57 = vpack.c.bf16 %v6300_v60, %v6298_v54  ;;  %v7460_v46 = vpack.c.bf16 %v6332_v52, %v6330_v33  ;;  %v6394_v27 = vcvt.s32.f32 %v4346_v6  ;;  %v4246_v26 = vunpack.c.0.s8 %v2384_v50  ;;  %v2390_v54 = vld [vmem:[%s10573_s20 + $0xe40] sm:$0xff] }
 0x393   : > { %v7476_v15 = vpack.c.bf16 %v6364_v47, %v6362_v12  ;;  %v6396_v19 = vcvt.s32.f32 %v4348_v34  ;;  %v11247_v41 = vadd.f32 %v11211_v0, %v8222_v14  ;;  %v4248_v63 = vunpack.c.1.s8 %v2384_v50  ;;  %v2398_v33 = vld [vmem:[%s10573_s20 + $0xe80] sm:$0xff] }
 0x394   : > { %8450 = vmatpush.bf16.msra.mxu0 %v7444_v57  ;;  %8463 = vmatpush.bf16.msra.mxu1 %v7460_v46  ;;  %v6294_v2 = vcvt.s32.f32 %v4246_v26  ;;  %v4278_v23 = vunpack.c.0.s8 %v2392_v38  ;;  %v4280_v36 = vunpack.c.1.s8 %v2392_v38  ;;  %v4310_v49 = vunpack.c.0.s8 %v2400_v55 }
 0x395   : > { %8476 = vmatpush.bf16.msra.mxu2 %v7476_v15  ;;  %v7492_v37 = vpack.c.bf16 %v6396_v19, %v6394_v27  ;;  %v6296_v24 = vcvt.s32.f32 %v4248_v63  ;;  %v4312_v43 = vunpack.c.1.s8 %v2400_v55  ;;  %v4342_v10 = vunpack.c.0.s8 %v2408_v59  ;;  %v2406_v55 = vld [vmem:[%s10573_s20 + $0xec0] sm:$0xff] }
 0x396   : > { %v6326_v0 = vcvt.s32.f32 %v4278_v23  ;;  %v6328_v32 = vcvt.s32.f32 %v4280_v36  ;;  %v6358_v50 = vcvt.s32.f32 %v4310_v49  ;;  %v4344_v60 = vunpack.c.1.s8 %v2408_v59  ;;  %v11255_v36 = vpop.f32.mrf.mxu1 }
 0x397   : > { %8489 = vmatpush.bf16.msra.mxu3 %v7492_v37  ;;  %v7442_v52 = vpack.c.bf16 %v6296_v24, %v6294_v2  ;;  %v6360_v6 = vcvt.s32.f32 %v4312_v43  ;;  %v6390_v38 = vcvt.s32.f32 %v4342_v10  ;;  %v4242_v12 = vunpack.c.2.s8 %v2382_v21 }
 0x398   : > { %v7458_v47 = vpack.c.bf16 %v6328_v32, %v6326_v0  ;;  %v6392_v34 = vcvt.s32.f32 %v4344_v60  ;;  %v4244_v14 = vunpack.c.3.s8 %v2382_v21  ;;  %v4274_v57 = vunpack.c.2.s8 %v2390_v54 }
 0x399   : > { %8451 = vmatpush.bf16.msra.mxu0 %v7442_v52  ;;  %v7474_v46 = vpack.c.bf16 %v6360_v6, %v6358_v50  ;;  %v6290_v27 = vcvt.s32.f32 %v4242_v12  ;;  %v4276_v26 = vunpack.c.3.s8 %v2390_v54  ;;  %v4306_v15 = vunpack.c.2.s8 %v2398_v33 }
 0x39a   : > { %8464 = vmatpush.bf16.msra.mxu1 %v7458_v47  ;;  %v7490_v19 = vpack.c.bf16 %v6392_v34, %v6390_v38  ;;  %v6292_v63 = vcvt.s32.f32 %v4244_v14  ;;  %v6322_v59 = vcvt.s32.f32 %v4274_v57  ;;  %v4308_v23 = vunpack.c.3.s8 %v2398_v33  ;;  %v8249_v38 = vpop.f32.mrf.mxu0  ;;  %v2420_v57 = vld [vmem:[%s10573_s20 + $0xf30] sm:$0xff] }
 0x39b   : > { %8477 = vmatpush.bf16.msra.mxu2 %v7474_v46  ;;  %v6324_v2 = vcvt.s32.f32 %v4276_v26  ;;  %v6354_v49 = vcvt.s32.f32 %v4306_v15  ;;  %v4338_v37 = vunpack.c.2.s8 %v2406_v55  ;;  %v4340_v24 = vunpack.c.3.s8 %v2406_v55 }
 0x39c   : > { %8490 = vmatpush.bf16.msra.mxu3 %v7490_v19  ;;  %v7440_v43 = vpack.c.bf16 %v6292_v63, %v6290_v27  ;;  %v6356_v10 = vcvt.s32.f32 %v4308_v23  ;;  %v4238_v0 = vunpack.c.0.s8 %v2382_v21  ;;  %v4240_v32 = vunpack.c.1.s8 %v2382_v21  ;;  %v11259_v19 = vld [vmem:[%s10573_s20 + $0xf70] sm:$0xff] }
 0x39d   : > { %v7456_v50 = vpack.c.bf16 %v6324_v2, %v6322_v59  ;;  %v6386_v60 = vcvt.s32.f32 %v4338_v37  ;;  %v6388_v52 = vcvt.s32.f32 %v4340_v24  ;;  %v4270_v6 = vunpack.c.0.s8 %v2390_v54  ;;  %v11261_v2 = vpop.f32.mrf.mxu2 }
 0x39e   : > { %8452 = vmatpush.bf16.msra.mxu0 %v7440_v43  ;;  %v7472_v12 = vpack.c.bf16 %v6356_v10, %v6354_v49  ;;  %v6286_v47 = vcvt.s32.f32 %v4238_v0  ;;  %v6288_v34 = vcvt.s32.f32 %v4240_v32  ;;  %v4272_v14 = vunpack.c.1.s8 %v2390_v54  ;;  %v11263_v49 = vpop.f32.mrf.mxu3  ;;  %v2436_v10 = vld [vmem:[%s10573_s20 + $0xfb0] sm:$0xff] }
 0x39f   : > { %8465 = vmatpush.bf16.msra.mxu1 %v7456_v50  ;;  %v7488_v46 = vpack.c.bf16 %v6388_v52, %v6386_v60  ;;  %v6318_v26 = vcvt.s32.f32 %v4270_v6  ;;  %v4302_v27 = vunpack.c.0.s8 %v2398_v33  ;;  %v4304_v15 = vunpack.c.1.s8 %v2398_v33  ;;  %v2444_v60 = vld [vmem:[%s10573_s20 + $0xff0] sm:$0xff]  ;;  %v7646_v52 = vld [vmem:[#allocation1] sm:$0xff]  ;;  %v8262_v6 = vpop.f32.mrf.mxu1 }
 0x3a0   : > { %8478 = vmatpush.bf16.msra.mxu2 %v7472_v12  ;;  %v7438_v21 = vpack.c.bf16 %v6288_v34, %v6286_v47  ;;  %v6320_v63 = vcvt.s32.f32 %v4272_v14  ;;  %v4334_v59 = vunpack.c.0.s8 %v2406_v55  ;;  %v4336_v23 = vunpack.c.1.s8 %v2406_v55 }
 0x3a1   : > { %8491 = vmatpush.bf16.msra.mxu3 %v7488_v46  ;;  %v6350_v54 = vcvt.s32.f32 %v4302_v27  ;;  %v6352_v37 = vcvt.s32.f32 %v4304_v15  ;;  %v4394_v24 = vunpack.c.2.s8 %v2420_v57  ;;  %v4396_v43 = vunpack.c.3.s8 %v2420_v57  ;;  %v7647_v15 = vld [vmem:[#allocation1 + $0x9] sm:$0xff] }
 0x3a2   : > { %8453 = vmatpush.bf16.msra.mxu0 %v7438_v21  ;;  %v7454_v33 = vpack.c.bf16 %v6320_v63, %v6318_v26  ;;  %v6382_v0 = vcvt.s32.f32 %v4334_v59  ;;  %v6384_v32 = vcvt.s32.f32 %v4336_v23  ;;  %v4426_v50 = vunpack.c.2.s8 %v11259_v19  ;;  %v7648_v23 = vld [vmem:[#allocation1 + $0x12] sm:$0xff] }
 0x3a3   : > { %v7470_v55 = vpack.c.bf16 %v6352_v37, %v6350_v54  ;;  %v6442_v38 = vcvt.s32.f32 %v4394_v24  ;;  %v6444_v12 = vcvt.s32.f32 %v4396_v43  ;;  %v4428_v47 = vunpack.c.3.s8 %v11259_v19  ;;  %v7649_v37 = vld [vmem:[#allocation1 + $0x1b] sm:$0xff] }
 0x3a4   : > { %8466 = vmatpush.bf16.msra.mxu1 %v7454_v33  ;;  %v7486_v34 = vpack.c.bf16 %v6384_v32, %v6382_v0  ;;  %v6474_v14 = vcvt.s32.f32 %v4426_v50  ;;  %v4458_v46 = vunpack.c.2.s8 %v2436_v10  ;;  %v4460_v27 = vunpack.c.3.s8 %v2436_v10 }
 0x3a5   : > { %8479 = vmatpush.bf16.msra.mxu2 %v7470_v55  ;;  %v7516_v26 = vpack.c.bf16 %v6444_v12, %v6442_v38  ;;  %v6476_v21 = vcvt.s32.f32 %v4428_v47  ;;  %v4490_v63 = vunpack.c.2.s8 %v2444_v60  ;;  %v4492_v59 = vunpack.c.3.s8 %v2444_v60  ;;  %8454 = vmatmul.bf16.vlgmr.msra.gmra.mxu0 %v7646_v52  ;;  %v2418_v47 = vld [vmem:[%s10573_s20 + $0xf20] sm:$0xff] }
 0x3a6   : > { %8492 = vmatpush.bf16.msra.mxu3 %v7486_v34  ;;  %v6506_v6 = vcvt.s32.f32 %v4458_v46  ;;  %v6508_v54 = vcvt.s32.f32 %v4460_v27  ;;  %v4390_v24 = vunpack.c.0.s8 %v2420_v57  ;;  %v4392_v43 = vunpack.c.1.s8 %v2420_v57  ;;  %v8275_v34 = vpop.f32.mrf.mxu2  ;;  %v8288_v46 = vpop.f32.mrf.mxu3 }
 0x3a7   : > { %8498 = vmatpush.bf16.msrb.mxu0 %v7516_v26  ;;  %v7532_v33 = vpack.c.bf16 %v6476_v21, %v6474_v14  ;;  %v6538_v0 = vcvt.s32.f32 %v4490_v63  ;;  %v6540_v32 = vcvt.s32.f32 %v4492_v59  ;;  %8467 = vmatmul.bf16.vlgmr.msra.gmra.mxu1 %v7647_v15  ;;  %v4422_v50 = vunpack.c.0.s8 %v11259_v19  ;;  %v2426_v15 = vld [vmem:[%s10573_s20 + $0xf60] sm:$0xff] }
 0x3a8   : > { %v7548_v55 = vpack.c.bf16 %v6508_v54, %v6506_v6  ;;  %8480 = vmatmul.bf16.vlgmr.msra.gmra.mxu2 %v7648_v23  ;;  %v6438_v38 = vcvt.s32.f32 %v4390_v24  ;;  %v6440_v52 = vcvt.s32.f32 %v4392_v43  ;;  %v4424_v12 = vunpack.c.1.s8 %v11259_v19  ;;  %v2434_v43 = vld [vmem:[%s10573_s20 + $0xfa0] sm:$0xff] }
 0x3a9   : > { %8511 = vmatpush.bf16.msrb.mxu1 %v7532_v33  ;;  %v7564_v27 = vpack.c.bf16 %v6540_v32, %v6538_v0  ;;  %8493 = vmatmul.bf16.vlgmr.msra.gmra.mxu3 %v7649_v37  ;;  %v6470_v57 = vcvt.s32.f32 %v4422_v50  ;;  %v4454_v14 = vunpack.c.0.s8 %v2436_v10  ;;  %v4456_v26 = vunpack.c.1.s8 %v2436_v10  ;;  %v2442_v50 = vld [vmem:[%s10573_s20 + $0xfe0] sm:$0xff] }
 0x3aa   : > { %8524 = vmatpush.bf16.msrb.mxu2 %v7548_v55  ;;  %v7514_v21 = vpack.c.bf16 %v6440_v52, %v6438_v38  ;;  %v6472_v63 = vcvt.s32.f32 %v4424_v12  ;;  %v4486_v59 = vunpack.c.0.s8 %v2444_v60  ;;  %v4488_v23 = vunpack.c.1.s8 %v2444_v60 }
 0x3ab   : > { %8537 = vmatpush.bf16.msrb.mxu3 %v7564_v27  ;;  %v6502_v6 = vcvt.s32.f32 %v4454_v14  ;;  %v6504_v19 = vcvt.s32.f32 %v4456_v26  ;;  %v4386_v54 = vunpack.c.2.s8 %v2418_v47  ;;  %v4388_v24 = vunpack.c.3.s8 %v2418_v47 }
 0x3ac   : > { %8499 = vmatpush.bf16.msrb.mxu0 %v7514_v21  ;;  %v7530_v33 = vpack.c.bf16 %v6472_v63, %v6470_v57  ;;  %v6534_v0 = vcvt.s32.f32 %v4486_v59  ;;  %v6536_v37 = vcvt.s32.f32 %v4488_v23  ;;  %v4418_v32 = vunpack.c.2.s8 %v2426_v15 }
 0x3ad   : > { %v7546_v10 = vpack.c.bf16 %v6504_v19, %v6502_v6  ;;  %v6434_v34 = vcvt.s32.f32 %v4386_v54  ;;  %v6436_v55 = vcvt.s32.f32 %v4388_v24  ;;  %v4420_v46 = vunpack.c.3.s8 %v2426_v15 }
 0x3ae   : > { %8512 = vmatpush.bf16.msrb.mxu1 %v7530_v33  ;;  %v7562_v38 = vpack.c.bf16 %v6536_v37, %v6534_v0  ;;  %v6466_v52 = vcvt.s32.f32 %v4418_v32  ;;  %v4450_v60 = vunpack.c.2.s8 %v2434_v43  ;;  %v4452_v12 = vunpack.c.3.s8 %v2434_v43 }
 0x3af   : > { %8525 = vmatpush.bf16.msrb.mxu2 %v7546_v10  ;;  %v7512_v27 = vpack.c.bf16 %v6436_v55, %v6434_v34  ;;  %v6468_v14 = vcvt.s32.f32 %v4420_v46  ;;  %v4482_v26 = vunpack.c.2.s8 %v2442_v50  ;;  %v4484_v48 = vunpack.c.3.s8 %v2442_v50  ;;  %v2416_v46 = vld [vmem:[%s10573_s20 + $0xf10] sm:$0xff] }
 0x3b0   : > { %8538 = vmatpush.bf16.msrb.mxu3 %v7562_v38  ;;  %v6498_v57 = vcvt.s32.f32 %v4450_v60  ;;  %v6500_v21 = vcvt.s32.f32 %v4452_v12  ;;  %v8248_v63 = vadd.f32 %v11251_v56, %v11247_v41  ;;  %v4382_v59 = vunpack.c.0.s8 %v2418_v47 }
 0x3b1   : > { %8500 = vmatpush.bf16.msrb.mxu0 %v7512_v27  ;;  %v7528_v23 = vpack.c.bf16 %v6468_v14, %v6466_v52  ;;  %v6530_v6 = vcvt.s32.f32 %v4482_v26  ;;  %v6532_v19 = vcvt.s32.f32 %v4484_v48  ;;  %v4384_v54 = vunpack.c.1.s8 %v2418_v47  ;;  %v2424_v48 = vld [vmem:[%s10573_s20 + $0xf50] sm:$0xff] }
 0x3b2   : > { %v7544_v24 = vpack.c.bf16 %v6500_v21, %v6498_v57  ;;  %v6430_v33 = vcvt.s32.f32 %v4382_v59  ;;  %v4414_v0 = vunpack.c.0.s8 %v2426_v15  ;;  %v4416_v37 = vunpack.c.1.s8 %v2426_v15  ;;  %v2432_v27 = vld [vmem:[%s10573_s20 + $0xf90] sm:$0xff] }
 0x3b3   : > { %8513 = vmatpush.bf16.msrb.mxu1 %v7528_v23  ;;  %v7560_v32 = vpack.c.bf16 %v6532_v19, %v6530_v6  ;;  %v6432_v10 = vcvt.s32.f32 %v4384_v54  ;;  %v4446_v34 = vunpack.c.0.s8 %v2434_v43  ;;  %v4448_v55 = vunpack.c.1.s8 %v2434_v43  ;;  %v2440_v43 = vld [vmem:[%s10573_s20 + $0xfd0] sm:$0xff] }
 0x3b4   : > { %8526 = vmatpush.bf16.msrb.mxu2 %v7544_v24  ;;  %v6462_v41 = vcvt.s32.f32 %v4414_v0  ;;  %v6464_v56 = vcvt.s32.f32 %v4416_v37  ;;  %v4478_v38 = vunpack.c.0.s8 %v2442_v50  ;;  %v4480_v52 = vunpack.c.1.s8 %v2442_v50 }
 0x3b5   : > { %8539 = vmatpush.bf16.msrb.mxu3 %v7560_v32  ;;  %v7510_v47 = vpack.c.bf16 %v6432_v10, %v6430_v33  ;;  %v6494_v60 = vcvt.s32.f32 %v4446_v34  ;;  %v6496_v12 = vcvt.s32.f32 %v4448_v55  ;;  %v8261_v15 = vadd.f32 %v11255_v36, %v8248_v63 }
 0x3b6   : > { %v7526_v14 = vpack.c.bf16 %v6464_v56, %v6462_v41  ;;  %v6526_v26 = vcvt.s32.f32 %v4478_v38  ;;  %v6528_v57 = vcvt.s32.f32 %v4480_v52  ;;  %v4378_v21 = vunpack.c.2.s8 %v2416_v46 }
 0x3b7   : > { %8501 = vmatpush.bf16.msrb.mxu0 %v7510_v47  ;;  %v7542_v59 = vpack.c.bf16 %v6496_v12, %v6494_v60  ;;  %v4380_v23 = vunpack.c.3.s8 %v2416_v46  ;;  %v4410_v6 = vunpack.c.2.s8 %v2424_v48  ;;  %v4412_v19 = vunpack.c.3.s8 %v2424_v48 }
 0x3b8   : > { %8514 = vmatpush.bf16.msrb.mxu1 %v7526_v14  ;;  %v7558_v50 = vpack.c.bf16 %v6528_v57, %v6526_v26  ;;  %v6426_v54 = vcvt.s32.f32 %v4378_v21  ;;  %v4442_v24 = vunpack.c.2.s8 %v2432_v27  ;;  %v4444_v33 = vunpack.c.3.s8 %v2432_v27 }
 0x3b9   : > { %8527 = vmatpush.bf16.msrb.mxu2 %v7542_v59  ;;  %v6428_v0 = vcvt.s32.f32 %v4380_v23  ;;  %v6458_v37 = vcvt.s32.f32 %v4410_v6  ;;  %v6460_v36 = vcvt.s32.f32 %v4412_v19  ;;  %v4474_v63 = vunpack.c.2.s8 %v2440_v43  ;;  %v2414_v23 = vld [vmem:[%s10573_s20 + $0xf00] sm:$0xff] }
 0x3ba   : > { %8540 = vmatpush.bf16.msrb.mxu3 %v7558_v50  ;;  %v6490_v32 = vcvt.s32.f32 %v4442_v24  ;;  %v6492_v10 = vcvt.s32.f32 %v4444_v33  ;;  %v4476_v34 = vunpack.c.3.s8 %v2440_v43  ;;  %v8274_v55 = vadd.f32 %v11261_v2, %v8261_v15  ;;  %v2422_v50 = vld [vmem:[%s10573_s20 + $0xf40] sm:$0xff] }
 0x3bb   : > { %v7508_v41 = vpack.c.bf16 %v6428_v0, %v6426_v54  ;;  %v7524_v56 = vpack.c.bf16 %v6460_v36, %v6458_v37  ;;  %v6522_v38 = vcvt.s32.f32 %v4474_v63  ;;  %v4374_v52 = vunpack.c.0.s8 %v2416_v46  ;;  %v11288_v54 = vpop.f32.mrf.mxu0  ;;  %v2430_v0 = vld [vmem:[%s10573_s20 + $0xf80] sm:$0xff] }
 0x3bc   : > { %v7540_v47 = vpack.c.bf16 %v6492_v10, %v6490_v32  ;;  %v6524_v60 = vcvt.s32.f32 %v4476_v34  ;;  %v11284_v12 = vadd.f32 %v11263_v49, %v8274_v55  ;;  %v4376_v14 = vunpack.c.1.s8 %v2416_v46 }
 0x3bd   : > { %8502 = vmatpush.bf16.msrb.mxu0 %v7508_v41  ;;  %8515 = vmatpush.bf16.msrb.mxu1 %v7524_v56  ;;  %v6422_v26 = vcvt.s32.f32 %v4374_v52  ;;  %v4406_v57 = vunpack.c.0.s8 %v2424_v48  ;;  %v4408_v21 = vunpack.c.1.s8 %v2424_v48  ;;  %v4438_v59 = vunpack.c.0.s8 %v2432_v27 }
 0x3be   : > { %8528 = vmatpush.bf16.msrb.mxu2 %v7540_v47  ;;  %v7556_v2 = vpack.c.bf16 %v6524_v60, %v6522_v38  ;;  %v6424_v15 = vcvt.s32.f32 %v4376_v14  ;;  %v4440_v6 = vunpack.c.1.s8 %v2432_v27  ;;  %v4470_v19 = vunpack.c.0.s8 %v2440_v43  ;;  %v2438_v27 = vld [vmem:[%s10573_s20 + $0xfc0] sm:$0xff] }
 0x3bf   : > { %v6454_v49 = vcvt.s32.f32 %v4406_v57  ;;  %v6456_v24 = vcvt.s32.f32 %v4408_v21  ;;  %v6486_v46 = vcvt.s32.f32 %v4438_v59  ;;  %v4472_v33 = vunpack.c.1.s8 %v2440_v43  ;;  %v11292_v57 = vpop.f32.mrf.mxu1 }
 0x3c0   : > { %8541 = vmatpush.bf16.msrb.mxu3 %v7556_v2  ;;  %v7506_v37 = vpack.c.bf16 %v6424_v15, %v6422_v26  ;;  %v6488_v36 = vcvt.s32.f32 %v4440_v6  ;;  %v6518_v48 = vcvt.s32.f32 %v4470_v19  ;;  %v4370_v63 = vunpack.c.2.s8 %v2414_v23 }
 0x3c1   : > { %v7522_v32 = vpack.c.bf16 %v6456_v24, %v6454_v49  ;;  %v6520_v10 = vcvt.s32.f32 %v4472_v33  ;;  %v4372_v34 = vunpack.c.3.s8 %v2414_v23  ;;  %v4402_v55 = vunpack.c.2.s8 %v2422_v50 }
 0x3c2   : > { %8503 = vmatpush.bf16.msrb.mxu0 %v7506_v37  ;;  %v7538_v41 = vpack.c.bf16 %v6488_v36, %v6486_v46  ;;  %v6418_v56 = vcvt.s32.f32 %v4370_v63  ;;  %v4404_v38 = vunpack.c.3.s8 %v2422_v50  ;;  %v4434_v52 = vunpack.c.2.s8 %v2430_v0 }
 0x3c3   : > { %8516 = vmatpush.bf16.msrb.mxu1 %v7522_v32  ;;  %v7554_v47 = vpack.c.bf16 %v6520_v10, %v6518_v48  ;;  %v6420_v60 = vcvt.s32.f32 %v4372_v34  ;;  %v6450_v43 = vcvt.s32.f32 %v4402_v55  ;;  %v4436_v14 = vunpack.c.3.s8 %v2430_v0  ;;  %v8301_v36 = vpop.f32.mrf.mxu0  ;;  %v1941_v34 = vld [vmem:[%s10573_s20 + $0x38] sm:$0xff] }
 0x3c4   : > { %8529 = vmatpush.bf16.msrb.mxu2 %v7538_v41  ;;  %v6452_v26 = vcvt.s32.f32 %v4404_v38  ;;  %v6482_v21 = vcvt.s32.f32 %v4434_v52  ;;  %v4466_v59 = vunpack.c.2.s8 %v2438_v27  ;;  %v4468_v2 = vunpack.c.3.s8 %v2438_v27  ;;  %v11296_v52 = vld [vmem:[%s10573_s20 + $0x78] sm:$0xff] }
 0x3c5   : > { %8542 = vmatpush.bf16.msrb.mxu3 %v7554_v47  ;;  %v7504_v15 = vpack.c.bf16 %v6420_v60, %v6418_v56  ;;  %v6484_v6 = vcvt.s32.f32 %v4436_v14  ;;  %v4366_v19 = vunpack.c.0.s8 %v2414_v23  ;;  %v4368_v49 = vunpack.c.1.s8 %v2414_v23  ;;  %v11298_v14 = vpop.f32.mrf.mxu2 }
 0x3c6   : > { %v7520_v24 = vpack.c.bf16 %v6452_v26, %v6450_v43  ;;  %v6514_v46 = vcvt.s32.f32 %v4466_v59  ;;  %v6516_v33 = vcvt.s32.f32 %v4468_v2  ;;  %v4398_v37 = vunpack.c.0.s8 %v2422_v50  ;;  %v11300_v26 = vpop.f32.mrf.mxu3 }
 0x3c7   : > { %8504 = vmatpush.bf16.msrb.mxu0 %v7504_v15  ;;  %v7536_v48 = vpack.c.bf16 %v6484_v6, %v6482_v21  ;;  %v6414_v63 = vcvt.s32.f32 %v4366_v19  ;;  %v6416_v32 = vcvt.s32.f32 %v4368_v49  ;;  %v4400_v10 = vunpack.c.1.s8 %v2422_v50  ;;  %v1957_v15 = vld [vmem:[%s10573_s20 + $0xb8] sm:$0xff] }
 0x3c8   : > { %8517 = vmatpush.bf16.msrb.mxu1 %v7520_v24  ;;  %v7552_v55 = vpack.c.bf16 %v6516_v33, %v6514_v46  ;;  %v6446_v41 = vcvt.s32.f32 %v4398_v37  ;;  %v4430_v56 = vunpack.c.0.s8 %v2430_v0  ;;  %v4432_v38 = vunpack.c.1.s8 %v2430_v0  ;;  %v1965_v24 = vld [vmem:[%s10573_s20 + $0xf8] sm:$0xff]  ;;  %v8314_v33 = vpop.f32.mrf.mxu1 }
 0x3c9   : > { %8530 = vmatpush.bf16.msrb.mxu2 %v7536_v48  ;;  %v7502_v23 = vpack.c.bf16 %v6416_v32, %v6414_v63  ;;  %v6448_v47 = vcvt.s32.f32 %v4400_v10  ;;  %v4462_v60 = vunpack.c.0.s8 %v2438_v27  ;;  %v4464_v43 = vunpack.c.1.s8 %v2438_v27  ;;  %v7650_v46 = vld [vmem:[#allocation1 + $0x24] sm:$0xff] }
 0x3ca   : > { %8543 = vmatpush.bf16.msrb.mxu3 %v7552_v55  ;;  %v6478_v50 = vcvt.s32.f32 %v4430_v56  ;;  %v6480_v21 = vcvt.s32.f32 %v4432_v38  ;;  %v2475_v59 = vunpack.c.2.s8 %v1941_v34  ;;  %v2477_v2 = vunpack.c.3.s8 %v1941_v34  ;;  %v7651_v56 = vld [vmem:[#allocation1 + $0x2d] sm:$0xff] }
 0x3cb   : > { %8505 = vmatpush.bf16.msrb.mxu0 %v7502_v23  ;;  %v7518_v0 = vpack.c.bf16 %v6448_v47, %v6446_v41  ;;  %v6510_v6 = vcvt.s32.f32 %v4462_v60  ;;  %v6512_v19 = vcvt.s32.f32 %v4464_v43  ;;  %v2507_v49 = vunpack.c.2.s8 %v11296_v52  ;;  %v7652_v60 = vld [vmem:[#allocation1 + $0x36] sm:$0xff] }
 0x3cc   : > { %v7534_v27 = vpack.c.bf16 %v6480_v21, %v6478_v50  ;;  %v4523_v37 = vcvt.s32.f32 %v2475_v59  ;;  %v4525_v36 = vcvt.s32.f32 %v2477_v2  ;;  %v2509_v48 = vunpack.c.3.s8 %v11296_v52  ;;  %v7653_v21 = vld [vmem:[#allocation1 + $0x3f] sm:$0xff] }
 0x3cd   : > { %8518 = vmatpush.bf16.msrb.mxu1 %v7518_v0  ;;  %v7550_v63 = vpack.c.bf16 %v6512_v19, %v6510_v6  ;;  %v4555_v32 = vcvt.s32.f32 %v2507_v49  ;;  %v2539_v10 = vunpack.c.2.s8 %v1957_v15  ;;  %v2541_v55 = vunpack.c.3.s8 %v1957_v15 }
 0x3ce   : > { %8531 = vmatpush.bf16.msrb.mxu2 %v7534_v27  ;;  %v6557_v41 = vpack.c.bf16 %v4525_v36, %v4523_v37  ;;  %v4557_v38 = vcvt.s32.f32 %v2509_v48  ;;  %v2571_v23 = vunpack.c.2.s8 %v1965_v24  ;;  %v2573_v47 = vunpack.c.3.s8 %v1965_v24  ;;  %8506 = vmatmul.bf16.vlgmr.msrb.gmra.mxu0 %v7650_v46  ;;  %v1939_v36 = vld [vmem:[%s10573_s20 + $0x28] sm:$0xff]  ;;  %v8327_v48 = vpop.f32.mrf.mxu2 }
 0x3cf   : > { %8544 = vmatpush.bf16.msrb.mxu3 %v7550_v63  ;;  %v4587_v43 = vcvt.s32.f32 %v2539_v10  ;;  %v4589_v50 = vcvt.s32.f32 %v2541_v55  ;;  %v2471_v59 = vunpack.c.0.s8 %v1941_v34  ;;  %v2473_v2 = vunpack.c.1.s8 %v1941_v34  ;;  %v8340_v63 = vpop.f32.mrf.mxu3 }
 0x3d0   : > { %8550 = vmatpush.bf16.msra.mxu0 %v6557_v41  ;;  %v6573_v0 = vpack.c.bf16 %v4557_v38, %v4555_v32  ;;  %v4619_v6 = vcvt.s32.f32 %v2571_v23  ;;  %v4621_v19 = vcvt.s32.f32 %v2573_v47  ;;  %8519 = vmatmul.bf16.vlgmr.msrb.gmra.mxu1 %v7651_v56  ;;  %v2503_v49 = vunpack.c.0.s8 %v11296_v52  ;;  %v1947_v56 = vld [vmem:[%s10573_s20 + $0x68] sm:$0xff] }
 0x3d1   : > { %v6589_v33 = vpack.c.bf16 %v4589_v50, %v4587_v43  ;;  %8532 = vmatmul.bf16.vlgmr.msrb.gmra.mxu2 %v7652_v60  ;;  %v4519_v27 = vcvt.s32.f32 %v2471_v59  ;;  %v4521_v46 = vcvt.s32.f32 %v2473_v2  ;;  %v2505_v37 = vunpack.c.1.s8 %v11296_v52  ;;  %v1955_v59 = vld [vmem:[%s10573_s20 + $0xa8] sm:$0xff] }
 0x3d2   : > { %8563 = vmatpush.bf16.msra.mxu1 %v6573_v0  ;;  %v6605_v10 = vpack.c.bf16 %v4621_v19, %v4619_v6  ;;  %8545 = vmatmul.bf16.vlgmr.msrb.gmra.mxu3 %v7653_v21  ;;  %v4551_v34 = vcvt.s32.f32 %v2503_v49  ;;  %v2535_v32 = vunpack.c.0.s8 %v1957_v15  ;;  %v2537_v55 = vunpack.c.1.s8 %v1957_v15  ;;  %v1963_v19 = vld [vmem:[%s10573_s20 + $0xe8] sm:$0xff] }
 0x3d3   : > { %8576 = vmatpush.bf16.msra.mxu2 %v6589_v33  ;;  %v6555_v41 = vpack.c.bf16 %v4521_v46, %v4519_v27  ;;  %v4553_v38 = vcvt.s32.f32 %v2505_v37  ;;  %v2567_v23 = vunpack.c.0.s8 %v1965_v24  ;;  %v2569_v47 = vunpack.c.1.s8 %v1965_v24 }
 0x3d4   : > { %8589 = vmatpush.bf16.msra.mxu3 %v6605_v10  ;;  %v4583_v60 = vcvt.s32.f32 %v2535_v32  ;;  %v4585_v52 = vcvt.s32.f32 %v2537_v55  ;;  %v2467_v43 = vunpack.c.2.s8 %v1939_v36  ;;  %v2469_v50 = vunpack.c.3.s8 %v1939_v36 }
 0x3d5   : > { %8551 = vmatpush.bf16.msra.mxu0 %v6555_v41  ;;  %v6571_v2 = vpack.c.bf16 %v4553_v38, %v4551_v34  ;;  %v4615_v0 = vcvt.s32.f32 %v2567_v23  ;;  %v4617_v21 = vcvt.s32.f32 %v2569_v47  ;;  %v2499_v6 = vunpack.c.2.s8 %v1947_v56 }
 0x3d6   : > { %v6587_v15 = vpack.c.bf16 %v4585_v52, %v4583_v60  ;;  %v4515_v49 = vcvt.s32.f32 %v2467_v43  ;;  %v4517_v33 = vcvt.s32.f32 %v2469_v50  ;;  %v2501_v48 = vunpack.c.3.s8 %v1947_v56 }
 0x3d7   : > { %8564 = vmatpush.bf16.msra.mxu1 %v6571_v2  ;;  %v6603_v27 = vpack.c.bf16 %v4617_v21, %v4615_v0  ;;  %v4547_v46 = vcvt.s32.f32 %v2499_v6  ;;  %v2531_v24 = vunpack.c.2.s8 %v1955_v59  ;;  %v2533_v37 = vunpack.c.3.s8 %v1955_v59 }
 0x3d8   : > { %8577 = vmatpush.bf16.msra.mxu2 %v6587_v15  ;;  %v6553_v63 = vpack.c.bf16 %v4517_v33, %v4515_v49  ;;  %v4549_v10 = vcvt.s32.f32 %v2501_v48  ;;  %v2563_v32 = vunpack.c.2.s8 %v1963_v19  ;;  %v2565_v55 = vunpack.c.3.s8 %v1963_v19  ;;  %v1937_v48 = vld [vmem:[%s10573_s20 + $0x18] sm:$0xff] }
 0x3d9   : > { %8590 = vmatpush.bf16.msra.mxu3 %v6603_v27  ;;  %v4579_v34 = vcvt.s32.f32 %v2531_v24  ;;  %v4581_v41 = vcvt.s32.f32 %v2533_v37  ;;  %v8300_v38 = vadd.f32 %v11288_v54, %v11284_v12  ;;  %v2463_v23 = vunpack.c.0.s8 %v1939_v36  ;;  %v1945_v24 = vld [vmem:[%s10573_s20 + $0x58] sm:$0xff] }
 0x3da   : > { %8552 = vmatpush.bf16.msra.mxu0 %v6553_v63  ;;  %v6569_v47 = vpack.c.bf16 %v4549_v10, %v4547_v46  ;;  %v4611_v60 = vcvt.s32.f32 %v2563_v32  ;;  %v4613_v52 = vcvt.s32.f32 %v2565_v55  ;;  %v2465_v43 = vunpack.c.1.s8 %v1939_v36  ;;  %v1953_v10 = vld [vmem:[%s10573_s20 + $0x98] sm:$0xff] }
 0x3db   : > { %v6585_v50 = vpack.c.bf16 %v4581_v41, %v4579_v34  ;;  %v4511_v2 = vcvt.s32.f32 %v2463_v23  ;;  %v2495_v0 = vunpack.c.0.s8 %v1947_v56  ;;  %v2497_v21 = vunpack.c.1.s8 %v1947_v56 }
 0x3dc   : > { %8565 = vmatpush.bf16.msra.mxu1 %v6569_v47  ;;  %v6601_v6 = vpack.c.bf16 %v4613_v52, %v4611_v60  ;;  %v4513_v15 = vcvt.s32.f32 %v2465_v43  ;;  %v2527_v49 = vunpack.c.0.s8 %v1955_v59  ;;  %v2529_v33 = vunpack.c.1.s8 %v1955_v59  ;;  %v1961_v59 = vld [vmem:[%s10573_s20 + $0xd8] sm:$0xff] }
 0x3dd   : > { %8578 = vmatpush.bf16.msra.mxu2 %v6585_v50  ;;  %v4543_v12 = vcvt.s32.f32 %v2495_v0  ;;  %v4545_v54 = vcvt.s32.f32 %v2497_v21  ;;  %v2559_v27 = vunpack.c.0.s8 %v1963_v19  ;;  %v2561_v46 = vunpack.c.1.s8 %v1963_v19 }
 0x3de   : > { %8591 = vmatpush.bf16.msra.mxu3 %v6601_v6  ;;  %v6551_v36 = vpack.c.bf16 %v4513_v15, %v4511_v2  ;;  %v4575_v37 = vcvt.s32.f32 %v2527_v49  ;;  %v4577_v63 = vcvt.s32.f32 %v2529_v33  ;;  %v8313_v56 = vadd.f32 %v11292_v57, %v8300_v38 }
 0x3df   : > { %v6567_v32 = vpack.c.bf16 %v4545_v54, %v4543_v12  ;;  %v4607_v55 = vcvt.s32.f32 %v2559_v27  ;;  %v4609_v34 = vcvt.s32.f32 %v2561_v46  ;;  %v2459_v41 = vunpack.c.2.s8 %v1937_v48 }
 0x3e0   : > { %8553 = vmatpush.bf16.msra.mxu0 %v6551_v36  ;;  %v6583_v23 = vpack.c.bf16 %v4577_v63, %v4575_v37  ;;  %v2461_v47 = vunpack.c.3.s8 %v1937_v48  ;;  %v2491_v60 = vunpack.c.2.s8 %v1945_v24  ;;  %v2493_v52 = vunpack.c.3.s8 %v1945_v24 }
 0x3e1   : > { %8566 = vmatpush.bf16.msra.mxu1 %v6567_v32  ;;  %v6599_v19 = vpack.c.bf16 %v4609_v34, %v4607_v55  ;;  %v4507_v43 = vcvt.s32.f32 %v2459_v41  ;;  %v2523_v50 = vunpack.c.2.s8 %v1953_v10  ;;  %v2525_v2 = vunpack.c.3.s8 %v1953_v10 }
 0x3e2   : > { %8579 = vmatpush.bf16.msra.mxu2 %v6583_v23  ;;  %v4509_v0 = vcvt.s32.f32 %v2461_v47  ;;  %v4539_v21 = vcvt.s32.f32 %v2491_v60  ;;  %v4541_v57 = vcvt.s32.f32 %v2493_v52  ;;  %v2555_v38 = vunpack.c.2.s8 %v1961_v59  ;;  %v1935_v47 = vld [vmem:[%s10573_s20 + $0x8] sm:$0xff] }
 0x3e3   : > { %8592 = vmatpush.bf16.msra.mxu3 %v6599_v19  ;;  %v4571_v6 = vcvt.s32.f32 %v2523_v50  ;;  %v4573_v15 = vcvt.s32.f32 %v2525_v2  ;;  %v2557_v49 = vunpack.c.3.s8 %v1961_v59  ;;  %v8326_v33 = vadd.f32 %v11298_v14, %v8313_v56  ;;  %v1943_v19 = vld [vmem:[%s10573_s20 + $0x48] sm:$0xff] }
 0x3e4   : > { %v6549_v12 = vpack.c.bf16 %v4509_v0, %v4507_v43  ;;  %v6565_v54 = vpack.c.bf16 %v4541_v57, %v4539_v21  ;;  %v4603_v27 = vcvt.s32.f32 %v2555_v38  ;;  %v2455_v46 = vunpack.c.0.s8 %v1937_v48  ;;  %v11325_v43 = vpop.f32.mrf.mxu0  ;;  %v1951_v0 = vld [vmem:[%s10573_s20 + $0x88] sm:$0xff] }
 0x3e5   : > { %v6581_v36 = vpack.c.bf16 %v4573_v15, %v4571_v6  ;;  %v4605_v37 = vcvt.s32.f32 %v2557_v49  ;;  %v11321_v63 = vadd.f32 %v11300_v26, %v8326_v33  ;;  %v2457_v32 = vunpack.c.1.s8 %v1937_v48 }
 0x3e6   : > { %8554 = vmatpush.bf16.msra.mxu0 %v6549_v12  ;;  %8567 = vmatpush.bf16.msra.mxu1 %v6565_v54  ;;  %v4503_v55 = vcvt.s32.f32 %v2455_v46  ;;  %v2487_v34 = vunpack.c.0.s8 %v1945_v24  ;;  %v2489_v41 = vunpack.c.1.s8 %v1945_v24  ;;  %v2519_v23 = vunpack.c.0.s8 %v1953_v10 }
 0x3e7   : > { %8580 = vmatpush.bf16.msra.mxu2 %v6581_v36  ;;  %v6597_v14 = vpack.c.bf16 %v4605_v37, %v4603_v27  ;;  %v4505_v56 = vcvt.s32.f32 %v2457_v32  ;;  %v2521_v60 = vunpack.c.1.s8 %v1953_v10  ;;  %v2551_v52 = vunpack.c.0.s8 %v1961_v59  ;;  %v1959_v10 = vld [vmem:[%s10573_s20 + $0xc8] sm:$0xff] }
 0x3e8   : > { %v4535_v26 = vcvt.s32.f32 %v2487_v34  ;;  %v4537_v50 = vcvt.s32.f32 %v2489_v41  ;;  %v4567_v48 = vcvt.s32.f32 %v2519_v23  ;;  %v2553_v2 = vunpack.c.1.s8 %v1961_v59  ;;  %v11329_v34 = vpop.f32.mrf.mxu1 }
 0x3e9   : > { %8593 = vmatpush.bf16.msra.mxu3 %v6597_v14  ;;  %v6547_v21 = vpack.c.bf16 %v4505_v56, %v4503_v55  ;;  %v4569_v57 = vcvt.s32.f32 %v2521_v60  ;;  %v4599_v24 = vcvt.s32.f32 %v2551_v52  ;;  %v2451_v38 = vunpack.c.2.s8 %v1935_v47 }
 0x3ea   : > { %v6563_v6 = vpack.c.bf16 %v4537_v50, %v4535_v26  ;;  %v4601_v15 = vcvt.s32.f32 %v2553_v2  ;;  %v2453_v49 = vunpack.c.3.s8 %v1935_v47  ;;  %v2483_v33 = vunpack.c.2.s8 %v1943_v19 }
 0x3eb   : > { %8555 = vmatpush.bf16.msra.mxu0 %v6547_v21  ;;  %v6579_v12 = vpack.c.bf16 %v4569_v57, %v4567_v48  ;;  %v4499_v54 = vcvt.s32.f32 %v2451_v38  ;;  %v2485_v27 = vunpack.c.3.s8 %v1943_v19  ;;  %v2515_v46 = vunpack.c.2.s8 %v1951_v0 }
 0x3ec   : > { %8568 = vmatpush.bf16.msra.mxu1 %v6563_v6  ;;  %v6595_v36 = vpack.c.bf16 %v4601_v15, %v4599_v24  ;;  %v4501_v37 = vcvt.s32.f32 %v2453_v49  ;;  %v4531_v59 = vcvt.s32.f32 %v2483_v33  ;;  %v2517_v32 = vunpack.c.3.s8 %v1951_v0  ;;  %v8353_v57 = vpop.f32.mrf.mxu0  ;;  %v1973_v49 = vld [vmem:[%s10573_s20 + $0x138] sm:$0xff] }
 0x3ed   : > { %8581 = vmatpush.bf16.msra.mxu2 %v6579_v12  ;;  %v4533_v55 = vcvt.s32.f32 %v2485_v27  ;;  %v4563_v41 = vcvt.s32.f32 %v2515_v46  ;;  %v2547_v23 = vunpack.c.2.s8 %v1959_v10  ;;  %v2549_v14 = vunpack.c.3.s8 %v1959_v10  ;;  %v11333_v46 = vld [vmem:[%s10573_s20 + $0x178] sm:$0xff] }
 0x3ee   : > { %8594 = vmatpush.bf16.msra.mxu3 %v6595_v36  ;;  %v6545_v56 = vpack.c.bf16 %v4501_v37, %v4499_v54  ;;  %v4565_v60 = vcvt.s32.f32 %v2517_v32  ;;  %v2447_v52 = vunpack.c.0.s8 %v1935_v47  ;;  %v2449_v26 = vunpack.c.1.s8 %v1935_v47  ;;  %v11335_v32 = vpop.f32.mrf.mxu2 }
 0x3ef   : > { %v6561_v50 = vpack.c.bf16 %v4533_v55, %v4531_v59  ;;  %v4595_v48 = vcvt.s32.f32 %v2547_v23  ;;  %v4597_v2 = vcvt.s32.f32 %v2549_v14  ;;  %v2479_v21 = vunpack.c.0.s8 %v1943_v19  ;;  %v11337_v55 = vpop.f32.mrf.mxu3 }
 0x3f0   : > { %8556 = vmatpush.bf16.msra.mxu0 %v6545_v56  ;;  %v6577_v24 = vpack.c.bf16 %v4565_v60, %v4563_v41  ;;  %v4495_v38 = vcvt.s32.f32 %v2447_v52  ;;  %v4497_v6 = vcvt.s32.f32 %v2449_v26  ;;  %v2481_v15 = vunpack.c.1.s8 %v1943_v19  ;;  %v1989_v56 = vld [vmem:[%s10573_s20 + $0x1b8] sm:$0xff] }
 0x3f1   : > { %8569 = vmatpush.bf16.msra.mxu1 %v6561_v50  ;;  %v6593_v33 = vpack.c.bf16 %v4597_v2, %v4595_v48  ;;  %v4527_v12 = vcvt.s32.f32 %v2479_v21  ;;  %v2511_v54 = vunpack.c.0.s8 %v1951_v0  ;;  %v2513_v27 = vunpack.c.1.s8 %v1951_v0  ;;  %v1997_v50 = vld [vmem:[%s10573_s20 + $0x1f8] sm:$0xff]  ;;  %v8366_v48 = vpop.f32.mrf.mxu1 }
 0x3f2   : > { %8582 = vmatpush.bf16.msra.mxu2 %v6577_v24  ;;  %v6543_v47 = vpack.c.bf16 %v4497_v6, %v4495_v38  ;;  %v4529_v36 = vcvt.s32.f32 %v2481_v15  ;;  %v2543_v37 = vunpack.c.0.s8 %v1959_v10  ;;  %v2545_v59 = vunpack.c.1.s8 %v1959_v10 }
 0x3f3   : > { %8595 = vmatpush.bf16.msra.mxu3 %v6593_v33  ;;  %v4559_v19 = vcvt.s32.f32 %v2511_v54  ;;  %v4561_v41 = vcvt.s32.f32 %v2513_v27  ;;  %v2603_v23 = vunpack.c.2.s8 %v1973_v49  ;;  %v2605_v14 = vunpack.c.3.s8 %v1973_v49 }
 0x3f4   : > { %8557 = vmatpush.bf16.msra.mxu0 %v6543_v47  ;;  %v6559_v0 = vpack.c.bf16 %v4529_v36, %v4527_v12  ;;  %v4591_v60 = vcvt.s32.f32 %v2543_v37  ;;  %v4593_v52 = vcvt.s32.f32 %v2545_v59  ;;  %v2635_v26 = vunpack.c.2.s8 %v11333_v46 }
 0x3f5   : > { %v6575_v2 = vpack.c.bf16 %v4561_v41, %v4559_v19  ;;  %v4651_v10 = vcvt.s32.f32 %v2603_v23  ;;  %v4653_v21 = vcvt.s32.f32 %v2605_v14  ;;  %v2637_v57 = vunpack.c.3.s8 %v11333_v46 }
 0x3f6   : > { %8570 = vmatpush.bf16.msra.mxu1 %v6559_v0  ;;  %v6591_v24 = vpack.c.bf16 %v4593_v52, %v4591_v60  ;;  %v4683_v38 = vcvt.s32.f32 %v2635_v26  ;;  %v2667_v6 = vunpack.c.2.s8 %v1989_v56  ;;  %v2669_v15 = vunpack.c.3.s8 %v1989_v56  ;;  %v1971_v26 = vld [vmem:[%s10573_s20 + $0x128] sm:$0xff]  ;;  %v8379_v48 = vpop.f32.mrf.mxu2 }
 0x3f7   : > { %8583 = vmatpush.bf16.msra.mxu2 %v6575_v2  ;;  %v6621_v33 = vpack.c.bf16 %v4653_v21, %v4651_v10  ;;  %v4685_v54 = vcvt.s32.f32 %v2637_v57  ;;  %v2699_v12 = vunpack.c.2.s8 %v1997_v50  ;;  %v2701_v27 = vunpack.c.3.s8 %v1997_v50  ;;  %8558 = vmatmul.bf16.vlgmr.msra.gmra.mxu0 %v10605_v61  ;;  %v8392_v2 = vpop.f32.mrf.mxu3 }
 0x3f8   : > { %8596 = vmatpush.bf16.msra.mxu3 %v6591_v24  ;;  %v4715_v47 = vcvt.s32.f32 %v2667_v6  ;;  %v4717_v36 = vcvt.s32.f32 %v2669_v15  ;;  %v2599_v37 = vunpack.c.0.s8 %v1973_v49  ;;  %v2601_v59 = vunpack.c.1.s8 %v1973_v49  ;;  %v1979_v24 = vld [vmem:[%s10573_s20 + $0x168] sm:$0xff] }
 0x3f9   : > { %8602 = vmatpush.bf16.msrb.mxu0 %v6621_v33  ;;  %v6637_v19 = vpack.c.bf16 %v4685_v54, %v4683_v38  ;;  %v4747_v41 = vcvt.s32.f32 %v2699_v12  ;;  %v4749_v23 = vcvt.s32.f32 %v2701_v27  ;;  %v2631_v14 = vunpack.c.0.s8 %v11333_v46  ;;  %8571 = vmatmul.bf16.vlgmr.msra.gmra.mxu1 %v10607_v62  ;;  %v1987_v12 = vld [vmem:[%s10573_s20 + $0x1a8] sm:$0xff] }
 0x3fa   : > { %v6653_v0 = vpack.c.bf16 %v4717_v36, %v4715_v47  ;;  %v4647_v60 = vcvt.s32.f32 %v2599_v37  ;;  %v4649_v52 = vcvt.s32.f32 %v2601_v59  ;;  %v2633_v61 = vunpack.c.1.s8 %v11333_v46  ;;  %8584 = vmatmul.bf16.vlgmr.msra.gmra.mxu2 %v10609_v3  ;;  %v1995_v37 = vld [vmem:[%s10573_s20 + $0x1e8] sm:$0xff] }
 0x3fb   : > { %8615 = vmatpush.bf16.msrb.mxu1 %v6637_v19  ;;  %v6669_v49 = vpack.c.bf16 %v4749_v23, %v4747_v41  ;;  %v4679_v10 = vcvt.s32.f32 %v2631_v14  ;;  %v2663_v21 = vunpack.c.0.s8 %v1989_v56  ;;  %v2665_v57 = vunpack.c.1.s8 %v1989_v56  ;;  %8597 = vmatmul.bf16.vlgmr.msra.gmra.mxu3 %v10612_v8 }
 0x3fc   : > { %8628 = vmatpush.bf16.msrb.mxu2 %v6653_v0  ;;  %v6619_v62 = vpack.c.bf16 %v4649_v52, %v4647_v60  ;;  %v4681_v38 = vcvt.s32.f32 %v2633_v61  ;;  %v2695_v6 = vunpack.c.0.s8 %v1997_v50  ;;  %v2697_v46 = vunpack.c.1.s8 %v1997_v50 }
 0x3fd   : > { %8641 = vmatpush.bf16.msrb.mxu3 %v6669_v49  ;;  %v4711_v15 = vcvt.s32.f32 %v2663_v21  ;;  %v4713_v3 = vcvt.s32.f32 %v2665_v57  ;;  %v2595_v33 = vunpack.c.2.s8 %v1971_v26  ;;  %v2597_v54 = vunpack.c.3.s8 %v1971_v26 }
 0x3fe   : > { %8603 = vmatpush.bf16.msrb.mxu0 %v6619_v62  ;;  %v6635_v27 = vpack.c.bf16 %v4681_v38, %v4679_v10  ;;  %v4743_v47 = vcvt.s32.f32 %v2695_v6  ;;  %v4745_v36 = vcvt.s32.f32 %v2697_v46  ;;  %v2627_v56 = vunpack.c.2.s8 %v1979_v24 }
 0x3ff   : > { %v6651_v59 = vpack.c.bf16 %v4713_v3, %v4711_v15  ;;  %v4643_v8 = vcvt.s32.f32 %v2595_v33  ;;  %v4645_v19 = vcvt.s32.f32 %v2597_v54  ;;  %v2629_v41 = vunpack.c.3.s8 %v1979_v24 }
 0x400   : > { %8616 = vmatpush.bf16.msrb.mxu1 %v6635_v27  ;;  %v6667_v23 = vpack.c.bf16 %v4745_v36, %v4743_v47  ;;  %v4675_v14 = vcvt.s32.f32 %v2627_v56  ;;  %v2659_v50 = vunpack.c.2.s8 %v1987_v12  ;;  %v2661_v0 = vunpack.c.3.s8 %v1987_v12  ;;  %v1969_v56 = vld [vmem:[%s10573_s20 + $0x118] sm:$0xff] }
 0x401   : > { %8629 = vmatpush.bf16.msrb.mxu2 %v6651_v59  ;;  %v6617_v60 = vpack.c.bf16 %v4645_v19, %v4643_v8  ;;  %v4677_v52 = vcvt.s32.f32 %v2629_v41  ;;  %v2691_v61 = vunpack.c.2.s8 %v1995_v37  ;;  %v2693_v48 = vunpack.c.3.s8 %v1995_v37  ;;  %v1977_v19 = vld [vmem:[%s10573_s20 + $0x158] sm:$0xff] }
 0x402   : > { %8642 = vmatpush.bf16.msrb.mxu3 %v6667_v23  ;;  %v4707_v2 = vcvt.s32.f32 %v2659_v50  ;;  %v4709_v49 = vcvt.s32.f32 %v2661_v0  ;;  %v8352_v10 = vadd.f32 %v11325_v43, %v11321_v63  ;;  %v2591_v21 = vunpack.c.0.s8 %v1971_v26 }
 0x403   : > { %8604 = vmatpush.bf16.msrb.mxu0 %v6617_v60  ;;  %v6633_v57 = vpack.c.bf16 %v4677_v52, %v4675_v14  ;;  %v4739_v62 = vcvt.s32.f32 %v2691_v61  ;;  %v4741_v38 = vcvt.s32.f32 %v2693_v48  ;;  %v2593_v6 = vunpack.c.1.s8 %v1971_v26  ;;  %v1985_v14 = vld [vmem:[%s10573_s20 + $0x198] sm:$0xff] }
 0x404   : > { %v6649_v46 = vpack.c.bf16 %v4709_v49, %v4707_v2  ;;  %v4639_v15 = vcvt.s32.f32 %v2591_v21  ;;  %v2623_v3 = vunpack.c.0.s8 %v1979_v24  ;;  %v2625_v33 = vunpack.c.1.s8 %v1979_v24 }
 0x405   : > { %8617 = vmatpush.bf16.msrb.mxu1 %v6633_v57  ;;  %v6665_v54 = vpack.c.bf16 %v4741_v38, %v4739_v62  ;;  %v4641_v27 = vcvt.s32.f32 %v2593_v6  ;;  %v2655_v47 = vunpack.c.0.s8 %v1987_v12  ;;  %v2657_v36 = vunpack.c.1.s8 %v1987_v12  ;;  %v1993_v12 = vld [vmem:[%s10573_s20 + $0x1d8] sm:$0xff] }
 0x406   : > { %8630 = vmatpush.bf16.msrb.mxu2 %v6649_v46  ;;  %v4671_v63 = vcvt.s32.f32 %v2623_v3  ;;  %v4673_v43 = vcvt.s32.f32 %v2625_v33  ;;  %v2687_v59 = vunpack.c.0.s8 %v1995_v37  ;;  %v2689_v8 = vunpack.c.1.s8 %v1995_v37 }
 0x407   : > { %8643 = vmatpush.bf16.msrb.mxu3 %v6665_v54  ;;  %v6615_v26 = vpack.c.bf16 %v4641_v27, %v4639_v15  ;;  %v4703_v41 = vcvt.s32.f32 %v2655_v47  ;;  %v4705_v23 = vcvt.s32.f32 %v2657_v36  ;;  %v8365_v24 = vadd.f32 %v11329_v34, %v8352_v10 }
 0x408   : > { %v6631_v50 = vpack.c.bf16 %v4673_v43, %v4671_v63  ;;  %v4735_v0 = vcvt.s32.f32 %v2687_v59  ;;  %v4737_v60 = vcvt.s32.f32 %v2689_v8  ;;  %v2587_v52 = vunpack.c.2.s8 %v1969_v56 }
 0x409   : > { %8605 = vmatpush.bf16.msrb.mxu0 %v6615_v26  ;;  %v6647_v61 = vpack.c.bf16 %v4705_v23, %v4703_v41  ;;  %v2589_v48 = vunpack.c.3.s8 %v1969_v56  ;;  %v2619_v2 = vunpack.c.2.s8 %v1977_v19  ;;  %v2621_v49 = vunpack.c.3.s8 %v1977_v19 }
 0x40a   : > { %8618 = vmatpush.bf16.msrb.mxu1 %v6631_v50  ;;  %v6663_v37 = vpack.c.bf16 %v4737_v60, %v4735_v0  ;;  %v4635_v21 = vcvt.s32.f32 %v2587_v52  ;;  %v2651_v57 = vunpack.c.2.s8 %v1985_v14  ;;  %v2653_v62 = vunpack.c.3.s8 %v1985_v14  ;;  %v1967_v0 = vld [vmem:[%s10573_s20 + $0x108] sm:$0xff] }
 0x40b   : > { %8631 = vmatpush.bf16.msrb.mxu2 %v6647_v61  ;;  %v4637_v38 = vcvt.s32.f32 %v2589_v48  ;;  %v4667_v6 = vcvt.s32.f32 %v2619_v2  ;;  %v4669_v34 = vcvt.s32.f32 %v2621_v49  ;;  %v2683_v10 = vunpack.c.2.s8 %v1993_v12  ;;  %v1975_v61 = vld [vmem:[%s10573_s20 + $0x148] sm:$0xff]  ;;  %v11366_v48 = vpop.f32.mrf.mxu0 }
 0x40c   : > { %8644 = vmatpush.bf16.msrb.mxu3 %v6663_v37  ;;  %v4699_v46 = vcvt.s32.f32 %v2651_v57  ;;  %v4701_v15 = vcvt.s32.f32 %v2653_v62  ;;  %v2685_v3 = vunpack.c.3.s8 %v1993_v12  ;;  %v8378_v33 = vadd.f32 %v11335_v32, %v8365_v24  ;;  %v1983_v37 = vld [vmem:[%s10573_s20 + $0x188] sm:$0xff] }
 0x40d   : > { %v6613_v54 = vpack.c.bf16 %v4637_v38, %v4635_v21  ;;  %v6629_v27 = vpack.c.bf16 %v4669_v34, %v4667_v6  ;;  %v4731_v47 = vcvt.s32.f32 %v2683_v10  ;;  %v2583_v36 = vunpack.c.0.s8 %v1969_v56 }
 0x40e   : > { %v6645_v63 = vpack.c.bf16 %v4701_v15, %v4699_v46  ;;  %v4733_v43 = vcvt.s32.f32 %v2685_v3  ;;  %v11362_v59 = vadd.f32 %v11337_v55, %v8378_v33  ;;  %v2585_v8 = vunpack.c.1.s8 %v1969_v56 }
 0x40f   : > { %8606 = vmatpush.bf16.msrb.mxu0 %v6613_v54  ;;  %8619 = vmatpush.bf16.msrb.mxu1 %v6629_v27  ;;  %v4631_v26 = vcvt.s32.f32 %v2583_v36  ;;  %v2615_v41 = vunpack.c.0.s8 %v1977_v19  ;;  %v2617_v23 = vunpack.c.1.s8 %v1977_v19  ;;  %v2647_v50 = vunpack.c.0.s8 %v1985_v14  ;;  %v11370_v36 = vpop.f32.mrf.mxu1 }
 0x410   : > { %8632 = vmatpush.bf16.msrb.mxu2 %v6645_v63  ;;  %v6661_v32 = vpack.c.bf16 %v4733_v43, %v4731_v47  ;;  %v4633_v24 = vcvt.s32.f32 %v2585_v8  ;;  %v2649_v60 = vunpack.c.1.s8 %v1985_v14  ;;  %v2679_v52 = vunpack.c.0.s8 %v1993_v12  ;;  %v1991_v14 = vld [vmem:[%s10573_s20 + $0x1c8] sm:$0xff] }
 0x411   : > { %v4663_v55 = vcvt.s32.f32 %v2615_v41  ;;  %v4665_v2 = vcvt.s32.f32 %v2617_v23  ;;  %v4695_v56 = vcvt.s32.f32 %v2647_v50  ;;  %v2681_v49 = vunpack.c.1.s8 %v1993_v12 }
 0x412   : > { %8645 = vmatpush.bf16.msrb.mxu3 %v6661_v32  ;;  %v6611_v21 = vpack.c.bf16 %v4633_v24, %v4631_v26  ;;  %v4697_v57 = vcvt.s32.f32 %v2649_v60  ;;  %v4727_v19 = vcvt.s32.f32 %v2679_v52  ;;  %v2579_v62 = vunpack.c.2.s8 %v1967_v0 }
 0x413   : > { %v6627_v38 = vpack.c.bf16 %v4665_v2, %v4663_v55  ;;  %v4729_v6 = vcvt.s32.f32 %v2681_v49  ;;  %v2581_v34 = vunpack.c.3.s8 %v1967_v0  ;;  %v2611_v10 = vunpack.c.2.s8 %v1975_v61  ;;  %v8405_v2 = vpop.f32.mrf.mxu0 }
 0x414   : > { %8607 = vmatpush.bf16.msrb.mxu0 %v6611_v21  ;;  %v6643_v46 = vpack.c.bf16 %v4697_v57, %v4695_v56  ;;  %v4627_v15 = vcvt.s32.f32 %v2579_v62  ;;  %v2613_v3 = vunpack.c.3.s8 %v1975_v61  ;;  %v2643_v33 = vunpack.c.2.s8 %v1983_v37 }
 0x415   : > { %8620 = vmatpush.bf16.msrb.mxu1 %v6627_v38  ;;  %v6659_v54 = vpack.c.bf16 %v4729_v6, %v4727_v19  ;;  %v4629_v27 = vcvt.s32.f32 %v2581_v34  ;;  %v4659_v12 = vcvt.s32.f32 %v2611_v10  ;;  %v2645_v47 = vunpack.c.3.s8 %v1983_v37  ;;  %v2005_v19 = vld [vmem:[%s10573_s20 + $0x238] sm:$0xff] }
 0x416   : > { %8633 = vmatpush.bf16.msrb.mxu2 %v6643_v46  ;;  %v4661_v63 = vcvt.s32.f32 %v2613_v3  ;;  %v4691_v43 = vcvt.s32.f32 %v2643_v33  ;;  %v2675_v8 = vunpack.c.2.s8 %v1991_v14  ;;  %v2677_v26 = vunpack.c.3.s8 %v1991_v14  ;;  %v11374_v10 = vld [vmem:[%s10573_s20 + $0x278] sm:$0xff]  ;;  %v11376_v33 = vpop.f32.mrf.mxu2 }
 0x417   : > { %8646 = vmatpush.bf16.msrb.mxu3 %v6659_v54  ;;  %v6609_v41 = vpack.c.bf16 %v4629_v27, %v4627_v15  ;;  %v4693_v23 = vcvt.s32.f32 %v2645_v47  ;;  %v2575_v50 = vunpack.c.0.s8 %v1967_v0  ;;  %v2577_v32 = vunpack.c.1.s8 %v1967_v0  ;;  %v11378_v54 = vpop.f32.mrf.mxu3 }
 0x418   : > { %v6625_v24 = vpack.c.bf16 %v4661_v63, %v4659_v12  ;;  %v4723_v60 = vcvt.s32.f32 %v2675_v8  ;;  %v4725_v52 = vcvt.s32.f32 %v2677_v26  ;;  %v2607_v55 = vunpack.c.0.s8 %v1975_v61  ;;  %v2021_v63 = vld [vmem:[%s10573_s20 + $0x2b8] sm:$0xff] }
 0x419   : > { %8608 = vmatpush.bf16.msrb.mxu0 %v6609_v41  ;;  %v6641_v56 = vpack.c.bf16 %v4693_v23, %v4691_v43  ;;  %v4623_v49 = vcvt.s32.f32 %v2575_v50  ;;  %v4625_v21 = vcvt.s32.f32 %v2577_v32  ;;  %v2609_v57 = vunpack.c.1.s8 %v1975_v61  ;;  %v2029_v41 = vld [vmem:[%s10573_s20 + $0x2f8] sm:$0xff]  ;;  %v8418_v23 = vpop.f32.mrf.mxu1 }
 0x41a   : > { %8621 = vmatpush.bf16.msrb.mxu1 %v6625_v24  ;;  %v6657_v62 = vpack.c.bf16 %v4725_v52, %v4723_v60  ;;  %v4655_v38 = vcvt.s32.f32 %v2607_v55  ;;  %v2639_v6 = vunpack.c.0.s8 %v1983_v37  ;;  %v2641_v34 = vunpack.c.1.s8 %v1983_v37 }
 0x41b   : > { %8634 = vmatpush.bf16.msrb.mxu2 %v6641_v56  ;;  %v6607_v0 = vpack.c.bf16 %v4625_v21, %v4623_v49  ;;  %v4657_v46 = vcvt.s32.f32 %v2609_v57  ;;  %v2671_v15 = vunpack.c.0.s8 %v1991_v14  ;;  %v2673_v3 = vunpack.c.1.s8 %v1991_v14 }
 0x41c   : > { %8647 = vmatpush.bf16.msrb.mxu3 %v6657_v62  ;;  %v4687_v61 = vcvt.s32.f32 %v2639_v6  ;;  %v4689_v27 = vcvt.s32.f32 %v2641_v34  ;;  %v2731_v12 = vunpack.c.2.s8 %v2005_v19  ;;  %v2733_v47 = vunpack.c.3.s8 %v2005_v19 }
 0x41d   : > { %8609 = vmatpush.bf16.msrb.mxu0 %v6607_v0  ;;  %v6623_v37 = vpack.c.bf16 %v4657_v46, %v4655_v38  ;;  %v4719_v43 = vcvt.s32.f32 %v2671_v15  ;;  %v4721_v8 = vcvt.s32.f32 %v2673_v3  ;;  %v2763_v26 = vunpack.c.2.s8 %v11374_v10 }
 0x41e   : > { %v6639_v50 = vpack.c.bf16 %v4689_v27, %v4687_v61  ;;  %v4779_v14 = vcvt.s32.f32 %v2731_v12  ;;  %v4781_v32 = vcvt.s32.f32 %v2733_v47  ;;  %v2765_v24 = vunpack.c.3.s8 %v11374_v10  ;;  %v2003_v47 = vld [vmem:[%s10573_s20 + $0x228] sm:$0xff] }
 0x41f   : > { %8622 = vmatpush.bf16.msrb.mxu1 %v6623_v37  ;;  %v6655_v60 = vpack.c.bf16 %v4721_v8, %v4719_v43  ;;  %v4811_v52 = vcvt.s32.f32 %v2763_v26  ;;  %v2795_v55 = vunpack.c.2.s8 %v2021_v63  ;;  %v2797_v2 = vunpack.c.3.s8 %v2021_v63  ;;  %v8431_v37 = vpop.f32.mrf.mxu2  ;;  %v8444_v43 = vpop.f32.mrf.mxu3 }
 0x420   : > { %8635 = vmatpush.bf16.msrb.mxu2 %v6639_v50  ;;  %v6685_v56 = vpack.c.bf16 %v4781_v32, %v4779_v14  ;;  %v4813_v49 = vcvt.s32.f32 %v2765_v24  ;;  %v2827_v21 = vunpack.c.2.s8 %v2029_v41  ;;  %v2829_v57 = vunpack.c.3.s8 %v2029_v41  ;;  %8610 = vmatmul.bf16.vlgmr.msrb.gmra.mxu0 %v10633_v53  ;;  %v2011_v50 = vld [vmem:[%s10573_s20 + $0x268] sm:$0xff] }
 0x421   : > { %8648 = vmatpush.bf16.msrb.mxu3 %v6655_v60  ;;  %v4843_v62 = vcvt.s32.f32 %v2795_v55  ;;  %v4845_v38 = vcvt.s32.f32 %v2797_v2  ;;  %v2727_v6 = vunpack.c.0.s8 %v2005_v19  ;;  %v2729_v34 = vunpack.c.1.s8 %v2005_v19  ;;  %v2019_v55 = vld [vmem:[%s10573_s20 + $0x2a8] sm:$0xff] }
 0x422   : > { %8654 = vmatpush.bf16.msra.mxu0 %v6685_v56  ;;  %v6701_v0 = vpack.c.bf16 %v4813_v49, %v4811_v52  ;;  %v4875_v46 = vcvt.s32.f32 %v2827_v21  ;;  %v4877_v15 = vcvt.s32.f32 %v2829_v57  ;;  %v2759_v3 = vunpack.c.0.s8 %v11374_v10  ;;  %8623 = vmatmul.bf16.vlgmr.msrb.gmra.mxu1 %v10635_v58  ;;  %v2027_v21 = vld [vmem:[%s10573_s20 + $0x2e8] sm:$0xff] }
 0x423   : > { %v6717_v61 = vpack.c.bf16 %v4845_v38, %v4843_v62  ;;  %v4775_v27 = vcvt.s32.f32 %v2727_v6  ;;  %v4777_v12 = vcvt.s32.f32 %v2729_v34  ;;  %v2761_v53 = vunpack.c.1.s8 %v11374_v10  ;;  %8636 = vmatmul.bf16.vlgmr.msrb.gmra.mxu2 %v10637_v1 }
 0x424   : > { %8667 = vmatpush.bf16.msra.mxu1 %v6701_v0  ;;  %v6733_v19 = vpack.c.bf16 %v4877_v15, %v4875_v46  ;;  %v4807_v8 = vcvt.s32.f32 %v2759_v3  ;;  %v2791_v26 = vunpack.c.0.s8 %v2021_v63  ;;  %v2793_v23 = vunpack.c.1.s8 %v2021_v63  ;;  %8649 = vmatmul.bf16.vlgmr.msrb.gmra.mxu3 %v10640_v7 }
 0x425   : > { %8680 = vmatpush.bf16.msra.mxu2 %v6717_v61  ;;  %v6683_v58 = vpack.c.bf16 %v4777_v12, %v4775_v27  ;;  %v4809_v14 = vcvt.s32.f32 %v2761_v53  ;;  %v2823_v32 = vunpack.c.0.s8 %v2029_v41  ;;  %v2825_v10 = vunpack.c.1.s8 %v2029_v41 }
 0x426   : > { %8693 = vmatpush.bf16.msra.mxu3 %v6733_v19  ;;  %v4839_v1 = vcvt.s32.f32 %v2791_v26  ;;  %v4841_v24 = vcvt.s32.f32 %v2793_v23  ;;  %v2723_v60 = vunpack.c.2.s8 %v2003_v47  ;;  %v2725_v52 = vunpack.c.3.s8 %v2003_v47 }
 0x427   : > { %8655 = vmatpush.bf16.msra.mxu0 %v6683_v58  ;;  %v6699_v2 = vpack.c.bf16 %v4809_v14, %v4807_v8  ;;  %v4871_v56 = vcvt.s32.f32 %v2823_v32  ;;  %v4873_v49 = vcvt.s32.f32 %v2825_v10  ;;  %v2755_v63 = vunpack.c.2.s8 %v2011_v50 }
 0x428   : > { %v6715_v7 = vpack.c.bf16 %v4841_v24, %v4839_v1  ;;  %v4771_v57 = vcvt.s32.f32 %v2723_v60  ;;  %v4773_v62 = vcvt.s32.f32 %v2725_v52  ;;  %v2757_v38 = vunpack.c.3.s8 %v2011_v50  ;;  %v2001_v52 = vld [vmem:[%s10573_s20 + $0x218] sm:$0xff] }
 0x429   : > { %8668 = vmatpush.bf16.msra.mxu1 %v6699_v2  ;;  %v6731_v6 = vpack.c.bf16 %v4873_v49, %v4871_v56  ;;  %v4803_v34 = vcvt.s32.f32 %v2755_v63  ;;  %v2787_v41 = vunpack.c.2.s8 %v2019_v55  ;;  %v2789_v0 = vunpack.c.3.s8 %v2019_v55  ;;  %v2009_v49 = vld [vmem:[%s10573_s20 + $0x258] sm:$0xff] }
 0x42a   : > { %8681 = vmatpush.bf16.msra.mxu2 %v6715_v7  ;;  %v6681_v46 = vpack.c.bf16 %v4773_v62, %v4771_v57  ;;  %v4805_v15 = vcvt.s32.f32 %v2757_v38  ;;  %v2819_v3 = vunpack.c.2.s8 %v2027_v21  ;;  %v2821_v61 = vunpack.c.3.s8 %v2027_v21  ;;  %v2017_v57 = vld [vmem:[%s10573_s20 + $0x298] sm:$0xff] }
 0x42b   : > { %8694 = vmatpush.bf16.msra.mxu3 %v6731_v6  ;;  %v4835_v27 = vcvt.s32.f32 %v2787_v41  ;;  %v4837_v12 = vcvt.s32.f32 %v2789_v0  ;;  %v8404_v53 = vadd.f32 %v11366_v48, %v11362_v59  ;;  %v2719_v37 = vunpack.c.0.s8 %v2003_v47 }
 0x42c   : > { %8656 = vmatpush.bf16.msra.mxu0 %v6681_v46  ;;  %v6697_v43 = vpack.c.bf16 %v4805_v15, %v4803_v34  ;;  %v4867_v19 = vcvt.s32.f32 %v2819_v3  ;;  %v4869_v8 = vcvt.s32.f32 %v2821_v61  ;;  %v2721_v26 = vunpack.c.1.s8 %v2003_v47 }
 0x42d   : > { %v6713_v23 = vpack.c.bf16 %v4837_v12, %v4835_v27  ;;  %v4767_v58 = vcvt.s32.f32 %v2719_v37  ;;  %v2751_v14 = vunpack.c.0.s8 %v2011_v50  ;;  %v2753_v32 = vunpack.c.1.s8 %v2011_v50 }
 0x42e   : > { %8669 = vmatpush.bf16.msra.mxu1 %v6697_v43  ;;  %v6729_v10 = vpack.c.bf16 %v4869_v8, %v4867_v19  ;;  %v4769_v1 = vcvt.s32.f32 %v2721_v26  ;;  %v2783_v24 = vunpack.c.0.s8 %v2019_v55  ;;  %v2785_v60 = vunpack.c.1.s8 %v2019_v55  ;;  %v2025_v55 = vld [vmem:[%s10573_s20 + $0x2d8] sm:$0xff] }
 0x42f   : > { %8682 = vmatpush.bf16.msra.mxu2 %v6713_v23  ;;  %v4799_v59 = vcvt.s32.f32 %v2751_v14  ;;  %v4801_v48 = vcvt.s32.f32 %v2753_v32  ;;  %v2815_v2 = vunpack.c.0.s8 %v2027_v21  ;;  %v2817_v56 = vunpack.c.1.s8 %v2027_v21 }
 0x430   : > { %8695 = vmatpush.bf16.msra.mxu3 %v6729_v10  ;;  %v6679_v47 = vpack.c.bf16 %v4769_v1, %v4767_v58  ;;  %v4831_v63 = vcvt.s32.f32 %v2783_v24  ;;  %v4833_v7 = vcvt.s32.f32 %v2785_v60  ;;  %v8417_v50 = vadd.f32 %v11370_v36, %v8404_v53 }
 0x431   : > { %v6695_v62 = vpack.c.bf16 %v4801_v48, %v4799_v59  ;;  %v4863_v38 = vcvt.s32.f32 %v2815_v2  ;;  %v4865_v6 = vcvt.s32.f32 %v2817_v56  ;;  %v2715_v34 = vunpack.c.2.s8 %v2001_v52 }
 0x432   : > { %8657 = vmatpush.bf16.msra.mxu0 %v6679_v47  ;;  %v6711_v41 = vpack.c.bf16 %v4833_v7, %v4831_v63  ;;  %v2717_v0 = vunpack.c.3.s8 %v2001_v52  ;;  %v2747_v46 = vunpack.c.2.s8 %v2009_v49  ;;  %v2749_v15 = vunpack.c.3.s8 %v2009_v49  ;;  %v1999_v47 = vld [vmem:[%s10573_s20 + $0x208] sm:$0xff] }
 0x433   : > { %8670 = vmatpush.bf16.msra.mxu1 %v6695_v62  ;;  %v6727_v21 = vpack.c.bf16 %v4865_v6, %v4863_v38  ;;  %v4763_v3 = vcvt.s32.f32 %v2715_v34  ;;  %v2779_v61 = vunpack.c.2.s8 %v2017_v57  ;;  %v2781_v27 = vunpack.c.3.s8 %v2017_v57  ;;  %v2007_v62 = vld [vmem:[%s10573_s20 + $0x248] sm:$0xff]  ;;  %v11407_v38 = vpop.f32.mrf.mxu0 }
 0x434   : > { %8683 = vmatpush.bf16.msra.mxu2 %v6711_v41  ;;  %v4765_v12 = vcvt.s32.f32 %v2717_v0  ;;  %v4795_v37 = vcvt.s32.f32 %v2747_v46  ;;  %v4797_v36 = vcvt.s32.f32 %v2749_v15  ;;  %v2811_v53 = vunpack.c.2.s8 %v2025_v55  ;;  %v2015_v41 = vld [vmem:[%s10573_s20 + $0x288] sm:$0xff] }
 0x435   : > { %8696 = vmatpush.bf16.msra.mxu3 %v6727_v21  ;;  %v4827_v43 = vcvt.s32.f32 %v2779_v61  ;;  %v4829_v19 = vcvt.s32.f32 %v2781_v27  ;;  %v2813_v8 = vunpack.c.3.s8 %v2025_v55  ;;  %v8430_v26 = vadd.f32 %v11376_v33, %v8417_v50 }
 0x436   : > { %v6677_v23 = vpack.c.bf16 %v4765_v12, %v4763_v3  ;;  %v6693_v58 = vpack.c.bf16 %v4797_v36, %v4795_v37  ;;  %v4859_v14 = vcvt.s32.f32 %v2811_v53  ;;  %v2711_v32 = vunpack.c.0.s8 %v2001_v52 }
 0x437   : > { %v6709_v10 = vpack.c.bf16 %v4829_v19, %v4827_v43  ;;  %v4861_v1 = vcvt.s32.f32 %v2813_v8  ;;  %v11403_v24 = vadd.f32 %v11378_v54, %v8430_v26  ;;  %v2713_v60 = vunpack.c.1.s8 %v2001_v52  ;;  %v11411_v26 = vpop.f32.mrf.mxu1 }
 0x438   : > { %8658 = vmatpush.bf16.msra.mxu0 %v6677_v23  ;;  %8671 = vmatpush.bf16.msra.mxu1 %v6693_v58  ;;  %v4759_v59 = vcvt.s32.f32 %v2711_v32  ;;  %v2743_v48 = vunpack.c.0.s8 %v2009_v49  ;;  %v2745_v2 = vunpack.c.1.s8 %v2009_v49  ;;  %v2775_v56 = vunpack.c.0.s8 %v2017_v57 }
 0x439   : > { %8684 = vmatpush.bf16.msra.mxu2 %v6709_v10  ;;  %v6725_v33 = vpack.c.bf16 %v4861_v1, %v4859_v14  ;;  %v4761_v63 = vcvt.s32.f32 %v2713_v60  ;;  %v2777_v7 = vunpack.c.1.s8 %v2017_v57  ;;  %v2807_v50 = vunpack.c.0.s8 %v2025_v55  ;;  %v2023_v57 = vld [vmem:[%s10573_s20 + $0x2c8] sm:$0xff] }
 0x43a   : > { %v4791_v54 = vcvt.s32.f32 %v2743_v48  ;;  %v4793_v6 = vcvt.s32.f32 %v2745_v2  ;;  %v4823_v52 = vcvt.s32.f32 %v2775_v56  ;;  %v2809_v34 = vunpack.c.1.s8 %v2025_v55 }
 0x43b   : > { %8697 = vmatpush.bf16.msra.mxu3 %v6725_v33  ;;  %v6675_v0 = vpack.c.bf16 %v4761_v63, %v4759_v59  ;;  %v4825_v46 = vcvt.s32.f32 %v2777_v7  ;;  %v4855_v49 = vcvt.s32.f32 %v2807_v50  ;;  %v2707_v15 = vunpack.c.2.s8 %v1999_v47  ;;  %v8457_v63 = vpop.f32.mrf.mxu0 }
 0x43c   : > { %v6691_v21 = vpack.c.bf16 %v4793_v6, %v4791_v54  ;;  %v4857_v3 = vcvt.s32.f32 %v2809_v34  ;;  %v2709_v61 = vunpack.c.3.s8 %v1999_v47  ;;  %v2739_v27 = vunpack.c.2.s8 %v2007_v62 }
 0x43d   : > { %8659 = vmatpush.bf16.msra.mxu0 %v6675_v0  ;;  %v6707_v12 = vpack.c.bf16 %v4825_v46, %v4823_v52  ;;  %v4755_v37 = vcvt.s32.f32 %v2707_v15  ;;  %v2741_v36 = vunpack.c.3.s8 %v2007_v62  ;;  %v2771_v53 = vunpack.c.2.s8 %v2015_v41  ;;  %v2037_v52 = vld [vmem:[%s10573_s20 + $0x338] sm:$0xff] }
 0x43e   : > { %8672 = vmatpush.bf16.msra.mxu1 %v6691_v21  ;;  %v6723_v43 = vpack.c.bf16 %v4857_v3, %v4855_v49  ;;  %v4757_v19 = vcvt.s32.f32 %v2709_v61  ;;  %v4787_v55 = vcvt.s32.f32 %v2739_v27  ;;  %v2773_v8 = vunpack.c.3.s8 %v2015_v41  ;;  %v11415_v15 = vld [vmem:[%s10573_s20 + $0x378] sm:$0xff]  ;;  %v11417_v27 = vpop.f32.mrf.mxu2 }
 0x43f   : > { %8685 = vmatpush.bf16.msra.mxu2 %v6707_v12  ;;  %v4789_v23 = vcvt.s32.f32 %v2741_v36  ;;  %v4819_v58 = vcvt.s32.f32 %v2771_v53  ;;  %v2803_v14 = vunpack.c.2.s8 %v2023_v57  ;;  %v2805_v32 = vunpack.c.3.s8 %v2023_v57  ;;  %v11419_v12 = vpop.f32.mrf.mxu3 }
 0x440   : > { %8698 = vmatpush.bf16.msra.mxu3 %v6723_v43  ;;  %v6673_v10 = vpack.c.bf16 %v4757_v19, %v4755_v37  ;;  %v4821_v1 = vcvt.s32.f32 %v2773_v8  ;;  %v2703_v60 = vunpack.c.0.s8 %v1999_v47  ;;  %v2705_v59 = vunpack.c.1.s8 %v1999_v47  ;;  %v2053_v43 = vld [vmem:[%s10573_s20 + $0x3b8] sm:$0xff] }
 0x441   : > { %v6689_v48 = vpack.c.bf16 %v4789_v23, %v4787_v55  ;;  %v4851_v2 = vcvt.s32.f32 %v2803_v14  ;;  %v4853_v56 = vcvt.s32.f32 %v2805_v32  ;;  %v2735_v33 = vunpack.c.0.s8 %v2007_v62  ;;  %v2061_v23 = vld [vmem:[%s10573_s20 + $0x3f8] sm:$0xff] }
 0x442   : > { %8660 = vmatpush.bf16.msra.mxu0 %v6673_v10  ;;  %v6705_v7 = vpack.c.bf16 %v4821_v1, %v4819_v58  ;;  %v4751_v50 = vcvt.s32.f32 %v2703_v60  ;;  %v4753_v54 = vcvt.s32.f32 %v2705_v59  ;;  %v2737_v6 = vunpack.c.1.s8 %v2007_v62  ;;  %v8470_v58 = vpop.f32.mrf.mxu1 }
 0x443   : > { %8673 = vmatpush.bf16.msra.mxu1 %v6689_v48  ;;  %v6721_v34 = vpack.c.bf16 %v4853_v56, %v4851_v2  ;;  %v4783_v0 = vcvt.s32.f32 %v2735_v33  ;;  %v2767_v46 = vunpack.c.0.s8 %v2015_v41  ;;  %v2769_v49 = vunpack.c.1.s8 %v2015_v41 }
 0x444   : > { %8686 = vmatpush.bf16.msra.mxu2 %v6705_v7  ;;  %v6671_v47 = vpack.c.bf16 %v4753_v54, %v4751_v50  ;;  %v4785_v21 = vcvt.s32.f32 %v2737_v6  ;;  %v2799_v3 = vunpack.c.0.s8 %v2023_v57  ;;  %v2801_v61 = vunpack.c.1.s8 %v2023_v57 }
 0x445   : > { %8699 = vmatpush.bf16.msra.mxu3 %v6721_v34  ;;  %v4815_v62 = vcvt.s32.f32 %v2767_v46  ;;  %v4817_v37 = vcvt.s32.f32 %v2769_v49  ;;  %v2859_v36 = vunpack.c.2.s8 %v2037_v52  ;;  %v2861_v53 = vunpack.c.3.s8 %v2037_v52 }
 0x446   : > { %8661 = vmatpush.bf16.msra.mxu0 %v6671_v47  ;;  %v6687_v41 = vpack.c.bf16 %v4785_v21, %v4783_v0  ;;  %v4847_v19 = vcvt.s32.f32 %v2799_v3  ;;  %v4849_v55 = vcvt.s32.f32 %v2801_v61  ;;  %v2891_v8 = vunpack.c.2.s8 %v11415_v15  ;;  %v2035_v61 = vld [vmem:[%s10573_s20 + $0x328] sm:$0xff] }
 0x447   : > { %v6703_v14 = vpack.c.bf16 %v4817_v37, %v4815_v62  ;;  %v4907_v57 = vcvt.s32.f32 %v2859_v36  ;;  %v4909_v32 = vcvt.s32.f32 %v2861_v53  ;;  %v2893_v10 = vunpack.c.3.s8 %v11415_v15  ;;  %v8483_v62 = vpop.f32.mrf.mxu2  ;;  %v8496_v37 = vpop.f32.mrf.mxu3 }
 0x448   : > { %8674 = vmatpush.bf16.msra.mxu1 %v6687_v41  ;;  %v6719_v1 = vpack.c.bf16 %v4849_v55, %v4847_v19  ;;  %v4939_v60 = vcvt.s32.f32 %v2891_v8  ;;  %v2923_v59 = vunpack.c.2.s8 %v2053_v43  ;;  %v2925_v48 = vunpack.c.3.s8 %v2053_v43  ;;  %v2043_v41 = vld [vmem:[%s10573_s20 + $0x368] sm:$0xff] }
 0x449   : > { %8687 = vmatpush.bf16.msra.mxu2 %v6703_v14  ;;  %v6749_v2 = vpack.c.bf16 %v4909_v32, %v4907_v57  ;;  %v4941_v56 = vcvt.s32.f32 %v2893_v10  ;;  %v2955_v33 = vunpack.c.2.s8 %v2061_v23  ;;  %v2957_v63 = vunpack.c.3.s8 %v2061_v23  ;;  %8662 = vmatmul.bf16.vlgmr.msra.gmra.mxu0 %v10668_v4  ;;  %v2051_v32 = vld [vmem:[%s10573_s20 + $0x3a8] sm:$0xff] }
 0x44a   : > { %8700 = vmatpush.bf16.msra.mxu3 %v6719_v1  ;;  %v4971_v7 = vcvt.s32.f32 %v2923_v59  ;;  %v4973_v50 = vcvt.s32.f32 %v2925_v48  ;;  %v2855_v54 = vunpack.c.0.s8 %v2037_v52  ;;  %v2857_v6 = vunpack.c.1.s8 %v2037_v52  ;;  %v2059_v59 = vld [vmem:[%s10573_s20 + $0x3e8] sm:$0xff] }
 0x44b   : > { %8706 = vmatpush.bf16.msrb.mxu0 %v6749_v2  ;;  %v6765_v34 = vpack.c.bf16 %v4941_v56, %v4939_v60  ;;  %v5003_v0 = vcvt.s32.f32 %v2955_v33  ;;  %v5005_v46 = vcvt.s32.f32 %v2957_v63  ;;  %8675 = vmatmul.bf16.vlgmr.msra.gmra.mxu1 %v10670_v11  ;;  %v2887_v49 = vunpack.c.0.s8 %v11415_v15 }
 0x44c   : > { %v6781_v47 = vpack.c.bf16 %v4973_v50, %v4971_v7  ;;  %8688 = vmatmul.bf16.vlgmr.msra.gmra.mxu2 %v10672_v16  ;;  %v4903_v21 = vcvt.s32.f32 %v2855_v54  ;;  %v4905_v4 = vcvt.s32.f32 %v2857_v6  ;;  %v2889_v3 = vunpack.c.1.s8 %v11415_v15 }
 0x44d   : > { %8719 = vmatpush.bf16.msrb.mxu1 %v6765_v34  ;;  %v6797_v52 = vpack.c.bf16 %v5005_v46, %v5003_v0  ;;  %8701 = vmatmul.bf16.vlgmr.msra.gmra.mxu3 %v10675_v20  ;;  %v4935_v36 = vcvt.s32.f32 %v2887_v49  ;;  %v2919_v11 = vunpack.c.0.s8 %v2053_v43  ;;  %v2921_v53 = vunpack.c.1.s8 %v2053_v43 }
 0x44e   : > { %8732 = vmatpush.bf16.msrb.mxu2 %v6781_v47  ;;  %v6747_v19 = vpack.c.bf16 %v4905_v4, %v4903_v21  ;;  %v4937_v16 = vcvt.s32.f32 %v2889_v3  ;;  %v2951_v55 = vunpack.c.0.s8 %v2061_v23  ;;  %v2953_v8 = vunpack.c.1.s8 %v2061_v23 }
 0x44f   : > { %8745 = vmatpush.bf16.msrb.mxu3 %v6797_v52  ;;  %v4967_v15 = vcvt.s32.f32 %v2919_v11  ;;  %v4969_v58 = vcvt.s32.f32 %v2921_v53  ;;  %v2851_v14 = vunpack.c.2.s8 %v2035_v61  ;;  %v2853_v57 = vunpack.c.3.s8 %v2035_v61 }
 0x450   : > { %8707 = vmatpush.bf16.msrb.mxu0 %v6747_v19  ;;  %v6763_v10 = vpack.c.bf16 %v4937_v16, %v4935_v36  ;;  %v4999_v1 = vcvt.s32.f32 %v2951_v55  ;;  %v5001_v20 = vcvt.s32.f32 %v2953_v8  ;;  %v2883_v60 = vunpack.c.2.s8 %v2043_v41  ;;  %v2033_v8 = vld [vmem:[%s10573_s20 + $0x318] sm:$0xff] }
 0x451   : > { %v6779_v43 = vpack.c.bf16 %v4969_v58, %v4967_v15  ;;  %v4899_v48 = vcvt.s32.f32 %v2851_v14  ;;  %v4901_v2 = vcvt.s32.f32 %v2853_v57  ;;  %v2885_v56 = vunpack.c.3.s8 %v2043_v41  ;;  %v2041_v14 = vld [vmem:[%s10573_s20 + $0x358] sm:$0xff] }
 0x452   : > { %8720 = vmatpush.bf16.msrb.mxu1 %v6763_v10  ;;  %v6795_v33 = vpack.c.bf16 %v5001_v20, %v4999_v1  ;;  %v4931_v63 = vcvt.s32.f32 %v2883_v60  ;;  %v2915_v23 = vunpack.c.2.s8 %v2051_v32  ;;  %v2917_v7 = vunpack.c.3.s8 %v2051_v32  ;;  %v2049_v1 = vld [vmem:[%s10573_s20 + $0x398] sm:$0xff] }
 0x453   : > { %8733 = vmatpush.bf16.msrb.mxu2 %v6779_v43  ;;  %v6745_v50 = vpack.c.bf16 %v4901_v2, %v4899_v48  ;;  %v4933_v54 = vcvt.s32.f32 %v2885_v56  ;;  %v2947_v6 = vunpack.c.2.s8 %v2059_v59  ;;  %v2949_v34 = vunpack.c.3.s8 %v2059_v59 }
 0x454   : > { %8746 = vmatpush.bf16.msrb.mxu3 %v6795_v33  ;;  %v4963_v0 = vcvt.s32.f32 %v2915_v23  ;;  %v4965_v46 = vcvt.s32.f32 %v2917_v7  ;;  %v8456_v49 = vadd.f32 %v11407_v38, %v11403_v24  ;;  %v2847_v47 = vunpack.c.0.s8 %v2035_v61 }
 0x455   : > { %8708 = vmatpush.bf16.msrb.mxu0 %v6745_v50  ;;  %v6761_v21 = vpack.c.bf16 %v4933_v54, %v4931_v63  ;;  %v4995_v4 = vcvt.s32.f32 %v2947_v6  ;;  %v4997_v3 = vcvt.s32.f32 %v2949_v34  ;;  %v2849_v62 = vunpack.c.1.s8 %v2035_v61 }
 0x456   : > { %v6777_v37 = vpack.c.bf16 %v4965_v46, %v4963_v0  ;;  %v4895_v52 = vcvt.s32.f32 %v2847_v47  ;;  %v2879_v36 = vunpack.c.0.s8 %v2043_v41  ;;  %v2881_v11 = vunpack.c.1.s8 %v2043_v41 }
 0x457   : > { %8721 = vmatpush.bf16.msrb.mxu1 %v6761_v21  ;;  %v6793_v53 = vpack.c.bf16 %v4997_v3, %v4995_v4  ;;  %v4897_v19 = vcvt.s32.f32 %v2849_v62  ;;  %v2911_v16 = vunpack.c.0.s8 %v2051_v32  ;;  %v2913_v55 = vunpack.c.1.s8 %v2051_v32  ;;  %v2057_v32 = vld [vmem:[%s10573_s20 + $0x3d8] sm:$0xff] }
 0x458   : > { %8734 = vmatpush.bf16.msrb.mxu2 %v6777_v37  ;;  %v4927_v24 = vcvt.s32.f32 %v2879_v36  ;;  %v4929_v38 = vcvt.s32.f32 %v2881_v11  ;;  %v2943_v15 = vunpack.c.0.s8 %v2059_v59  ;;  %v2945_v58 = vunpack.c.1.s8 %v2059_v59 }
 0x459   : > { %8747 = vmatpush.bf16.msrb.mxu3 %v6793_v53  ;;  %v6743_v61 = vpack.c.bf16 %v4897_v19, %v4895_v52  ;;  %v4959_v57 = vcvt.s32.f32 %v2911_v16  ;;  %v4961_v10 = vcvt.s32.f32 %v2913_v55  ;;  %v8469_v41 = vadd.f32 %v11411_v26, %v8456_v49 }
 0x45a   : > { %v6759_v20 = vpack.c.bf16 %v4929_v38, %v4927_v24  ;;  %v4991_v60 = vcvt.s32.f32 %v2943_v15  ;;  %v4993_v43 = vcvt.s32.f32 %v2945_v58  ;;  %v2843_v48 = vunpack.c.2.s8 %v2033_v8  ;;  %v2031_v24 = vld [vmem:[%s10573_s20 + $0x308] sm:$0xff] }
 0x45b   : > { %8709 = vmatpush.bf16.msrb.mxu0 %v6743_v61  ;;  %v6775_v2 = vpack.c.bf16 %v4961_v10, %v4959_v57  ;;  %v2845_v56 = vunpack.c.3.s8 %v2033_v8  ;;  %v2875_v33 = vunpack.c.2.s8 %v2041_v14  ;;  %v2877_v63 = vunpack.c.3.s8 %v2041_v14  ;;  %v2039_v61 = vld [vmem:[%s10573_s20 + $0x348] sm:$0xff]  ;;  %v11448_v57 = vpop.f32.mrf.mxu0 }
 0x45c   : > { %8722 = vmatpush.bf16.msrb.mxu1 %v6759_v20  ;;  %v6791_v59 = vpack.c.bf16 %v4993_v43, %v4991_v60  ;;  %v4891_v23 = vcvt.s32.f32 %v2843_v48  ;;  %v2907_v7 = vunpack.c.2.s8 %v2049_v1  ;;  %v2909_v50 = vunpack.c.3.s8 %v2049_v1  ;;  %v2047_v20 = vld [vmem:[%s10573_s20 + $0x388] sm:$0xff] }
 0x45d   : > { %8735 = vmatpush.bf16.msrb.mxu2 %v6775_v2  ;;  %v4893_v54 = vcvt.s32.f32 %v2845_v56  ;;  %v4923_v6 = vcvt.s32.f32 %v2875_v33  ;;  %v4925_v26 = vcvt.s32.f32 %v2877_v63  ;;  %v2939_v34 = vunpack.c.2.s8 %v2057_v32 }
 0x45e   : > { %8748 = vmatpush.bf16.msrb.mxu3 %v6791_v59  ;;  %v4955_v0 = vcvt.s32.f32 %v2907_v7  ;;  %v4957_v46 = vcvt.s32.f32 %v2909_v50  ;;  %v2941_v49 = vunpack.c.3.s8 %v2057_v32  ;;  %v8482_v47 = vadd.f32 %v11417_v27, %v8469_v41 }
 0x45f   : > { %v6741_v21 = vpack.c.bf16 %v4893_v54, %v4891_v23  ;;  %v6757_v4 = vpack.c.bf16 %v4925_v26, %v4923_v6  ;;  %v4987_v3 = vcvt.s32.f32 %v2939_v34  ;;  %v2839_v62 = vunpack.c.0.s8 %v2033_v8  ;;  %v11452_v34 = vpop.f32.mrf.mxu1 }
 0x460   : > { %v6773_v37 = vpack.c.bf16 %v4957_v46, %v4955_v0  ;;  %v4989_v52 = vcvt.s32.f32 %v2941_v49  ;;  %v11444_v36 = vadd.f32 %v11419_v12, %v8482_v47  ;;  %v2841_v11 = vunpack.c.1.s8 %v2033_v8 }
 0x461   : > { %8710 = vmatpush.bf16.msrb.mxu0 %v6741_v21  ;;  %8723 = vmatpush.bf16.msrb.mxu1 %v6757_v4  ;;  %v4887_v53 = vcvt.s32.f32 %v2839_v62  ;;  %v2871_v19 = vunpack.c.0.s8 %v2041_v14  ;;  %v2873_v16 = vunpack.c.1.s8 %v2041_v14  ;;  %v2903_v55 = vunpack.c.0.s8 %v2049_v1 }
 0x462   : > { %8736 = vmatpush.bf16.msrb.mxu2 %v6773_v37  ;;  %v6789_v27 = vpack.c.bf16 %v4989_v52, %v4987_v3  ;;  %v4889_v38 = vcvt.s32.f32 %v2841_v11  ;;  %v2905_v15 = vunpack.c.1.s8 %v2049_v1  ;;  %v2935_v58 = vunpack.c.0.s8 %v2057_v32  ;;  %v2055_v1 = vld [vmem:[%s10573_s20 + $0x3c8] sm:$0xff] }
 0x463   : > { %v4919_v12 = vcvt.s32.f32 %v2871_v19  ;;  %v4921_v10 = vcvt.s32.f32 %v2873_v16  ;;  %v4951_v8 = vcvt.s32.f32 %v2903_v55  ;;  %v2937_v41 = vunpack.c.1.s8 %v2057_v32  ;;  %v8509_v19 = vpop.f32.mrf.mxu0 }
 0x464   : > { %8749 = vmatpush.bf16.msrb.mxu3 %v6789_v27  ;;  %v6739_v60 = vpack.c.bf16 %v4889_v38, %v4887_v53  ;;  %v4953_v43 = vcvt.s32.f32 %v2905_v15  ;;  %v4983_v14 = vcvt.s32.f32 %v2935_v58  ;;  %v2835_v48 = vunpack.c.2.s8 %v2031_v24  ;;  %v2069_v15 = vld [vmem:[%s10573_s20 + $0x438] sm:$0xff] }
 0x465   : > { %v6755_v2 = vpack.c.bf16 %v4921_v10, %v4919_v12  ;;  %v4985_v56 = vcvt.s32.f32 %v2937_v41  ;;  %v2837_v33 = vunpack.c.3.s8 %v2031_v24  ;;  %v2867_v63 = vunpack.c.2.s8 %v2039_v61  ;;  %v11456_v41 = vld [vmem:[%s10573_s20 + $0x478] sm:$0xff] }
 0x466   : > { %8711 = vmatpush.bf16.msrb.mxu0 %v6739_v60  ;;  %v6771_v59 = vpack.c.bf16 %v4953_v43, %v4951_v8  ;;  %v4883_v23 = vcvt.s32.f32 %v2835_v48  ;;  %v2869_v7 = vunpack.c.3.s8 %v2039_v61  ;;  %v2899_v50 = vunpack.c.2.s8 %v2047_v20  ;;  %v11458_v48 = vpop.f32.mrf.mxu2 }
 0x467   : > { %8724 = vmatpush.bf16.msrb.mxu1 %v6755_v2  ;;  %v6787_v54 = vpack.c.bf16 %v4985_v56, %v4983_v14  ;;  %v4885_v6 = vcvt.s32.f32 %v2837_v33  ;;  %v4915_v32 = vcvt.s32.f32 %v2867_v63  ;;  %v2901_v26 = vunpack.c.3.s8 %v2047_v20  ;;  %v11460_v2 = vpop.f32.mrf.mxu3 }
 0x468   : > { %8737 = vmatpush.bf16.msrb.mxu2 %v6771_v59  ;;  %v4917_v0 = vcvt.s32.f32 %v2869_v7  ;;  %v4947_v46 = vcvt.s32.f32 %v2899_v50  ;;  %v2931_v49 = vunpack.c.2.s8 %v2055_v1  ;;  %v2933_v47 = vunpack.c.3.s8 %v2055_v1  ;;  %v2085_v59 = vld [vmem:[%s10573_s20 + $0x4b8] sm:$0xff] }
 0x469   : > { %8750 = vmatpush.bf16.msrb.mxu3 %v6787_v54  ;;  %v6737_v21 = vpack.c.bf16 %v4885_v6, %v4883_v23  ;;  %v4949_v4 = vcvt.s32.f32 %v2901_v26  ;;  %v2831_v3 = vunpack.c.0.s8 %v2031_v24  ;;  %v2833_v62 = vunpack.c.1.s8 %v2031_v24  ;;  %v2093_v54 = vld [vmem:[%s10573_s20 + $0x4f8] sm:$0xff]  ;;  %v8522_v6 = vpop.f32.mrf.mxu1 }
 0x46a   : > { %v6753_v37 = vpack.c.bf16 %v4917_v0, %v4915_v32  ;;  %v4979_v52 = vcvt.s32.f32 %v2931_v49  ;;  %v4981_v11 = vcvt.s32.f32 %v2933_v47  ;;  %v2863_v53 = vunpack.c.0.s8 %v2039_v61 }
 0x46b   : > { %8712 = vmatpush.bf16.msrb.mxu0 %v6737_v21  ;;  %v6769_v16 = vpack.c.bf16 %v4949_v4, %v4947_v46  ;;  %v4879_v55 = vcvt.s32.f32 %v2831_v3  ;;  %v4881_v27 = vcvt.s32.f32 %v2833_v62  ;;  %v2865_v38 = vunpack.c.1.s8 %v2039_v61 }
 0x46c   : > { %8725 = vmatpush.bf16.msrb.mxu1 %v6753_v37  ;;  %v6785_v58 = vpack.c.bf16 %v4981_v11, %v4979_v52  ;;  %v4911_v12 = vcvt.s32.f32 %v2863_v53  ;;  %v2895_v10 = vunpack.c.0.s8 %v2047_v20  ;;  %v2897_v8 = vunpack.c.1.s8 %v2047_v20 }
 0x46d   : > { %8738 = vmatpush.bf16.msrb.mxu2 %v6769_v16  ;;  %v6735_v24 = vpack.c.bf16 %v4881_v27, %v4879_v55  ;;  %v4913_v60 = vcvt.s32.f32 %v2865_v38  ;;  %v2927_v43 = vunpack.c.0.s8 %v2055_v1  ;;  %v2929_v14 = vunpack.c.1.s8 %v2055_v1 }
 0x46e   : > { %8751 = vmatpush.bf16.msrb.mxu3 %v6785_v58  ;;  %v4943_v61 = vcvt.s32.f32 %v2895_v10  ;;  %v4945_v56 = vcvt.s32.f32 %v2897_v8  ;;  %v2987_v33 = vunpack.c.2.s8 %v2069_v15  ;;  %v2989_v63 = vunpack.c.3.s8 %v2069_v15  ;;  %v2067_v8 = vld [vmem:[%s10573_s20 + $0x428] sm:$0xff] }
 0x46f   : > { %8713 = vmatpush.bf16.msrb.mxu0 %v6735_v24  ;;  %v6751_v20 = vpack.c.bf16 %v4913_v60, %v4911_v12  ;;  %v4975_v23 = vcvt.s32.f32 %v2927_v43  ;;  %v4977_v7 = vcvt.s32.f32 %v2929_v14  ;;  %v3019_v50 = vunpack.c.2.s8 %v11456_v41  ;;  %v8535_v24 = vpop.f32.mrf.mxu2  ;;  %v8548_v60 = vpop.f32.mrf.mxu3 }
 0x470   : > { %v6767_v32 = vpack.c.bf16 %v4945_v56, %v4943_v61  ;;  %v5035_v1 = vcvt.s32.f32 %v2987_v33  ;;  %v5037_v26 = vcvt.s32.f32 %v2989_v63  ;;  %v3021_v0 = vunpack.c.3.s8 %v11456_v41  ;;  %v2075_v61 = vld [vmem:[%s10573_s20 + $0x468] sm:$0xff] }
 0x471   : > { %8726 = vmatpush.bf16.msrb.mxu1 %v6751_v20  ;;  %v6783_v46 = vpack.c.bf16 %v4977_v7, %v4975_v23  ;;  %v5067_v49 = vcvt.s32.f32 %v3019_v50  ;;  %v3051_v47 = vunpack.c.2.s8 %v2085_v59  ;;  %v3053_v21 = vunpack.c.3.s8 %v2085_v59  ;;  %v2083_v50 = vld [vmem:[%s10573_s20 + $0x4a8] sm:$0xff] }
 0x472   : > { %8739 = vmatpush.bf16.msrb.mxu2 %v6767_v32  ;;  %v6813_v4 = vpack.c.bf16 %v5037_v26, %v5035_v1  ;;  %v5069_v3 = vcvt.s32.f32 %v3021_v0  ;;  %v3083_v62 = vunpack.c.2.s8 %v2093_v54  ;;  %v3085_v37 = vunpack.c.3.s8 %v2093_v54  ;;  %8714 = vmatmul.bf16.vlgmr.msrb.gmra.mxu0 %v10702_v31  ;;  %v2091_v26 = vld [vmem:[%s10573_s20 + $0x4e8] sm:$0xff] }
 0x473   : > { %8752 = vmatpush.bf16.msrb.mxu3 %v6783_v46  ;;  %v5099_v52 = vcvt.s32.f32 %v3051_v47  ;;  %v5101_v11 = vcvt.s32.f32 %v3053_v21  ;;  %v2983_v53 = vunpack.c.0.s8 %v2069_v15  ;;  %v2985_v19 = vunpack.c.1.s8 %v2069_v15 }
 0x474   : > { %8758 = vmatpush.bf16.msra.mxu0 %v6813_v4  ;;  %v6829_v16 = vpack.c.bf16 %v5069_v3, %v5067_v49  ;;  %v5131_v55 = vcvt.s32.f32 %v3083_v62  ;;  %v5133_v27 = vcvt.s32.f32 %v3085_v37  ;;  %8727 = vmatmul.bf16.vlgmr.msrb.gmra.mxu1 %v10704_v35  ;;  %v3015_v38 = vunpack.c.0.s8 %v11456_v41 }
 0x475   : > { %v6845_v58 = vpack.c.bf16 %v5101_v11, %v5099_v52  ;;  %8740 = vmatmul.bf16.vlgmr.msrb.gmra.mxu2 %v10706_v40  ;;  %v5031_v12 = vcvt.s32.f32 %v2983_v53  ;;  %v5033_v31 = vcvt.s32.f32 %v2985_v19  ;;  %v3017_v10 = vunpack.c.1.s8 %v11456_v41 }
 0x476   : > { %8771 = vmatpush.bf16.msra.mxu1 %v6829_v16  ;;  %v6861_v15 = vpack.c.bf16 %v5133_v27, %v5131_v55  ;;  %8753 = vmatmul.bf16.vlgmr.msrb.gmra.mxu3 %v10709_v44  ;;  %v5063_v43 = vcvt.s32.f32 %v3015_v38  ;;  %v3047_v35 = vunpack.c.0.s8 %v2085_v59  ;;  %v3049_v14 = vunpack.c.1.s8 %v2085_v59 }
 0x477   : > { %8784 = vmatpush.bf16.msra.mxu2 %v6845_v58  ;;  %v6811_v56 = vpack.c.bf16 %v5033_v31, %v5031_v12  ;;  %v5065_v40 = vcvt.s32.f32 %v3017_v10  ;;  %v3079_v33 = vunpack.c.0.s8 %v2093_v54  ;;  %v3081_v63 = vunpack.c.1.s8 %v2093_v54 }
 0x478   : > { %8797 = vmatpush.bf16.msra.mxu3 %v6861_v15  ;;  %v5095_v41 = vcvt.s32.f32 %v3047_v35  ;;  %v5097_v20 = vcvt.s32.f32 %v3049_v14  ;;  %v2979_v23 = vunpack.c.2.s8 %v2067_v8  ;;  %v2981_v7 = vunpack.c.3.s8 %v2067_v8  ;;  %v2065_v14 = vld [vmem:[%s10573_s20 + $0x418] sm:$0xff] }
 0x479   : > { %8759 = vmatpush.bf16.msra.mxu0 %v6811_v56  ;;  %v6827_v6 = vpack.c.bf16 %v5065_v40, %v5063_v43  ;;  %v5127_v32 = vcvt.s32.f32 %v3079_v33  ;;  %v5129_v44 = vcvt.s32.f32 %v3081_v63  ;;  %v3011_v1 = vunpack.c.2.s8 %v2075_v61  ;;  %v2073_v33 = vld [vmem:[%s10573_s20 + $0x458] sm:$0xff] }
 0x47a   : > { %v6843_v59 = vpack.c.bf16 %v5097_v20, %v5095_v41  ;;  %v5027_v0 = vcvt.s32.f32 %v2979_v23  ;;  %v5029_v46 = vcvt.s32.f32 %v2981_v7  ;;  %v3013_v49 = vunpack.c.3.s8 %v2075_v61  ;;  %v2081_v20 = vld [vmem:[%s10573_s20 + $0x498] sm:$0xff] }
 0x47b   : > { %8772 = vmatpush.bf16.msra.mxu1 %v6827_v6  ;;  %v6859_v47 = vpack.c.bf16 %v5129_v44, %v5127_v32  ;;  %v5059_v21 = vcvt.s32.f32 %v3011_v1  ;;  %v3043_v54 = vunpack.c.2.s8 %v2083_v50  ;;  %v3045_v4 = vunpack.c.3.s8 %v2083_v50 }
 0x47c   : > { %8785 = vmatpush.bf16.msra.mxu2 %v6843_v59  ;;  %v6809_v3 = vpack.c.bf16 %v5029_v46, %v5027_v0  ;;  %v5061_v62 = vcvt.s32.f32 %v3013_v49  ;;  %v3075_v37 = vunpack.c.2.s8 %v2091_v26  ;;  %v3077_v52 = vunpack.c.3.s8 %v2091_v26 }
 0x47d   : > { %8798 = vmatpush.bf16.msra.mxu3 %v6859_v47  ;;  %v5091_v11 = vcvt.s32.f32 %v3043_v54  ;;  %v5093_v53 = vcvt.s32.f32 %v3045_v4  ;;  %v8508_v19 = vadd.f32 %v11448_v57, %v11444_v36  ;;  %v2975_v16 = vunpack.c.0.s8 %v2067_v8 }
 0x47e   : > { %8760 = vmatpush.bf16.msra.mxu0 %v6809_v3  ;;  %v6825_v55 = vpack.c.bf16 %v5061_v62, %v5059_v21  ;;  %v5123_v27 = vcvt.s32.f32 %v3075_v37  ;;  %v5125_v38 = vcvt.s32.f32 %v3077_v52  ;;  %v2977_v58 = vunpack.c.1.s8 %v2067_v8 }
 0x47f   : > { %v6841_v12 = vpack.c.bf16 %v5093_v53, %v5091_v11  ;;  %v5023_v31 = vcvt.s32.f32 %v2975_v16  ;;  %v3007_v10 = vunpack.c.0.s8 %v2075_v61  ;;  %v3009_v24 = vunpack.c.1.s8 %v2075_v61 }
 0x480   : > { %8773 = vmatpush.bf16.msra.mxu1 %v6825_v55  ;;  %v6857_v60 = vpack.c.bf16 %v5125_v38, %v5123_v27  ;;  %v5025_v15 = vcvt.s32.f32 %v2977_v58  ;;  %v3039_v43 = vunpack.c.0.s8 %v2083_v50  ;;  %v3041_v35 = vunpack.c.1.s8 %v2083_v50  ;;  %v2089_v50 = vld [vmem:[%s10573_s20 + $0x4d8] sm:$0xff] }
 0x481   : > { %8786 = vmatpush.bf16.msra.mxu2 %v6841_v12  ;;  %v5055_v36 = vcvt.s32.f32 %v3007_v10  ;;  %v5057_v57 = vcvt.s32.f32 %v3009_v24  ;;  %v3071_v56 = vunpack.c.0.s8 %v2091_v26  ;;  %v3073_v40 = vunpack.c.1.s8 %v2091_v26 }
 0x482   : > { %8799 = vmatpush.bf16.msra.mxu3 %v6857_v60  ;;  %v6807_v8 = vpack.c.bf16 %v5025_v15, %v5023_v31  ;;  %v5087_v63 = vcvt.s32.f32 %v3039_v43  ;;  %v5089_v41 = vcvt.s32.f32 %v3041_v35  ;;  %v8521_v61 = vadd.f32 %v11452_v34, %v8508_v19  ;;  %v2063_v60 = vld [vmem:[%s10573_s20 + $0x408] sm:$0xff] }
 0x483   : > { %v6823_v23 = vpack.c.bf16 %v5057_v57, %v5055_v36  ;;  %v5119_v7 = vcvt.s32.f32 %v3071_v56  ;;  %v5121_v6 = vcvt.s32.f32 %v3073_v40  ;;  %v2971_v32 = vunpack.c.2.s8 %v2065_v14 }
 0x484   : > { %8761 = vmatpush.bf16.msra.mxu0 %v6807_v8  ;;  %v6839_v44 = vpack.c.bf16 %v5089_v41, %v5087_v63  ;;  %v2973_v1 = vunpack.c.3.s8 %v2065_v14  ;;  %v3003_v59 = vunpack.c.2.s8 %v2073_v33  ;;  %v3005_v0 = vunpack.c.3.s8 %v2073_v33  ;;  %v2079_v8 = vld [vmem:[%s10573_s20 + $0x488] sm:$0xff] }
 0x485   : > { %8774 = vmatpush.bf16.msra.mxu1 %v6823_v23  ;;  %v6855_v26 = vpack.c.bf16 %v5121_v6, %v5119_v7  ;;  %v5019_v46 = vcvt.s32.f32 %v2971_v32  ;;  %v3035_v49 = vunpack.c.2.s8 %v2081_v20  ;;  %v3037_v47 = vunpack.c.3.s8 %v2081_v20 }
 0x486   : > { %8787 = vmatpush.bf16.msra.mxu2 %v6839_v44  ;;  %v5021_v21 = vcvt.s32.f32 %v2973_v1  ;;  %v5051_v54 = vcvt.s32.f32 %v3003_v59  ;;  %v5053_v34 = vcvt.s32.f32 %v3005_v0  ;;  %v3067_v4 = vunpack.c.2.s8 %v2089_v50 }
 0x487   : > { %8800 = vmatpush.bf16.msra.mxu3 %v6855_v26  ;;  %v5083_v3 = vcvt.s32.f32 %v3035_v49  ;;  %v5085_v62 = vcvt.s32.f32 %v3037_v47  ;;  %v3069_v37 = vunpack.c.3.s8 %v2089_v50  ;;  %v8534_v52 = vadd.f32 %v11458_v48, %v8521_v61  ;;  %v2087_v61 = vld [vmem:[%s10573_s20 + $0x4c8] sm:$0xff] }
 0x488   : > { %v6805_v11 = vpack.c.bf16 %v5021_v21, %v5019_v46  ;;  %v6821_v53 = vpack.c.bf16 %v5053_v34, %v5051_v54  ;;  %v5115_v19 = vcvt.s32.f32 %v3067_v4  ;;  %v2967_v38 = vunpack.c.0.s8 %v2065_v14 }
 0x489   : > { %v6837_v16 = vpack.c.bf16 %v5085_v62, %v5083_v3  ;;  %v5117_v55 = vcvt.s32.f32 %v3069_v37  ;;  %v11485_v27 = vadd.f32 %v11460_v2, %v8534_v52  ;;  %v2969_v58 = vunpack.c.1.s8 %v2065_v14  ;;  %v2071_v2 = vld [vmem:[%s10573_s20 + $0x448] sm:$0xff] }
 0x48a   : > { %8762 = vmatpush.bf16.msra.mxu0 %v6805_v11  ;;  %8775 = vmatpush.bf16.msra.mxu1 %v6821_v53  ;;  %v2999_v12 = vunpack.c.0.s8 %v2073_v33  ;;  %v3001_v31 = vunpack.c.1.s8 %v2073_v33  ;;  %v3031_v48 = vunpack.c.0.s8 %v2081_v20  ;;  %v3033_v24 = vunpack.c.1.s8 %v2081_v20 }
 0x48b   : > { %8788 = vmatpush.bf16.msra.mxu2 %v6837_v16  ;;  %v6853_v10 = vpack.c.bf16 %v5117_v55, %v5115_v19  ;;  %v5015_v15 = vcvt.s32.f32 %v2967_v38  ;;  %v5017_v43 = vcvt.s32.f32 %v2969_v58  ;;  %v3063_v40 = vunpack.c.0.s8 %v2089_v50  ;;  %v2101_v58 = vld [vmem:[%s10573_s20 + $0x538] sm:$0xff] }
 0x48c   : > { %v5047_v35 = vcvt.s32.f32 %v2999_v12  ;;  %v5049_v36 = vcvt.s32.f32 %v3001_v31  ;;  %v5079_v57 = vcvt.s32.f32 %v3031_v48  ;;  %v5081_v56 = vcvt.s32.f32 %v3033_v24  ;;  %v2109_v24 = vld [vmem:[%s10573_s20 + $0x578] sm:$0xff] }
 0x48d   : > { %8801 = vmatpush.bf16.msra.mxu3 %v6853_v10  ;;  %v6803_v14 = vpack.c.bf16 %v5017_v43, %v5015_v15  ;;  %v3065_v41 = vunpack.c.1.s8 %v2089_v50  ;;  %v2963_v33 = vunpack.c.2.s8 %v2063_v60  ;;  %v5111_v7 = vcvt.s32.f32 %v3063_v40  ;;  %v2117_v40 = vld [vmem:[%s10573_s20 + $0x5b8] sm:$0xff] }
 0x48e   : > { %v6819_v63 = vpack.c.bf16 %v5049_v36, %v5047_v35  ;;  %v6835_v23 = vpack.c.bf16 %v5081_v56, %v5079_v57  ;;  %v2965_v20 = vunpack.c.3.s8 %v2063_v60  ;;  %v2995_v6 = vunpack.c.2.s8 %v2071_v2 }
 0x48f   : > { %8763 = vmatpush.bf16.msra.mxu0 %v6803_v14  ;;  %v5113_v32 = vcvt.s32.f32 %v3065_v41  ;;  %v5011_v44 = vcvt.s32.f32 %v2963_v33  ;;  %v2997_v1 = vunpack.c.3.s8 %v2071_v2  ;;  %v3027_v59 = vunpack.c.2.s8 %v2079_v8 }
 0x490   : > { %8776 = vmatpush.bf16.msra.mxu1 %v6819_v63  ;;  %8789 = vmatpush.bf16.msra.mxu2 %v6835_v23  ;;  %v5013_v0 = vcvt.s32.f32 %v2965_v20  ;;  %v5043_v26 = vcvt.s32.f32 %v2995_v6  ;;  %v3029_v46 = vunpack.c.3.s8 %v2079_v8  ;;  %v3059_v49 = vunpack.c.2.s8 %v2087_v61  ;;  %v2125_v23 = vld [vmem:[%s10573_s20 + $0x5f8] sm:$0xff] }
 0x491   : > { %v6851_v47 = vpack.c.bf16 %v5113_v32, %v5111_v7  ;;  %v5045_v21 = vcvt.s32.f32 %v2997_v1  ;;  %v5075_v50 = vcvt.s32.f32 %v3027_v59  ;;  %v3061_v54 = vunpack.c.3.s8 %v2087_v61 }
 0x492   : > { %v6801_v34 = vpack.c.bf16 %v5013_v0, %v5011_v44  ;;  %v5077_v4 = vcvt.s32.f32 %v3029_v46  ;;  %v5107_v3 = vcvt.s32.f32 %v3059_v49  ;;  %v2959_v62 = vunpack.c.0.s8 %v2063_v60 }
 0x493   : > { %8802 = vmatpush.bf16.msra.mxu3 %v6851_v47  ;;  %v6817_v37 = vpack.c.bf16 %v5045_v21, %v5043_v26  ;;  %v5109_v52 = vcvt.s32.f32 %v3061_v54  ;;  %v2961_v11 = vunpack.c.1.s8 %v2063_v60  ;;  %v2991_v53 = vunpack.c.0.s8 %v2071_v2 }
 0x494   : > { %8764 = vmatpush.bf16.msra.mxu0 %v6801_v34  ;;  %v6833_v19 = vpack.c.bf16 %v5077_v4, %v5075_v50  ;;  %v5007_v16 = vcvt.s32.f32 %v2959_v62  ;;  %v2993_v55 = vunpack.c.1.s8 %v2071_v2  ;;  %v3023_v38 = vunpack.c.0.s8 %v2079_v8 }
 0x495   : > { %8777 = vmatpush.bf16.msra.mxu1 %v6817_v37  ;;  %v6849_v12 = vpack.c.bf16 %v5109_v52, %v5107_v3  ;;  %v5009_v31 = vcvt.s32.f32 %v2961_v11  ;;  %v5039_v10 = vcvt.s32.f32 %v2991_v53  ;;  %v3025_v48 = vunpack.c.1.s8 %v2079_v8  ;;  %v2099_v53 = vld [vmem:[%s10573_s20 + $0x528] sm:$0xff] }
 0x496   : > { %8790 = vmatpush.bf16.msra.mxu2 %v6833_v19  ;;  %v5041_v15 = vcvt.s32.f32 %v2993_v55  ;;  %v5071_v43 = vcvt.s32.f32 %v3023_v38  ;;  %v3055_v35 = vunpack.c.0.s8 %v2087_v61  ;;  %v3057_v60 = vunpack.c.1.s8 %v2087_v61  ;;  %v2107_v38 = vld [vmem:[%s10573_s20 + $0x568] sm:$0xff] }
 0x497   : > { %8803 = vmatpush.bf16.msra.mxu3 %v6849_v12  ;;  %v6799_v36 = vpack.c.bf16 %v5009_v31, %v5007_v16  ;;  %v5073_v57 = vcvt.s32.f32 %v3025_v48  ;;  %v3115_v56 = vunpack.c.2.s8 %v2101_v58  ;;  %v3117_v2 = vunpack.c.3.s8 %v2101_v58 }
 0x498   : > { %v6815_v14 = vpack.c.bf16 %v5041_v15, %v5039_v10  ;;  %v5103_v63 = vcvt.s32.f32 %v3055_v35  ;;  %v5105_v41 = vcvt.s32.f32 %v3057_v60  ;;  %v3147_v33 = vunpack.c.2.s8 %v2109_v24  ;;  %v2115_v15 = vld [vmem:[%s10573_s20 + $0x5a8] sm:$0xff] }
 0x499   : > { %8765 = vmatpush.bf16.msra.mxu0 %v6799_v36  ;;  %v6831_v8 = vpack.c.bf16 %v5073_v57, %v5071_v43  ;;  %v5163_v7 = vcvt.s32.f32 %v3115_v56  ;;  %v5165_v20 = vcvt.s32.f32 %v3117_v2  ;;  %v3149_v6 = vunpack.c.3.s8 %v2109_v24  ;;  %v2123_v36 = vld [vmem:[%s10573_s20 + $0x5e8] sm:$0xff] }
 0x49a   : > { %8778 = vmatpush.bf16.msra.mxu1 %v6815_v14  ;;  %v6847_v32 = vpack.c.bf16 %v5105_v41, %v5103_v63  ;;  %v5195_v44 = vcvt.s32.f32 %v3147_v33  ;;  %v3179_v61 = vunpack.c.2.s8 %v2117_v40  ;;  %v3181_v1 = vunpack.c.3.s8 %v2117_v40 }
 0x49b   : > { %8791 = vmatpush.bf16.msra.mxu2 %v6831_v8  ;;  %v6877_v59 = vpack.c.bf16 %v5165_v20, %v5163_v7  ;;  %v5197_v0 = vcvt.s32.f32 %v3149_v6  ;;  %v3211_v26 = vunpack.c.2.s8 %v2125_v23  ;;  %v3213_v46 = vunpack.c.3.s8 %v2125_v23 }
 0x49c   : > { %8804 = vmatpush.bf16.msra.mxu3 %v6847_v32  ;;  %v5227_v49 = vcvt.s32.f32 %v3179_v61  ;;  %v5229_v47 = vcvt.s32.f32 %v3181_v1  ;;  %8766 = vmatmul.bf16.vlgmr.msra.gmra.mxu0 %v10739_v13  ;;  %v3111_v21 = vunpack.c.0.s8 %v2101_v58  ;;  %v3113_v50 = vunpack.c.1.s8 %v2101_v58 }
 0x49d   : > { %8810 = vmatpush.bf16.msrb.mxu0 %v6877_v59  ;;  %v6893_v54 = vpack.c.bf16 %v5197_v0, %v5195_v44  ;;  %v5259_v34 = vcvt.s32.f32 %v3211_v26  ;;  %v5261_v4 = vcvt.s32.f32 %v3213_v46  ;;  %8779 = vmatmul.bf16.vlgmr.msra.gmra.mxu1 %v10741_v18  ;;  %v3143_v3 = vunpack.c.0.s8 %v2109_v24 }
 0x49e   : > { %v6909_v62 = vpack.c.bf16 %v5229_v47, %v5227_v49  ;;  %8792 = vmatmul.bf16.vlgmr.msra.gmra.mxu2 %v10743_v25  ;;  %v5159_v37 = vcvt.s32.f32 %v3111_v21  ;;  %v5161_v52 = vcvt.s32.f32 %v3113_v50  ;;  %v3145_v11 = vunpack.c.1.s8 %v2109_v24  ;;  %v2097_v50 = vld [vmem:[%s10573_s20 + $0x518] sm:$0xff] }
 0x49f   : > { %8823 = vmatpush.bf16.msrb.mxu1 %v6893_v54  ;;  %v6925_v19 = vpack.c.bf16 %v5261_v4, %v5259_v34  ;;  %8805 = vmatmul.bf16.vlgmr.msra.gmra.mxu3 %v10746_v29  ;;  %v5191_v13 = vcvt.s32.f32 %v3143_v3  ;;  %v3175_v16 = vunpack.c.0.s8 %v2117_v40  ;;  %v3177_v55 = vunpack.c.1.s8 %v2117_v40 }
 0x4a0   : > { %8836 = vmatpush.bf16.msrb.mxu2 %v6909_v62  ;;  %v6875_v18 = vpack.c.bf16 %v5161_v52, %v5159_v37  ;;  %v5193_v58 = vcvt.s32.f32 %v3145_v11  ;;  %v3207_v12 = vunpack.c.0.s8 %v2125_v23  ;;  %v3209_v31 = vunpack.c.1.s8 %v2125_v23  ;;  %v2105_v62 = vld [vmem:[%s10573_s20 + $0x558] sm:$0xff]  ;;  %v11505_v37 = vpop.f32.mrf.mxu0  ;;  %v11507_v52 = vpop.f32.mrf.mxu1 }
 0x4a1   : > { %8849 = vmatpush.bf16.msrb.mxu3 %v6925_v19  ;;  %v5223_v25 = vcvt.s32.f32 %v3175_v16  ;;  %v5225_v10 = vcvt.s32.f32 %v3177_v55  ;;  %v3107_v48 = vunpack.c.2.s8 %v2099_v53  ;;  %v3109_v24 = vunpack.c.3.s8 %v2099_v53 }
 0x4a2   : > { %8811 = vmatpush.bf16.msrb.mxu0 %v6875_v18  ;;  %v6891_v43 = vpack.c.bf16 %v5193_v58, %v5191_v13  ;;  %v5255_v35 = vcvt.s32.f32 %v3207_v12  ;;  %v5257_v29 = vcvt.s32.f32 %v3209_v31  ;;  %v3139_v60 = vunpack.c.2.s8 %v2107_v38  ;;  %v2113_v58 = vld [vmem:[%s10573_s20 + $0x598] sm:$0xff] }
 0x4a3   : > { %v6907_v57 = vpack.c.bf16 %v5225_v10, %v5223_v25  ;;  %v5155_v56 = vcvt.s32.f32 %v3107_v48  ;;  %v5157_v2 = vcvt.s32.f32 %v3109_v24  ;;  %v3141_v40 = vunpack.c.3.s8 %v2107_v38  ;;  %v2121_v48 = vld [vmem:[%s10573_s20 + $0x5d8] sm:$0xff] }
 0x4a4   : > { %8824 = vmatpush.bf16.msrb.mxu1 %v6891_v43  ;;  %v6923_v14 = vpack.c.bf16 %v5257_v29, %v5255_v35  ;;  %v5187_v63 = vcvt.s32.f32 %v3139_v60  ;;  %v3171_v41 = vunpack.c.2.s8 %v2115_v15  ;;  %v3173_v33 = vunpack.c.3.s8 %v2115_v15 }
 0x4a5   : > { %8837 = vmatpush.bf16.msrb.mxu2 %v6907_v57  ;;  %v6873_v23 = vpack.c.bf16 %v5157_v2, %v5155_v56  ;;  %v5189_v8 = vcvt.s32.f32 %v3141_v40  ;;  %v3203_v7 = vunpack.c.2.s8 %v2123_v36  ;;  %v3205_v20 = vunpack.c.3.s8 %v2123_v36  ;;  %v11511_v56 = vpop.f32.mrf.mxu2  ;;  %v11513_v2 = vpop.f32.mrf.mxu3 }
 0x4a6   : > { %8850 = vmatpush.bf16.msrb.mxu3 %v6923_v14  ;;  %v5219_v6 = vcvt.s32.f32 %v3171_v41  ;;  %v5221_v32 = vcvt.s32.f32 %v3173_v33  ;;  %v3103_v44 = vunpack.c.0.s8 %v2099_v53  ;;  %v3105_v61 = vunpack.c.1.s8 %v2099_v53 }
 0x4a7   : > { %8812 = vmatpush.bf16.msrb.mxu0 %v6873_v23  ;;  %v6889_v1 = vpack.c.bf16 %v5189_v8, %v5187_v63  ;;  %v5251_v59 = vcvt.s32.f32 %v3203_v7  ;;  %v5253_v0 = vcvt.s32.f32 %v3205_v20  ;;  %v3135_v26 = vunpack.c.0.s8 %v2107_v38 }
 0x4a8   : > { %v6905_v46 = vpack.c.bf16 %v5221_v32, %v5219_v6  ;;  %v5151_v49 = vcvt.s32.f32 %v3103_v44  ;;  %v5153_v47 = vcvt.s32.f32 %v3105_v61  ;;  %v3137_v21 = vunpack.c.1.s8 %v2107_v38  ;;  %v8561_v61 = vpop.f32.mrf.mxu0 }
 0x4a9   : > { %8825 = vmatpush.bf16.msrb.mxu1 %v6889_v1  ;;  %v6921_v54 = vpack.c.bf16 %v5253_v0, %v5251_v59  ;;  %v5183_v34 = vcvt.s32.f32 %v3135_v26  ;;  %v3167_v4 = vunpack.c.0.s8 %v2115_v15  ;;  %v3169_v3 = vunpack.c.1.s8 %v2115_v15  ;;  %v8574_v1 = vpop.f32.mrf.mxu1 }
 0x4aa   : > { %8838 = vmatpush.bf16.msrb.mxu2 %v6905_v46  ;;  %v6871_v11 = vpack.c.bf16 %v5153_v47, %v5151_v49  ;;  %v5185_v53 = vcvt.s32.f32 %v3137_v21  ;;  %v3199_v19 = vunpack.c.0.s8 %v2123_v36  ;;  %v3201_v13 = vunpack.c.1.s8 %v2123_v36  ;;  %v2095_v49 = vld [vmem:[%s10573_s20 + $0x508] sm:$0xff] }
 0x4ab   : > { %8851 = vmatpush.bf16.msrb.mxu3 %v6921_v54  ;;  %v5215_v16 = vcvt.s32.f32 %v3167_v4  ;;  %v5217_v55 = vcvt.s32.f32 %v3169_v3  ;;  %v3099_v38 = vunpack.c.2.s8 %v2097_v50  ;;  %v3101_v18 = vunpack.c.3.s8 %v2097_v50 }
 0x4ac   : > { %8813 = vmatpush.bf16.msrb.mxu0 %v6871_v11  ;;  %v6887_v12 = vpack.c.bf16 %v5185_v53, %v5183_v34  ;;  %v5247_v31 = vcvt.s32.f32 %v3199_v19  ;;  %v5249_v25 = vcvt.s32.f32 %v3201_v13  ;;  %v3131_v10 = vunpack.c.2.s8 %v2105_v62 }
 0x4ad   : > { %v6903_v24 = vpack.c.bf16 %v5217_v55, %v5215_v16  ;;  %v5147_v15 = vcvt.s32.f32 %v3099_v38  ;;  %v5149_v43 = vcvt.s32.f32 %v3101_v18  ;;  %v3133_v35 = vunpack.c.3.s8 %v2105_v62 }
 0x4ae   : > { %8826 = vmatpush.bf16.msrb.mxu1 %v6887_v12  ;;  %v6919_v29 = vpack.c.bf16 %v5249_v25, %v5247_v31  ;;  %v5179_v60 = vcvt.s32.f32 %v3131_v10  ;;  %v3163_v36 = vunpack.c.2.s8 %v2113_v58  ;;  %v3165_v57 = vunpack.c.3.s8 %v2113_v58  ;;  %v2119_v25 = vld [vmem:[%s10573_s20 + $0x5c8] sm:$0xff]  ;;  %v8600_v10 = vpop.f32.mrf.mxu3 }
 0x4af   : > { %8839 = vmatpush.bf16.msrb.mxu2 %v6903_v24  ;;  %v6869_v40 = vpack.c.bf16 %v5149_v43, %v5147_v15  ;;  %v5181_v14 = vcvt.s32.f32 %v3133_v35  ;;  %v3195_v63 = vunpack.c.2.s8 %v2121_v48  ;;  %v3197_v41 = vunpack.c.3.s8 %v2121_v48 }
 0x4b0   : > { %8852 = vmatpush.bf16.msrb.mxu3 %v6919_v29  ;;  %v5211_v33 = vcvt.s32.f32 %v3163_v36  ;;  %v5213_v23 = vcvt.s32.f32 %v3165_v57  ;;  %v3095_v8 = vunpack.c.0.s8 %v2097_v50  ;;  %v3097_v7 = vunpack.c.1.s8 %v2097_v50  ;;  %v2103_v50 = vld [vmem:[%s10573_s20 + $0x548] sm:$0xff] }
 0x4b1   : > { %8814 = vmatpush.bf16.msrb.mxu0 %v6869_v40  ;;  %v6885_v20 = vpack.c.bf16 %v5181_v14, %v5179_v60  ;;  %v5243_v6 = vcvt.s32.f32 %v3195_v63  ;;  %v5245_v32 = vcvt.s32.f32 %v3197_v41  ;;  %v3127_v44 = vunpack.c.0.s8 %v2105_v62 }
 0x4b2   : > { %v6901_v59 = vpack.c.bf16 %v5213_v23, %v5211_v33  ;;  %v5143_v0 = vcvt.s32.f32 %v3095_v8  ;;  %v5145_v26 = vcvt.s32.f32 %v3097_v7  ;;  %v3129_v46 = vunpack.c.1.s8 %v2105_v62  ;;  %v2111_v62 = vld [vmem:[%s10573_s20 + $0x588] sm:$0xff] }
 0x4b3   : > { %8827 = vmatpush.bf16.msrb.mxu1 %v6885_v20  ;;  %v6917_v47 = vpack.c.bf16 %v5245_v32, %v5243_v6  ;;  %v5175_v21 = vcvt.s32.f32 %v3127_v44  ;;  %v3159_v54 = vunpack.c.0.s8 %v2113_v58  ;;  %v3161_v34 = vunpack.c.1.s8 %v2113_v58  ;;  %v8587_v58 = vpop.f32.mrf.mxu2 }
 0x4b4   : > { %8840 = vmatpush.bf16.msrb.mxu2 %v6901_v59  ;;  %v6867_v4 = vpack.c.bf16 %v5145_v26, %v5143_v0  ;;  %v5177_v3 = vcvt.s32.f32 %v3129_v46  ;;  %v3191_v11 = vunpack.c.0.s8 %v2121_v48  ;;  %v3193_v53 = vunpack.c.1.s8 %v2121_v48  ;;  %v11520_v0 = vld [vmem:[%s10573_s20 + $0x638] sm:$0xff] }
 0x4b5   : > { %8853 = vmatpush.bf16.msrb.mxu3 %v6917_v47  ;;  %v5207_v19 = vcvt.s32.f32 %v3159_v54  ;;  %v5209_v13 = vcvt.s32.f32 %v3161_v34  ;;  %v3091_v16 = vunpack.c.2.s8 %v2095_v49  ;;  %v3093_v55 = vunpack.c.3.s8 %v2095_v49  ;;  %v11523_v54 = vld [vmem:[%s10573_s20 + $0x678] sm:$0xff] }
 0x4b6   : > { %8815 = vmatpush.bf16.msrb.mxu0 %v6867_v4  ;;  %v6883_v38 = vpack.c.bf16 %v5177_v3, %v5175_v21  ;;  %v5239_v18 = vcvt.s32.f32 %v3191_v11  ;;  %v5241_v12 = vcvt.s32.f32 %v3193_v53  ;;  %v3123_v31 = vunpack.c.2.s8 %v2103_v50  ;;  %v11525_v11 = vpop.f32.mrf.mxu0  ;;  %v11527_v53 = vpop.f32.mrf.mxu1 }
 0x4b7   : > { %v6899_v24 = vpack.c.bf16 %v5209_v13, %v5207_v19  ;;  %v5139_v15 = vcvt.s32.f32 %v3091_v16  ;;  %v5141_v43 = vcvt.s32.f32 %v3093_v55  ;;  %v3125_v35 = vunpack.c.3.s8 %v2103_v50  ;;  %v2149_v55 = vld [vmem:[%s10573_s20 + $0x6b8] sm:$0xff] }
 0x4b8   : > { %8828 = vmatpush.bf16.msrb.mxu1 %v6883_v38  ;;  %v6915_v48 = vpack.c.bf16 %v5241_v12, %v5239_v18  ;;  %v5171_v29 = vcvt.s32.f32 %v3123_v31  ;;  %v3155_v60 = vunpack.c.2.s8 %v2111_v62  ;;  %v3157_v36 = vunpack.c.3.s8 %v2111_v62  ;;  %v2157_v31 = vld [vmem:[%s10573_s20 + $0x6f8] sm:$0xff] }
 0x4b9   : > { %8841 = vmatpush.bf16.msrb.mxu2 %v6899_v24  ;;  %v6865_v57 = vpack.c.bf16 %v5141_v43, %v5139_v15  ;;  %v5173_v40 = vcvt.s32.f32 %v3125_v35  ;;  %v3187_v14 = vunpack.c.2.s8 %v2119_v25  ;;  %v3189_v63 = vunpack.c.3.s8 %v2119_v25 }
 0x4ba   : > { %8854 = vmatpush.bf16.msrb.mxu3 %v6915_v48  ;;  %v5203_v41 = vcvt.s32.f32 %v3155_v60  ;;  %v5205_v33 = vcvt.s32.f32 %v3157_v36  ;;  %v3087_v23 = vunpack.c.0.s8 %v2095_v49  ;;  %v3089_v8 = vunpack.c.1.s8 %v2095_v49 }
 0x4bb   : > { %8816 = vmatpush.bf16.msrb.mxu0 %v6865_v57  ;;  %v6881_v7 = vpack.c.bf16 %v5173_v40, %v5171_v29  ;;  %v5235_v20 = vcvt.s32.f32 %v3187_v14  ;;  %v5237_v6 = vcvt.s32.f32 %v3189_v63  ;;  %v3119_v32 = vunpack.c.0.s8 %v2103_v50  ;;  %v11536_v40 = vpop.f32.mrf.mxu2  ;;  %v11538_v14 = vpop.f32.mrf.mxu3 }
 0x4bc   : > { %v6897_v44 = vpack.c.bf16 %v5205_v33, %v5203_v41  ;;  %v5135_v61 = vcvt.s32.f32 %v3087_v23  ;;  %v5137_v1 = vcvt.s32.f32 %v3089_v8  ;;  %v3121_v59 = vunpack.c.1.s8 %v2103_v50 }
 0x4bd   : > { %8829 = vmatpush.bf16.msrb.mxu1 %v6881_v7  ;;  %v6913_v26 = vpack.c.bf16 %v5237_v6, %v5235_v20  ;;  %v5167_v46 = vcvt.s32.f32 %v3119_v32  ;;  %v3151_v47 = vunpack.c.0.s8 %v2111_v62  ;;  %v3153_v21 = vunpack.c.1.s8 %v2111_v62 }
 0x4be   : > { %8842 = vmatpush.bf16.msrb.mxu2 %v6897_v44  ;;  %v6863_v49 = vpack.c.bf16 %v5137_v1, %v5135_v61  ;;  %v5169_v34 = vcvt.s32.f32 %v3121_v59  ;;  %v3183_v4 = vunpack.c.0.s8 %v2119_v25  ;;  %v3185_v3 = vunpack.c.1.s8 %v2119_v25  ;;  %v8626_v61 = vpop.f32.mrf.mxu1 }
 0x4bf   : > { %8855 = vmatpush.bf16.msrb.mxu3 %v6913_v26  ;;  %v5199_v50 = vcvt.s32.f32 %v3151_v47  ;;  %v5201_v19 = vcvt.s32.f32 %v3153_v21  ;;  %v3243_v13 = vunpack.c.2.s8 %v11520_v0  ;;  %v3245_v16 = vunpack.c.3.s8 %v11520_v0 }
 0x4c0   : > { %8817 = vmatpush.bf16.msrb.mxu0 %v6863_v49  ;;  %v6879_v62 = vpack.c.bf16 %v5169_v34, %v5167_v46  ;;  %v5231_v38 = vcvt.s32.f32 %v3183_v4  ;;  %v5233_v18 = vcvt.s32.f32 %v3185_v3  ;;  %v3275_v12 = vunpack.c.2.s8 %v11523_v54  ;;  %v2139_v49 = vld [vmem:[%s10573_s20 + $0x668] sm:$0xff] }
 0x4c1   : > { %v6895_v25 = vpack.c.bf16 %v5201_v19, %v5199_v50  ;;  %v5291_v58 = vcvt.s32.f32 %v3243_v13  ;;  %v5293_v10 = vcvt.s32.f32 %v3245_v16  ;;  %v3277_v24 = vunpack.c.3.s8 %v11523_v54  ;;  %v2147_v50 = vld [vmem:[%s10573_s20 + $0x6a8] sm:$0xff] }
 0x4c2   : > { %8830 = vmatpush.bf16.msrb.mxu1 %v6879_v62  ;;  %v6911_v15 = vpack.c.bf16 %v5233_v18, %v5231_v38  ;;  %v5323_v43 = vcvt.s32.f32 %v3275_v12  ;;  %v3307_v35 = vunpack.c.2.s8 %v2149_v55  ;;  %v3309_v48 = vunpack.c.3.s8 %v2149_v55 }
 0x4c3   : > { %8843 = vmatpush.bf16.msrb.mxu2 %v6895_v25  ;;  %v6941_v29 = vpack.c.bf16 %v5293_v10, %v5291_v58  ;;  %v5325_v60 = vcvt.s32.f32 %v3277_v24  ;;  %v3339_v36 = vunpack.c.2.s8 %v2157_v31  ;;  %v3341_v57 = vunpack.c.3.s8 %v2157_v31  ;;  %8818 = vmatmul.bf16.vlgmr.msrb.gmra.mxu0 %v10791_v39  ;;  %v8652_v25 = vpop.f32.mrf.mxu3 }
 0x4c4   : > { %8856 = vmatpush.bf16.msrb.mxu3 %v6911_v15  ;;  %v5355_v63 = vcvt.s32.f32 %v3307_v35  ;;  %v5357_v41 = vcvt.s32.f32 %v3309_v48  ;;  %v8573_v33 = vadd.f32 %v11507_v52, %v11505_v37  ;;  %v3239_v23 = vunpack.c.0.s8 %v11520_v0  ;;  %v8613_v52 = vpop.f32.mrf.mxu0 }
 0x4c5   : > { %8862 = vmatpush.bf16.msra.mxu0 %v6941_v29  ;;  %v6957_v8 = vpack.c.bf16 %v5325_v60, %v5323_v43  ;;  %v5387_v7 = vcvt.s32.f32 %v3339_v36  ;;  %v5389_v20 = vcvt.s32.f32 %v3341_v57  ;;  %8831 = vmatmul.bf16.vlgmr.msrb.gmra.mxu1 %v10793_v42  ;;  %v3241_v39 = vunpack.c.1.s8 %v11520_v0  ;;  %v2131_v0 = vld [vmem:[%s10573_s20 + $0x628] sm:$0xff] }
 0x4c6   : > { %v6973_v6 = vpack.c.bf16 %v5357_v41, %v5355_v63  ;;  %8844 = vmatmul.bf16.vlgmr.msrb.gmra.mxu2 %v10797_v51  ;;  %v5287_v32 = vcvt.s32.f32 %v3239_v23  ;;  %v3271_v44 = vunpack.c.0.s8 %v11523_v54  ;;  %v3273_v37 = vunpack.c.1.s8 %v11523_v54 }
 0x4c7   : > { %8875 = vmatpush.bf16.msra.mxu1 %v6957_v8  ;;  %v6989_v1 = vpack.c.bf16 %v5389_v20, %v5387_v7  ;;  %8857 = vmatmul.bf16.vlgmr.msrb.gmra.mxu3 %v10806_v17  ;;  %v5289_v59 = vcvt.s32.f32 %v3241_v39  ;;  %v3303_v42 = vunpack.c.0.s8 %v2149_v55  ;;  %v3305_v26 = vunpack.c.1.s8 %v2149_v55  ;;  %v2155_v55 = vld [vmem:[%s10573_s20 + $0x6e8] sm:$0xff] }
 0x4c8   : > { %8888 = vmatpush.bf16.msra.mxu2 %v6973_v6  ;;  %v5319_v51 = vcvt.s32.f32 %v3271_v44  ;;  %v5321_v46 = vcvt.s32.f32 %v3273_v37  ;;  %v3335_v47 = vunpack.c.0.s8 %v2157_v31  ;;  %v3337_v21 = vunpack.c.1.s8 %v2157_v31  ;;  %v8639_v31 = vpop.f32.mrf.mxu2  ;;  %v2129_v37 = vld [vmem:[%s10573_s20 + $0x618] sm:$0xff] }
 0x4c9   : > { %8901 = vmatpush.bf16.msra.mxu3 %v6989_v1  ;;  %v6939_v54 = vpack.c.bf16 %v5289_v59, %v5287_v32  ;;  %v5351_v34 = vcvt.s32.f32 %v3303_v42  ;;  %v5353_v4 = vcvt.s32.f32 %v3305_v26  ;;  %v8586_v3 = vadd.f32 %v11511_v56, %v8573_v33  ;;  %v2137_v42 = vld [vmem:[%s10573_s20 + $0x658] sm:$0xff] }
 0x4ca   : > { %v6955_v17 = vpack.c.bf16 %v5321_v46, %v5319_v51  ;;  %v5383_v19 = vcvt.s32.f32 %v3335_v47  ;;  %v5385_v13 = vcvt.s32.f32 %v3337_v21  ;;  %v3235_v16 = vunpack.c.2.s8 %v2131_v0  ;;  %v2145_v47 = vld [vmem:[%s10573_s20 + $0x698] sm:$0xff] }
 0x4cb   : > { %8863 = vmatpush.bf16.msra.mxu0 %v6939_v54  ;;  %v6971_v62 = vpack.c.bf16 %v5353_v4, %v5351_v34  ;;  %v11555_v38 = vadd.f32 %v11513_v2, %v8586_v3  ;;  %v3237_v18 = vunpack.c.3.s8 %v2131_v0  ;;  %v3267_v12 = vunpack.c.2.s8 %v2139_v49 }
 0x4cc   : > { %8876 = vmatpush.bf16.msra.mxu1 %v6955_v17  ;;  %v6987_v58 = vpack.c.bf16 %v5385_v13, %v5383_v19  ;;  %v5283_v10 = vcvt.s32.f32 %v3235_v16  ;;  %v3269_v24 = vunpack.c.3.s8 %v2139_v49  ;;  %v3299_v56 = vunpack.c.2.s8 %v2147_v50 }
 0x4cd   : > { %8889 = vmatpush.bf16.msra.mxu2 %v6971_v62  ;;  %v5285_v15 = vcvt.s32.f32 %v3237_v18  ;;  %v5315_v43 = vcvt.s32.f32 %v3267_v12  ;;  %v3301_v35 = vunpack.c.3.s8 %v2147_v50  ;;  %v3331_v48 = vunpack.c.2.s8 %v2155_v55 }
 0x4ce   : > { %8902 = vmatpush.bf16.msra.mxu3 %v6987_v58  ;;  %v5317_v29 = vcvt.s32.f32 %v3269_v24  ;;  %v5347_v60 = vcvt.s32.f32 %v3299_v56  ;;  %v3333_v2 = vunpack.c.3.s8 %v2155_v55  ;;  %v3231_v36 = vunpack.c.0.s8 %v2131_v0 }
 0x4cf   : > { %v6937_v57 = vpack.c.bf16 %v5285_v15, %v5283_v10  ;;  %v5349_v63 = vcvt.s32.f32 %v3301_v35  ;;  %v5379_v41 = vcvt.s32.f32 %v3331_v48  ;;  %v3233_v33 = vunpack.c.1.s8 %v2131_v0 }
 0x4d0   : > { %v6953_v23 = vpack.c.bf16 %v5317_v29, %v5315_v43  ;;  %v5381_v8 = vcvt.s32.f32 %v3333_v2  ;;  %v5279_v7 = vcvt.s32.f32 %v3231_v36  ;;  %v3263_v20 = vunpack.c.0.s8 %v2139_v49 }
 0x4d1   : > { %8864 = vmatpush.bf16.msra.mxu0 %v6937_v57  ;;  %v6969_v39 = vpack.c.bf16 %v5349_v63, %v5347_v60  ;;  %v5281_v6 = vcvt.s32.f32 %v3233_v33  ;;  %v3265_v32 = vunpack.c.1.s8 %v2139_v49  ;;  %v3295_v44 = vunpack.c.0.s8 %v2147_v50 }
 0x4d2   : > { %8877 = vmatpush.bf16.msra.mxu1 %v6953_v23  ;;  %v6985_v52 = vpack.c.bf16 %v5381_v8, %v5379_v41  ;;  %v5311_v61 = vcvt.s32.f32 %v3263_v20  ;;  %v3297_v1 = vunpack.c.1.s8 %v2147_v50  ;;  %v3327_v59 = vunpack.c.0.s8 %v2155_v55  ;;  %v2153_v50 = vld [vmem:[%s10573_s20 + $0x6d8] sm:$0xff]  ;;  %v2127_v23 = vld [vmem:[%s10573_s20 + $0x608] sm:$0xff] }
 0x4d3   : > { %8890 = vmatpush.bf16.msra.mxu2 %v6969_v39  ;;  %v6935_v26 = vpack.c.bf16 %v5281_v6, %v5279_v7  ;;  %v5313_v0 = vcvt.s32.f32 %v3265_v32  ;;  %v5343_v51 = vcvt.s32.f32 %v3295_v44  ;;  %v3329_v46 = vunpack.c.1.s8 %v2155_v55  ;;  %v2135_v44 = vld [vmem:[%s10573_s20 + $0x648] sm:$0xff] }
 0x4d4   : > { %8903 = vmatpush.bf16.msra.mxu3 %v6985_v52  ;;  %v5345_v21 = vcvt.s32.f32 %v3297_v1  ;;  %v5375_v54 = vcvt.s32.f32 %v3327_v59  ;;  %v3227_v34 = vunpack.c.2.s8 %v2129_v37  ;;  %v3229_v49 = vunpack.c.3.s8 %v2129_v37  ;;  %v2143_v59 = vld [vmem:[%s10573_s20 + $0x688] sm:$0xff] }
 0x4d5   : > { %8865 = vmatpush.bf16.msra.mxu0 %v6935_v26  ;;  %v6951_v4 = vpack.c.bf16 %v5313_v0, %v5311_v61  ;;  %v5377_v3 = vcvt.s32.f32 %v3329_v46  ;;  %v3259_v17 = vunpack.c.2.s8 %v2137_v42  ;;  %v3261_v19 = vunpack.c.3.s8 %v2137_v42  ;;  %v2151_v46 = vld [vmem:[%s10573_s20 + $0x6c8] sm:$0xff] }
 0x4d6   : > { %v6967_v13 = vpack.c.bf16 %v5345_v21, %v5343_v51  ;;  %v5275_v16 = vcvt.s32.f32 %v3227_v34  ;;  %v5277_v62 = vcvt.s32.f32 %v3229_v49  ;;  %v3291_v18 = vunpack.c.2.s8 %v2145_v47 }
 0x4d7   : > { %8878 = vmatpush.bf16.msra.mxu1 %v6951_v4  ;;  %v6983_v12 = vpack.c.bf16 %v5377_v3, %v5375_v54  ;;  %v5307_v31 = vcvt.s32.f32 %v3259_v17  ;;  %v5309_v55 = vcvt.s32.f32 %v3261_v19  ;;  %v3293_v25 = vunpack.c.3.s8 %v2145_v47 }
 0x4d8   : > { %8891 = vmatpush.bf16.msra.mxu2 %v6967_v13  ;;  %v6933_v58 = vpack.c.bf16 %v5277_v62, %v5275_v16  ;;  %v5339_v10 = vcvt.s32.f32 %v3291_v18  ;;  %v3323_v24 = vunpack.c.2.s8 %v2153_v50  ;;  %v3325_v56 = vunpack.c.3.s8 %v2153_v50  ;;  %v11574_v16 = vpop.f32.mrf.mxu1 }
 0x4d9   : > { %8904 = vmatpush.bf16.msra.mxu3 %v6983_v12  ;;  %v6949_v15 = vpack.c.bf16 %v5309_v55, %v5307_v31  ;;  %v5341_v43 = vcvt.s32.f32 %v3293_v25  ;;  %v8612_v35 = vadd.f32 %v11525_v11, %v11555_v38  ;;  %v3223_v48 = vunpack.c.0.s8 %v2129_v37 }
 0x4da   : > { %8866 = vmatpush.bf16.msra.mxu0 %v6933_v58  ;;  %v5371_v29 = vcvt.s32.f32 %v3323_v24  ;;  %v5373_v60 = vcvt.s32.f32 %v3325_v56  ;;  %v3225_v2 = vunpack.c.1.s8 %v2129_v37  ;;  %v3255_v36 = vunpack.c.0.s8 %v2137_v42  ;;  %v11566_v37 = vpop.f32.mrf.mxu0 }
 0x4db   : > { %8879 = vmatpush.bf16.msra.mxu1 %v6949_v15  ;;  %v6965_v57 = vpack.c.bf16 %v5341_v43, %v5339_v10  ;;  %v8625_v63 = vadd.f32 %v11527_v53, %v8612_v35  ;;  %v5271_v41 = vcvt.s32.f32 %v3223_v48  ;;  %v3257_v33 = vunpack.c.1.s8 %v2137_v42 }
 0x4dc   : > { %v6981_v8 = vpack.c.bf16 %v5373_v60, %v5371_v29  ;;  %v5273_v7 = vcvt.s32.f32 %v3225_v2  ;;  %v5303_v20 = vcvt.s32.f32 %v3255_v36  ;;  %v3287_v39 = vunpack.c.0.s8 %v2145_v47  ;;  %v2165_v2 = vld [vmem:[%s10573_s20 + $0x738] sm:$0xff] }
 0x4dd   : > { %8892 = vmatpush.bf16.msra.mxu2 %v6965_v57  ;;  %v5305_v11 = vcvt.s32.f32 %v3257_v33  ;;  %v3289_v38 = vunpack.c.1.s8 %v2145_v47  ;;  %v3319_v6 = vunpack.c.0.s8 %v2153_v50  ;;  %v3321_v32 = vunpack.c.1.s8 %v2153_v50  ;;  %v2173_v33 = vld [vmem:[%s10573_s20 + $0x778] sm:$0xff] }
 0x4de   : > { %8905 = vmatpush.bf16.msra.mxu3 %v6981_v8  ;;  %v6931_v52 = vpack.c.bf16 %v5273_v7, %v5271_v41  ;;  %v5335_v53 = vcvt.s32.f32 %v3287_v39  ;;  %v8638_v61 = vadd.f32 %v11536_v40, %v8625_v63  ;;  %v3219_v1 = vunpack.c.2.s8 %v2127_v23  ;;  %v11580_v8 = vpop.f32.mrf.mxu3 }
 0x4df   : > { %v6947_v42 = vpack.c.bf16 %v5305_v11, %v5303_v20  ;;  %v5337_v26 = vcvt.s32.f32 %v3289_v38  ;;  %v5367_v0 = vcvt.s32.f32 %v3319_v6  ;;  %v5369_v51 = vcvt.s32.f32 %v3321_v32  ;;  %v2181_v38 = vld [vmem:[%s10573_s20 + $0x7b8] sm:$0xff] }
 0x4e0   : > { %8867 = vmatpush.bf16.msra.mxu0 %v6931_v52  ;;  %v11572_v47 = vadd.f32 %v11538_v14, %v8638_v61  ;;  %v3221_v21 = vunpack.c.3.s8 %v2127_v23  ;;  %v5267_v54 = vcvt.s32.f32 %v3219_v1  ;;  %v3251_v34 = vunpack.c.2.s8 %v2135_v44 }
 0x4e1   : > { %8880 = vmatpush.bf16.msra.mxu1 %v6947_v42  ;;  %v6963_v49 = vpack.c.bf16 %v5337_v26, %v5335_v53  ;;  %v6979_v4 = vpack.c.bf16 %v5369_v51, %v5367_v0  ;;  %v3253_v3 = vunpack.c.3.s8 %v2135_v44  ;;  %v3283_v17 = vunpack.c.2.s8 %v2143_v59  ;;  %v2189_v42 = vld [vmem:[%s10573_s20 + $0x7f8] sm:$0xff]  ;;  %v8678_v26 = vpop.f32.mrf.mxu1 }
 0x4e2   : > { %v5269_v40 = vcvt.s32.f32 %v3221_v21  ;;  %v5299_v19 = vcvt.s32.f32 %v3251_v34  ;;  %v3285_v50 = vunpack.c.3.s8 %v2143_v59  ;;  %v3315_v13 = vunpack.c.2.s8 %v2151_v46  ;;  %v8665_v43 = vpop.f32.mrf.mxu0 }
 0x4e3   : > { %8893 = vmatpush.bf16.msra.mxu2 %v6963_v49  ;;  %8906 = vmatpush.bf16.msra.mxu3 %v6979_v4  ;;  %v5301_v62 = vcvt.s32.f32 %v3253_v3  ;;  %v5331_v18 = vcvt.s32.f32 %v3283_v17  ;;  %v3317_v14 = vunpack.c.3.s8 %v2151_v46  ;;  %v3215_v12 = vunpack.c.0.s8 %v2127_v23 }
 0x4e4   : > { %v6929_v31 = vpack.c.bf16 %v5269_v40, %v5267_v54  ;;  %v5333_v55 = vcvt.s32.f32 %v3285_v50  ;;  %v5363_v25 = vcvt.s32.f32 %v3315_v13  ;;  %v3217_v58 = vunpack.c.1.s8 %v2127_v23  ;;  %v11578_v23 = vpop.f32.mrf.mxu2 }
 0x4e5   : > { %v6945_v10 = vpack.c.bf16 %v5301_v62, %v5299_v19  ;;  %v5365_v24 = vcvt.s32.f32 %v3317_v14  ;;  %v5263_v56 = vcvt.s32.f32 %v3215_v12  ;;  %v3247_v15 = vunpack.c.0.s8 %v2135_v44 }
 0x4e6   : > { %8868 = vmatpush.bf16.msra.mxu0 %v6929_v31  ;;  %v6961_v35 = vpack.c.bf16 %v5333_v55, %v5331_v18  ;;  %v5265_v48 = vcvt.s32.f32 %v3217_v58  ;;  %v3249_v29 = vunpack.c.1.s8 %v2135_v44  ;;  %v3279_v60 = vunpack.c.0.s8 %v2143_v59  ;;  %v8704_v58 = vpop.f32.mrf.mxu3 }
 0x4e7   : > { %8881 = vmatpush.bf16.msra.mxu1 %v6945_v10  ;;  %v6977_v36 = vpack.c.bf16 %v5365_v24, %v5363_v25  ;;  %v5295_v57 = vcvt.s32.f32 %v3247_v15  ;;  %v3281_v63 = vunpack.c.1.s8 %v2143_v59  ;;  %v3311_v41 = vunpack.c.0.s8 %v2151_v46  ;;  %v2163_v15 = vld [vmem:[%s10573_s20 + $0x728] sm:$0xff]  ;;  %v2169_v58 = vld [vmem:[%s10573_s20 + $0x758] sm:$0xff] }
 0x4e8   : > { %8894 = vmatpush.bf16.msra.mxu2 %v6961_v35  ;;  %v6927_v7 = vpack.c.bf16 %v5265_v48, %v5263_v56  ;;  %v5297_v20 = vcvt.s32.f32 %v3249_v29  ;;  %v5327_v39 = vcvt.s32.f32 %v3279_v60  ;;  %v3313_v11 = vunpack.c.1.s8 %v2151_v46  ;;  %v2171_v29 = vld [vmem:[%s10573_s20 + $0x768] sm:$0xff] }
 0x4e9   : > { %8907 = vmatpush.bf16.msra.mxu3 %v6977_v36  ;;  %v5329_v6 = vcvt.s32.f32 %v3281_v63  ;;  %v5359_v32 = vcvt.s32.f32 %v3311_v41  ;;  %v3371_v44 = vunpack.c.2.s8 %v2165_v2  ;;  %v3373_v52 = vunpack.c.3.s8 %v2165_v2  ;;  %v2179_v63 = vld [vmem:[%s10573_s20 + $0x7a8] sm:$0xff] }
 0x4ea   : > { %8869 = vmatpush.bf16.msra.mxu0 %v6927_v7  ;;  %v6943_v53 = vpack.c.bf16 %v5297_v20, %v5295_v57  ;;  %v5361_v61 = vcvt.s32.f32 %v3313_v11  ;;  %v3403_v1 = vunpack.c.2.s8 %v2173_v33  ;;  %v3405_v59 = vunpack.c.3.s8 %v2173_v33 }
 0x4eb   : > { %v6959_v0 = vpack.c.bf16 %v5329_v6, %v5327_v39  ;;  %v5419_v51 = vcvt.s32.f32 %v3371_v44  ;;  %v5421_v21 = vcvt.s32.f32 %v3373_v52  ;;  %v3435_v54 = vunpack.c.2.s8 %v2181_v38  ;;  %v2187_v6 = vld [vmem:[%s10573_s20 + $0x7e8] sm:$0xff] }
 0x4ec   : > { %8882 = vmatpush.bf16.msra.mxu1 %v6943_v53  ;;  %v6975_v34 = vpack.c.bf16 %v5361_v61, %v5359_v32  ;;  %v5451_v46 = vcvt.s32.f32 %v3403_v1  ;;  %v5453_v49 = vcvt.s32.f32 %v3405_v59  ;;  %v3437_v4 = vunpack.c.3.s8 %v2181_v38  ;;  %v8691_v25 = vpop.f32.mrf.mxu2 }
 0x4ed   : > { %8895 = vmatpush.bf16.msra.mxu2 %v6959_v0  ;;  %v7005_v3 = vpack.c.bf16 %v5421_v21, %v5419_v51  ;;  %v5483_v17 = vcvt.s32.f32 %v3435_v54  ;;  %v3467_v40 = vunpack.c.2.s8 %v2189_v42  ;;  %v3469_v19 = vunpack.c.3.s8 %v2189_v42  ;;  %8870 = vmatmul.bf16.vlgmr.msra.gmra.mxu0 %v10860_v28 }
 0x4ee   : > { %8908 = vmatpush.bf16.msra.mxu3 %v6975_v34  ;;  %v7021_v50 = vpack.c.bf16 %v5453_v49, %v5451_v46  ;;  %v5485_v13 = vcvt.s32.f32 %v3437_v4  ;;  %v3367_v62 = vunpack.c.0.s8 %v2165_v2  ;;  %v3369_v18 = vunpack.c.1.s8 %v2165_v2 }
 0x4ef   : > { %8914 = vmatpush.bf16.msrb.mxu0 %v7005_v3  ;;  %v5515_v14 = vcvt.s32.f32 %v3467_v40  ;;  %v5517_v12 = vcvt.s32.f32 %v3469_v19  ;;  %8883 = vmatmul.bf16.vlgmr.msra.gmra.mxu1 %v10865_v30  ;;  %v3399_v31 = vunpack.c.0.s8 %v2173_v33  ;;  %v3401_v55 = vunpack.c.1.s8 %v2173_v33 }
 0x4f0   : > { %8927 = vmatpush.bf16.msrb.mxu1 %v7021_v50  ;;  %v7037_v10 = vpack.c.bf16 %v5485_v13, %v5483_v17  ;;  %8896 = vmatmul.bf16.vlgmr.msra.gmra.mxu2 %v10868_v45  ;;  %v5415_v28 = vcvt.s32.f32 %v3367_v62  ;;  %v5417_v24 = vcvt.s32.f32 %v3369_v18  ;;  %v3431_v56 = vunpack.c.0.s8 %v2181_v38  ;;  %v2161_v62 = vld [vmem:[%s10573_s20 + $0x718] sm:$0xff] }
 0x4f1   : > { %v7053_v43 = vpack.c.bf16 %v5517_v12, %v5515_v14  ;;  %8909 = vmatmul.bf16.vlgmr.msra.gmra.mxu3 %v10870_v9  ;;  %v5447_v35 = vcvt.s32.f32 %v3399_v31  ;;  %v5449_v48 = vcvt.s32.f32 %v3401_v55  ;;  %v3433_v30 = vunpack.c.1.s8 %v2181_v38 }
 0x4f2   : > { %8940 = vmatpush.bf16.msrb.mxu2 %v7037_v10  ;;  %v7003_v60 = vpack.c.bf16 %v5417_v24, %v5415_v28  ;;  %v5479_v2 = vcvt.s32.f32 %v3431_v56  ;;  %v3463_v36 = vunpack.c.0.s8 %v2189_v42  ;;  %v3465_v57 = vunpack.c.1.s8 %v2189_v42 }
 0x4f3   : > { %8953 = vmatpush.bf16.msrb.mxu3 %v7053_v43  ;;  %v7019_v45 = vpack.c.bf16 %v5449_v48, %v5447_v35  ;;  %v5481_v41 = vcvt.s32.f32 %v3433_v30  ;;  %v3363_v33 = vunpack.c.2.s8 %v2163_v15  ;;  %v3365_v7 = vunpack.c.3.s8 %v2163_v15 }
 0x4f4   : > { %8915 = vmatpush.bf16.msrb.mxu0 %v7003_v60  ;;  %v5511_v20 = vcvt.s32.f32 %v3463_v36  ;;  %v5513_v39 = vcvt.s32.f32 %v3465_v57  ;;  %v3395_v9 = vunpack.c.2.s8 %v2171_v29  ;;  %v3397_v11 = vunpack.c.3.s8 %v2171_v29 }
 0x4f5   : > { %8928 = vmatpush.bf16.msrb.mxu1 %v7019_v45  ;;  %v7035_v38 = vpack.c.bf16 %v5481_v41, %v5479_v2  ;;  %v5411_v32 = vcvt.s32.f32 %v3363_v33  ;;  %v5413_v44 = vcvt.s32.f32 %v3365_v7  ;;  %v3427_v52 = vunpack.c.2.s8 %v2179_v63 }
 0x4f6   : > { %v7051_v53 = vpack.c.bf16 %v5513_v39, %v5511_v20  ;;  %v5443_v61 = vcvt.s32.f32 %v3395_v9  ;;  %v5445_v1 = vcvt.s32.f32 %v3397_v11  ;;  %v3429_v59 = vunpack.c.3.s8 %v2179_v63 }
 0x4f7   : > { %8941 = vmatpush.bf16.msrb.mxu2 %v7035_v38  ;;  %v7001_v42 = vpack.c.bf16 %v5413_v44, %v5411_v32  ;;  %v5475_v26 = vcvt.s32.f32 %v3427_v52  ;;  %v3459_v0 = vunpack.c.2.s8 %v2187_v6  ;;  %v3461_v51 = vunpack.c.3.s8 %v2187_v6 }
 0x4f8   : > { %8954 = vmatpush.bf16.msrb.mxu3 %v7051_v53  ;;  %v7017_v21 = vpack.c.bf16 %v5445_v1, %v5443_v61  ;;  %v5477_v54 = vcvt.s32.f32 %v3429_v59  ;;  %v8664_v34 = vadd.f32 %v11566_v37, %v11572_v47  ;;  %v3359_v46 = vunpack.c.0.s8 %v2163_v15 }
 0x4f9   : > { %8916 = vmatpush.bf16.msrb.mxu0 %v7001_v42  ;;  %v5507_v49 = vcvt.s32.f32 %v3459_v0  ;;  %v5509_v4 = vcvt.s32.f32 %v3461_v51  ;;  %v3361_v3 = vunpack.c.1.s8 %v2163_v15  ;;  %v3391_v17 = vunpack.c.0.s8 %v2171_v29  ;;  %v2177_v15 = vld [vmem:[%s10573_s20 + $0x798] sm:$0xff] }
 0x4fa   : > { %8929 = vmatpush.bf16.msrb.mxu1 %v7017_v21  ;;  %v7033_v40 = vpack.c.bf16 %v5477_v54, %v5475_v26  ;;  %v5407_v19 = vcvt.s32.f32 %v3359_v46  ;;  %v3393_v50 = vunpack.c.1.s8 %v2171_v29  ;;  %v3423_v13 = vunpack.c.0.s8 %v2179_v63  ;;  %v2185_v29 = vld [vmem:[%s10573_s20 + $0x7d8] sm:$0xff]  ;;  %v2159_v26 = vld [vmem:[%s10573_s20 + $0x708] sm:$0xff] }
 0x4fb   : > { %v7049_v18 = vpack.c.bf16 %v5509_v4, %v5507_v49  ;;  %v5409_v14 = vcvt.s32.f32 %v3361_v3  ;;  %v5439_v12 = vcvt.s32.f32 %v3391_v17  ;;  %v3425_v31 = vunpack.c.1.s8 %v2179_v63  ;;  %v2167_v4 = vld [vmem:[%s10573_s20 + $0x748] sm:$0xff]  ;;  %v11605_v3 = vpop.f32.mrf.mxu0 }
 0x4fc   : > { %8942 = vmatpush.bf16.msrb.mxu2 %v7033_v40  ;;  %v5441_v37 = vcvt.s32.f32 %v3393_v50  ;;  %v5471_v47 = vcvt.s32.f32 %v3423_v13  ;;  %v3455_v55 = vunpack.c.0.s8 %v2187_v6  ;;  %v3457_v25 = vunpack.c.1.s8 %v2187_v6  ;;  %v2175_v50 = vld [vmem:[%s10573_s20 + $0x788] sm:$0xff] }
 0x4fd   : > { %8955 = vmatpush.bf16.msrb.mxu3 %v7049_v18  ;;  %v6999_v10 = vpack.c.bf16 %v5409_v14, %v5407_v19  ;;  %v5473_v28 = vcvt.s32.f32 %v3425_v31  ;;  %v8677_v24 = vadd.f32 %v11574_v16, %v8664_v34  ;;  %v3355_v56 = vunpack.c.2.s8 %v2161_v62 }
 0x4fe   : > { %v7015_v43 = vpack.c.bf16 %v5441_v37, %v5439_v12  ;;  %v5503_v35 = vcvt.s32.f32 %v3455_v55  ;;  %v5505_v48 = vcvt.s32.f32 %v3457_v25  ;;  %v3357_v30 = vunpack.c.3.s8 %v2161_v62  ;;  %v2183_v12 = vld [vmem:[%s10573_s20 + $0x7c8] sm:$0xff] }
 0x4ff   : > { %8917 = vmatpush.bf16.msrb.mxu0 %v6999_v10  ;;  %v7031_v60 = vpack.c.bf16 %v5473_v28, %v5471_v47  ;;  %v5403_v2 = vcvt.s32.f32 %v3355_v56  ;;  %v3387_v36 = vunpack.c.2.s8 %v2169_v58  ;;  %v3389_v57 = vunpack.c.3.s8 %v2169_v58 }
 0x500   : > { %8930 = vmatpush.bf16.msrb.mxu1 %v7015_v43  ;;  %v7047_v63 = vpack.c.bf16 %v5505_v48, %v5503_v35  ;;  %v5405_v45 = vcvt.s32.f32 %v3357_v30  ;;  %v3419_v41 = vunpack.c.2.s8 %v2177_v15  ;;  %v3421_v33 = vunpack.c.3.s8 %v2177_v15  ;;  %v11609_v35 = vpop.f32.mrf.mxu1 }
 0x501   : > { %8943 = vmatpush.bf16.msrb.mxu2 %v7031_v60  ;;  %v5435_v7 = vcvt.s32.f32 %v3387_v36  ;;  %v5437_v16 = vcvt.s32.f32 %v3389_v57  ;;  %v3451_v20 = vunpack.c.2.s8 %v2185_v29  ;;  %v3453_v39 = vunpack.c.3.s8 %v2185_v29 }
 0x502   : > { %8956 = vmatpush.bf16.msrb.mxu3 %v7047_v63  ;;  %v6997_v9 = vpack.c.bf16 %v5405_v45, %v5403_v2  ;;  %v5467_v11 = vcvt.s32.f32 %v3419_v41  ;;  %v5469_v6 = vcvt.s32.f32 %v3421_v33  ;;  %v8690_v38 = vadd.f32 %v11578_v23, %v8677_v24 }
 0x503   : > { %v7013_v32 = vpack.c.bf16 %v5437_v16, %v5435_v7  ;;  %v5499_v44 = vcvt.s32.f32 %v3451_v20  ;;  %v5501_v52 = vcvt.s32.f32 %v3453_v39  ;;  %v3351_v53 = vunpack.c.0.s8 %v2161_v62  ;;  %v8717_v16 = vpop.f32.mrf.mxu0 }
 0x504   : > { %8918 = vmatpush.bf16.msrb.mxu0 %v6997_v9  ;;  %v7029_v61 = vpack.c.bf16 %v5469_v6, %v5467_v11  ;;  %v11601_v1 = vadd.f32 %v11580_v8, %v8690_v38  ;;  %v3353_v59 = vunpack.c.1.s8 %v2161_v62  ;;  %v3383_v42 = vunpack.c.0.s8 %v2169_v58  ;;  %v2197_v6 = vld [vmem:[%s10573_s20 + $0x838] sm:$0xff] }
 0x505   : > { %8931 = vmatpush.bf16.msrb.mxu1 %v7013_v32  ;;  %v7045_v0 = vpack.c.bf16 %v5501_v52, %v5499_v44  ;;  %v5399_v51 = vcvt.s32.f32 %v3351_v53  ;;  %v3385_v21 = vunpack.c.1.s8 %v2169_v58  ;;  %v3415_v54 = vunpack.c.0.s8 %v2177_v15  ;;  %v2205_v53 = vld [vmem:[%s10573_s20 + $0x878] sm:$0xff] }
 0x506   : > { %8944 = vmatpush.bf16.msrb.mxu2 %v7029_v61  ;;  %v5401_v23 = vcvt.s32.f32 %v3353_v59  ;;  %v5431_v34 = vcvt.s32.f32 %v3383_v42  ;;  %v3417_v46 = vunpack.c.1.s8 %v2177_v15  ;;  %v3447_v49 = vunpack.c.0.s8 %v2185_v29  ;;  %v11613_v61 = vpop.f32.mrf.mxu2  ;;  %v11615_v59 = vpop.f32.mrf.mxu3 }
 0x507   : > { %8957 = vmatpush.bf16.msrb.mxu3 %v7045_v0  ;;  %v5433_v8 = vcvt.s32.f32 %v3385_v21  ;;  %v5463_v17 = vcvt.s32.f32 %v3415_v54  ;;  %v3449_v40 = vunpack.c.1.s8 %v2185_v29  ;;  %v3347_v19 = vunpack.c.2.s8 %v2159_v26  ;;  %v2213_v21 = vld [vmem:[%s10573_s20 + $0x8b8] sm:$0xff] }
 0x508   : > { %v6995_v13 = vpack.c.bf16 %v5401_v23, %v5399_v51  ;;  %v5465_v62 = vcvt.s32.f32 %v3417_v46  ;;  %v5495_v18 = vcvt.s32.f32 %v3447_v49  ;;  %v3349_v14 = vunpack.c.3.s8 %v2159_v26 }
 0x509   : > { %v7011_v31 = vpack.c.bf16 %v5433_v8, %v5431_v34  ;;  %v5497_v37 = vcvt.s32.f32 %v3449_v40  ;;  %v5395_v47 = vcvt.s32.f32 %v3347_v19  ;;  %v3379_v55 = vunpack.c.2.s8 %v2167_v4  ;;  %v2221_v40 = vld [vmem:[%s10573_s20 + $0x8f8] sm:$0xff]  ;;  %v8730_v19 = vpop.f32.mrf.mxu1 }
 0x50a   : > { %8919 = vmatpush.bf16.msrb.mxu0 %v6995_v13  ;;  %v7027_v25 = vpack.c.bf16 %v5465_v62, %v5463_v17  ;;  %v5397_v58 = vcvt.s32.f32 %v3349_v14  ;;  %v3381_v10 = vunpack.c.3.s8 %v2167_v4  ;;  %v3411_v28 = vunpack.c.2.s8 %v2175_v50 }
 0x50b   : > { %8932 = vmatpush.bf16.msrb.mxu1 %v7011_v31  ;;  %v7043_v24 = vpack.c.bf16 %v5497_v37, %v5495_v18  ;;  %v5427_v56 = vcvt.s32.f32 %v3379_v55  ;;  %v3413_v15 = vunpack.c.3.s8 %v2175_v50  ;;  %v3443_v43 = vunpack.c.2.s8 %v2183_v12 }
 0x50c   : > { %8945 = vmatpush.bf16.msrb.mxu2 %v7027_v25  ;;  %v6993_v48 = vpack.c.bf16 %v5397_v58, %v5395_v47  ;;  %v5429_v30 = vcvt.s32.f32 %v3381_v10  ;;  %v5459_v29 = vcvt.s32.f32 %v3411_v28  ;;  %v3445_v60 = vunpack.c.3.s8 %v2183_v12 }
 0x50d   : > { %8958 = vmatpush.bf16.msrb.mxu3 %v7043_v24  ;;  %v5461_v2 = vcvt.s32.f32 %v3413_v15  ;;  %v5491_v36 = vcvt.s32.f32 %v3443_v43  ;;  %v3343_v57 = vunpack.c.0.s8 %v2159_v26  ;;  %v3345_v63 = vunpack.c.1.s8 %v2159_v26 }
 0x50e   : > { %8920 = vmatpush.bf16.msrb.mxu0 %v6993_v48  ;;  %v7009_v45 = vpack.c.bf16 %v5429_v30, %v5427_v56  ;;  %v5493_v41 = vcvt.s32.f32 %v3445_v60  ;;  %v3375_v33 = vunpack.c.0.s8 %v2167_v4  ;;  %v3377_v7 = vunpack.c.1.s8 %v2167_v4  ;;  %v8756_v60 = vpop.f32.mrf.mxu3 }
 0x50f   : > { %v7025_v20 = vpack.c.bf16 %v5461_v2, %v5459_v29  ;;  %v5391_v39 = vcvt.s32.f32 %v3343_v57  ;;  %v5393_v9 = vcvt.s32.f32 %v3345_v63  ;;  %v3407_v11 = vunpack.c.0.s8 %v2175_v50  ;;  %v8743_v29 = vpop.f32.mrf.mxu2  ;;  %v2201_v60 = vld [vmem:[%s10573_s20 + $0x858] sm:$0xff] }
 0x510   : > { %8933 = vmatpush.bf16.msrb.mxu1 %v7009_v45  ;;  %v7041_v38 = vpack.c.bf16 %v5493_v41, %v5491_v36  ;;  %v5423_v32 = vcvt.s32.f32 %v3375_v33  ;;  %v5425_v44 = vcvt.s32.f32 %v3377_v7  ;;  %v3409_v52 = vunpack.c.1.s8 %v2175_v50  ;;  %v12094_v36 = vld [vmem:[#allocation13_spill] sm:$0xff]  ;;  %v12095_v41 = vld [vmem:[#allocation14_spill] sm:$0xff] }
 0x511   : > { %8946 = vmatpush.bf16.msrb.mxu2 %v7025_v20  ;;  %v6991_v42 = vpack.c.bf16 %v5393_v9, %v5391_v39  ;;  %v5455_v26 = vcvt.s32.f32 %v3407_v11  ;;  %v3439_v0 = vunpack.c.0.s8 %v2183_v12  ;;  %v3441_v51 = vunpack.c.1.s8 %v2183_v12  ;;  %v2203_v20 = vld [vmem:[%s10573_s20 + $0x868] sm:$0xff] }
 0x512   : > { %8959 = vmatpush.bf16.msrb.mxu3 %v7041_v38  ;;  %v7007_v54 = vpack.c.bf16 %v5425_v44, %v5423_v32  ;;  %v5457_v23 = vcvt.s32.f32 %v3409_v52  ;;  %v3499_v34 = vunpack.c.2.s8 %v2197_v6  ;;  %v3501_v46 = vunpack.c.3.s8 %v2197_v6  ;;  %v2211_v38 = vld [vmem:[%s10573_s20 + $0x8a8] sm:$0xff] }
 0x513   : > { %8921 = vmatpush.bf16.msrb.mxu0 %v6991_v42  ;;  %v5487_v49 = vcvt.s32.f32 %v3439_v0  ;;  %v5489_v4 = vcvt.s32.f32 %v3441_v51  ;;  %v3531_v8 = vunpack.c.2.s8 %v2205_v53  ;;  %v3533_v17 = vunpack.c.3.s8 %v2205_v53 }
 0x514   : > { %8934 = vmatpush.bf16.msrb.mxu1 %v7007_v54  ;;  %v7023_v50 = vpack.c.bf16 %v5457_v23, %v5455_v26  ;;  %v5547_v13 = vcvt.s32.f32 %v3499_v34  ;;  %v5549_v62 = vcvt.s32.f32 %v3501_v46  ;;  %v3563_v18 = vunpack.c.2.s8 %v2213_v21  ;;  %v2219_v54 = vld [vmem:[%s10573_s20 + $0x8e8] sm:$0xff] }
 0x515   : > { %v7039_v14 = vpack.c.bf16 %v5489_v4, %v5487_v49  ;;  %v5579_v12 = vcvt.s32.f32 %v3531_v8  ;;  %v5581_v31 = vcvt.s32.f32 %v3533_v17  ;;  %v3565_v37 = vunpack.c.3.s8 %v2213_v21 }
 0x516   : > { %8947 = vmatpush.bf16.msrb.mxu2 %v7023_v50  ;;  %v7069_v47 = vpack.c.bf16 %v5549_v62, %v5547_v13  ;;  %v5611_v55 = vcvt.s32.f32 %v3563_v18  ;;  %v3595_v25 = vunpack.c.2.s8 %v2221_v40  ;;  %v3597_v58 = vunpack.c.3.s8 %v2221_v40  ;;  %8922 = vmatmul.bf16.vlgmr.msrb.gmra.mxu0 %v10913_v22 }
 0x517   : > { %8960 = vmatpush.bf16.msrb.mxu3 %v7039_v14  ;;  %v7085_v10 = vpack.c.bf16 %v5581_v31, %v5579_v12  ;;  %v5613_v28 = vcvt.s32.f32 %v3565_v37  ;;  %8935 = vmatmul.bf16.vlgmr.msrb.gmra.mxu1 %v10916_v5  ;;  %v3495_v24 = vunpack.c.0.s8 %v2197_v6  ;;  %v3497_v56 = vunpack.c.1.s8 %v2197_v6  ;;  %v2195_v5 = vld [vmem:[%s10573_s20 + $0x828] sm:$0xff] }
 0x518   : > { %8966 = vmatpush.bf16.msra.mxu0 %v7069_v47  ;;  %v5643_v15 = vcvt.s32.f32 %v3595_v25  ;;  %v5645_v43 = vcvt.s32.f32 %v3597_v58  ;;  %v3527_v48 = vunpack.c.0.s8 %v2205_v53  ;;  %v3529_v30 = vunpack.c.1.s8 %v2205_v53 }
 0x519   : > { %8979 = vmatpush.bf16.msra.mxu1 %v7085_v10  ;;  %v7101_v2 = vpack.c.bf16 %v5613_v28, %v5611_v55  ;;  %8948 = vmatmul.bf16.vlgmr.msrb.gmra.mxu2 %v12094_v36  ;;  %v5543_v22 = vcvt.s32.f32 %v3495_v24  ;;  %v5545_v57 = vcvt.s32.f32 %v3497_v56  ;;  %v3559_v63 = vunpack.c.0.s8 %v2213_v21  ;;  %v2193_v24 = vld [vmem:[%s10573_s20 + $0x818] sm:$0xff] }
 0x51a   : > { %v7117_v45 = vpack.c.bf16 %v5645_v43, %v5643_v15  ;;  %8961 = vmatmul.bf16.vlgmr.msrb.gmra.mxu3 %v12095_v41  ;;  %v5575_v33 = vcvt.s32.f32 %v3527_v48  ;;  %v5577_v7 = vcvt.s32.f32 %v3529_v30  ;;  %v3561_v16 = vunpack.c.1.s8 %v2213_v21 }
 0x51b   : > { %8992 = vmatpush.bf16.msra.mxu2 %v7101_v2  ;;  %v7067_v39 = vpack.c.bf16 %v5545_v57, %v5543_v22  ;;  %v5607_v9 = vcvt.s32.f32 %v3559_v63  ;;  %v3591_v11 = vunpack.c.0.s8 %v2221_v40  ;;  %v3593_v6 = vunpack.c.1.s8 %v2221_v40  ;;  %v2209_v63 = vld [vmem:[%s10573_s20 + $0x898] sm:$0xff] }
 0x51c   : > { %9005 = vmatpush.bf16.msra.mxu3 %v7117_v45  ;;  %v7083_v32 = vpack.c.bf16 %v5577_v7, %v5575_v33  ;;  %v5609_v44 = vcvt.s32.f32 %v3561_v16  ;;  %v3491_v52 = vunpack.c.2.s8 %v2195_v5  ;;  %v3493_v53 = vunpack.c.3.s8 %v2195_v5  ;;  %v2217_v7 = vld [vmem:[%s10573_s20 + $0x8d8] sm:$0xff] }
 0x51d   : > { %8967 = vmatpush.bf16.msra.mxu0 %v7067_v39  ;;  %v5639_v42 = vcvt.s32.f32 %v3591_v11  ;;  %v5641_v26 = vcvt.s32.f32 %v3593_v6  ;;  %v3523_v0 = vunpack.c.2.s8 %v2203_v20  ;;  %v3525_v51 = vunpack.c.3.s8 %v2203_v20 }
 0x51e   : > { %8980 = vmatpush.bf16.msra.mxu1 %v7083_v32  ;;  %v7099_v21 = vpack.c.bf16 %v5609_v44, %v5607_v9  ;;  %v5539_v23 = vcvt.s32.f32 %v3491_v52  ;;  %v5541_v34 = vcvt.s32.f32 %v3493_v53  ;;  %v3555_v46 = vunpack.c.2.s8 %v2211_v38 }
 0x51f   : > { %v7115_v49 = vpack.c.bf16 %v5641_v26, %v5639_v42  ;;  %v5571_v4 = vcvt.s32.f32 %v3523_v0  ;;  %v5573_v8 = vcvt.s32.f32 %v3525_v51  ;;  %v3557_v17 = vunpack.c.3.s8 %v2211_v38 }
 0x520   : > { %8993 = vmatpush.bf16.msra.mxu2 %v7099_v21  ;;  %v7065_v40 = vpack.c.bf16 %v5541_v34, %v5539_v23  ;;  %v5603_v19 = vcvt.s32.f32 %v3555_v46  ;;  %v3587_v50 = vunpack.c.2.s8 %v2219_v54  ;;  %v3589_v13 = vunpack.c.3.s8 %v2219_v54 }
 0x521   : > { %9006 = vmatpush.bf16.msra.mxu3 %v7115_v49  ;;  %v7081_v62 = vpack.c.bf16 %v5573_v8, %v5571_v4  ;;  %v5605_v18 = vcvt.s32.f32 %v3557_v17  ;;  %v8716_v14 = vadd.f32 %v11605_v3, %v11601_v1  ;;  %v3487_v12 = vunpack.c.0.s8 %v2195_v5  ;;  %v2191_v17 = vld [vmem:[%s10573_s20 + $0x808] sm:$0xff] }
 0x522   : > { %8968 = vmatpush.bf16.msra.mxu0 %v7065_v40  ;;  %v5635_v31 = vcvt.s32.f32 %v3587_v50  ;;  %v5637_v37 = vcvt.s32.f32 %v3589_v13  ;;  %v3489_v47 = vunpack.c.1.s8 %v2195_v5  ;;  %v3519_v55 = vunpack.c.0.s8 %v2203_v20 }
 0x523   : > { %8981 = vmatpush.bf16.msra.mxu1 %v7081_v62  ;;  %v7097_v25 = vpack.c.bf16 %v5605_v18, %v5603_v19  ;;  %v5535_v58 = vcvt.s32.f32 %v3487_v12  ;;  %v3521_v10 = vunpack.c.1.s8 %v2203_v20  ;;  %v3551_v28 = vunpack.c.0.s8 %v2211_v38  ;;  %v2199_v12 = vld [vmem:[%s10573_s20 + $0x848] sm:$0xff] }
 0x524   : > { %v7113_v56 = vpack.c.bf16 %v5637_v37, %v5635_v31  ;;  %v5537_v15 = vcvt.s32.f32 %v3489_v47  ;;  %v5567_v43 = vcvt.s32.f32 %v3519_v55  ;;  %v3553_v48 = vunpack.c.1.s8 %v2211_v38  ;;  %v11640_v31 = vpop.f32.mrf.mxu0 }
 0x525   : > { %8994 = vmatpush.bf16.msra.mxu2 %v7097_v25  ;;  %v5569_v1 = vcvt.s32.f32 %v3521_v10  ;;  %v5599_v3 = vcvt.s32.f32 %v3551_v28  ;;  %v3583_v30 = vunpack.c.0.s8 %v2219_v54  ;;  %v3585_v29 = vunpack.c.1.s8 %v2219_v54  ;;  %v2207_v25 = vld [vmem:[%s10573_s20 + $0x888] sm:$0xff] }
 0x526   : > { %9007 = vmatpush.bf16.msra.mxu3 %v7113_v56  ;;  %v7063_v2 = vpack.c.bf16 %v5537_v15, %v5535_v58  ;;  %v5601_v36 = vcvt.s32.f32 %v3553_v48  ;;  %v8729_v22 = vadd.f32 %v11609_v35, %v8716_v14  ;;  %v3483_v57 = vunpack.c.2.s8 %v2193_v24  ;;  %v2215_v56 = vld [vmem:[%s10573_s20 + $0x8c8] sm:$0xff] }
 0x527   : > { %v7079_v5 = vpack.c.bf16 %v5569_v1, %v5567_v43  ;;  %v5631_v45 = vcvt.s32.f32 %v3583_v30  ;;  %v5633_v41 = vcvt.s32.f32 %v3585_v29  ;;  %v3485_v33 = vunpack.c.3.s8 %v2193_v24 }
 0x528   : > { %8969 = vmatpush.bf16.msra.mxu0 %v7063_v2  ;;  %v7095_v16 = vpack.c.bf16 %v5601_v36, %v5599_v3  ;;  %v5531_v20 = vcvt.s32.f32 %v3483_v57  ;;  %v3515_v39 = vunpack.c.2.s8 %v2201_v60  ;;  %v3517_v9 = vunpack.c.3.s8 %v2201_v60 }
 0x529   : > { %8982 = vmatpush.bf16.msra.mxu1 %v7079_v5  ;;  %v7111_v11 = vpack.c.bf16 %v5633_v41, %v5631_v45  ;;  %v5533_v6 = vcvt.s32.f32 %v3485_v33  ;;  %v3547_v38 = vunpack.c.2.s8 %v2209_v63  ;;  %v3549_v32 = vunpack.c.3.s8 %v2209_v63 }
 0x52a   : > { %8995 = vmatpush.bf16.msra.mxu2 %v7095_v16  ;;  %v5563_v44 = vcvt.s32.f32 %v3515_v39  ;;  %v5565_v35 = vcvt.s32.f32 %v3517_v9  ;;  %v3579_v52 = vunpack.c.2.s8 %v2217_v7  ;;  %v3581_v53 = vunpack.c.3.s8 %v2217_v7 }
 0x52b   : > { %9008 = vmatpush.bf16.msra.mxu3 %v7111_v11  ;;  %v7061_v42 = vpack.c.bf16 %v5533_v6, %v5531_v20  ;;  %v5595_v26 = vcvt.s32.f32 %v3547_v38  ;;  %v5597_v0 = vcvt.s32.f32 %v3549_v32  ;;  %v8742_v51 = vadd.f32 %v11613_v61, %v8729_v22 }
 0x52c   : > { %v7077_v54 = vpack.c.bf16 %v5565_v35, %v5563_v44  ;;  %v5627_v21 = vcvt.s32.f32 %v3579_v52  ;;  %v5629_v23 = vcvt.s32.f32 %v3581_v53  ;;  %v3479_v34 = vunpack.c.0.s8 %v2193_v24  ;;  %v8769_v32 = vpop.f32.mrf.mxu0 }
 0x52d   : > { %8970 = vmatpush.bf16.msra.mxu0 %v7061_v42  ;;  %v7093_v46 = vpack.c.bf16 %v5597_v0, %v5595_v26  ;;  %v11636_v49 = vadd.f32 %v11615_v59, %v8742_v51  ;;  %v3481_v4 = vunpack.c.1.s8 %v2193_v24  ;;  %v3511_v8 = vunpack.c.0.s8 %v2201_v60  ;;  %v2229_v42 = vld [vmem:[%s10573_s20 + $0x938] sm:$0xff] }
 0x52e   : > { %8983 = vmatpush.bf16.msra.mxu1 %v7077_v54  ;;  %v7109_v40 = vpack.c.bf16 %v5629_v23, %v5627_v21  ;;  %v5527_v19 = vcvt.s32.f32 %v3479_v34  ;;  %v3513_v50 = vunpack.c.1.s8 %v2201_v60  ;;  %v3543_v13 = vunpack.c.0.s8 %v2209_v63  ;;  %v2237_v21 = vld [vmem:[%s10573_s20 + $0x978] sm:$0xff]  ;;  %v11648_v23 = vpop.f32.mrf.mxu2  ;;  %v11650_v34 = vpop.f32.mrf.mxu3 }
 0x52f   : > { %8996 = vmatpush.bf16.msra.mxu2 %v7093_v46  ;;  %v5529_v61 = vcvt.s32.f32 %v3481_v4  ;;  %v5559_v62 = vcvt.s32.f32 %v3511_v8  ;;  %v3545_v18 = vunpack.c.1.s8 %v2209_v63  ;;  %v3575_v14 = vunpack.c.0.s8 %v2217_v7  ;;  %v11644_v63 = vpop.f32.mrf.mxu1 }
 0x530   : > { %9009 = vmatpush.bf16.msra.mxu3 %v7109_v40  ;;  %v5561_v59 = vcvt.s32.f32 %v3513_v50  ;;  %v5591_v37 = vcvt.s32.f32 %v3543_v13  ;;  %v3577_v47 = vunpack.c.1.s8 %v2217_v7  ;;  %v3475_v55 = vunpack.c.2.s8 %v2191_v17  ;;  %v2245_v40 = vld [vmem:[%s10573_s20 + $0x9b8] sm:$0xff] }
 0x531   : > { %v7059_v58 = vpack.c.bf16 %v5529_v61, %v5527_v19  ;;  %v5593_v10 = vcvt.s32.f32 %v3545_v18  ;;  %v5623_v28 = vcvt.s32.f32 %v3575_v14  ;;  %v3477_v24 = vunpack.c.3.s8 %v2191_v17 }
 0x532   : > { %v7075_v15 = vpack.c.bf16 %v5561_v59, %v5559_v62  ;;  %v5625_v43 = vcvt.s32.f32 %v3577_v47  ;;  %v5523_v48 = vcvt.s32.f32 %v3475_v55  ;;  %v3507_v1 = vunpack.c.2.s8 %v2199_v12  ;;  %v2253_v59 = vld [vmem:[%s10573_s20 + $0x9f8] sm:$0xff] }
 0x533   : > { %8971 = vmatpush.bf16.msra.mxu0 %v7059_v58  ;;  %v7091_v3 = vpack.c.bf16 %v5593_v10, %v5591_v37  ;;  %v5525_v30 = vcvt.s32.f32 %v3477_v24  ;;  %v3509_v29 = vunpack.c.3.s8 %v2199_v12  ;;  %v3539_v60 = vunpack.c.2.s8 %v2207_v25 }
 0x534   : > { %8984 = vmatpush.bf16.msra.mxu1 %v7075_v15  ;;  %v7107_v2 = vpack.c.bf16 %v5625_v43, %v5623_v28  ;;  %v5555_v36 = vcvt.s32.f32 %v3507_v1  ;;  %v3541_v22 = vunpack.c.3.s8 %v2207_v25  ;;  %v3571_v57 = vunpack.c.2.s8 %v2215_v56 }
 0x535   : > { %8997 = vmatpush.bf16.msra.mxu2 %v7091_v3  ;;  %v7057_v5 = vpack.c.bf16 %v5525_v30, %v5523_v48  ;;  %v5557_v45 = vcvt.s32.f32 %v3509_v29  ;;  %v5587_v41 = vcvt.s32.f32 %v3539_v60  ;;  %v3573_v33 = vunpack.c.3.s8 %v2215_v56  ;;  %v12096_v3 = vld [vmem:[#allocation15_spill] sm:$0xff]  ;;  %v12097_v60 = vld [vmem:[#allocation16_spill] sm:$0xff] }
 0x536   : > { %9010 = vmatpush.bf16.msra.mxu3 %v7107_v2  ;;  %v5589_v7 = vcvt.s32.f32 %v3541_v22  ;;  %v5619_v16 = vcvt.s32.f32 %v3571_v57  ;;  %v3471_v20 = vunpack.c.0.s8 %v2191_v17  ;;  %v3473_v39 = vunpack.c.1.s8 %v2191_v17 }
 0x537   : > { %8972 = vmatpush.bf16.msra.mxu0 %v7057_v5  ;;  %v7073_v9 = vpack.c.bf16 %v5557_v45, %v5555_v36  ;;  %v5621_v11 = vcvt.s32.f32 %v3573_v33  ;;  %v3503_v6 = vunpack.c.0.s8 %v2199_v12  ;;  %v3505_v38 = vunpack.c.1.s8 %v2199_v12  ;;  %v8782_v37 = vpop.f32.mrf.mxu1  ;;  %v8808_v33 = vpop.f32.mrf.mxu3 }
 0x538   : > { %v7089_v44 = vpack.c.bf16 %v5589_v7, %v5587_v41  ;;  %v5519_v35 = vcvt.s32.f32 %v3471_v20  ;;  %v5521_v52 = vcvt.s32.f32 %v3473_v39  ;;  %v3535_v53 = vunpack.c.0.s8 %v2207_v25  ;;  %v8795_v41 = vpop.f32.mrf.mxu2  ;;  %v2233_v33 = vld [vmem:[%s10573_s20 + $0x958] sm:$0xff] }
 0x539   : > { %8985 = vmatpush.bf16.msra.mxu1 %v7073_v9  ;;  %v7105_v26 = vpack.c.bf16 %v5621_v11, %v5619_v16  ;;  %v5551_v0 = vcvt.s32.f32 %v3503_v6  ;;  %v5553_v51 = vcvt.s32.f32 %v3505_v38  ;;  %v3537_v54 = vunpack.c.1.s8 %v2207_v25  ;;  %v12098_v16 = vld [vmem:[#allocation17_spill] sm:$0xff]  ;;  %v12099_v38 = vld [vmem:[#allocation18_spill] sm:$0xff] }
 0x53a   : > { %8998 = vmatpush.bf16.msra.mxu2 %v7089_v44  ;;  %v7055_v46 = vpack.c.bf16 %v5521_v52, %v5519_v35  ;;  %v5583_v4 = vcvt.s32.f32 %v3535_v53  ;;  %v3567_v8 = vunpack.c.0.s8 %v2215_v56  ;;  %v3569_v17 = vunpack.c.1.s8 %v2215_v56  ;;  %v2227_v11 = vld [vmem:[%s10573_s20 + $0x928] sm:$0xff] }
 0x53b   : > { %9011 = vmatpush.bf16.msra.mxu3 %v7105_v26  ;;  %v7071_v19 = vpack.c.bf16 %v5553_v51, %v5551_v0  ;;  %v5585_v50 = vcvt.s32.f32 %v3537_v54  ;;  %v3627_v13 = vunpack.c.2.s8 %v2229_v42  ;;  %v3629_v61 = vunpack.c.3.s8 %v2229_v42  ;;  %v2235_v52 = vld [vmem:[%s10573_s20 + $0x968] sm:$0xff] }
 0x53c   : > { %8973 = vmatpush.bf16.msra.mxu0 %v7055_v46  ;;  %v5615_v62 = vcvt.s32.f32 %v3567_v8  ;;  %v5617_v18 = vcvt.s32.f32 %v3569_v17  ;;  %v3659_v14 = vunpack.c.2.s8 %v2237_v21  ;;  %v3661_v12 = vunpack.c.3.s8 %v2237_v21  ;;  %v2243_v51 = vld [vmem:[%s10573_s20 + $0x9a8] sm:$0xff] }
 0x53d   : > { %8986 = vmatpush.bf16.msra.mxu1 %v7071_v19  ;;  %v7087_v47 = vpack.c.bf16 %v5585_v50, %v5583_v4  ;;  %v5675_v55 = vcvt.s32.f32 %v3627_v13  ;;  %v5677_v25 = vcvt.s32.f32 %v3629_v61  ;;  %v3691_v58 = vunpack.c.2.s8 %v2245_v40  ;;  %v2251_v13 = vld [vmem:[%s10573_s20 + $0x9e8] sm:$0xff] }
 0x53e   : > { %v7103_v10 = vpack.c.bf16 %v5617_v18, %v5615_v62  ;;  %v5707_v28 = vcvt.s32.f32 %v3659_v14  ;;  %v5709_v24 = vcvt.s32.f32 %v3661_v12  ;;  %v3693_v56 = vunpack.c.3.s8 %v2245_v40 }
 0x53f   : > { %8999 = vmatpush.bf16.msra.mxu2 %v7087_v47  ;;  %v7133_v15 = vpack.c.bf16 %v5677_v25, %v5675_v55  ;;  %v5739_v43 = vcvt.s32.f32 %v3691_v58  ;;  %v3723_v48 = vunpack.c.2.s8 %v2253_v59  ;;  %v3725_v1 = vunpack.c.3.s8 %v2253_v59  ;;  %8974 = vmatmul.bf16.vlgmr.msra.gmra.mxu0 %v12096_v3 }
 0x540   : > { %9012 = vmatpush.bf16.msra.mxu3 %v7103_v10  ;;  %v7149_v30 = vpack.c.bf16 %v5709_v24, %v5707_v28  ;;  %v5741_v29 = vcvt.s32.f32 %v3693_v56  ;;  %8987 = vmatmul.bf16.vlgmr.msra.gmra.mxu1 %v12097_v60  ;;  %v3623_v2 = vunpack.c.0.s8 %v2229_v42  ;;  %v3625_v36 = vunpack.c.1.s8 %v2229_v42 }
 0x541   : > { %9018 = vmatpush.bf16.msrb.mxu0 %v7133_v15  ;;  %v5771_v22 = vcvt.s32.f32 %v3723_v48  ;;  %v5773_v57 = vcvt.s32.f32 %v3725_v1  ;;  %v3655_v5 = vunpack.c.0.s8 %v2237_v21  ;;  %v3657_v45 = vunpack.c.1.s8 %v2237_v21 }
 0x542   : > { %9031 = vmatpush.bf16.msrb.mxu1 %v7149_v30  ;;  %v7165_v7 = vpack.c.bf16 %v5741_v29, %v5739_v43  ;;  %9000 = vmatmul.bf16.vlgmr.msra.gmra.mxu2 %v12098_v16  ;;  %v5671_v20 = vcvt.s32.f32 %v3623_v2  ;;  %v5673_v39 = vcvt.s32.f32 %v3625_v36  ;;  %v3687_v9 = vunpack.c.0.s8 %v2245_v40  ;;  %v2225_v2 = vld [vmem:[%s10573_s20 + $0x918] sm:$0xff] }
 0x543   : > { %v7181_v6 = vpack.c.bf16 %v5773_v57, %v5771_v22  ;;  %9013 = vmatmul.bf16.vlgmr.msra.gmra.mxu3 %v12099_v38  ;;  %v5703_v32 = vcvt.s32.f32 %v3655_v5  ;;  %v5705_v44 = vcvt.s32.f32 %v3657_v45  ;;  %v3689_v35 = vunpack.c.1.s8 %v2245_v40 }
 0x544   : > { %9044 = vmatpush.bf16.msrb.mxu2 %v7165_v7  ;;  %v7131_v53 = vpack.c.bf16 %v5673_v39, %v5671_v20  ;;  %v5735_v42 = vcvt.s32.f32 %v3687_v9  ;;  %v3719_v26 = vunpack.c.0.s8 %v2253_v59  ;;  %v3721_v0 = vunpack.c.1.s8 %v2253_v59  ;;  %v2241_v9 = vld [vmem:[%s10573_s20 + $0x998] sm:$0xff] }
 0x545   : > { %9057 = vmatpush.bf16.msrb.mxu3 %v7181_v6  ;;  %v7147_v54 = vpack.c.bf16 %v5705_v44, %v5703_v32  ;;  %v5737_v21 = vcvt.s32.f32 %v3689_v35  ;;  %v3619_v46 = vunpack.c.2.s8 %v2227_v11  ;;  %v3621_v4 = vunpack.c.3.s8 %v2227_v11  ;;  %v2249_v44 = vld [vmem:[%s10573_s20 + $0x9d8] sm:$0xff] }
 0x546   : > { %9019 = vmatpush.bf16.msrb.mxu0 %v7131_v53  ;;  %v5767_v8 = vcvt.s32.f32 %v3719_v26  ;;  %v5769_v17 = vcvt.s32.f32 %v3721_v0  ;;  %v3651_v19 = vunpack.c.2.s8 %v2235_v52  ;;  %v3653_v50 = vunpack.c.3.s8 %v2235_v52 }
 0x547   : > { %9032 = vmatpush.bf16.msrb.mxu1 %v7147_v54  ;;  %v7163_v40 = vpack.c.bf16 %v5737_v21, %v5735_v42  ;;  %v5667_v61 = vcvt.s32.f32 %v3619_v46  ;;  %v5669_v62 = vcvt.s32.f32 %v3621_v4  ;;  %v3683_v18 = vunpack.c.2.s8 %v2243_v51 }
 0x548   : > { %v7179_v14 = vpack.c.bf16 %v5769_v17, %v5767_v8  ;;  %v5699_v12 = vcvt.s32.f32 %v3651_v19  ;;  %v5701_v59 = vcvt.s32.f32 %v3653_v50  ;;  %v3685_v37 = vunpack.c.3.s8 %v2243_v51 }
 0x549   : > { %9045 = vmatpush.bf16.msrb.mxu2 %v7163_v40  ;;  %v7129_v47 = vpack.c.bf16 %v5669_v62, %v5667_v61  ;;  %v5731_v55 = vcvt.s32.f32 %v3683_v18  ;;  %v3715_v25 = vunpack.c.2.s8 %v2251_v13  ;;  %v3717_v58 = vunpack.c.3.s8 %v2251_v13 }
 0x54a   : > { %9058 = vmatpush.bf16.msrb.mxu3 %v7179_v14  ;;  %v7145_v10 = vpack.c.bf16 %v5701_v59, %v5699_v12  ;;  %v5733_v28 = vcvt.s32.f32 %v3685_v37  ;;  %v8768_v24 = vadd.f32 %v11640_v31, %v11636_v49  ;;  %v3615_v56 = vunpack.c.0.s8 %v2227_v11  ;;  %v2223_v37 = vld [vmem:[%s10573_s20 + $0x908] sm:$0xff] }
 0x54b   : > { %9020 = vmatpush.bf16.msrb.mxu0 %v7129_v47  ;;  %v5763_v15 = vcvt.s32.f32 %v3715_v25  ;;  %v5765_v43 = vcvt.s32.f32 %v3717_v58  ;;  %v3617_v48 = vunpack.c.1.s8 %v2227_v11  ;;  %v3647_v1 = vunpack.c.0.s8 %v2235_v52 }
 0x54c   : > { %9033 = vmatpush.bf16.msrb.mxu1 %v7145_v10  ;;  %v7161_v3 = vpack.c.bf16 %v5733_v28, %v5731_v55  ;;  %v5663_v30 = vcvt.s32.f32 %v3615_v56  ;;  %v3649_v29 = vunpack.c.1.s8 %v2235_v52  ;;  %v3679_v60 = vunpack.c.0.s8 %v2243_v51  ;;  %v2231_v56 = vld [vmem:[%s10573_s20 + $0x948] sm:$0xff] }
 0x54d   : > { %v7177_v36 = vpack.c.bf16 %v5765_v43, %v5763_v15  ;;  %v5665_v22 = vcvt.s32.f32 %v3617_v48  ;;  %v5695_v57 = vcvt.s32.f32 %v3647_v1  ;;  %v3681_v5 = vunpack.c.1.s8 %v2243_v51  ;;  %v11675_v15 = vpop.f32.mrf.mxu0 }
 0x54e   : > { %9046 = vmatpush.bf16.msrb.mxu2 %v7161_v3  ;;  %v5697_v49 = vcvt.s32.f32 %v3649_v29  ;;  %v5727_v31 = vcvt.s32.f32 %v3679_v60  ;;  %v3711_v45 = vunpack.c.0.s8 %v2251_v13  ;;  %v3713_v41 = vunpack.c.1.s8 %v2251_v13  ;;  %v2239_v3 = vld [vmem:[%s10573_s20 + $0x988] sm:$0xff] }
 0x54f   : > { %9059 = vmatpush.bf16.msrb.mxu3 %v7177_v36  ;;  %v7127_v7 = vpack.c.bf16 %v5665_v22, %v5663_v30  ;;  %v5729_v16 = vcvt.s32.f32 %v3681_v5  ;;  %v8781_v20 = vadd.f32 %v11644_v63, %v8768_v24  ;;  %v3611_v39 = vunpack.c.2.s8 %v2225_v2  ;;  %v2247_v36 = vld [vmem:[%s10573_s20 + $0x9c8] sm:$0xff] }
 0x550   : > { %v7143_v11 = vpack.c.bf16 %v5697_v49, %v5695_v57  ;;  %v5759_v6 = vcvt.s32.f32 %v3711_v45  ;;  %v5761_v38 = vcvt.s32.f32 %v3713_v41  ;;  %v3613_v32 = vunpack.c.3.s8 %v2225_v2 }
 0x551   : > { %9021 = vmatpush.bf16.msrb.mxu0 %v7127_v7  ;;  %v7159_v35 = vpack.c.bf16 %v5729_v16, %v5727_v31  ;;  %v5659_v52 = vcvt.s32.f32 %v3611_v39  ;;  %v3643_v53 = vunpack.c.2.s8 %v2233_v33  ;;  %v3645_v42 = vunpack.c.3.s8 %v2233_v33 }
 0x552   : > { %9034 = vmatpush.bf16.msrb.mxu1 %v7143_v11  ;;  %v7175_v26 = vpack.c.bf16 %v5761_v38, %v5759_v6  ;;  %v5661_v0 = vcvt.s32.f32 %v3613_v32  ;;  %v3675_v51 = vunpack.c.2.s8 %v2241_v9  ;;  %v3677_v54 = vunpack.c.3.s8 %v2241_v9 }
 0x553   : > { %9047 = vmatpush.bf16.msrb.mxu2 %v7159_v35  ;;  %v5691_v21 = vcvt.s32.f32 %v3643_v53  ;;  %v5693_v63 = vcvt.s32.f32 %v3645_v42  ;;  %v3707_v46 = vunpack.c.2.s8 %v2249_v44  ;;  %v3709_v4 = vunpack.c.3.s8 %v2249_v44 }
 0x554   : > { %9060 = vmatpush.bf16.msrb.mxu3 %v7175_v26  ;;  %v7125_v8 = vpack.c.bf16 %v5661_v0, %v5659_v52  ;;  %v5723_v17 = vcvt.s32.f32 %v3675_v51  ;;  %v5725_v19 = vcvt.s32.f32 %v3677_v54  ;;  %v8794_v50 = vadd.f32 %v11648_v23, %v8781_v20 }
 0x555   : > { %v7141_v13 = vpack.c.bf16 %v5693_v63, %v5691_v21  ;;  %v5755_v40 = vcvt.s32.f32 %v3707_v46  ;;  %v5757_v61 = vcvt.s32.f32 %v3709_v4  ;;  %v3607_v62 = vunpack.c.0.s8 %v2225_v2  ;;  %v8821_v54 = vpop.f32.mrf.mxu0 }
 0x556   : > { %9022 = vmatpush.bf16.msrb.mxu0 %v7125_v8  ;;  %v7157_v18 = vpack.c.bf16 %v5725_v19, %v5723_v17  ;;  %v11671_v14 = vadd.f32 %v11650_v34, %v8794_v50  ;;  %v3609_v12 = vunpack.c.1.s8 %v2225_v2  ;;  %v3639_v59 = vunpack.c.0.s8 %v2233_v33  ;;  %v2261_v8 = vld [vmem:[%s10573_s20 + $0xa38] sm:$0xff] }
 0x557   : > { %9035 = vmatpush.bf16.msrb.mxu1 %v7141_v13  ;;  %v7173_v47 = vpack.c.bf16 %v5757_v61, %v5755_v40  ;;  %v5655_v55 = vcvt.s32.f32 %v3607_v62  ;;  %v3641_v25 = vunpack.c.1.s8 %v2233_v33  ;;  %v3671_v58 = vunpack.c.0.s8 %v2241_v9  ;;  %v2269_v40 = vld [vmem:[%s10573_s20 + $0xa78] sm:$0xff]  ;;  %v11683_v61 = vpop.f32.mrf.mxu2  ;;  %v11685_v62 = vpop.f32.mrf.mxu3 }
 0x558   : > { %9048 = vmatpush.bf16.msrb.mxu2 %v7157_v18  ;;  %v5657_v23 = vcvt.s32.f32 %v3609_v12  ;;  %v5687_v10 = vcvt.s32.f32 %v3639_v59  ;;  %v3673_v28 = vunpack.c.1.s8 %v2241_v9  ;;  %v3703_v24 = vunpack.c.0.s8 %v2249_v44  ;;  %v11679_v9 = vpop.f32.mrf.mxu1 }
 0x559   : > { %9061 = vmatpush.bf16.msrb.mxu3 %v7173_v47  ;;  %v5689_v34 = vcvt.s32.f32 %v3641_v25  ;;  %v5719_v43 = vcvt.s32.f32 %v3671_v58  ;;  %v3705_v48 = vunpack.c.1.s8 %v2249_v44  ;;  %v3603_v1 = vunpack.c.2.s8 %v2223_v37  ;;  %v2277_v47 = vld [vmem:[%s10573_s20 + $0xab8] sm:$0xff] }
 0x55a   : > { %v7123_v30 = vpack.c.bf16 %v5657_v23, %v5655_v55  ;;  %v5721_v29 = vcvt.s32.f32 %v3673_v28  ;;  %v5751_v60 = vcvt.s32.f32 %v3703_v24  ;;  %v3605_v2 = vunpack.c.3.s8 %v2223_v37 }
 0x55b   : > { %v7139_v22 = vpack.c.bf16 %v5689_v34, %v5687_v10  ;;  %v5753_v57 = vcvt.s32.f32 %v3705_v48  ;;  %v5651_v5 = vcvt.s32.f32 %v3603_v1  ;;  %v3635_v49 = vunpack.c.2.s8 %v2231_v56  ;;  %v2285_v34 = vld [vmem:[%s10573_s20 + $0xaf8] sm:$0xff] }
 0x55c   : > { %9023 = vmatpush.bf16.msrb.mxu0 %v7123_v30  ;;  %v7155_v31 = vpack.c.bf16 %v5721_v29, %v5719_v43  ;;  %v5653_v45 = vcvt.s32.f32 %v3605_v2  ;;  %v3637_v41 = vunpack.c.3.s8 %v2231_v56  ;;  %v3667_v33 = vunpack.c.2.s8 %v2239_v3 }
 0x55d   : > { %9036 = vmatpush.bf16.msrb.mxu1 %v7139_v22  ;;  %v7171_v7 = vpack.c.bf16 %v5753_v57, %v5751_v60  ;;  %v5683_v16 = vcvt.s32.f32 %v3635_v49  ;;  %v3669_v20 = vunpack.c.3.s8 %v2239_v3  ;;  %v3699_v39 = vunpack.c.2.s8 %v2247_v36 }
 0x55e   : > { %9049 = vmatpush.bf16.msrb.mxu2 %v7155_v31  ;;  %v7121_v11 = vpack.c.bf16 %v5653_v45, %v5651_v5  ;;  %v5685_v6 = vcvt.s32.f32 %v3637_v41  ;;  %v5715_v38 = vcvt.s32.f32 %v3667_v33  ;;  %v3701_v32 = vunpack.c.3.s8 %v2247_v36  ;;  %v12100_v31 = vld [vmem:[#allocation19_spill] sm:$0xff]  ;;  %v12101_v33 = vld [vmem:[#allocation20_spill] sm:$0xff] }
 0x55f   : > { %9062 = vmatpush.bf16.msrb.mxu3 %v7171_v7  ;;  %v5717_v44 = vcvt.s32.f32 %v3669_v20  ;;  %v5747_v35 = vcvt.s32.f32 %v3699_v39  ;;  %v3599_v52 = vunpack.c.0.s8 %v2223_v37  ;;  %v3601_v53 = vunpack.c.1.s8 %v2223_v37 }
 0x560   : > { %9024 = vmatpush.bf16.msrb.mxu0 %v7121_v11  ;;  %v7137_v42 = vpack.c.bf16 %v5685_v6, %v5683_v16  ;;  %v5749_v26 = vcvt.s32.f32 %v3701_v32  ;;  %v3631_v0 = vunpack.c.0.s8 %v2231_v56  ;;  %v3633_v51 = vunpack.c.1.s8 %v2231_v56  ;;  %v8834_v43 = vpop.f32.mrf.mxu1  ;;  %v8860_v32 = vpop.f32.mrf.mxu3 }
 0x561   : > { %v7153_v21 = vpack.c.bf16 %v5717_v44, %v5715_v38  ;;  %v5647_v63 = vcvt.s32.f32 %v3599_v52  ;;  %v5649_v46 = vcvt.s32.f32 %v3601_v53  ;;  %v3663_v4 = vunpack.c.0.s8 %v2239_v3  ;;  %v8847_v38 = vpop.f32.mrf.mxu2  ;;  %v2265_v32 = vld [vmem:[%s10573_s20 + $0xa58] sm:$0xff] }
 0x562   : > { %9037 = vmatpush.bf16.msrb.mxu1 %v7137_v42  ;;  %v7169_v17 = vpack.c.bf16 %v5749_v26, %v5747_v35  ;;  %v5679_v19 = vcvt.s32.f32 %v3631_v0  ;;  %v5681_v50 = vcvt.s32.f32 %v3633_v51  ;;  %v3665_v13 = vunpack.c.1.s8 %v2239_v3  ;;  %v12102_v35 = vld [vmem:[#allocation21_spill] sm:$0xff]  ;;  %v12103_v51 = vld [vmem:[#allocation22_spill] sm:$0xff] }
 0x563   : > { %9050 = vmatpush.bf16.msrb.mxu2 %v7153_v21  ;;  %v7119_v18 = vpack.c.bf16 %v5649_v46, %v5647_v63  ;;  %v5711_v12 = vcvt.s32.f32 %v3663_v4  ;;  %v3695_v59 = vunpack.c.0.s8 %v2247_v36  ;;  %v3697_v37 = vunpack.c.1.s8 %v2247_v36  ;;  %v2259_v26 = vld [vmem:[%s10573_s20 + $0xa28] sm:$0xff] }
 0x564   : > { %9063 = vmatpush.bf16.msrb.mxu3 %v7169_v17  ;;  %v7135_v55 = vpack.c.bf16 %v5681_v50, %v5679_v19  ;;  %v5713_v25 = vcvt.s32.f32 %v3665_v13  ;;  %v3755_v58 = vunpack.c.2.s8 %v2261_v8  ;;  %v3757_v23 = vunpack.c.3.s8 %v2261_v8  ;;  %v2267_v46 = vld [vmem:[%s10573_s20 + $0xa68] sm:$0xff] }
 0x565   : > { %9025 = vmatpush.bf16.msrb.mxu0 %v7119_v18  ;;  %v5743_v10 = vcvt.s32.f32 %v3695_v59  ;;  %v5745_v28 = vcvt.s32.f32 %v3697_v37  ;;  %v3787_v24 = vunpack.c.2.s8 %v2269_v40  ;;  %v3789_v56 = vunpack.c.3.s8 %v2269_v40  ;;  %v2275_v50 = vld [vmem:[%s10573_s20 + $0xaa8] sm:$0xff] }
 0x566   : > { %9038 = vmatpush.bf16.msrb.mxu1 %v7135_v55  ;;  %v7151_v48 = vpack.c.bf16 %v5713_v25, %v5711_v12  ;;  %v5803_v1 = vcvt.s32.f32 %v3755_v58  ;;  %v5805_v3 = vcvt.s32.f32 %v3757_v23  ;;  %v3819_v30 = vunpack.c.2.s8 %v2277_v47  ;;  %v2283_v58 = vld [vmem:[%s10573_s20 + $0xae8] sm:$0xff] }
 0x567   : > { %v7167_v29 = vpack.c.bf16 %v5745_v28, %v5743_v10  ;;  %v5835_v60 = vcvt.s32.f32 %v3787_v24  ;;  %v5837_v2 = vcvt.s32.f32 %v3789_v56  ;;  %v3821_v36 = vunpack.c.3.s8 %v2277_v47 }
 0x568   : > { %9051 = vmatpush.bf16.msrb.mxu2 %v7151_v48  ;;  %v7197_v22 = vpack.c.bf16 %v5805_v3, %v5803_v1  ;;  %v5867_v57 = vcvt.s32.f32 %v3819_v30  ;;  %v3851_v5 = vunpack.c.2.s8 %v2285_v34  ;;  %v3853_v49 = vunpack.c.3.s8 %v2285_v34  ;;  %9026 = vmatmul.bf16.vlgmr.msrb.gmra.mxu0 %v12100_v31 }
 0x569   : > { %9064 = vmatpush.bf16.msrb.mxu3 %v7167_v29  ;;  %v7213_v45 = vpack.c.bf16 %v5837_v2, %v5835_v60  ;;  %v5869_v41 = vcvt.s32.f32 %v3821_v36  ;;  %9039 = vmatmul.bf16.vlgmr.msrb.gmra.mxu1 %v12101_v33  ;;  %v3751_v7 = vunpack.c.0.s8 %v2261_v8  ;;  %v3753_v16 = vunpack.c.1.s8 %v2261_v8 }
 0x56a   : > { %9070 = vmatpush.bf16.msra.mxu0 %v7197_v22  ;;  %v5899_v20 = vcvt.s32.f32 %v3851_v5  ;;  %v5901_v39 = vcvt.s32.f32 %v3853_v49  ;;  %v3783_v11 = vunpack.c.0.s8 %v2269_v40  ;;  %v3785_v6 = vunpack.c.1.s8 %v2269_v40 }
 0x56b   : > { %9083 = vmatpush.bf16.msra.mxu1 %v7213_v45  ;;  %v7229_v44 = vpack.c.bf16 %v5869_v41, %v5867_v57  ;;  %9052 = vmatmul.bf16.vlgmr.msrb.gmra.mxu2 %v12102_v35  ;;  %v5799_v52 = vcvt.s32.f32 %v3751_v7  ;;  %v5801_v53 = vcvt.s32.f32 %v3753_v16  ;;  %v3815_v42 = vunpack.c.0.s8 %v2277_v47  ;;  %v2257_v7 = vld [vmem:[%s10573_s20 + $0xa18] sm:$0xff] }
 0x56c   : > { %v7245_v0 = vpack.c.bf16 %v5901_v39, %v5899_v20  ;;  %9065 = vmatmul.bf16.vlgmr.msrb.gmra.mxu3 %v12103_v51  ;;  %v5831_v54 = vcvt.s32.f32 %v3783_v11  ;;  %v5833_v21 = vcvt.s32.f32 %v3785_v6  ;;  %v3817_v63 = vunpack.c.1.s8 %v2277_v47 }
 0x56d   : > { %9096 = vmatpush.bf16.msra.mxu2 %v7229_v44  ;;  %v7195_v4 = vpack.c.bf16 %v5801_v53, %v5799_v52  ;;  %v5863_v8 = vcvt.s32.f32 %v3815_v42  ;;  %v3847_v17 = vunpack.c.0.s8 %v2285_v34  ;;  %v3849_v19 = vunpack.c.1.s8 %v2285_v34  ;;  %v2273_v42 = vld [vmem:[%s10573_s20 + $0xa98] sm:$0xff] }
 0x56e   : > { %9109 = vmatpush.bf16.msra.mxu3 %v7245_v0  ;;  %v7211_v13 = vpack.c.bf16 %v5833_v21, %v5831_v54  ;;  %v5865_v40 = vcvt.s32.f32 %v3817_v63  ;;  %v3747_v18 = vunpack.c.2.s8 %v2259_v26  ;;  %v3749_v12 = vunpack.c.3.s8 %v2259_v26  ;;  %v2281_v21 = vld [vmem:[%s10573_s20 + $0xad8] sm:$0xff] }
 0x56f   : > { %9071 = vmatpush.bf16.msra.mxu0 %v7195_v4  ;;  %v5895_v59 = vcvt.s32.f32 %v3847_v17  ;;  %v5897_v37 = vcvt.s32.f32 %v3849_v19  ;;  %v3779_v55 = vunpack.c.2.s8 %v2267_v46  ;;  %v3781_v25 = vunpack.c.3.s8 %v2267_v46 }
 0x570   : > { %9084 = vmatpush.bf16.msra.mxu1 %v7211_v13  ;;  %v7227_v47 = vpack.c.bf16 %v5865_v40, %v5863_v8  ;;  %v5795_v23 = vcvt.s32.f32 %v3747_v18  ;;  %v5797_v10 = vcvt.s32.f32 %v3749_v12  ;;  %v3811_v28 = vunpack.c.2.s8 %v2275_v50 }
 0x571   : > { %v7243_v24 = vpack.c.bf16 %v5897_v37, %v5895_v59  ;;  %v5827_v56 = vcvt.s32.f32 %v3779_v55  ;;  %v5829_v34 = vcvt.s32.f32 %v3781_v25  ;;  %v3813_v43 = vunpack.c.3.s8 %v2275_v50 }
 0x572   : > { %9097 = vmatpush.bf16.msra.mxu2 %v7227_v47  ;;  %v7193_v48 = vpack.c.bf16 %v5797_v10, %v5795_v23  ;;  %v5859_v1 = vcvt.s32.f32 %v3811_v28  ;;  %v3843_v3 = vunpack.c.2.s8 %v2283_v58  ;;  %v3845_v30 = vunpack.c.3.s8 %v2283_v58 }
 0x573   : > { %9110 = vmatpush.bf16.msra.mxu3 %v7243_v24  ;;  %v7209_v29 = vpack.c.bf16 %v5829_v34, %v5827_v56  ;;  %v5861_v60 = vcvt.s32.f32 %v3813_v43  ;;  %v8820_v2 = vadd.f32 %v11675_v15, %v11671_v14  ;;  %v3743_v36 = vunpack.c.0.s8 %v2259_v26  ;;  %v2255_v43 = vld [vmem:[%s10573_s20 + $0xa08] sm:$0xff] }
 0x574   : > { %9072 = vmatpush.bf16.msra.mxu0 %v7193_v48  ;;  %v5891_v22 = vcvt.s32.f32 %v3843_v3  ;;  %v5893_v57 = vcvt.s32.f32 %v3845_v30  ;;  %v3745_v5 = vunpack.c.1.s8 %v2259_v26  ;;  %v3775_v49 = vunpack.c.0.s8 %v2267_v46 }
 0x575   : > { %9085 = vmatpush.bf16.msra.mxu1 %v7209_v29  ;;  %v7225_v31 = vpack.c.bf16 %v5861_v60, %v5859_v1  ;;  %v5791_v45 = vcvt.s32.f32 %v3743_v36  ;;  %v3777_v41 = vunpack.c.1.s8 %v2267_v46  ;;  %v3807_v33 = vunpack.c.0.s8 %v2275_v50  ;;  %v2263_v36 = vld [vmem:[%s10573_s20 + $0xa48] sm:$0xff] }
 0x576   : > { %v7241_v16 = vpack.c.bf16 %v5893_v57, %v5891_v22  ;;  %v5793_v20 = vcvt.s32.f32 %v3745_v5  ;;  %v5823_v39 = vcvt.s32.f32 %v3775_v49  ;;  %v3809_v11 = vunpack.c.1.s8 %v2275_v50  ;;  %v11710_v22 = vpop.f32.mrf.mxu0 }
 0x577   : > { %9098 = vmatpush.bf16.msra.mxu2 %v7225_v31  ;;  %v5825_v14 = vcvt.s32.f32 %v3777_v41  ;;  %v5855_v15 = vcvt.s32.f32 %v3807_v33  ;;  %v3839_v6 = vunpack.c.0.s8 %v2283_v58  ;;  %v3841_v38 = vunpack.c.1.s8 %v2283_v58  ;;  %v2271_v31 = vld [vmem:[%s10573_s20 + $0xa88] sm:$0xff] }
 0x578   : > { %9111 = vmatpush.bf16.msra.mxu3 %v7241_v16  ;;  %v7191_v44 = vpack.c.bf16 %v5793_v20, %v5791_v45  ;;  %v5857_v35 = vcvt.s32.f32 %v3809_v11  ;;  %v8833_v52 = vadd.f32 %v11679_v9, %v8820_v2  ;;  %v3739_v53 = vunpack.c.2.s8 %v2257_v7  ;;  %v2279_v16 = vld [vmem:[%s10573_s20 + $0xac8] sm:$0xff] }
 0x579   : > { %v7207_v26 = vpack.c.bf16 %v5825_v14, %v5823_v39  ;;  %v5887_v0 = vcvt.s32.f32 %v3839_v6  ;;  %v5889_v51 = vcvt.s32.f32 %v3841_v38  ;;  %v3741_v54 = vunpack.c.3.s8 %v2257_v7 }
 0x57a   : > { %9073 = vmatpush.bf16.msra.mxu0 %v7191_v44  ;;  %v7223_v63 = vpack.c.bf16 %v5857_v35, %v5855_v15  ;;  %v5787_v46 = vcvt.s32.f32 %v3739_v53  ;;  %v3771_v4 = vunpack.c.2.s8 %v2265_v32  ;;  %v3773_v8 = vunpack.c.3.s8 %v2265_v32 }
 0x57b   : > { %9086 = vmatpush.bf16.msra.mxu1 %v7207_v26  ;;  %v7239_v17 = vpack.c.bf16 %v5889_v51, %v5887_v0  ;;  %v5789_v19 = vcvt.s32.f32 %v3741_v54  ;;  %v3803_v50 = vunpack.c.2.s8 %v2273_v42  ;;  %v3805_v13 = vunpack.c.3.s8 %v2273_v42 }
 0x57c   : > { %9099 = vmatpush.bf16.msra.mxu2 %v7223_v63  ;;  %v5819_v40 = vcvt.s32.f32 %v3771_v4  ;;  %v5821_v9 = vcvt.s32.f32 %v3773_v8  ;;  %v3835_v18 = vunpack.c.2.s8 %v2281_v21  ;;  %v3837_v12 = vunpack.c.3.s8 %v2281_v21 }
 0x57d   : > { %9112 = vmatpush.bf16.msra.mxu3 %v7239_v17  ;;  %v7189_v59 = vpack.c.bf16 %v5789_v19, %v5787_v46  ;;  %v5851_v37 = vcvt.s32.f32 %v3803_v50  ;;  %v5853_v55 = vcvt.s32.f32 %v3805_v13  ;;  %v8846_v25 = vadd.f32 %v11683_v61, %v8833_v52 }
 0x57e   : > { %v7205_v58 = vpack.c.bf16 %v5821_v9, %v5819_v40  ;;  %v5883_v47 = vcvt.s32.f32 %v3835_v18  ;;  %v5885_v23 = vcvt.s32.f32 %v3837_v12  ;;  %v3735_v10 = vunpack.c.0.s8 %v2257_v7  ;;  %v8873_v13 = vpop.f32.mrf.mxu0 }
 0x57f   : > { %9074 = vmatpush.bf16.msra.mxu0 %v7189_v59  ;;  %v7221_v28 = vpack.c.bf16 %v5853_v55, %v5851_v37  ;;  %v11706_v24 = vadd.f32 %v11685_v62, %v8846_v25  ;;  %v3737_v56 = vunpack.c.1.s8 %v2257_v7  ;;  %v3767_v34 = vunpack.c.0.s8 %v2265_v32  ;;  %v2293_v59 = vld [vmem:[%s10573_s20 + $0xb38] sm:$0xff] }
 0x580   : > { %9087 = vmatpush.bf16.msra.mxu1 %v7205_v58  ;;  %v7237_v48 = vpack.c.bf16 %v5885_v23, %v5883_v47  ;;  %v5783_v1 = vcvt.s32.f32 %v3735_v10  ;;  %v3769_v3 = vunpack.c.1.s8 %v2265_v32  ;;  %v3799_v30 = vunpack.c.0.s8 %v2273_v42  ;;  %v2301_v47 = vld [vmem:[%s10573_s20 + $0xb78] sm:$0xff]  ;;  %v11718_v23 = vpop.f32.mrf.mxu2  ;;  %v11720_v10 = vpop.f32.mrf.mxu3 }
 0x581   : > { %9100 = vmatpush.bf16.msra.mxu2 %v7221_v28  ;;  %v5785_v61 = vcvt.s32.f32 %v3737_v56  ;;  %v5815_v29 = vcvt.s32.f32 %v3767_v34  ;;  %v3801_v60 = vunpack.c.1.s8 %v2273_v42  ;;  %v3831_v2 = vunpack.c.0.s8 %v2281_v21  ;;  %v11714_v42 = vpop.f32.mrf.mxu1 }
 0x582   : > { %9113 = vmatpush.bf16.msra.mxu3 %v7237_v48  ;;  %v5817_v62 = vcvt.s32.f32 %v3769_v3  ;;  %v5847_v57 = vcvt.s32.f32 %v3799_v30  ;;  %v3833_v5 = vunpack.c.1.s8 %v2281_v21  ;;  %v3731_v49 = vunpack.c.2.s8 %v2255_v43  ;;  %v2309_v48 = vld [vmem:[%s10573_s20 + $0xbb8] sm:$0xff] }
 0x583   : > { %v7187_v45 = vpack.c.bf16 %v5785_v61, %v5783_v1  ;;  %v5849_v41 = vcvt.s32.f32 %v3801_v60  ;;  %v5879_v33 = vcvt.s32.f32 %v3831_v2  ;;  %v3733_v7 = vunpack.c.3.s8 %v2255_v43 }
 0x584   : > { %v7203_v20 = vpack.c.bf16 %v5817_v62, %v5815_v29  ;;  %v5881_v39 = vcvt.s32.f32 %v3833_v5  ;;  %v5779_v11 = vcvt.s32.f32 %v3731_v49  ;;  %v3763_v14 = vunpack.c.2.s8 %v2263_v36  ;;  %v2317_v62 = vld [vmem:[%s10573_s20 + $0xbf8] sm:$0xff] }
 0x585   : > { %9075 = vmatpush.bf16.msra.mxu0 %v7187_v45  ;;  %v7219_v15 = vpack.c.bf16 %v5849_v41, %v5847_v57  ;;  %v5781_v6 = vcvt.s32.f32 %v3733_v7  ;;  %v3765_v38 = vunpack.c.3.s8 %v2263_v36  ;;  %v3795_v32 = vunpack.c.2.s8 %v2271_v31 }
 0x586   : > { %9088 = vmatpush.bf16.msra.mxu1 %v7203_v20  ;;  %v7235_v44 = vpack.c.bf16 %v5881_v39, %v5879_v33  ;;  %v5811_v35 = vcvt.s32.f32 %v3763_v14  ;;  %v3797_v52 = vunpack.c.3.s8 %v2271_v31  ;;  %v3827_v53 = vunpack.c.2.s8 %v2279_v16 }
 0x587   : > { %9101 = vmatpush.bf16.msra.mxu2 %v7219_v15  ;;  %v7185_v26 = vpack.c.bf16 %v5781_v6, %v5779_v11  ;;  %v5813_v0 = vcvt.s32.f32 %v3765_v38  ;;  %v5843_v51 = vcvt.s32.f32 %v3795_v32  ;;  %v3829_v54 = vunpack.c.3.s8 %v2279_v16  ;;  %v12104_v15 = vld [vmem:[#allocation23_spill] sm:$0xff]  ;;  %v12105_v32 = vld [vmem:[#allocation24_spill] sm:$0xff] }
 0x588   : > { %9114 = vmatpush.bf16.msra.mxu3 %v7235_v44  ;;  %v5845_v21 = vcvt.s32.f32 %v3797_v52  ;;  %v5875_v63 = vcvt.s32.f32 %v3827_v53  ;;  %v3727_v46 = vunpack.c.0.s8 %v2255_v43  ;;  %v3729_v4 = vunpack.c.1.s8 %v2255_v43 }
 0x589   : > { %9076 = vmatpush.bf16.msra.mxu0 %v7185_v26  ;;  %v7201_v8 = vpack.c.bf16 %v5813_v0, %v5811_v35  ;;  %v5877_v17 = vcvt.s32.f32 %v3829_v54  ;;  %v3759_v19 = vunpack.c.0.s8 %v2263_v36  ;;  %v3761_v50 = vunpack.c.1.s8 %v2263_v36  ;;  %v8886_v57 = vpop.f32.mrf.mxu1  ;;  %v8912_v54 = vpop.f32.mrf.mxu3 }
 0x58a   : > { %v7217_v40 = vpack.c.bf16 %v5845_v21, %v5843_v51  ;;  %v5775_v9 = vcvt.s32.f32 %v3727_v46  ;;  %v5777_v18 = vcvt.s32.f32 %v3729_v4  ;;  %v3791_v12 = vunpack.c.0.s8 %v2271_v31  ;;  %v8899_v51 = vpop.f32.mrf.mxu2  ;;  %v2297_v54 = vld [vmem:[%s10573_s20 + $0xb58] sm:$0xff] }
 0x58b   : > { %9089 = vmatpush.bf16.msra.mxu1 %v7201_v8  ;;  %v7233_v37 = vpack.c.bf16 %v5877_v17, %v5875_v63  ;;  %v5807_v55 = vcvt.s32.f32 %v3759_v19  ;;  %v5809_v25 = vcvt.s32.f32 %v3761_v50  ;;  %v3793_v58 = vunpack.c.1.s8 %v2271_v31  ;;  %v12106_v63 = vld [vmem:[#allocation25_spill] sm:$0xff]  ;;  %v12107_v50 = vld [vmem:[#allocation26_spill] sm:$0xff] }
 0x58c   : > { %9102 = vmatpush.bf16.msra.mxu2 %v7217_v40  ;;  %v7183_v28 = vpack.c.bf16 %v5777_v18, %v5775_v9  ;;  %v5839_v56 = vcvt.s32.f32 %v3791_v12  ;;  %v3823_v34 = vunpack.c.0.s8 %v2279_v16  ;;  %v3825_v43 = vunpack.c.1.s8 %v2279_v16  ;;  %v2291_v17 = vld [vmem:[%s10573_s20 + $0xb28] sm:$0xff] }
 0x58d   : > { %9115 = vmatpush.bf16.msra.mxu3 %v7233_v37  ;;  %v7199_v1 = vpack.c.bf16 %v5809_v25, %v5807_v55  ;;  %v5841_v3 = vcvt.s32.f32 %v3793_v58  ;;  %v3883_v30 = vunpack.c.2.s8 %v2293_v59  ;;  %v3885_v61 = vunpack.c.3.s8 %v2293_v59  ;;  %v2299_v18 = vld [vmem:[%s10573_s20 + $0xb68] sm:$0xff] }
 0x58e   : > { %9077 = vmatpush.bf16.msra.mxu0 %v7183_v28  ;;  %v5871_v29 = vcvt.s32.f32 %v3823_v34  ;;  %v5873_v60 = vcvt.s32.f32 %v3825_v43  ;;  %v3915_v2 = vunpack.c.2.s8 %v2301_v47  ;;  %v3917_v36 = vunpack.c.3.s8 %v2301_v47  ;;  %v2307_v25 = vld [vmem:[%s10573_s20 + $0xba8] sm:$0xff] }
 0x58f   : > { %9090 = vmatpush.bf16.msra.mxu1 %v7199_v1  ;;  %v7215_v5 = vpack.c.bf16 %v5841_v3, %v5839_v56  ;;  %v5931_v49 = vcvt.s32.f32 %v3883_v30  ;;  %v5933_v31 = vcvt.s32.f32 %v3885_v61  ;;  %v3947_v45 = vunpack.c.2.s8 %v2309_v48  ;;  %v2315_v30 = vld [vmem:[%s10573_s20 + $0xbe8] sm:$0xff] }
 0x590   : > { %v7231_v41 = vpack.c.bf16 %v5873_v60, %v5871_v29  ;;  %v5963_v33 = vcvt.s32.f32 %v3915_v2  ;;  %v5965_v7 = vcvt.s32.f32 %v3917_v36  ;;  %v3949_v16 = vunpack.c.3.s8 %v2309_v48 }
 0x591   : > { %9103 = vmatpush.bf16.msra.mxu2 %v7215_v5  ;;  %v7261_v20 = vpack.c.bf16 %v5933_v31, %v5931_v49  ;;  %v5995_v39 = vcvt.s32.f32 %v3947_v45  ;;  %v3979_v11 = vunpack.c.2.s8 %v2317_v62  ;;  %v3981_v14 = vunpack.c.3.s8 %v2317_v62  ;;  %9078 = vmatmul.bf16.vlgmr.msra.gmra.mxu0 %v12104_v15 }
 0x592   : > { %9116 = vmatpush.bf16.msra.mxu3 %v7231_v41  ;;  %v7277_v6 = vpack.c.bf16 %v5965_v7, %v5963_v33  ;;  %v5997_v38 = vcvt.s32.f32 %v3949_v16  ;;  %9091 = vmatmul.bf16.vlgmr.msra.gmra.mxu1 %v12105_v32  ;;  %v3879_v44 = vunpack.c.0.s8 %v2293_v59  ;;  %v3881_v35 = vunpack.c.1.s8 %v2293_v59 }
 0x593   : > { %9122 = vmatpush.bf16.msrb.mxu0 %v7261_v20  ;;  %v6027_v52 = vcvt.s32.f32 %v3979_v11  ;;  %v6029_v53 = vcvt.s32.f32 %v3981_v14  ;;  %v3911_v26 = vunpack.c.0.s8 %v2301_v47  ;;  %v3913_v0 = vunpack.c.1.s8 %v2301_v47 }
 0x594   : > { %9135 = vmatpush.bf16.msrb.mxu1 %v7277_v6  ;;  %v7293_v21 = vpack.c.bf16 %v5997_v38, %v5995_v39  ;;  %9104 = vmatmul.bf16.vlgmr.msra.gmra.mxu2 %v12106_v63  ;;  %v5927_v46 = vcvt.s32.f32 %v3879_v44  ;;  %v5929_v4 = vcvt.s32.f32 %v3881_v35  ;;  %v3943_v8 = vunpack.c.0.s8 %v2309_v48  ;;  %v2289_v44 = vld [vmem:[%s10573_s20 + $0xb18] sm:$0xff] }
 0x595   : > { %v7309_v19 = vpack.c.bf16 %v6029_v53, %v6027_v52  ;;  %9117 = vmatmul.bf16.vlgmr.msra.gmra.mxu3 %v12107_v50  ;;  %v5959_v13 = vcvt.s32.f32 %v3911_v26  ;;  %v5961_v40 = vcvt.s32.f32 %v3913_v0  ;;  %v3945_v9 = vunpack.c.1.s8 %v2309_v48 }
 0x596   : > { %9148 = vmatpush.bf16.msrb.mxu2 %v7293_v21  ;;  %v7259_v12 = vpack.c.bf16 %v5929_v4, %v5927_v46  ;;  %v5991_v59 = vcvt.s32.f32 %v3943_v8  ;;  %v3975_v37 = vunpack.c.0.s8 %v2317_v62  ;;  %v3977_v55 = vunpack.c.1.s8 %v2317_v62  ;;  %v2305_v8 = vld [vmem:[%s10573_s20 + $0xb98] sm:$0xff] }
 0x597   : > { %9161 = vmatpush.bf16.msrb.mxu3 %v7309_v19  ;;  %v7275_v58 = vpack.c.bf16 %v5961_v40, %v5959_v13  ;;  %v5993_v47 = vcvt.s32.f32 %v3945_v9  ;;  %v3875_v28 = vunpack.c.2.s8 %v2291_v17  ;;  %v3877_v56 = vunpack.c.3.s8 %v2291_v17  ;;  %v2313_v40 = vld [vmem:[%s10573_s20 + $0xbd8] sm:$0xff] }
 0x598   : > { %9123 = vmatpush.bf16.msrb.mxu0 %v7259_v12  ;;  %v6023_v34 = vcvt.s32.f32 %v3975_v37  ;;  %v6025_v43 = vcvt.s32.f32 %v3977_v55  ;;  %v3907_v1 = vunpack.c.2.s8 %v2299_v18  ;;  %v3909_v3 = vunpack.c.3.s8 %v2299_v18 }
 0x599   : > { %9136 = vmatpush.bf16.msrb.mxu1 %v7275_v58  ;;  %v7291_v48 = vpack.c.bf16 %v5993_v47, %v5991_v59  ;;  %v5923_v61 = vcvt.s32.f32 %v3875_v28  ;;  %v5925_v29 = vcvt.s32.f32 %v3877_v56  ;;  %v3939_v60 = vunpack.c.2.s8 %v2307_v25 }
 0x59a   : > { %v7307_v2 = vpack.c.bf16 %v6025_v43, %v6023_v34  ;;  %v5955_v36 = vcvt.s32.f32 %v3907_v1  ;;  %v5957_v62 = vcvt.s32.f32 %v3909_v3  ;;  %v3941_v57 = vunpack.c.3.s8 %v2307_v25 }
 0x59b   : > { %9149 = vmatpush.bf16.msrb.mxu2 %v7291_v48  ;;  %v7257_v5 = vpack.c.bf16 %v5925_v29, %v5923_v61  ;;  %v5987_v49 = vcvt.s32.f32 %v3939_v60  ;;  %v3971_v31 = vunpack.c.2.s8 %v2315_v30  ;;  %v3973_v45 = vunpack.c.3.s8 %v2315_v30 }
 0x59c   : > { %9162 = vmatpush.bf16.msrb.mxu3 %v7307_v2  ;;  %v7273_v41 = vpack.c.bf16 %v5957_v62, %v5955_v36  ;;  %v5989_v33 = vcvt.s32.f32 %v3941_v57  ;;  %v8872_v7 = vadd.f32 %v11710_v22, %v11706_v24  ;;  %v3871_v16 = vunpack.c.0.s8 %v2291_v17  ;;  %v2287_v57 = vld [vmem:[%s10573_s20 + $0xb08] sm:$0xff] }
 0x59d   : > { %9124 = vmatpush.bf16.msrb.mxu0 %v7257_v5  ;;  %v6019_v20 = vcvt.s32.f32 %v3971_v31  ;;  %v6021_v39 = vcvt.s32.f32 %v3973_v45  ;;  %v3873_v11 = vunpack.c.1.s8 %v2291_v17  ;;  %v3903_v14 = vunpack.c.0.s8 %v2299_v18 }
 0x59e   : > { %9137 = vmatpush.bf16.msrb.mxu1 %v7273_v41  ;;  %v7289_v15 = vpack.c.bf16 %v5989_v33, %v5987_v49  ;;  %v5919_v6 = vcvt.s32.f32 %v3871_v16  ;;  %v3905_v38 = vunpack.c.1.s8 %v2299_v18  ;;  %v3935_v32 = vunpack.c.0.s8 %v2307_v25  ;;  %v2295_v16 = vld [vmem:[%s10573_s20 + $0xb48] sm:$0xff] }
 0x59f   : > { %v7305_v35 = vpack.c.bf16 %v6021_v39, %v6019_v20  ;;  %v5921_v52 = vcvt.s32.f32 %v3873_v11  ;;  %v5951_v53 = vcvt.s32.f32 %v3903_v14  ;;  %v3937_v26 = vunpack.c.1.s8 %v2307_v25  ;;  %v11745_v20 = vpop.f32.mrf.mxu0 }
 0x5a0   : > { %9150 = vmatpush.bf16.msrb.mxu2 %v7289_v15  ;;  %v5953_v24 = vcvt.s32.f32 %v3905_v38  ;;  %v5983_v22 = vcvt.s32.f32 %v3935_v32  ;;  %v3967_v0 = vunpack.c.0.s8 %v2315_v30  ;;  %v3969_v51 = vunpack.c.1.s8 %v2315_v30  ;;  %v2303_v15 = vld [vmem:[%s10573_s20 + $0xb88] sm:$0xff] }
 0x5a1   : > { %9163 = vmatpush.bf16.msrb.mxu3 %v7305_v35  ;;  %v7255_v21 = vpack.c.bf16 %v5921_v52, %v5919_v6  ;;  %v5985_v63 = vcvt.s32.f32 %v3937_v26  ;;  %v8885_v46 = vadd.f32 %v11714_v42, %v8872_v7  ;;  %v3867_v4 = vunpack.c.2.s8 %v2289_v44  ;;  %v2311_v35 = vld [vmem:[%s10573_s20 + $0xbc8] sm:$0xff] }
 0x5a2   : > { %v7271_v17 = vpack.c.bf16 %v5953_v24, %v5951_v53  ;;  %v6015_v19 = vcvt.s32.f32 %v3967_v0  ;;  %v6017_v50 = vcvt.s32.f32 %v3969_v51  ;;  %v3869_v13 = vunpack.c.3.s8 %v2289_v44 }
 0x5a3   : > { %9125 = vmatpush.bf16.msrb.mxu0 %v7255_v21  ;;  %v7287_v9 = vpack.c.bf16 %v5985_v63, %v5983_v22  ;;  %v5915_v18 = vcvt.s32.f32 %v3867_v4  ;;  %v3899_v12 = vunpack.c.2.s8 %v2297_v54  ;;  %v3901_v59 = vunpack.c.3.s8 %v2297_v54 }
 0x5a4   : > { %9138 = vmatpush.bf16.msrb.mxu1 %v7271_v17  ;;  %v7303_v37 = vpack.c.bf16 %v6017_v50, %v6015_v19  ;;  %v5917_v55 = vcvt.s32.f32 %v3869_v13  ;;  %v3931_v25 = vunpack.c.2.s8 %v2305_v8  ;;  %v3933_v58 = vunpack.c.3.s8 %v2305_v8 }
 0x5a5   : > { %9151 = vmatpush.bf16.msrb.mxu2 %v7287_v9  ;;  %v5947_v47 = vcvt.s32.f32 %v3899_v12  ;;  %v5949_v42 = vcvt.s32.f32 %v3901_v59  ;;  %v3963_v28 = vunpack.c.2.s8 %v2313_v40  ;;  %v3965_v56 = vunpack.c.3.s8 %v2313_v40 }
 0x5a6   : > { %9164 = vmatpush.bf16.msrb.mxu3 %v7303_v37  ;;  %v7253_v34 = vpack.c.bf16 %v5917_v55, %v5915_v18  ;;  %v5979_v43 = vcvt.s32.f32 %v3931_v25  ;;  %v5981_v1 = vcvt.s32.f32 %v3933_v58  ;;  %v8898_v3 = vadd.f32 %v11718_v23, %v8885_v46 }
 0x5a7   : > { %v7269_v30 = vpack.c.bf16 %v5949_v42, %v5947_v47  ;;  %v6011_v48 = vcvt.s32.f32 %v3963_v28  ;;  %v6013_v61 = vcvt.s32.f32 %v3965_v56  ;;  %v3863_v29 = vunpack.c.0.s8 %v2289_v44  ;;  %v8925_v58 = vpop.f32.mrf.mxu0 }
 0x5a8   : > { %9126 = vmatpush.bf16.msrb.mxu0 %v7253_v34  ;;  %v7285_v60 = vpack.c.bf16 %v5981_v1, %v5979_v43  ;;  %v11741_v2 = vadd.f32 %v11720_v10, %v8898_v3  ;;  %v3865_v36 = vunpack.c.1.s8 %v2289_v44  ;;  %v3895_v62 = vunpack.c.0.s8 %v2297_v54  ;;  %v2325_v34 = vld [vmem:[%s10573_s20 + $0xc38] sm:$0xff] }
 0x5a9   : > { %9139 = vmatpush.bf16.msrb.mxu1 %v7269_v30  ;;  %v7301_v5 = vpack.c.bf16 %v6013_v61, %v6011_v48  ;;  %v5911_v49 = vcvt.s32.f32 %v3863_v29  ;;  %v3897_v31 = vunpack.c.1.s8 %v2297_v54  ;;  %v3927_v45 = vunpack.c.0.s8 %v2305_v8  ;;  %v2333_v48 = vld [vmem:[%s10573_s20 + $0xc78] sm:$0xff]  ;;  %v11753_v61 = vpop.f32.mrf.mxu2  ;;  %v11755_v29 = vpop.f32.mrf.mxu3 }
 0x5aa   : > { %9152 = vmatpush.bf16.msrb.mxu2 %v7285_v60  ;;  %v5913_v23 = vcvt.s32.f32 %v3865_v36  ;;  %v5943_v41 = vcvt.s32.f32 %v3895_v62  ;;  %v3929_v33 = vunpack.c.1.s8 %v2305_v8  ;;  %v3959_v7 = vunpack.c.0.s8 %v2313_v40  ;;  %v11749_v8 = vpop.f32.mrf.mxu1 }
 0x5ab   : > { %9165 = vmatpush.bf16.msrb.mxu3 %v7301_v5  ;;  %v5945_v10 = vcvt.s32.f32 %v3897_v31  ;;  %v5975_v39 = vcvt.s32.f32 %v3927_v45  ;;  %v3961_v11 = vunpack.c.1.s8 %v2313_v40  ;;  %v3859_v14 = vunpack.c.2.s8 %v2287_v57  ;;  %v2341_v5 = vld [vmem:[%s10573_s20 + $0xcb8] sm:$0xff] }
 0x5ac   : > { %v7251_v6 = vpack.c.bf16 %v5913_v23, %v5911_v49  ;;  %v5977_v38 = vcvt.s32.f32 %v3929_v33  ;;  %v6007_v32 = vcvt.s32.f32 %v3959_v7  ;;  %v3861_v44 = vunpack.c.3.s8 %v2287_v57 }
 0x5ad   : > { %v7267_v52 = vpack.c.bf16 %v5945_v10, %v5943_v41  ;;  %v6009_v53 = vcvt.s32.f32 %v3961_v11  ;;  %v5907_v26 = vcvt.s32.f32 %v3859_v14  ;;  %v3891_v24 = vunpack.c.2.s8 %v2295_v16  ;;  %v2349_v10 = vld [vmem:[%s10573_s20 + $0xcf8] sm:$0xff] }
 0x5ae   : > { %9127 = vmatpush.bf16.msrb.mxu0 %v7251_v6  ;;  %v7283_v22 = vpack.c.bf16 %v5977_v38, %v5975_v39  ;;  %v5909_v0 = vcvt.s32.f32 %v3861_v44  ;;  %v3893_v51 = vunpack.c.3.s8 %v2295_v16  ;;  %v3923_v54 = vunpack.c.2.s8 %v2303_v15 }
 0x5af   : > { %9140 = vmatpush.bf16.msrb.mxu1 %v7267_v52  ;;  %v7299_v21 = vpack.c.bf16 %v6009_v53, %v6007_v32  ;;  %v5939_v63 = vcvt.s32.f32 %v3891_v24  ;;  %v3925_v46 = vunpack.c.3.s8 %v2303_v15  ;;  %v3955_v4 = vunpack.c.2.s8 %v2311_v35 }
 0x5b0   : > { %9153 = vmatpush.bf16.msrb.mxu2 %v7283_v22  ;;  %v7249_v17 = vpack.c.bf16 %v5909_v0, %v5907_v26  ;;  %v5941_v19 = vcvt.s32.f32 %v3893_v51  ;;  %v5971_v50 = vcvt.s32.f32 %v3923_v54  ;;  %v3957_v13 = vunpack.c.3.s8 %v2311_v35  ;;  %v12108_v22 = vld [vmem:[#allocation27_spill] sm:$0xff]  ;;  %v12109_v54 = vld [vmem:[#allocation28_spill] sm:$0xff] }
 0x5b1   : > { %9166 = vmatpush.bf16.msrb.mxu3 %v7299_v21  ;;  %v5973_v40 = vcvt.s32.f32 %v3925_v46  ;;  %v6003_v9 = vcvt.s32.f32 %v3955_v4  ;;  %v3855_v18 = vunpack.c.0.s8 %v2287_v57  ;;  %v3857_v12 = vunpack.c.1.s8 %v2287_v57 }
 0x5b2   : > { %9128 = vmatpush.bf16.msrb.mxu0 %v7249_v17  ;;  %v7265_v59 = vpack.c.bf16 %v5941_v19, %v5939_v63  ;;  %v6005_v37 = vcvt.s32.f32 %v3957_v13  ;;  %v3887_v55 = vunpack.c.0.s8 %v2295_v16  ;;  %v3889_v25 = vunpack.c.1.s8 %v2295_v16  ;;  %v8938_v39 = vpop.f32.mrf.mxu1  ;;  %v8964_v13 = vpop.f32.mrf.mxu3 }
 0x5b3   : > { %v7281_v47 = vpack.c.bf16 %v5973_v40, %v5971_v50  ;;  %v5903_v42 = vcvt.s32.f32 %v3855_v18  ;;  %v5905_v28 = vcvt.s32.f32 %v3857_v12  ;;  %v3919_v56 = vunpack.c.0.s8 %v2303_v15  ;;  %v8951_v50 = vpop.f32.mrf.mxu2  ;;  %v2329_v13 = vld [vmem:[%s10573_s20 + $0xc58] sm:$0xff] }
 0x5b4   : > { %9141 = vmatpush.bf16.msrb.mxu1 %v7265_v59  ;;  %v7297_v43 = vpack.c.bf16 %v6005_v37, %v6003_v9  ;;  %v5935_v1 = vcvt.s32.f32 %v3887_v55  ;;  %v5937_v3 = vcvt.s32.f32 %v3889_v25  ;;  %v3921_v30 = vunpack.c.1.s8 %v2303_v15  ;;  %v12110_v9 = vld [vmem:[#allocation29_spill] sm:$0xff]  ;;  %v12111_v25 = vld [vmem:[#allocation30_spill] sm:$0xff] }
 0x5b5   : > { %9154 = vmatpush.bf16.msrb.mxu2 %v7281_v47  ;;  %v7247_v60 = vpack.c.bf16 %v5905_v28, %v5903_v42  ;;  %v5967_v36 = vcvt.s32.f32 %v3919_v56  ;;  %v3951_v62 = vunpack.c.0.s8 %v2311_v35  ;;  %v3953_v57 = vunpack.c.1.s8 %v2311_v35  ;;  %v2323_v37 = vld [vmem:[%s10573_s20 + $0xc28] sm:$0xff] }
 0x5b6   : > { %9167 = vmatpush.bf16.msrb.mxu3 %v7297_v43  ;;  %v7263_v49 = vpack.c.bf16 %v5937_v3, %v5935_v1  ;;  %v5969_v31 = vcvt.s32.f32 %v3921_v30  ;;  %v4011_v45 = vunpack.c.2.s8 %v2325_v34  ;;  %v4013_v23 = vunpack.c.3.s8 %v2325_v34  ;;  %v2331_v28 = vld [vmem:[%s10573_s20 + $0xc68] sm:$0xff] }
 0x5b7   : > { %9129 = vmatpush.bf16.msrb.mxu0 %v7247_v60  ;;  %v5999_v41 = vcvt.s32.f32 %v3951_v62  ;;  %v6001_v33 = vcvt.s32.f32 %v3953_v57  ;;  %v4043_v7 = vunpack.c.2.s8 %v2333_v48  ;;  %v4045_v16 = vunpack.c.3.s8 %v2333_v48  ;;  %v2339_v3 = vld [vmem:[%s10573_s20 + $0xca8] sm:$0xff] }
 0x5b8   : > { %9142 = vmatpush.bf16.msrb.mxu1 %v7263_v49  ;;  %v7279_v11 = vpack.c.bf16 %v5969_v31, %v5967_v36  ;;  %v6059_v14 = vcvt.s32.f32 %v4011_v45  ;;  %v6061_v15 = vcvt.s32.f32 %v4013_v23  ;;  %v4075_v6 = vunpack.c.2.s8 %v2341_v5  ;;  %v2347_v45 = vld [vmem:[%s10573_s20 + $0xce8] sm:$0xff] }
 0x5b9   : > { %v7295_v38 = vpack.c.bf16 %v6001_v33, %v5999_v41  ;;  %v6091_v32 = vcvt.s32.f32 %v4043_v7  ;;  %v6093_v44 = vcvt.s32.f32 %v4045_v16  ;;  %v4077_v35 = vunpack.c.3.s8 %v2341_v5 }
 0x5ba   : > { %9155 = vmatpush.bf16.msrb.mxu2 %v7279_v11  ;;  %v7325_v52 = vpack.c.bf16 %v6061_v15, %v6059_v14  ;;  %v6123_v53 = vcvt.s32.f32 %v4075_v6  ;;  %v4107_v26 = vunpack.c.2.s8 %v2349_v10  ;;  %v4109_v24 = vunpack.c.3.s8 %v2349_v10  ;;  %9130 = vmatmul.bf16.vlgmr.msrb.gmra.mxu0 %v12108_v22 }
 0x5bb   : > { %9168 = vmatpush.bf16.msrb.mxu3 %v7295_v38  ;;  %v7341_v0 = vpack.c.bf16 %v6093_v44, %v6091_v32  ;;  %v6125_v51 = vcvt.s32.f32 %v4077_v35  ;;  %9143 = vmatmul.bf16.vlgmr.msrb.gmra.mxu1 %v12109_v54  ;;  %v4007_v21 = vunpack.c.0.s8 %v2325_v34  ;;  %v4009_v63 = vunpack.c.1.s8 %v2325_v34 }
 0x5bc   : > { %9174 = vmatpush.bf16.msra.mxu0 %v7325_v52  ;;  %v6155_v46 = vcvt.s32.f32 %v4107_v26  ;;  %v6157_v4 = vcvt.s32.f32 %v4109_v24  ;;  %v4039_v17 = vunpack.c.0.s8 %v2333_v48  ;;  %v4041_v19 = vunpack.c.1.s8 %v2333_v48 }
 0x5bd   : > { %9187 = vmatpush.bf16.msra.mxu1 %v7341_v0  ;;  %v7357_v40 = vpack.c.bf16 %v6125_v51, %v6123_v53  ;;  %9156 = vmatmul.bf16.vlgmr.msrb.gmra.mxu2 %v12110_v9  ;;  %v6055_v18 = vcvt.s32.f32 %v4007_v21  ;;  %v6057_v12 = vcvt.s32.f32 %v4009_v63  ;;  %v4071_v59 = vunpack.c.0.s8 %v2341_v5  ;;  %v2321_v21 = vld [vmem:[%s10573_s20 + $0xc18] sm:$0xff] }
 0x5be   : > { %v7373_v55 = vpack.c.bf16 %v6157_v4, %v6155_v46  ;;  %9169 = vmatmul.bf16.vlgmr.msrb.gmra.mxu3 %v12111_v25  ;;  %v6087_v58 = vcvt.s32.f32 %v4039_v17  ;;  %v6089_v47 = vcvt.s32.f32 %v4041_v19  ;;  %v4073_v42 = vunpack.c.1.s8 %v2341_v5 }
 0x5bf   : > { %9200 = vmatpush.bf16.msra.mxu2 %v7357_v40  ;;  %v7323_v56 = vpack.c.bf16 %v6057_v12, %v6055_v18  ;;  %v6119_v34 = vcvt.s32.f32 %v4071_v59  ;;  %v4103_v43 = vunpack.c.0.s8 %v2349_v10  ;;  %v4105_v1 = vunpack.c.1.s8 %v2349_v10  ;;  %v2337_v59 = vld [vmem:[%s10573_s20 + $0xc98] sm:$0xff] }
 0x5c0   : > { %9213 = vmatpush.bf16.msra.mxu3 %v7373_v55  ;;  %v7339_v30 = vpack.c.bf16 %v6089_v47, %v6087_v58  ;;  %v6121_v48 = vcvt.s32.f32 %v4073_v42  ;;  %v4003_v60 = vunpack.c.2.s8 %v2323_v37  ;;  %v4005_v36 = vunpack.c.3.s8 %v2323_v37  ;;  %v2345_v47 = vld [vmem:[%s10573_s20 + $0xcd8] sm:$0xff] }
 0x5c1   : > { %9175 = vmatpush.bf16.msra.mxu0 %v7323_v56  ;;  %v6151_v62 = vcvt.s32.f32 %v4103_v43  ;;  %v6153_v57 = vcvt.s32.f32 %v4105_v1  ;;  %v4035_v49 = vunpack.c.2.s8 %v2331_v28  ;;  %v4037_v31 = vunpack.c.3.s8 %v2331_v28 }
 0x5c2   : > { %9188 = vmatpush.bf16.msra.mxu1 %v7339_v30  ;;  %v7355_v5 = vpack.c.bf16 %v6121_v48, %v6119_v34  ;;  %v6051_v23 = vcvt.s32.f32 %v4003_v60  ;;  %v6053_v41 = vcvt.s32.f32 %v4005_v36  ;;  %v4067_v33 = vunpack.c.2.s8 %v2339_v3 }
 0x5c3   : > { %v7371_v7 = vpack.c.bf16 %v6153_v57, %v6151_v62  ;;  %v6083_v16 = vcvt.s32.f32 %v4035_v49  ;;  %v6085_v10 = vcvt.s32.f32 %v4037_v31  ;;  %v4069_v39 = vunpack.c.3.s8 %v2339_v3 }
 0x5c4   : > { %9201 = vmatpush.bf16.msra.mxu2 %v7355_v5  ;;  %v7321_v11 = vpack.c.bf16 %v6053_v41, %v6051_v23  ;;  %v6115_v14 = vcvt.s32.f32 %v4067_v33  ;;  %v4099_v15 = vunpack.c.2.s8 %v2347_v45  ;;  %v4101_v6 = vunpack.c.3.s8 %v2347_v45 }
 0x5c5   : > { %9214 = vmatpush.bf16.msra.mxu3 %v7371_v7  ;;  %v7337_v38 = vpack.c.bf16 %v6085_v10, %v6083_v16  ;;  %v6117_v32 = vcvt.s32.f32 %v4069_v39  ;;  %v8924_v44 = vadd.f32 %v11745_v20, %v11741_v2  ;;  %v3999_v35 = vunpack.c.0.s8 %v2323_v37  ;;  %v2319_v39 = vld [vmem:[%s10573_s20 + $0xc08] sm:$0xff] }
 0x5c6   : > { %9176 = vmatpush.bf16.msra.mxu0 %v7321_v11  ;;  %v6147_v52 = vcvt.s32.f32 %v4099_v15  ;;  %v6149_v53 = vcvt.s32.f32 %v4101_v6  ;;  %v4001_v26 = vunpack.c.1.s8 %v2323_v37  ;;  %v4031_v24 = vunpack.c.0.s8 %v2331_v28 }
 0x5c7   : > { %9189 = vmatpush.bf16.msra.mxu1 %v7337_v38  ;;  %v7353_v22 = vpack.c.bf16 %v6117_v32, %v6115_v14  ;;  %v6047_v0 = vcvt.s32.f32 %v3999_v35  ;;  %v4033_v51 = vunpack.c.1.s8 %v2331_v28  ;;  %v4063_v54 = vunpack.c.0.s8 %v2339_v3  ;;  %v2327_v35 = vld [vmem:[%s10573_s20 + $0xc48] sm:$0xff] }
 0x5c8   : > { %v7369_v63 = vpack.c.bf16 %v6149_v53, %v6147_v52  ;;  %v6049_v46 = vcvt.s32.f32 %v4001_v26  ;;  %v6079_v4 = vcvt.s32.f32 %v4031_v24  ;;  %v4065_v17 = vunpack.c.1.s8 %v2339_v3  ;;  %v11780_v52 = vpop.f32.mrf.mxu0 }
 0x5c9   : > { %9202 = vmatpush.bf16.msra.mxu2 %v7353_v22  ;;  %v6081_v2 = vcvt.s32.f32 %v4033_v51  ;;  %v6111_v20 = vcvt.s32.f32 %v4063_v54  ;;  %v4095_v19 = vunpack.c.0.s8 %v2347_v45  ;;  %v4097_v50 = vunpack.c.1.s8 %v2347_v45  ;;  %v2335_v22 = vld [vmem:[%s10573_s20 + $0xc88] sm:$0xff] }
 0x5ca   : > { %9215 = vmatpush.bf16.msra.mxu3 %v7369_v63  ;;  %v7319_v40 = vpack.c.bf16 %v6049_v46, %v6047_v0  ;;  %v6113_v9 = vcvt.s32.f32 %v4065_v17  ;;  %v8937_v18 = vadd.f32 %v11749_v8, %v8924_v44  ;;  %v3995_v12 = vunpack.c.2.s8 %v2321_v21  ;;  %v2343_v63 = vld [vmem:[%s10573_s20 + $0xcc8] sm:$0xff] }
 0x5cb   : > { %v7335_v37 = vpack.c.bf16 %v6081_v2, %v6079_v4  ;;  %v6143_v55 = vcvt.s32.f32 %v4095_v19  ;;  %v6145_v25 = vcvt.s32.f32 %v4097_v50  ;;  %v3997_v58 = vunpack.c.3.s8 %v2321_v21 }
 0x5cc   : > { %9177 = vmatpush.bf16.msra.mxu0 %v7319_v40  ;;  %v7351_v42 = vpack.c.bf16 %v6113_v9, %v6111_v20  ;;  %v6043_v28 = vcvt.s32.f32 %v3995_v12  ;;  %v4027_v56 = vunpack.c.2.s8 %v2329_v13  ;;  %v4029_v34 = vunpack.c.3.s8 %v2329_v13 }
 0x5cd   : > { %9190 = vmatpush.bf16.msra.mxu1 %v7335_v37  ;;  %v7367_v43 = vpack.c.bf16 %v6145_v25, %v6143_v55  ;;  %v6045_v1 = vcvt.s32.f32 %v3997_v58  ;;  %v4059_v3 = vunpack.c.2.s8 %v2337_v59  ;;  %v4061_v30 = vunpack.c.3.s8 %v2337_v59 }
 0x5ce   : > { %9203 = vmatpush.bf16.msra.mxu2 %v7351_v42  ;;  %v6075_v48 = vcvt.s32.f32 %v4027_v56  ;;  %v6077_v8 = vcvt.s32.f32 %v4029_v34  ;;  %v4091_v60 = vunpack.c.2.s8 %v2345_v47  ;;  %v4093_v36 = vunpack.c.3.s8 %v2345_v47 }
 0x5cf   : > { %9216 = vmatpush.bf16.msra.mxu3 %v7367_v43  ;;  %v7317_v62 = vpack.c.bf16 %v6045_v1, %v6043_v28  ;;  %v6107_v57 = vcvt.s32.f32 %v4059_v3  ;;  %v6109_v49 = vcvt.s32.f32 %v4061_v30  ;;  %v8950_v31 = vadd.f32 %v11753_v61, %v8937_v18 }
 0x5d0   : > { %v7333_v45 = vpack.c.bf16 %v6077_v8, %v6075_v48  ;;  %v6139_v5 = vcvt.s32.f32 %v4091_v60  ;;  %v6141_v23 = vcvt.s32.f32 %v4093_v36  ;;  %v3991_v41 = vunpack.c.0.s8 %v2321_v21  ;;  %v8977_v30 = vpop.f32.mrf.mxu0 }
 0x5d1   : > { %9178 = vmatpush.bf16.msra.mxu0 %v7317_v62  ;;  %v7349_v33 = vpack.c.bf16 %v6109_v49, %v6107_v57  ;;  %v11776_v7 = vadd.f32 %v11755_v29, %v8950_v31  ;;  %v3993_v16 = vunpack.c.1.s8 %v2321_v21  ;;  %v4023_v10 = vunpack.c.0.s8 %v2329_v13  ;;  %v2357_v62 = vld [vmem:[%s10573_s20 + $0xd38] sm:$0xff] }
 0x5d2   : > { %9191 = vmatpush.bf16.msra.mxu1 %v7333_v45  ;;  %v7365_v11 = vpack.c.bf16 %v6141_v23, %v6139_v5  ;;  %v6039_v14 = vcvt.s32.f32 %v3991_v41  ;;  %v4025_v15 = vunpack.c.1.s8 %v2329_v13  ;;  %v4055_v6 = vunpack.c.0.s8 %v2337_v59  ;;  %v2365_v5 = vld [vmem:[%s10573_s20 + $0xd78] sm:$0xff]  ;;  %v11788_v23 = vpop.f32.mrf.mxu2  ;;  %v11790_v41 = vpop.f32.mrf.mxu3 }
 0x5d3   : > { %9204 = vmatpush.bf16.msra.mxu2 %v7349_v33  ;;  %v6041_v61 = vcvt.s32.f32 %v3993_v16  ;;  %v6071_v38 = vcvt.s32.f32 %v4023_v10  ;;  %v4057_v32 = vunpack.c.1.s8 %v2337_v59  ;;  %v4087_v44 = vunpack.c.0.s8 %v2345_v47  ;;  %v11784_v59 = vpop.f32.mrf.mxu1 }
 0x5d4   : > { %9217 = vmatpush.bf16.msra.mxu3 %v7365_v11  ;;  %v6073_v29 = vcvt.s32.f32 %v4025_v15  ;;  %v6103_v53 = vcvt.s32.f32 %v4055_v6  ;;  %v4089_v26 = vunpack.c.1.s8 %v2345_v47  ;;  %v3987_v24 = vunpack.c.2.s8 %v2319_v39  ;;  %v2373_v11 = vld [vmem:[%s10573_s20 + $0xdb8] sm:$0xff] }
 0x5d5   : > { %v7315_v0 = vpack.c.bf16 %v6041_v61, %v6039_v14  ;;  %v6105_v51 = vcvt.s32.f32 %v4057_v32  ;;  %v6135_v54 = vcvt.s32.f32 %v4087_v44  ;;  %v3989_v21 = vunpack.c.3.s8 %v2319_v39 }
 0x5d6   : > { %v7331_v46 = vpack.c.bf16 %v6073_v29, %v6071_v38  ;;  %v6137_v4 = vcvt.s32.f32 %v4089_v26  ;;  %v6035_v17 = vcvt.s32.f32 %v3987_v24  ;;  %v4019_v2 = vunpack.c.2.s8 %v2327_v35  ;;  %v2381_v29 = vld [vmem:[%s10573_s20 + $0xdf8] sm:$0xff] }
 0x5d7   : > { %9179 = vmatpush.bf16.msra.mxu0 %v7315_v0  ;;  %v7347_v20 = vpack.c.bf16 %v6105_v51, %v6103_v53  ;;  %v6037_v19 = vcvt.s32.f32 %v3989_v21  ;;  %v4021_v50 = vunpack.c.3.s8 %v2327_v35  ;;  %v4051_v13 = vunpack.c.2.s8 %v2335_v22 }
 0x5d8   : > { %9192 = vmatpush.bf16.msra.mxu1 %v7331_v46  ;;  %v7363_v40 = vpack.c.bf16 %v6137_v4, %v6135_v54  ;;  %v6067_v9 = vcvt.s32.f32 %v4019_v2  ;;  %v4053_v18 = vunpack.c.3.s8 %v2335_v22  ;;  %v4083_v12 = vunpack.c.2.s8 %v2343_v63 }
 0x5d9   : > { %9205 = vmatpush.bf16.msra.mxu2 %v7347_v20  ;;  %v7313_v37 = vpack.c.bf16 %v6037_v19, %v6035_v17  ;;  %v6069_v55 = vcvt.s32.f32 %v4021_v50  ;;  %v6099_v25 = vcvt.s32.f32 %v4051_v13  ;;  %v4085_v58 = vunpack.c.3.s8 %v2343_v63  ;;  %v12112_v20 = vld [vmem:[#allocation31_spill] sm:$0xff]  ;;  %v12113_v13 = vld [vmem:[#allocation32_spill] sm:$0xff] }
 0x5da   : > { %9218 = vmatpush.bf16.msra.mxu3 %v7363_v40  ;;  %v6101_v47 = vcvt.s32.f32 %v4053_v18  ;;  %v6131_v42 = vcvt.s32.f32 %v4083_v12  ;;  %v3983_v28 = vunpack.c.0.s8 %v2319_v39  ;;  %v3985_v56 = vunpack.c.1.s8 %v2319_v39 }
 0x5db   : > { %9180 = vmatpush.bf16.msra.mxu0 %v7313_v37  ;;  %v7329_v34 = vpack.c.bf16 %v6069_v55, %v6067_v9  ;;  %v6133_v43 = vcvt.s32.f32 %v4085_v58  ;;  %v4015_v1 = vunpack.c.0.s8 %v2327_v35  ;;  %v4017_v3 = vunpack.c.1.s8 %v2327_v35  ;;  %v8990_v53 = vpop.f32.mrf.mxu1  ;;  %v9016_v58 = vpop.f32.mrf.mxu3 }
 0x5dc   : > { %v7345_v48 = vpack.c.bf16 %v6101_v47, %v6099_v25  ;;  %v6031_v8 = vcvt.s32.f32 %v3983_v28  ;;  %v6033_v60 = vcvt.s32.f32 %v3985_v56  ;;  %v4047_v36 = vunpack.c.0.s8 %v2335_v22  ;;  %v9003_v25 = vpop.f32.mrf.mxu2  ;;  %v2361_v58 = vld [vmem:[%s10573_s20 + $0xd58] sm:$0xff] }
 0x5dd   : > { %9193 = vmatpush.bf16.msra.mxu1 %v7329_v34  ;;  %v7361_v57 = vpack.c.bf16 %v6133_v43, %v6131_v42  ;;  %v6063_v49 = vcvt.s32.f32 %v4015_v1  ;;  %v6065_v31 = vcvt.s32.f32 %v4017_v3  ;;  %v4049_v45 = vunpack.c.1.s8 %v2335_v22  ;;  %v12114_v42 = vld [vmem:[#allocation33_spill] sm:$0xff]  ;;  %v12115_v3 = vld [vmem:[#allocation34_spill] sm:$0xff] }
 0x5de   : > { %9206 = vmatpush.bf16.msra.mxu2 %v7345_v48  ;;  %v7311_v33 = vpack.c.bf16 %v6033_v60, %v6031_v8  ;;  %v6095_v16 = vcvt.s32.f32 %v4047_v36  ;;  %v4079_v10 = vunpack.c.0.s8 %v2343_v63  ;;  %v4081_v39 = vunpack.c.1.s8 %v2343_v63  ;;  %v2355_v43 = vld [vmem:[%s10573_s20 + $0xd28] sm:$0xff] }
 0x5df   : > { %9219 = vmatpush.bf16.msra.mxu3 %v7361_v57  ;;  %v7327_v14 = vpack.c.bf16 %v6065_v31, %v6063_v49  ;;  %v6097_v15 = vcvt.s32.f32 %v4049_v45  ;;  %v4139_v6 = vunpack.c.2.s8 %v2357_v62  ;;  %v4141_v61 = vunpack.c.3.s8 %v2357_v62  ;;  %v2363_v60 = vld [vmem:[%s10573_s20 + $0xd68] sm:$0xff] }
 0x5e0   : > { %9181 = vmatpush.bf16.msra.mxu0 %v7311_v33  ;;  %v6127_v38 = vcvt.s32.f32 %v4079_v10  ;;  %v6129_v32 = vcvt.s32.f32 %v4081_v39  ;;  %v4171_v44 = vunpack.c.2.s8 %v2365_v5  ;;  %v4173_v35 = vunpack.c.3.s8 %v2365_v5  ;;  %v2371_v31 = vld [vmem:[%s10573_s20 + $0xda8] sm:$0xff] }
 0x5e1   : > { %9194 = vmatpush.bf16.msra.mxu1 %v7327_v14  ;;  %v7343_v26 = vpack.c.bf16 %v6097_v15, %v6095_v16  ;;  %v6187_v24 = vcvt.s32.f32 %v4139_v6  ;;  %v6189_v22 = vcvt.s32.f32 %v4141_v61  ;;  %v4203_v0 = vunpack.c.2.s8 %v2373_v11  ;;  %v2379_v6 = vld [vmem:[%s10573_s20 + $0xde8] sm:$0xff] }
 0x5e2   : > { %v7359_v51 = vpack.c.bf16 %v6129_v32, %v6127_v38  ;;  %v6219_v54 = vcvt.s32.f32 %v4171_v44  ;;  %v6221_v21 = vcvt.s32.f32 %v4173_v35  ;;  %v4205_v63 = vunpack.c.3.s8 %v2373_v11 }
 0x5e3   : > { %9207 = vmatpush.bf16.msra.mxu2 %v7343_v26  ;;  %v7389_v46 = vpack.c.bf16 %v6189_v22, %v6187_v24  ;;  %v6251_v4 = vcvt.s32.f32 %v4203_v0  ;;  %v4235_v17 = vunpack.c.2.s8 %v2381_v29  ;;  %v4237_v2 = vunpack.c.3.s8 %v2381_v29  ;;  %9182 = vmatmul.bf16.vlgmr.msra.gmra.mxu0 %v12112_v20 }
 0x5e4   : > { %9220 = vmatpush.bf16.msra.mxu3 %v7359_v51  ;;  %v7405_v19 = vpack.c.bf16 %v6221_v21, %v6219_v54  ;;  %v6253_v50 = vcvt.s32.f32 %v4205_v63  ;;  %9195 = vmatmul.bf16.vlgmr.msra.gmra.mxu1 %v12113_v13  ;;  %v4135_v40 = vunpack.c.0.s8 %v2357_v62  ;;  %v4137_v9 = vunpack.c.1.s8 %v2357_v62 }
 0x5e5   : > { %9226 = vmatpush.bf16.msrb.mxu0 %v7389_v46  ;;  %v6283_v18 = vcvt.s32.f32 %v4235_v17  ;;  %v6285_v12 = vcvt.s32.f32 %v4237_v2  ;;  %v4167_v37 = vunpack.c.0.s8 %v2365_v5  ;;  %v4169_v55 = vunpack.c.1.s8 %v2365_v5 }
 0x5e6   : > { %9239 = vmatpush.bf16.msrb.mxu1 %v7405_v19  ;;  %v7421_v47 = vpack.c.bf16 %v6253_v50, %v6251_v4  ;;  %9208 = vmatmul.bf16.vlgmr.msra.gmra.mxu2 %v12114_v42  ;;  %v6183_v28 = vcvt.s32.f32 %v4135_v40  ;;  %v6185_v56 = vcvt.s32.f32 %v4137_v9  ;;  %v4199_v34 = vunpack.c.0.s8 %v2373_v11  ;;  %v2353_v40 = vld [vmem:[%s10573_s20 + $0xd18] sm:$0xff] }
 0x5e7   : > { %v7437_v1 = vpack.c.bf16 %v6285_v12, %v6283_v18  ;;  %9221 = vmatmul.bf16.vlgmr.msra.gmra.mxu3 %v12115_v3  ;;  %v6215_v30 = vcvt.s32.f32 %v4167_v37  ;;  %v6217_v48 = vcvt.s32.f32 %v4169_v55  ;;  %v4201_v8 = vunpack.c.1.s8 %v2373_v11 }
 0x5e8   : > { %9252 = vmatpush.bf16.msrb.mxu2 %v7421_v47  ;;  %v7387_v36 = vpack.c.bf16 %v6185_v56, %v6183_v28  ;;  %v6247_v62 = vcvt.s32.f32 %v4199_v34  ;;  %v4231_v57 = vunpack.c.0.s8 %v2381_v29  ;;  %v4233_v49 = vunpack.c.1.s8 %v2381_v29  ;;  %v2369_v34 = vld [vmem:[%s10573_s20 + $0xd98] sm:$0xff] }
 0x5e9   : > { %9265 = vmatpush.bf16.msrb.mxu3 %v7437_v1  ;;  %v7403_v45 = vpack.c.bf16 %v6217_v48, %v6215_v30  ;;  %v6249_v5 = vcvt.s32.f32 %v4201_v8  ;;  %v4131_v33 = vunpack.c.2.s8 %v2355_v43  ;;  %v4133_v16 = vunpack.c.3.s8 %v2355_v43  ;;  %v2377_v48 = vld [vmem:[%s10573_s20 + $0xdd8] sm:$0xff] }
 0x5ea   : > { %9227 = vmatpush.bf16.msrb.mxu0 %v7387_v36  ;;  %v6279_v10 = vcvt.s32.f32 %v4231_v57  ;;  %v6281_v39 = vcvt.s32.f32 %v4233_v49  ;;  %v4163_v14 = vunpack.c.2.s8 %v2363_v60  ;;  %v4165_v15 = vunpack.c.3.s8 %v2363_v60 }
 0x5eb   : > { %9240 = vmatpush.bf16.msrb.mxu1 %v7403_v45  ;;  %v7419_v11 = vpack.c.bf16 %v6249_v5, %v6247_v62  ;;  %v6179_v61 = vcvt.s32.f32 %v4131_v33  ;;  %v6181_v38 = vcvt.s32.f32 %v4133_v16  ;;  %v4195_v32 = vunpack.c.2.s8 %v2371_v31 }
 0x5ec   : > { %v7435_v44 = vpack.c.bf16 %v6281_v39, %v6279_v10  ;;  %v6211_v35 = vcvt.s32.f32 %v4163_v14  ;;  %v6213_v29 = vcvt.s32.f32 %v4165_v15  ;;  %v4197_v53 = vunpack.c.3.s8 %v2371_v31 }
 0x5ed   : > { %9253 = vmatpush.bf16.msrb.mxu2 %v7419_v11  ;;  %v7385_v26 = vpack.c.bf16 %v6181_v38, %v6179_v61  ;;  %v6243_v24 = vcvt.s32.f32 %v4195_v32  ;;  %v4227_v22 = vunpack.c.2.s8 %v2379_v6  ;;  %v4229_v0 = vunpack.c.3.s8 %v2379_v6 }
 0x5ee   : > { %9266 = vmatpush.bf16.msrb.mxu3 %v7435_v44  ;;  %v7401_v51 = vpack.c.bf16 %v6213_v29, %v6211_v35  ;;  %v6245_v54 = vcvt.s32.f32 %v4197_v53  ;;  %v8976_v21 = vadd.f32 %v11780_v52, %v11776_v7  ;;  %v4127_v63 = vunpack.c.0.s8 %v2355_v43  ;;  %v2351_v53 = vld [vmem:[%s10573_s20 + $0xd08] sm:$0xff] }
 0x5ef   : > { %9228 = vmatpush.bf16.msrb.mxu0 %v7385_v26  ;;  %v6275_v46 = vcvt.s32.f32 %v4227_v22  ;;  %v6277_v4 = vcvt.s32.f32 %v4229_v0  ;;  %v4129_v17 = vunpack.c.1.s8 %v2355_v43  ;;  %v4159_v2 = vunpack.c.0.s8 %v2363_v60 }
 0x5f0   : > { %9241 = vmatpush.bf16.msrb.mxu1 %v7401_v51  ;;  %v7417_v20 = vpack.c.bf16 %v6245_v54, %v6243_v24  ;;  %v6175_v19 = vcvt.s32.f32 %v4127_v63  ;;  %v4161_v50 = vunpack.c.1.s8 %v2363_v60  ;;  %v4191_v13 = vunpack.c.0.s8 %v2371_v31  ;;  %v2359_v63 = vld [vmem:[%s10573_s20 + $0xd48] sm:$0xff] }
 0x5f1   : > { %v7433_v9 = vpack.c.bf16 %v6277_v4, %v6275_v46  ;;  %v6177_v18 = vcvt.s32.f32 %v4129_v17  ;;  %v6207_v12 = vcvt.s32.f32 %v4159_v2  ;;  %v4193_v37 = vunpack.c.1.s8 %v2371_v31  ;;  %v11815_v46 = vpop.f32.mrf.mxu0 }
 0x5f2   : > { %9254 = vmatpush.bf16.msrb.mxu2 %v7417_v20  ;;  %v6209_v7 = vcvt.s32.f32 %v4161_v50  ;;  %v6239_v52 = vcvt.s32.f32 %v4191_v13  ;;  %v4223_v55 = vunpack.c.0.s8 %v2379_v6  ;;  %v4225_v25 = vunpack.c.1.s8 %v2379_v6  ;;  %v2367_v20 = vld [vmem:[%s10573_s20 + $0xd88] sm:$0xff] }
 0x5f3   : > { %9267 = vmatpush.bf16.msrb.mxu3 %v7433_v9  ;;  %v7383_v47 = vpack.c.bf16 %v6177_v18, %v6175_v19  ;;  %v6241_v42 = vcvt.s32.f32 %v4193_v37  ;;  %v8989_v28 = vadd.f32 %v11784_v59, %v8976_v21  ;;  %v4123_v56 = vunpack.c.2.s8 %v2353_v40  ;;  %v2375_v9 = vld [vmem:[%s10573_s20 + $0xdc8] sm:$0xff] }
 0x5f4   : > { %v7399_v43 = vpack.c.bf16 %v6209_v7, %v6207_v12  ;;  %v6271_v1 = vcvt.s32.f32 %v4223_v55  ;;  %v6273_v3 = vcvt.s32.f32 %v4225_v25  ;;  %v4125_v30 = vunpack.c.3.s8 %v2353_v40 }
 0x5f5   : > { %9229 = vmatpush.bf16.msrb.mxu0 %v7383_v47  ;;  %v7415_v8 = vpack.c.bf16 %v6241_v42, %v6239_v52  ;;  %v6171_v60 = vcvt.s32.f32 %v4123_v56  ;;  %v4155_v36 = vunpack.c.2.s8 %v2361_v58  ;;  %v4157_v62 = vunpack.c.3.s8 %v2361_v58 }
 0x5f6   : > { %9242 = vmatpush.bf16.msrb.mxu1 %v7399_v43  ;;  %v7431_v57 = vpack.c.bf16 %v6273_v3, %v6271_v1  ;;  %v6173_v49 = vcvt.s32.f32 %v4125_v30  ;;  %v4187_v31 = vunpack.c.2.s8 %v2369_v34  ;;  %v4189_v45 = vunpack.c.3.s8 %v2369_v34 }
 0x5f7   : > { %9255 = vmatpush.bf16.msrb.mxu2 %v7415_v8  ;;  %v6203_v5 = vcvt.s32.f32 %v4155_v36  ;;  %v6205_v59 = vcvt.s32.f32 %v4157_v62  ;;  %v4219_v33 = vunpack.c.2.s8 %v2377_v48  ;;  %v4221_v16 = vunpack.c.3.s8 %v2377_v48 }
 0x5f8   : > { %9268 = vmatpush.bf16.msrb.mxu3 %v7431_v57  ;;  %v7381_v10 = vpack.c.bf16 %v6173_v49, %v6171_v60  ;;  %v6235_v39 = vcvt.s32.f32 %v4187_v31  ;;  %v6237_v14 = vcvt.s32.f32 %v4189_v45  ;;  %v9002_v15 = vadd.f32 %v11788_v23, %v8989_v28 }
 0x5f9   : > { %v7397_v6 = vpack.c.bf16 %v6205_v59, %v6203_v5  ;;  %v6267_v11 = vcvt.s32.f32 %v4219_v33  ;;  %v6269_v61 = vcvt.s32.f32 %v4221_v16  ;;  %v4119_v38 = vunpack.c.0.s8 %v2353_v40  ;;  %v9029_v45 = vpop.f32.mrf.mxu0 }
 0x5fa   : > { %9230 = vmatpush.bf16.msrb.mxu0 %v7381_v10  ;;  %v7413_v32 = vpack.c.bf16 %v6237_v14, %v6235_v39  ;;  %v11811_v44 = vadd.f32 %v11790_v41, %v9002_v15  ;;  %v4121_v35 = vunpack.c.1.s8 %v2353_v40  ;;  %v4151_v29 = vunpack.c.0.s8 %v2361_v58  ;;  %v2389_v10 = vld [vmem:[%s10573_s20 + $0xe38] sm:$0xff] }
 0x5fb   : > { %9243 = vmatpush.bf16.msrb.mxu1 %v7397_v6  ;;  %v7429_v26 = vpack.c.bf16 %v6269_v61, %v6267_v11  ;;  %v6167_v24 = vcvt.s32.f32 %v4119_v38  ;;  %v4153_v22 = vunpack.c.1.s8 %v2361_v58  ;;  %v4183_v0 = vunpack.c.0.s8 %v2369_v34  ;;  %v2397_v11 = vld [vmem:[%s10573_s20 + $0xe78] sm:$0xff]  ;;  %v11823_v61 = vpop.f32.mrf.mxu2  ;;  %v11825_v38 = vpop.f32.mrf.mxu3 }
 0x5fc   : > { %9256 = vmatpush.bf16.msrb.mxu2 %v7413_v32  ;;  %v6169_v23 = vcvt.s32.f32 %v4121_v35  ;;  %v6199_v51 = vcvt.s32.f32 %v4151_v29  ;;  %v4185_v54 = vunpack.c.1.s8 %v2369_v34  ;;  %v4215_v21 = vunpack.c.0.s8 %v2377_v48  ;;  %v11819_v34 = vpop.f32.mrf.mxu1 }
 0x5fd   : > { %9269 = vmatpush.bf16.msrb.mxu3 %v7429_v26  ;;  %v6201_v41 = vcvt.s32.f32 %v4153_v22  ;;  %v6231_v4 = vcvt.s32.f32 %v4183_v0  ;;  %v4217_v17 = vunpack.c.1.s8 %v2377_v48  ;;  %v4115_v2 = vunpack.c.2.s8 %v2351_v53  ;;  %v2405_v26 = vld [vmem:[%s10573_s20 + $0xeb8] sm:$0xff] }
 0x5fe   : > { %v7379_v19 = vpack.c.bf16 %v6169_v23, %v6167_v24  ;;  %v6233_v50 = vcvt.s32.f32 %v4185_v54  ;;  %v6263_v13 = vcvt.s32.f32 %v4215_v21  ;;  %v4117_v40 = vunpack.c.3.s8 %v2351_v53 }
 0x5ff   : > { %v7395_v18 = vpack.c.bf16 %v6201_v41, %v6199_v51  ;;  %v6265_v12 = vcvt.s32.f32 %v4217_v17  ;;  %v6163_v37 = vcvt.s32.f32 %v4115_v2  ;;  %v4147_v7 = vunpack.c.2.s8 %v2359_v63  ;;  %v2413_v41 = vld [vmem:[%s10573_s20 + $0xef8] sm:$0xff] }
 0x600   : > { %9231 = vmatpush.bf16.msrb.mxu0 %v7379_v19  ;;  %v7411_v52 = vpack.c.bf16 %v6233_v50, %v6231_v4  ;;  %v6165_v55 = vcvt.s32.f32 %v4117_v40  ;;  %v4149_v25 = vunpack.c.3.s8 %v2359_v63  ;;  %v4179_v58 = vunpack.c.2.s8 %v2367_v20 }
 0x601   : > { %9244 = vmatpush.bf16.msrb.mxu1 %v7395_v18  ;;  %v7427_v47 = vpack.c.bf16 %v6265_v12, %v6263_v13  ;;  %v6195_v42 = vcvt.s32.f32 %v4147_v7  ;;  %v4181_v28 = vunpack.c.3.s8 %v2367_v20  ;;  %v4211_v56 = vunpack.c.2.s8 %v2375_v9 }
 0x602   : > { %9257 = vmatpush.bf16.msrb.mxu2 %v7411_v52  ;;  %v7377_v43 = vpack.c.bf16 %v6165_v55, %v6163_v37  ;;  %v6197_v1 = vcvt.s32.f32 %v4149_v25  ;;  %v6227_v3 = vcvt.s32.f32 %v4179_v58  ;;  %v4213_v30 = vunpack.c.3.s8 %v2375_v9  ;;  %v12116_v52 = vld [vmem:[#allocation35_spill] sm:$0xff]  ;;  %v12117_v58 = vld [vmem:[#allocation36_spill] sm:$0xff] }
 0x603   : > { %9270 = vmatpush.bf16.msrb.mxu3 %v7427_v47  ;;  %v6229_v48 = vcvt.s32.f32 %v4181_v28  ;;  %v6259_v8 = vcvt.s32.f32 %v4211_v56  ;;  %v4111_v60 = vunpack.c.0.s8 %v2351_v53  ;;  %v4113_v36 = vunpack.c.1.s8 %v2351_v53 }
 0x604   : > { %9232 = vmatpush.bf16.msrb.mxu0 %v7377_v43  ;;  %v7393_v62 = vpack.c.bf16 %v6197_v1, %v6195_v42  ;;  %v6261_v57 = vcvt.s32.f32 %v4213_v30  ;;  %v4143_v49 = vunpack.c.0.s8 %v2359_v63  ;;  %v4145_v31 = vunpack.c.1.s8 %v2359_v63  ;;  %v9042_v4 = vpop.f32.mrf.mxu1  ;;  %v9068_v30 = vpop.f32.mrf.mxu3 }
 0x605   : > { %v7409_v5 = vpack.c.bf16 %v6229_v48, %v6227_v3  ;;  %v6159_v59 = vcvt.s32.f32 %v4111_v60  ;;  %v6161_v33 = vcvt.s32.f32 %v4113_v36  ;;  %v4175_v16 = vunpack.c.0.s8 %v2367_v20  ;;  %v9055_v3 = vpop.f32.mrf.mxu2  ;;  %v2393_v30 = vld [vmem:[%s10573_s20 + $0xe58] sm:$0xff] }
 0x606   : > { %9245 = vmatpush.bf16.msrb.mxu1 %v7393_v62  ;;  %v7425_v39 = vpack.c.bf16 %v6261_v57, %v6259_v8  ;;  %v6191_v14 = vcvt.s32.f32 %v4143_v49  ;;  %v6193_v15 = vcvt.s32.f32 %v4145_v31  ;;  %v4177_v6 = vunpack.c.1.s8 %v2367_v20  ;;  %v12118_v8 = vld [vmem:[#allocation37_spill] sm:$0xff]  ;;  %v12119_v31 = vld [vmem:[#allocation38_spill] sm:$0xff] }
 0x607   : > { %9258 = vmatpush.bf16.msrb.mxu2 %v7409_v5  ;;  %v7375_v32 = vpack.c.bf16 %v6161_v33, %v6159_v59  ;;  %v6223_v35 = vcvt.s32.f32 %v4175_v16  ;;  %v4207_v29 = vunpack.c.0.s8 %v2375_v9  ;;  %v4209_v53 = vunpack.c.1.s8 %v2375_v9  ;;  %v2387_v57 = vld [vmem:[%s10573_s20 + $0xe28] sm:$0xff] }
 0x608   : > { %9271 = vmatpush.bf16.msrb.mxu3 %v7425_v39  ;;  %v7391_v24 = vpack.c.bf16 %v6193_v15, %v6191_v14  ;;  %v6225_v22 = vcvt.s32.f32 %v4177_v6  ;;  %v4267_v0 = vunpack.c.2.s8 %v2389_v10  ;;  %v4269_v23 = vunpack.c.3.s8 %v2389_v10  ;;  %v2395_v33 = vld [vmem:[%s10573_s20 + $0xe68] sm:$0xff] }
 0x609   : > { %9233 = vmatpush.bf16.msrb.mxu0 %v7375_v32  ;;  %v6255_v51 = vcvt.s32.f32 %v4207_v29  ;;  %v6257_v54 = vcvt.s32.f32 %v4209_v53  ;;  %v4299_v21 = vunpack.c.2.s8 %v2397_v11  ;;  %v4301_v63 = vunpack.c.3.s8 %v2397_v11  ;;  %v2403_v15 = vld [vmem:[%s10573_s20 + $0xea8] sm:$0xff] }
 0x60a   : > { %9246 = vmatpush.bf16.msrb.mxu1 %v7391_v24  ;;  %v7407_v17 = vpack.c.bf16 %v6225_v22, %v6223_v35  ;;  %v6315_v2 = vcvt.s32.f32 %v4267_v0  ;;  %v6317_v20 = vcvt.s32.f32 %v4269_v23  ;;  %v4331_v19 = vunpack.c.2.s8 %v2405_v26  ;;  %v2411_v0 = vld [vmem:[%s10573_s20 + $0xee8] sm:$0xff] }
 0x60b   : > { %v7423_v50 = vpack.c.bf16 %v6257_v54, %v6255_v51  ;;  %v6347_v13 = vcvt.s32.f32 %v4299_v21  ;;  %v6349_v40 = vcvt.s32.f32 %v4301_v63  ;;  %v4333_v9 = vunpack.c.3.s8 %v2405_v26 }
 0x60c   : > { %9259 = vmatpush.bf16.msrb.mxu2 %v7407_v17  ;;  %v7453_v18 = vpack.c.bf16 %v6317_v20, %v6315_v2  ;;  %v6379_v12 = vcvt.s32.f32 %v4331_v19  ;;  %v4363_v37 = vunpack.c.2.s8 %v2413_v41  ;;  %v4365_v7 = vunpack.c.3.s8 %v2413_v41  ;;  %9234 = vmatmul.bf16.vlgmr.msrb.gmra.mxu0 %v12116_v52 }
 0x60d   : > { %9272 = vmatpush.bf16.msrb.mxu3 %v7423_v50  ;;  %v7469_v55 = vpack.c.bf16 %v6349_v40, %v6347_v13  ;;  %v6381_v25 = vcvt.s32.f32 %v4333_v9  ;;  %9247 = vmatmul.bf16.vlgmr.msrb.gmra.mxu1 %v12117_v58  ;;  %v4263_v47 = vunpack.c.0.s8 %v2389_v10  ;;  %v4265_v42 = vunpack.c.1.s8 %v2389_v10 }
 0x60e   : > { %9278 = vmatpush.bf16.msra.mxu0 %v7453_v18  ;;  %v6411_v28 = vcvt.s32.f32 %v4363_v37  ;;  %v6413_v56 = vcvt.s32.f32 %v4365_v7  ;;  %v4295_v43 = vunpack.c.0.s8 %v2397_v11  ;;  %v4297_v1 = vunpack.c.1.s8 %v2397_v11 }
 0x60f   : > { %9291 = vmatpush.bf16.msra.mxu1 %v7469_v55  ;;  %v7485_v48 = vpack.c.bf16 %v6381_v25, %v6379_v12  ;;  %9260 = vmatmul.bf16.vlgmr.msrb.gmra.mxu2 %v12118_v8  ;;  %v6311_v60 = vcvt.s32.f32 %v4263_v47  ;;  %v6313_v36 = vcvt.s32.f32 %v4265_v42  ;;  %v4327_v62 = vunpack.c.0.s8 %v2405_v26  ;;  %v2385_v47 = vld [vmem:[%s10573_s20 + $0xe18] sm:$0xff] }
 0x610   : > { %v7501_v49 = vpack.c.bf16 %v6413_v56, %v6411_v28  ;;  %9273 = vmatmul.bf16.vlgmr.msrb.gmra.mxu3 %v12119_v31  ;;  %v6343_v45 = vcvt.s32.f32 %v4295_v43  ;;  %v6345_v5 = vcvt.s32.f32 %v4297_v1  ;;  %v4329_v59 = vunpack.c.1.s8 %v2405_v26 }
 0x611   : > { %9304 = vmatpush.bf16.msra.mxu2 %v7485_v48  ;;  %v7451_v16 = vpack.c.bf16 %v6313_v36, %v6311_v60  ;;  %v6375_v10 = vcvt.s32.f32 %v4327_v62  ;;  %v4359_v39 = vunpack.c.0.s8 %v2413_v41  ;;  %v4361_v14 = vunpack.c.1.s8 %v2413_v41  ;;  %v2401_v62 = vld [vmem:[%s10573_s20 + $0xe98] sm:$0xff] }
 0x612   : > { %9317 = vmatpush.bf16.msra.mxu3 %v7501_v49  ;;  %v7467_v6 = vpack.c.bf16 %v6345_v5, %v6343_v45  ;;  %v6377_v11 = vcvt.s32.f32 %v4329_v59  ;;  %v4259_v32 = vunpack.c.2.s8 %v2387_v57  ;;  %v4261_v35 = vunpack.c.3.s8 %v2387_v57  ;;  %v2409_v5 = vld [vmem:[%s10573_s20 + $0xed8] sm:$0xff] }
 0x613   : > { %9279 = vmatpush.bf16.msra.mxu0 %v7451_v16  ;;  %v6407_v29 = vcvt.s32.f32 %v4359_v39  ;;  %v6409_v53 = vcvt.s32.f32 %v4361_v14  ;;  %v4291_v24 = vunpack.c.2.s8 %v2395_v33  ;;  %v4293_v22 = vunpack.c.3.s8 %v2395_v33 }
 0x614   : > { %9292 = vmatpush.bf16.msra.mxu1 %v7467_v6  ;;  %v7483_v26 = vpack.c.bf16 %v6377_v11, %v6375_v10  ;;  %v6307_v23 = vcvt.s32.f32 %v4259_v32  ;;  %v6309_v51 = vcvt.s32.f32 %v4261_v35  ;;  %v4323_v54 = vunpack.c.2.s8 %v2403_v15 }
 0x615   : > { %v7499_v21 = vpack.c.bf16 %v6409_v53, %v6407_v29  ;;  %v6339_v63 = vcvt.s32.f32 %v4291_v24  ;;  %v6341_v41 = vcvt.s32.f32 %v4293_v22  ;;  %v4325_v4 = vunpack.c.3.s8 %v2403_v15 }
 0x616   : > { %9305 = vmatpush.bf16.msra.mxu2 %v7483_v26  ;;  %v7449_v17 = vpack.c.bf16 %v6309_v51, %v6307_v23  ;;  %v6371_v2 = vcvt.s32.f32 %v4323_v54  ;;  %v4355_v20 = vunpack.c.2.s8 %v2411_v0  ;;  %v4357_v19 = vunpack.c.3.s8 %v2411_v0 }
 0x617   : > { %9318 = vmatpush.bf16.msra.mxu3 %v7499_v21  ;;  %v7465_v50 = vpack.c.bf16 %v6341_v41, %v6339_v63  ;;  %v6373_v13 = vcvt.s32.f32 %v4325_v4  ;;  %v9028_v40 = vadd.f32 %v11815_v46, %v11811_v44  ;;  %v4255_v9 = vunpack.c.0.s8 %v2387_v57  ;;  %v2383_v4 = vld [vmem:[%s10573_s20 + $0xe08] sm:$0xff] }
 0x618   : > { %9280 = vmatpush.bf16.msra.mxu0 %v7449_v17  ;;  %v6403_v18 = vcvt.s32.f32 %v4355_v20  ;;  %v6405_v12 = vcvt.s32.f32 %v4357_v19  ;;  %v4257_v37 = vunpack.c.1.s8 %v2387_v57  ;;  %v4287_v7 = vunpack.c.0.s8 %v2395_v33 }
 0x619   : > { %9293 = vmatpush.bf16.msra.mxu1 %v7465_v50  ;;  %v7481_v52 = vpack.c.bf16 %v6373_v13, %v6371_v2  ;;  %v6303_v55 = vcvt.s32.f32 %v4255_v9  ;;  %v4289_v25 = vunpack.c.1.s8 %v2395_v33  ;;  %v4319_v58 = vunpack.c.0.s8 %v2403_v15  ;;  %v2391_v9 = vld [vmem:[%s10573_s20 + $0xe48] sm:$0xff] }
 0x61a   : > { %v7497_v42 = vpack.c.bf16 %v6405_v12, %v6403_v18  ;;  %v6305_v28 = vcvt.s32.f32 %v4257_v37  ;;  %v6335_v56 = vcvt.s32.f32 %v4287_v7  ;;  %v4321_v43 = vunpack.c.1.s8 %v2403_v15  ;;  %v11850_v18 = vpop.f32.mrf.mxu0 }
 0x61b   : > { %9306 = vmatpush.bf16.msra.mxu2 %v7481_v52  ;;  %v6337_v44 = vcvt.s32.f32 %v4289_v25  ;;  %v6367_v46 = vcvt.s32.f32 %v4319_v58  ;;  %v4351_v1 = vunpack.c.0.s8 %v2411_v0  ;;  %v4353_v3 = vunpack.c.1.s8 %v2411_v0  ;;  %v2399_v52 = vld [vmem:[%s10573_s20 + $0xe88] sm:$0xff] }
 0x61c   : > { %9319 = vmatpush.bf16.msra.mxu3 %v7497_v42  ;;  %v7447_v48 = vpack.c.bf16 %v6305_v28, %v6303_v55  ;;  %v6369_v8 = vcvt.s32.f32 %v4321_v43  ;;  %v9041_v60 = vadd.f32 %v11819_v34, %v9028_v40  ;;  %v4251_v36 = vunpack.c.2.s8 %v2385_v47  ;;  %v2407_v42 = vld [vmem:[%s10573_s20 + $0xec8] sm:$0xff] }
 0x61d   : > { %v7463_v57 = vpack.c.bf16 %v6337_v44, %v6335_v56  ;;  %v6399_v49 = vcvt.s32.f32 %v4351_v1  ;;  %v6401_v31 = vcvt.s32.f32 %v4353_v3  ;;  %v4253_v45 = vunpack.c.3.s8 %v2385_v47 }
 0x61e   : > { %9281 = vmatpush.bf16.msra.mxu0 %v7447_v48  ;;  %v7479_v59 = vpack.c.bf16 %v6369_v8, %v6367_v46  ;;  %v6299_v33 = vcvt.s32.f32 %v4251_v36  ;;  %v4283_v16 = vunpack.c.2.s8 %v2393_v30  ;;  %v4285_v10 = vunpack.c.3.s8 %v2393_v30 }
 0x61f   : > { %9294 = vmatpush.bf16.msra.mxu1 %v7463_v57  ;;  %v7495_v39 = vpack.c.bf16 %v6401_v31, %v6399_v49  ;;  %v6301_v14 = vcvt.s32.f32 %v4253_v45  ;;  %v4315_v15 = vunpack.c.2.s8 %v2401_v62  ;;  %v4317_v6 = vunpack.c.3.s8 %v2401_v62 }
 0x620   : > { %9307 = vmatpush.bf16.msra.mxu2 %v7479_v59  ;;  %v6331_v11 = vcvt.s32.f32 %v4283_v16  ;;  %v6333_v34 = vcvt.s32.f32 %v4285_v10  ;;  %v4347_v32 = vunpack.c.2.s8 %v2409_v5  ;;  %v4349_v35 = vunpack.c.3.s8 %v2409_v5 }
 0x621   : > { %9320 = vmatpush.bf16.msra.mxu3 %v7495_v39  ;;  %v7445_v29 = vpack.c.bf16 %v6301_v14, %v6299_v33  ;;  %v6363_v53 = vcvt.s32.f32 %v4315_v15  ;;  %v6365_v24 = vcvt.s32.f32 %v4317_v6  ;;  %v9054_v22 = vadd.f32 %v11823_v61, %v9041_v60 }
 0x622   : > { %v7461_v0 = vpack.c.bf16 %v6333_v34, %v6331_v11  ;;  %v6395_v26 = vcvt.s32.f32 %v4347_v32  ;;  %v6397_v23 = vcvt.s32.f32 %v4349_v35  ;;  %v4247_v51 = vunpack.c.0.s8 %v2385_v47  ;;  %v9081_v6 = vpop.f32.mrf.mxu0 }
 0x623   : > { %9282 = vmatpush.bf16.msra.mxu0 %v7445_v29  ;;  %v7477_v54 = vpack.c.bf16 %v6365_v24, %v6363_v53  ;;  %v11846_v21 = vadd.f32 %v11825_v38, %v9054_v22  ;;  %v4249_v63 = vunpack.c.1.s8 %v2385_v47  ;;  %v4279_v41 = vunpack.c.0.s8 %v2393_v30  ;;  %v2421_v29 = vld [vmem:[%s10573_s20 + $0xf38] sm:$0xff] }
 0x624   : > { %9295 = vmatpush.bf16.msra.mxu1 %v7461_v0  ;;  %v7493_v17 = vpack.c.bf16 %v6397_v23, %v6395_v26  ;;  %v6295_v2 = vcvt.s32.f32 %v4247_v51  ;;  %v4281_v20 = vunpack.c.1.s8 %v2393_v30  ;;  %v4311_v19 = vunpack.c.0.s8 %v2401_v62  ;;  %v11858_v26 = vld [vmem:[%s10573_s20 + $0xf78] sm:$0xff]  ;;  %v11860_v23 = vpop.f32.mrf.mxu2  ;;  %v11862_v51 = vpop.f32.mrf.mxu3 }
 0x625   : > { %9308 = vmatpush.bf16.msra.mxu2 %v7477_v54  ;;  %v6297_v61 = vcvt.s32.f32 %v4249_v63  ;;  %v6327_v50 = vcvt.s32.f32 %v4279_v41  ;;  %v4313_v13 = vunpack.c.1.s8 %v2401_v62  ;;  %v4343_v40 = vunpack.c.0.s8 %v2409_v5  ;;  %v11854_v62 = vpop.f32.mrf.mxu1 }
 0x626   : > { %9321 = vmatpush.bf16.msra.mxu3 %v7493_v17  ;;  %v6329_v38 = vcvt.s32.f32 %v4281_v20  ;;  %v6359_v12 = vcvt.s32.f32 %v4311_v19  ;;  %v4345_v37 = vunpack.c.1.s8 %v2409_v5  ;;  %v4243_v7 = vunpack.c.2.s8 %v2383_v4  ;;  %v11865_v17 = vld [vmem:[%s10573_s20 + $0xfb8] sm:$0xff] }
 0x627   : > { %v7443_v55 = vpack.c.bf16 %v6297_v61, %v6295_v2  ;;  %v6361_v25 = vcvt.s32.f32 %v4313_v13  ;;  %v6391_v58 = vcvt.s32.f32 %v4343_v40  ;;  %v4245_v47 = vunpack.c.3.s8 %v2383_v4 }
 0x628   : > { %v7459_v28 = vpack.c.bf16 %v6329_v38, %v6327_v50  ;;  %v6393_v56 = vcvt.s32.f32 %v4345_v37  ;;  %v6291_v43 = vcvt.s32.f32 %v4243_v7  ;;  %v4275_v44 = vunpack.c.2.s8 %v2391_v9  ;;  %v2445_v38 = vld [vmem:[%s10573_s20 + $0xff8] sm:$0xff] }
 0x629   : > { %9283 = vmatpush.bf16.msra.mxu0 %v7443_v55  ;;  %v7475_v46 = vpack.c.bf16 %v6361_v25, %v6359_v12  ;;  %v6293_v1 = vcvt.s32.f32 %v4245_v47  ;;  %v4277_v3 = vunpack.c.3.s8 %v2391_v9  ;;  %v4307_v30 = vunpack.c.2.s8 %v2399_v52 }
 0x62a   : > { %9296 = vmatpush.bf16.msra.mxu1 %v7459_v28  ;;  %v7491_v48 = vpack.c.bf16 %v6393_v56, %v6391_v58  ;;  %v6323_v8 = vcvt.s32.f32 %v4275_v44  ;;  %v4309_v60 = vunpack.c.3.s8 %v2399_v52  ;;  %v4339_v36 = vunpack.c.2.s8 %v2407_v42 }
 0x62b   : > { %9309 = vmatpush.bf16.msra.mxu2 %v7475_v46  ;;  %v7441_v57 = vpack.c.bf16 %v6293_v1, %v6291_v43  ;;  %v6325_v49 = vcvt.s32.f32 %v4277_v3  ;;  %v6355_v31 = vcvt.s32.f32 %v4307_v30  ;;  %v4341_v45 = vunpack.c.3.s8 %v2407_v42  ;;  %v9751_v46 = vld [vmem:[#allocation1] sm:$0xff]  ;;  %v9752_v30 = vld [vmem:[#allocation1 + $0x9] sm:$0xff] }
 0x62c   : > { %9322 = vmatpush.bf16.msra.mxu3 %v7491_v48  ;;  %v6357_v5 = vcvt.s32.f32 %v4309_v60  ;;  %v6387_v59 = vcvt.s32.f32 %v4339_v36  ;;  %v4239_v33 = vunpack.c.0.s8 %v2383_v4  ;;  %v4241_v16 = vunpack.c.1.s8 %v2383_v4 }
 0x62d   : > { %9284 = vmatpush.bf16.msra.mxu0 %v7441_v57  ;;  %v7457_v10 = vpack.c.bf16 %v6325_v49, %v6323_v8  ;;  %v6389_v39 = vcvt.s32.f32 %v4341_v45  ;;  %v4271_v14 = vunpack.c.0.s8 %v2391_v9  ;;  %v4273_v15 = vunpack.c.1.s8 %v2391_v9  ;;  %v9094_v12 = vpop.f32.mrf.mxu1  ;;  %v9120_v45 = vpop.f32.mrf.mxu3 }
 0x62e   : > { %v7473_v11 = vpack.c.bf16 %v6357_v5, %v6355_v31  ;;  %v6287_v34 = vcvt.s32.f32 %v4239_v33  ;;  %v6289_v32 = vcvt.s32.f32 %v4241_v16  ;;  %v4303_v35 = vunpack.c.0.s8 %v2399_v52  ;;  %v9107_v31 = vpop.f32.mrf.mxu2  ;;  %v2425_v45 = vld [vmem:[%s10573_s20 + $0xf58] sm:$0xff] }
 0x62f   : > { %9297 = vmatpush.bf16.msra.mxu1 %v7457_v10  ;;  %v7489_v53 = vpack.c.bf16 %v6389_v39, %v6387_v59  ;;  %v6319_v24 = vcvt.s32.f32 %v4271_v14  ;;  %v6321_v22 = vcvt.s32.f32 %v4273_v15  ;;  %v4305_v0 = vunpack.c.1.s8 %v2399_v52  ;;  %v9753_v59 = vld [vmem:[#allocation1 + $0x12] sm:$0xff]  ;;  %v9754_v15 = vld [vmem:[#allocation1 + $0x1b] sm:$0xff] }
 0x630   : > { %9310 = vmatpush.bf16.msra.mxu2 %v7473_v11  ;;  %v7439_v54 = vpack.c.bf16 %v6289_v32, %v6287_v34  ;;  %v6351_v63 = vcvt.s32.f32 %v4303_v35  ;;  %v4335_v41 = vunpack.c.0.s8 %v2407_v42  ;;  %v4337_v4 = vunpack.c.1.s8 %v2407_v42  ;;  %v2419_v39 = vld [vmem:[%s10573_s20 + $0xf28] sm:$0xff] }
 0x631   : > { %9323 = vmatpush.bf16.msra.mxu3 %v7489_v53  ;;  %v7455_v2 = vpack.c.bf16 %v6321_v22, %v6319_v24  ;;  %v6353_v20 = vcvt.s32.f32 %v4305_v0  ;;  %v4395_v19 = vunpack.c.2.s8 %v2421_v29  ;;  %v4397_v61 = vunpack.c.3.s8 %v2421_v29  ;;  %v2427_v32 = vld [vmem:[%s10573_s20 + $0xf68] sm:$0xff] }
 0x632   : > { %9285 = vmatpush.bf16.msra.mxu0 %v7439_v54  ;;  %v6383_v50 = vcvt.s32.f32 %v4335_v41  ;;  %v6385_v13 = vcvt.s32.f32 %v4337_v4  ;;  %v4427_v40 = vunpack.c.2.s8 %v11858_v26  ;;  %v4429_v9 = vunpack.c.3.s8 %v11858_v26  ;;  %v2435_v22 = vld [vmem:[%s10573_s20 + $0xfa8] sm:$0xff] }
 0x633   : > { %9298 = vmatpush.bf16.msra.mxu1 %v7455_v2  ;;  %v7471_v37 = vpack.c.bf16 %v6353_v20, %v6351_v63  ;;  %v6443_v7 = vcvt.s32.f32 %v4395_v19  ;;  %v6445_v52 = vcvt.s32.f32 %v4397_v61  ;;  %v4459_v55 = vunpack.c.2.s8 %v11865_v17  ;;  %v2443_v19 = vld [vmem:[%s10573_s20 + $0xfe8] sm:$0xff] }
 0x634   : > { %v7487_v25 = vpack.c.bf16 %v6385_v13, %v6383_v50  ;;  %v6475_v58 = vcvt.s32.f32 %v4427_v40  ;;  %v6477_v47 = vcvt.s32.f32 %v4429_v9  ;;  %v4461_v42 = vunpack.c.3.s8 %v11865_v17 }
 0x635   : > { %9311 = vmatpush.bf16.msra.mxu2 %v7471_v37  ;;  %v7517_v28 = vpack.c.bf16 %v6445_v52, %v6443_v7  ;;  %v6507_v56 = vcvt.s32.f32 %v4459_v55  ;;  %v4491_v43 = vunpack.c.2.s8 %v2445_v38  ;;  %v4493_v44 = vunpack.c.3.s8 %v2445_v38  ;;  %9286 = vmatmul.bf16.vlgmr.msra.gmra.mxu0 %v9751_v46 }
 0x636   : > { %9324 = vmatpush.bf16.msra.mxu3 %v7487_v25  ;;  %v7533_v1 = vpack.c.bf16 %v6477_v47, %v6475_v58  ;;  %v6509_v3 = vcvt.s32.f32 %v4461_v42  ;;  %9299 = vmatmul.bf16.vlgmr.msra.gmra.mxu1 %v9752_v30  ;;  %v4391_v48 = vunpack.c.0.s8 %v2421_v29  ;;  %v4393_v8 = vunpack.c.1.s8 %v2421_v29 }
 0x637   : > { %9330 = vmatpush.bf16.msrb.mxu0 %v7517_v28  ;;  %v6539_v60 = vcvt.s32.f32 %v4491_v43  ;;  %v6541_v36 = vcvt.s32.f32 %v4493_v44  ;;  %v4423_v57 = vunpack.c.0.s8 %v11858_v26  ;;  %v4425_v49 = vunpack.c.1.s8 %v11858_v26 }
 0x638   : > { %9343 = vmatpush.bf16.msrb.mxu1 %v7533_v1  ;;  %v7549_v5 = vpack.c.bf16 %v6509_v3, %v6507_v56  ;;  %9312 = vmatmul.bf16.vlgmr.msra.gmra.mxu2 %v9753_v59  ;;  %v6439_v33 = vcvt.s32.f32 %v4391_v48  ;;  %v6441_v16 = vcvt.s32.f32 %v4393_v8  ;;  %v4455_v10 = vunpack.c.0.s8 %v11865_v17  ;;  %v2417_v48 = vld [vmem:[%s10573_s20 + $0xf18] sm:$0xff] }
 0x639   : > { %v7565_v14 = vpack.c.bf16 %v6541_v36, %v6539_v60  ;;  %9325 = vmatmul.bf16.vlgmr.msra.gmra.mxu3 %v9754_v15  ;;  %v6471_v6 = vcvt.s32.f32 %v4423_v57  ;;  %v6473_v11 = vcvt.s32.f32 %v4425_v49  ;;  %v4457_v34 = vunpack.c.1.s8 %v11865_v17 }
 0x63a   : > { %9356 = vmatpush.bf16.msrb.mxu2 %v7549_v5  ;;  %v7515_v35 = vpack.c.bf16 %v6441_v16, %v6439_v33  ;;  %v6503_v29 = vcvt.s32.f32 %v4455_v10  ;;  %v4487_v53 = vunpack.c.0.s8 %v2445_v38  ;;  %v4489_v24 = vunpack.c.1.s8 %v2445_v38  ;;  %v2433_v10 = vld [vmem:[%s10573_s20 + $0xf98] sm:$0xff] }
 0x63b   : > { %9369 = vmatpush.bf16.msrb.mxu3 %v7565_v14  ;;  %v7531_v0 = vpack.c.bf16 %v6473_v11, %v6471_v6  ;;  %v6505_v26 = vcvt.s32.f32 %v4457_v34  ;;  %v4387_v54 = vunpack.c.2.s8 %v2419_v39  ;;  %v4389_v63 = vunpack.c.3.s8 %v2419_v39  ;;  %v2441_v11 = vld [vmem:[%s10573_s20 + $0xfd8] sm:$0xff] }
 0x63c   : > { %9331 = vmatpush.bf16.msrb.mxu0 %v7515_v35  ;;  %v6535_v41 = vcvt.s32.f32 %v4487_v53  ;;  %v6537_v4 = vcvt.s32.f32 %v4489_v24  ;;  %v4419_v2 = vunpack.c.2.s8 %v2427_v32  ;;  %v4421_v20 = vunpack.c.3.s8 %v2427_v32 }
 0x63d   : > { %9344 = vmatpush.bf16.msrb.mxu1 %v7531_v0  ;;  %v7547_v17 = vpack.c.bf16 %v6505_v26, %v6503_v29  ;;  %v6435_v61 = vcvt.s32.f32 %v4387_v54  ;;  %v6437_v50 = vcvt.s32.f32 %v4389_v63  ;;  %v4451_v13 = vunpack.c.2.s8 %v2435_v22 }
 0x63e   : > { %v7563_v40 = vpack.c.bf16 %v6537_v4, %v6535_v41  ;;  %v6467_v9 = vcvt.s32.f32 %v4419_v2  ;;  %v6469_v38 = vcvt.s32.f32 %v4421_v20  ;;  %v4453_v12 = vunpack.c.3.s8 %v2435_v22 }
 0x63f   : > { %9357 = vmatpush.bf16.msrb.mxu2 %v7547_v17  ;;  %v7513_v37 = vpack.c.bf16 %v6437_v50, %v6435_v61  ;;  %v6499_v7 = vcvt.s32.f32 %v4451_v13  ;;  %v4483_v52 = vunpack.c.2.s8 %v2443_v19  ;;  %v4485_v55 = vunpack.c.3.s8 %v2443_v19  ;;  %v11891_v17 = vpop.f32.mrf.mxu1 }
 0x640   : > { %9370 = vmatpush.bf16.msrb.mxu3 %v7563_v40  ;;  %v7529_v25 = vpack.c.bf16 %v6469_v38, %v6467_v9  ;;  %v6501_v58 = vcvt.s32.f32 %v4453_v12  ;;  %v9080_v47 = vadd.f32 %v11850_v18, %v11846_v21  ;;  %v4383_v42 = vunpack.c.0.s8 %v2419_v39 }
 0x641   : > { %9332 = vmatpush.bf16.msrb.mxu0 %v7513_v37  ;;  %v6531_v28 = vcvt.s32.f32 %v4483_v52  ;;  %v6533_v56 = vcvt.s32.f32 %v4485_v55  ;;  %v4385_v43 = vunpack.c.1.s8 %v2419_v39  ;;  %v4415_v44 = vunpack.c.0.s8 %v2427_v32 }
 0x642   : > { %9345 = vmatpush.bf16.msrb.mxu1 %v7529_v25  ;;  %v7545_v46 = vpack.c.bf16 %v6501_v58, %v6499_v7  ;;  %v6431_v1 = vcvt.s32.f32 %v4383_v42  ;;  %v4417_v3 = vunpack.c.1.s8 %v2427_v32  ;;  %v4447_v30 = vunpack.c.0.s8 %v2435_v22 }
 0x643   : > { %v7561_v8 = vpack.c.bf16 %v6533_v56, %v6531_v28  ;;  %v6433_v60 = vcvt.s32.f32 %v4385_v43  ;;  %v6463_v36 = vcvt.s32.f32 %v4415_v44  ;;  %v4449_v57 = vunpack.c.1.s8 %v2435_v22  ;;  %v2423_v56 = vld [vmem:[%s10573_s20 + $0xf48] sm:$0xff] }
 0x644   : > { %9358 = vmatpush.bf16.msrb.mxu2 %v7545_v46  ;;  %v6465_v21 = vcvt.s32.f32 %v4417_v3  ;;  %v6495_v18 = vcvt.s32.f32 %v4447_v30  ;;  %v4479_v49 = vunpack.c.0.s8 %v2443_v19  ;;  %v4481_v31 = vunpack.c.1.s8 %v2443_v19  ;;  %v2431_v3 = vld [vmem:[%s10573_s20 + $0xf88] sm:$0xff] }
 0x645   : > { %9371 = vmatpush.bf16.msrb.mxu3 %v7561_v8  ;;  %v7511_v5 = vpack.c.bf16 %v6433_v60, %v6431_v1  ;;  %v6497_v59 = vcvt.s32.f32 %v4449_v57  ;;  %v9093_v33 = vadd.f32 %v11854_v62, %v9080_v47  ;;  %v4379_v16 = vunpack.c.2.s8 %v2417_v48  ;;  %v11888_v62 = vpop.f32.mrf.mxu0  ;;  %v11914_v57 = vpop.f32.mrf.mxu3 }
 0x646   : > { %v7527_v39 = vpack.c.bf16 %v6465_v21, %v6463_v36  ;;  %v6527_v14 = vcvt.s32.f32 %v4479_v49  ;;  %v6529_v15 = vcvt.s32.f32 %v4481_v31  ;;  %v4381_v6 = vunpack.c.3.s8 %v2417_v48  ;;  %v2439_v36 = vld [vmem:[%s10573_s20 + $0xfc8] sm:$0xff] }
 0x647   : > { %9333 = vmatpush.bf16.msrb.mxu0 %v7511_v5  ;;  %v7543_v34 = vpack.c.bf16 %v6497_v59, %v6495_v18  ;;  %v6427_v32 = vcvt.s32.f32 %v4379_v16  ;;  %v4411_v35 = vunpack.c.2.s8 %v2425_v45  ;;  %v4413_v29 = vunpack.c.3.s8 %v2425_v45 }
 0x648   : > { %9346 = vmatpush.bf16.msrb.mxu1 %v7527_v39  ;;  %v7559_v53 = vpack.c.bf16 %v6529_v15, %v6527_v14  ;;  %v6429_v24 = vcvt.s32.f32 %v4381_v6  ;;  %v4443_v22 = vunpack.c.2.s8 %v2433_v10  ;;  %v4445_v0 = vunpack.c.3.s8 %v2433_v10 }
 0x649   : > { %9359 = vmatpush.bf16.msrb.mxu2 %v7543_v34  ;;  %v6459_v26 = vcvt.s32.f32 %v4411_v35  ;;  %v6461_v54 = vcvt.s32.f32 %v4413_v29  ;;  %v4475_v63 = vunpack.c.2.s8 %v2441_v11  ;;  %v4477_v41 = vunpack.c.3.s8 %v2441_v11 }
 0x64a   : > { %9372 = vmatpush.bf16.msrb.mxu3 %v7559_v53  ;;  %v7509_v4 = vpack.c.bf16 %v6429_v24, %v6427_v32  ;;  %v6491_v2 = vcvt.s32.f32 %v4443_v22  ;;  %v6493_v20 = vcvt.s32.f32 %v4445_v0  ;;  %v9106_v19 = vadd.f32 %v11860_v23, %v9093_v33  ;;  %v2415_v23 = vld [vmem:[%s10573_s20 + $0xf08] sm:$0xff]  ;;  %s9669_s20 = sshll.u32 %s12131_s7, 3  ;;  %s9801_s7 = sshra.s32 %s9499_s30, 4  ;;  %s9802_s7 = int_to_ptr.hbm [resolvable:$true] %s9801_s7 }
 0x64b   : > { %v7525_v61 = vpack.c.bf16 %v6461_v54, %v6459_v26  ;;  %v6523_v50 = vcvt.s32.f32 %v4475_v63  ;;  %v6525_v13 = vcvt.s32.f32 %v4477_v41  ;;  %v4375_v40 = vunpack.c.0.s8 %v2417_v48  ;;  %s11920_s15 = scalar_lea.vmem %s12020_s4, %s9669_s20  ;;  %s9803_s8 = scalar_lea.hbm %s9802_s7, 4 }
 0x64c   : > { %9334 = vmatpush.bf16.msrb.mxu0 %v7509_v4  ;;  %v7541_v9 = vpack.c.bf16 %v6493_v20, %v6491_v2  ;;  %v11900_v38 = vadd.f32 %v11862_v51, %v9106_v19  ;;  %v4377_v12 = vunpack.c.1.s8 %v2417_v48  ;;  %v4407_v37 = vunpack.c.0.s8 %v2425_v45  ;;  %v11904_v51 = vpop.f32.mrf.mxu2  ;;  %p9804_p1 = scmp.ne.s32.totalorder %s9802_s7, %s9803_s8  ;;  %p9808_p4 = scmp.lt.s32.totalorder %s9802_s7, %s12021_s5 }
 0x64d   : > { %9347 = vmatpush.bf16.msrb.mxu1 %v7525_v61  ;;  %v7557_v7 = vpack.c.bf16 %v6525_v13, %v6523_v50  ;;  %v6423_v52 = vcvt.s32.f32 %v4375_v40  ;;  %v4409_v55 = vunpack.c.1.s8 %v2425_v45  ;;  %v4439_v25 = vunpack.c.0.s8 %v2433_v10  ;;  %v9133_v21 = vpop.f32.mrf.mxu0  ;;  %p9809_p7 = scmp.lt.s32.totalorder %s9807_s14, %s9803_s8 }
 0x64e   : > { %9360 = vmatpush.bf16.msrb.mxu2 %v7541_v9  ;;  %v6425_v58 = vcvt.s32.f32 %v4377_v12  ;;  %v6455_v47 = vcvt.s32.f32 %v4407_v37  ;;  %v4441_v42 = vunpack.c.1.s8 %v2433_v10  ;;  %v4471_v28 = vunpack.c.0.s8 %v2441_v11  ;;  %v9146_v10 = vpop.f32.mrf.mxu1  ;;  %v9172_v9 = vpop.f32.mrf.mxu3  ;;  %p9805_p2 = pnand %p9804_p1, %p9970_p9 }
 0x64f   : > { %9373 = vmatpush.bf16.msrb.mxu3 %v7557_v7  ;;  %v6457_v43 = vcvt.s32.f32 %v4409_v55  ;;  %v6487_v44 = vcvt.s32.f32 %v4439_v25  ;;  %v4473_v46 = vunpack.c.1.s8 %v2441_v11  ;;  %v4371_v1 = vunpack.c.2.s8 %v2415_v23  ;;  %p9810_p8 = por %p9809_p7, %p9808_p4 }
 0x650   : > { %v7507_v30 = vpack.c.bf16 %v6425_v58, %v6423_v52  ;;  %v6489_v48 = vcvt.s32.f32 %v4441_v42  ;;  %v6519_v8 = vcvt.s32.f32 %v4471_v28  ;;  %v4373_v60 = vunpack.c.3.s8 %v2415_v23  ;;  %v9420_v52 = vld [vmem:[%s11920_s15 + $0x78] sm:$0xff]  ;;  %p9806_p3 = pneg %p9805_p2 }
 0x651   : > { %v7523_v18 = vpack.c.bf16 %v6457_v43, %v6455_v47  ;;  %v6521_v49 = vcvt.s32.f32 %v4473_v46  ;;  %v6419_v31 = vcvt.s32.f32 %v4371_v1  ;;  %v4403_v45 = vunpack.c.2.s8 %v2423_v56  ;;  %v9755_v46 = vld [vmem:[#allocation1 + $0x24] sm:$0xff] }
 0x652   : > { %9335 = vmatpush.bf16.msrb.mxu0 %v7507_v30  ;;  %v7539_v5 = vpack.c.bf16 %v6489_v48, %v6487_v44  ;;  %v6421_v59 = vcvt.s32.f32 %v4373_v60  ;;  %v4405_v33 = vunpack.c.3.s8 %v2423_v56  ;;  %v4435_v16 = vunpack.c.2.s8 %v2431_v3  ;;  %v9419_v44 = vld [vmem:[%s11920_s15 + $0x70] sm:$0xff]  ;;  %v9417_v48 = vld [vmem:[%s11920_s15 + $0x60] sm:$0xff]  ;;  %p9811_p12 = pnand %p9810_p8, %p9806_p3 }
 0x653   : > { %9348 = vmatpush.bf16.msrb.mxu1 %v7523_v18  ;;  %v7555_v39 = vpack.c.bf16 %v6521_v49, %v6519_v8  ;;  %v6451_v14 = vcvt.s32.f32 %v4403_v45  ;;  %v4437_v15 = vunpack.c.3.s8 %v2431_v3  ;;  %v4467_v6 = vunpack.c.2.s8 %v2439_v36  ;;  %v9758_v60 = vld [vmem:[#allocation1 + $0x3f] sm:$0xff]  ;;  %v9415_v18 = vld [vmem:[%s11920_s15 + $0x50] sm:$0xff] }
 0x654   : > { %9361 = vmatpush.bf16.msrb.mxu2 %v7539_v5  ;;  %v7505_v11 = vpack.c.bf16 %v6421_v59, %v6419_v31  ;;  %v6453_v34 = vcvt.s32.f32 %v4405_v33  ;;  %v6483_v32 = vcvt.s32.f32 %v4435_v16  ;;  %v4469_v35 = vunpack.c.3.s8 %v2439_v36  ;;  %v9159_v41 = vpop.f32.mrf.mxu2  ;;  %v9413_v31 = vld [vmem:[%s11920_s15 + $0x40] sm:$0xff]  ;;  %v9412_v16 = vld [vmem:[%s11920_s15 + $0x38] sm:$0xff] }
 0x655   : > { %9374 = vmatpush.bf16.msrb.mxu3 %v7555_v39  ;;  %v6485_v29 = vcvt.s32.f32 %v4437_v15  ;;  %v6515_v53 = vcvt.s32.f32 %v4467_v6  ;;  %v4367_v24 = vunpack.c.0.s8 %v2415_v23  ;;  %v4369_v22 = vunpack.c.1.s8 %v2415_v23  ;;  %v9411_v39 = vld [vmem:[%s11920_s15 + $0x30] sm:$0xff]  ;;  %v11942_v15 = vld [vmem:[%s1920_s11] sm:$0x3] }
 0x656   : > { %9336 = vmatpush.bf16.msrb.mxu0 %v7505_v11  ;;  %v7521_v0 = vpack.c.bf16 %v6453_v34, %v6451_v14  ;;  %v6517_v26 = vcvt.s32.f32 %v4469_v35  ;;  %v4399_v54 = vunpack.c.0.s8 %v2423_v56  ;;  %v4401_v63 = vunpack.c.1.s8 %v2423_v56  ;;  %v9410_v14 = vld [vmem:[%s11920_s15 + $0x28] sm:$0xff]  ;;  %v9409_v6 = vld [vmem:[%s11920_s15 + $0x20] sm:$0xff]  ;;  %v9408_v35 = vld [vmem:[%s11920_s15 + $0x18] sm:$0xff] }
 0x657   : > { %v7537_v4 = vpack.c.bf16 %v6485_v29, %v6483_v32  ;;  %v6415_v2 = vcvt.s32.f32 %v4367_v24  ;;  %v6417_v20 = vcvt.s32.f32 %v4369_v22  ;;  %v4431_v19 = vunpack.c.0.s8 %v2431_v3  ;;  %v11948_v29 = vld [vmem:[%s10576_s21] sm:$0x3]  ;;  %s9666_s21 = sshll.u32 %s10569_s27, 2 }
 0x658   : > { %9349 = vmatpush.bf16.msrb.mxu1 %v7521_v0  ;;  %v7553_v61 = vpack.c.bf16 %v6517_v26, %v6515_v53  ;;  %v6447_v50 = vcvt.s32.f32 %v4399_v54  ;;  %v6449_v13 = vcvt.s32.f32 %v4401_v63  ;;  %v4433_v40 = vunpack.c.1.s8 %v2431_v3  ;;  %v9407_v53 = vld [vmem:[%s11920_s15 + $0x10] sm:$0xff]  ;;  %v9406_v0 = vld [vmem:[%s11920_s15 + $0x8] sm:$0xff]  ;;  %v9405_v26 = vld [vmem:[%s11920_s15] sm:$0xff]  ;;  %s1909_s18 = scalar_lea.vmem [#allocation6], %s9666_s21 }
 0x659   : > { %9362 = vmatpush.bf16.msrb.mxu2 %v7537_v4  ;;  %v7503_v12 = vpack.c.bf16 %v6417_v20, %v6415_v2  ;;  %v6479_v37 = vcvt.s32.f32 %v4431_v19  ;;  %v4463_v23 = vunpack.c.0.s8 %v2439_v36  ;;  %v4465_v7 = vunpack.c.1.s8 %v2439_v36  ;;  %v9416_v36 = vld [vmem:[%s11920_s15 + $0x58] sm:$0xff]  ;;  %s9496_s1 = sshll.u32 %s1909_s18, 4  ;;  %s9497_s1 = int_to_ptr.vmem [resolvable:$true] %s9496_s1 }
 0x65a   : > { %9375 = vmatpush.bf16.msrb.mxu3 %v7553_v61  ;;  %v7519_v55 = vpack.c.bf16 %v6449_v13, %v6447_v50  ;;  %v6481_v25 = vcvt.s32.f32 %v4433_v40  ;;  %v9132_v58 = vadd.f32 %v11888_v62, %v11900_v38  ;;  %v9756_v62 = vld [vmem:[#allocation1 + $0x2d] sm:$0xff]  ;;  %v9384_v32 = vperm.slane %v11942_v15, 0 }
 0x65b   : > { %9337 = vmatpush.bf16.msrb.mxu0 %v7503_v12  ;;  %v6511_v47 = vcvt.s32.f32 %v4463_v23  ;;  %v6513_v42 = vcvt.s32.f32 %v4465_v7  ;;  %v9418_v38 = vld [vmem:[%s11920_s15 + $0x68] sm:$0xff]  ;;  %v9392_v22 = vperm.slane %v11948_v29, 0  ;;  %v9436_v12 = vld [vmem:[%s11920_s15 + $0xf8] sm:$0xff]  ;;  %v9433_v7 = vld [vmem:[%s11920_s15 + $0xe0] sm:$0xff] }
 0x65c   : > { %9350 = vmatpush.bf16.msrb.mxu1 %v7519_v55  ;;  %v7535_v28 = vpack.c.bf16 %v6481_v25, %v6479_v37  ;;  %v9145_v56 = vadd.f32 %v11891_v17, %v9132_v58  ;;  %v9757_v17 = vld [vmem:[#allocation1 + $0x36] sm:$0xff]  ;;  %v9388_v24 = vmul.f32 %v9384_v32, %v11485_v27  ;;  %v9434_v23 = vld [vmem:[%s11920_s15 + $0xe8] sm:$0xff]  ;;  %v9429_v58 = vld [vmem:[%s11920_s15 + $0xc0] sm:$0xff] }
 0x65d   : > { %v7551_v43 = vpack.c.bf16 %v6513_v42, %v6511_v47  ;;  %v9435_v37 = vld [vmem:[%s11920_s15 + $0xf0] sm:$0xff]  ;;  %v9430_v25 = vld [vmem:[%s11920_s15 + $0xc8] sm:$0xff] }
 0x65e   : > { %9363 = vmatpush.bf16.msrb.mxu2 %v7535_v28  ;;  %9338 = vmatmul.bf16.vlgmr.msrb.gmra.mxu0 %v9755_v46  ;;  %v9158_v1 = vadd.f32 %v11904_v51, %v9145_v56  ;;  %v11955_v54 = vadd.f32 %v9392_v22, %v9388_v24  ;;  %v9431_v55 = vld [vmem:[%s11920_s15 + $0xd0] sm:$0xff]  ;;  %v9428_v46 = vld [vmem:[%s11920_s15 + $0xb8] sm:$0xff] }
 0x65f   : > { %9437 = vmatpush.msra.mxu0 %v9420_v52  ;;  %9376 = vmatpush.bf16.msrb.mxu3 %v7551_v43  ;;  %v9432_v52 = vld [vmem:[%s11920_s15 + $0xd8] sm:$0xff] }
 0x660   : > { %9351 = vmatmul.bf16.vlgmr.msrb.gmra.mxu1 %v9756_v62  ;;  %v9171_v3 = vadd.f32 %v11914_v57, %v9158_v1  ;;  %v9183_v30 = vpop.f32.mrf.mxu0  ;;  %v9414_v57 = vld [vmem:[%s11920_s15 + $0x48] sm:$0xff]  ;;  %v9427_v1 = vld [vmem:[%s11920_s15 + $0xb0] sm:$0xff] }
 0x661   : > { %9438 = vmatpush.msra.mxu0 %v9419_v44  ;;  %9364 = vmatmul.bf16.vlgmr.msrb.gmra.mxu2 %v9757_v17  ;;  %v9196_v8 = vpop.f32.mrf.mxu1  ;;  %v9426_v62 = vld [vmem:[%s11920_s15 + $0xa8] sm:$0xff]  ;;  %v9424_v17 = vld [vmem:[%s11920_s15 + $0x98] sm:$0xff] }
 0x662   : > { %9377 = vmatmul.bf16.vlgmr.msrb.gmra.mxu3 %v9758_v60  ;;  %v9184_v51 = vadd.f32 %v9183_v30, %v9171_v3  ;;  %9457 = vmatpush.msra.mxu1 %v9436_v12  ;;  %v9425_v30 = vld [vmem:[%s11920_s15 + $0xa0] sm:$0xff] }
 0x663   : > { %9439 = vmatpush.msra.mxu0 %v9418_v38  ;;  %v9421_v60 = vld [vmem:[%s11920_s15 + $0x80] sm:$0xff] }
 0x664   : > { %v9197_v21 = vadd.f32 %v9196_v8, %v9184_v51  ;;  %9458 = vmatpush.msra.mxu1 %v9435_v37  ;;  %v9422_v8 = vld [vmem:[%s11920_s15 + $0x88] sm:$0xff] }
 0x665   : > { %9440 = vmatpush.msra.mxu0 %v9417_v48  ;;  %v9423_v48 = vld [vmem:[%s11920_s15 + $0x90] sm:$0xff] }
 0x666   : > { %9459 = vmatpush.msra.mxu1 %v9434_v23 }
 0x667   : > { %9441 = vmatpush.msra.mxu0 %v9416_v36 }
 0x668   : > { %v9185_v49 = vpop.f32.mrf.mxu0  ;;  %9460 = vmatpush.msra.mxu1 %v9433_v7 }
 0x669   : > { %9442 = vmatpush.msra.mxu0 %v9415_v18  ;;  %v9209_v45 = vpop.f32.mrf.mxu2  ;;  %v9198_v5 = vpop.f32.mrf.mxu1 }
 0x66a   : > { %v9210_v59 = vadd.f32 %v9209_v45, %v9197_v21  ;;  %v9222_v33 = vpop.f32.mrf.mxu3  ;;  %9461 = vmatpush.msra.mxu1 %v9432_v52 }
 0x66b   : > { %9443 = vmatpush.msra.mxu0 %v9414_v57 }
 0x66c   : > { %v9223_v10 = vadd.f32 %v9222_v33, %v9210_v59  ;;  %9462 = vmatpush.msra.mxu1 %v9431_v55 }
 0x66d   : > { %9444 = vmatpush.msra.mxu0 %v9413_v31 }
 0x66e   : > { %9463 = vmatpush.msra.mxu1 %v9430_v25 }
 0x66f   : > { %9445 = vmatpush.msra.mxu0 %v9412_v16 }
 0x670   : > { %9464 = vmatpush.msra.mxu1 %v9429_v58 }
 0x671   : > { %9446 = vmatpush.msra.mxu0 %v9411_v39  ;;  %v9211_v11 = vpop.f32.mrf.mxu2  ;;  %v9385_v39 = vperm.slane %v11942_v15, 1 }
 0x672   : > { %v9224_v34 = vpop.f32.mrf.mxu3  ;;  %9465 = vmatpush.msra.mxu1 %v9428_v46 }
 0x673   : > { %9447 = vmatpush.msra.mxu0 %v9410_v14 }
 0x674   : > { %9466 = vmatpush.msra.mxu1 %v9427_v1 }
 0x675   : > { %9448 = vmatpush.msra.mxu0 %v9409_v6  ;;  %v9393_v6 = vperm.slane %v11948_v29, 1 }
 0x676   : > { %9467 = vmatpush.msra.mxu1 %v9426_v62 }
 0x677   : > { %9449 = vmatpush.msra.mxu0 %v9408_v35 }
 0x678   : > { %9468 = vmatpush.msra.mxu1 %v9425_v30 }
 0x679   : > { %9450 = vmatpush.msra.mxu0 %v9407_v53 }
 0x67a   : > { %9469 = vmatpush.msra.mxu1 %v9424_v17 }
 0x67b   : > { %9451 = vmatpush.msra.mxu0 %v9406_v0 }
 0x67c   : > { %9470 = vmatpush.msra.mxu1 %v9423_v48 }
 0x67d   : > { %9452 = vmatpush.msra.mxu0 %v9405_v26 }
 0x67e   : > { %9453 = vmatmul.f32.vlgmr.msra.gmra.mxu0 %v11955_v54  ;;  %9471 = vmatpush.msra.mxu1 %v9422_v8 }
 0x680   : > { %9472 = vmatpush.msra.mxu1 %v9421_v60 }
 0x689   : > { %v9235_v63 = vpop.f32.mrf.mxu0 }
 0x68a   : > { %v9236_v41 = vadd.f32 %v9235_v63, %v9223_v10  ;;  %v9248_v4 = vpop.f32.mrf.mxu1 }
 0x68c   : > { %v9249_v2 = vadd.f32 %v9248_v4, %v9236_v41 }
 0x691   : > { %v9237_v27 = vpop.f32.mrf.mxu0 }
 0x692   : > { %v9261_v20 = vpop.f32.mrf.mxu2  ;;  %v9250_v19 = vpop.f32.mrf.mxu1 }
 0x693   : > { %v9262_v61 = vadd.f32 %v9261_v20, %v9249_v2  ;;  %v9274_v50 = vpop.f32.mrf.mxu3 }
 0x695   : > { %v9275_v13 = vadd.f32 %v9274_v50, %v9262_v61 }
 0x69a   : > { %v9263_v40 = vpop.f32.mrf.mxu2 }
 0x69b   : > { %v9276_v9 = vpop.f32.mrf.mxu3 }
 0x6b2   : > { %v9287_v47 = vpop.f32.mrf.mxu0 }
 0x6b3   : > { %v9300_v42 = vpop.f32.mrf.mxu1  ;;  %v9288_v51 = vadd.f32 %v9287_v47, %v9275_v13 }
 0x6b5   : > { %v9301_v36 = vadd.f32 %v9300_v42, %v9288_v51 }
 0x6ba   : > { %v9289_v28 = vpop.f32.mrf.mxu0 }
 0x6bb   : > { %v9313_v56 = vpop.f32.mrf.mxu2  ;;  %v9302_v43 = vpop.f32.mrf.mxu1 }
 0x6bc   : > { %v9326_v44 = vpop.f32.mrf.mxu3  ;;  %v9314_v21 = vadd.f32 %v9313_v56, %v9301_v36 }
 0x6be   : > { %v9327_v49 = vadd.f32 %v9326_v44, %v9314_v21 }
 0x6c3   : > { %v9315_v38 = vpop.f32.mrf.mxu2 }
 0x6c4   : > { %v9328_v3 = vpop.f32.mrf.mxu3 }
 0x6db   : > { %v9339_v18 = vpop.f32.mrf.mxu0 }
 0x6dc   : > { %v9340_v31 = vadd.f32 %v9339_v18, %v9327_v49 }
 0x6dd   : > { %v9352_v57 = vpop.f32.mrf.mxu1 }
 0x6de   : > { %v9353_v45 = vadd.f32 %v9352_v57, %v9340_v31 }
 0x6e3   : > { %v9341_v5 = vpop.f32.mrf.mxu0 }
 0x6e4   : > { %v9365_v59 = vpop.f32.mrf.mxu2 }
 0x6e5   : > { %v9354_v33 = vpop.f32.mrf.mxu1  ;;  %v9366_v16 = vadd.f32 %v9365_v59, %v9353_v45  ;;  %v9378_v10 = vpop.f32.mrf.mxu3 }
 0x6e7   : > { %v9379_v14 = vadd.f32 %v9378_v10, %v9366_v16 }
 0x6e9   : > { %v9389_v11 = vmul.f32 %v9385_v39, %v9379_v14 }
 0x6eb   : > { %v9397_v34 = vadd.f32 %v9393_v6, %v9389_v11 }
 0x6ec   : > { %v9367_v32 = vpop.f32.mrf.mxu2 }
 0x6ed   : > { %v9400_v35 = vrot.slane %v9397_v34, 6  ;;  %v9380_v15 = vpop.f32.mrf.mxu3  ;;  %9473 = vmatmul.f32.vlgmr.msra.gmra.mxu1 %v9397_v34 }
 0x6ef   : > { %v9402_v29 = vsel %vm9401_vm0, %v11955_v54, %v9400_v35 }
 0x6f0   : > { %9404 = vst [vmem:[%s1909_s18] sm:$0xf] %v9402_v29 }
 0x6f1   : > { %9814 = shalt.err (!%p9811_p12)
}
 0x6f2   : > { %9680 = dma.vmem_to_hbm [thread:$0]  (%p9970_p9), %s9497_s1, 64, %s9499_s30, %s9479_s19  }
 0x6f3   : > { %p1930_p13 = scmp.lt.s32.totalorder %s9943_s25, 1 }
 0x6f5   : > { %s12135_s25 = smov (!%p1930_p13, %s9943_s25), 1 }
 0x6f6   : > { %s9670_s27 = sshll.u32 %s12135_s25, 1 }
 0x6f7   : > { %s1933_s11 = scalar_lea.vmem %s12022_s6, %s9670_s27 }
 0x6fb   : > { %v9454_v53 = vpop.f32.mrf.mxu0 }
 0x76a   : > { %v9474_v24 = vpop.f32.mrf.mxu1 }
 0x76b   : > { %v9475_v22 = vadd.f32 %v9474_v24, %v9454_v53 }
 0x76d   : > { %9477 = vst [vmem:[%s1933_s11] sm:$0x3] %v9475_v22 }
 0x76e PF: > { %s12121_s21 = sld [smem:[#allocation9_spill]]  ;;  %p9683_p0 = pnand %p9655_p11, %p9974_p10 }
 0x770   : > { %p9684_p9 = pneg %p9683_p0 }
 0x774   : > { %s9513_s13 = sand.u32 1, %s12121_s21  }
 0x775   : > { %s9514_s9 = scalar_lea.sflag [#allocation5], %s9513_s13 }
 0x776   : > { %9852 = dma.done.wait (%p9684_p9), %s9514_s9, 64  }
 0x777   : > { %9854 = vsyncadd (%p9684_p9), %s9514_s9, 4294967232  ;;  %s12123_s24 = sld [smem:[#allocation10_spill]]  ;;  %s12125_s21 = smov %s9861_s22 }
 0x778   : > { %s12124_s25 = sld [smem:[#allocation11_spill]]  ;;  %s12126_s22 = smov %s9865_s23 }
 0x77d   : > { %p20_p5 = scmp.ge.s32.totalorder %s12123_s24, 4  }
 0x77e   : > { %s12127_s23 = smov %s12124_s25 }
 0x77f   :  { %22 = sbr.rel (!%p20_p5) target bundleno = 7 (0x7), region = 161 }
 0x784   :  { %9527 = vsyncpa [#allocation4], 1 }
 0x785   :  { %9529 = vsyncpa [#allocation4 + $0x1], 1 }
 0x786   :  { %9530 = vsyncpa [#allocation5], 1 }
 0x787   :  { %9532 = vsyncpa [#allocation5 + $0x1], 1 }

</bundles_post_ra>
